<compile_context>
chip_gen: v5e
topology: v5e:2x2
jax: 0.10.0
libtpu: 0.0.40
codegen_flags: <defaults>
</compile_context>

<pallas_src>
import functools

import jax
import jax.numpy as jnp
from jax.experimental import pallas as pl
from jax.experimental.pallas import tpu as pltpu


def _round_up(x, m):
    return ((x + m - 1) // m) * m


def _vq_kernel(x_ref, neg2_et_ref, e_ref, e2_ref, q_ref, stats_ref,
               *, n_valid, sse_lane):
    """One grid step processes a tile of `tn` flattened input rows.

    x_ref:       (tn, D)      input rows (original dtype, VMEM tile)
    neg2_et_ref: (D,  K_pad)  -2 * codebook^T (hoisted; -2 folded into MXU)
    e_ref:       (K_pad, D)   codebook, zero-padded rows beyond K
    e2_ref:      (1,  K_pad)  ||e_k||^2; padded lanes = 3e38 (finite sentinel)
    q_ref:       (tn, D)      quantized rows (output tile, original dtype)
    stats_ref:   (1, 1, K_pad) per-block partials: lanes 0..K-1 = counts,
                               lane `sse_lane` (a dummy codebook lane) = SSE
    """
    i = pl.program_id(0)

    x = x_ref[...].astype(jnp.float32)                      # (tn, D)
    tn = x.shape[0]
    k_pad = e_ref.shape[0]

    # scores = ||e||^2 - 2 x.e^T  (same argmin as the full squared distance;
    # the per-row ||x||^2 constant is only added back for the SSE below).
    scores = jnp.dot(x, neg2_et_ref[...],
                     preferred_element_type=jnp.float32,
                     precision=jax.lax.Precision.HIGHEST) + e2_ref[...]   # (tn, K_pad)

    # First-occurrence argmin via min + iota select (matches torch.argmin ties).
    m = jnp.min(scores, axis=1, keepdims=True)                       # (tn, 1)
    lane = jax.lax.broadcasted_iota(jnp.int32, scores.shape, 1)      # (tn, K_pad)
    first = jnp.min(jnp.where(scores == m, lane, k_pad), axis=1, keepdims=True)
    onehot = (lane == first).astype(jnp.float32)                     # (tn, K_pad)

    # quantized = onehot @ embedding (MXU): exact copies of codebook rows.
    q = jnp.dot(onehot, e_ref[...],
                preferred_element_type=jnp.float32,
                precision=jax.lax.Precision.HIGHEST)                 # (tn, D)
    q_ref[...] = q.astype(q_ref.dtype)

    # Mask rows that are ragged-tile padding (global row index >= row count).
    # jnp.where (not multiply) so garbage rows can't poison sums with NaN.
    row = i * tn + jax.lax.broadcasted_iota(jnp.int32, (tn, 1), 0)
    valid = row < n_valid                                            # (tn, 1) bool

    counts = jnp.sum(jnp.where(valid, onehot, 0.0), axis=0, keepdims=True)  # (1, K_pad)

    # ||q - x||^2 per row == ||x||^2 + min(||e||^2 - 2 x.e); clamp for the
    # (tiny) cancellation case.
    x2 = jnp.sum(x * x, axis=1, keepdims=True)                       # (tn, 1)
    err = jnp.maximum(x2 + m, 0.0)                                   # (tn, 1)
    sse = jnp.sum(jnp.where(valid, err, 0.0))                        # scalar

    # Fuse the SSE scalar into the counts vector on a dummy (never-selected)
    # codebook lane -> single unmasked 128-lane-wide partial-stats store.
    lane1 = jax.lax.broadcasted_iota(jnp.int32, (1, k_pad), 1)
    stats_ref[...] = jnp.where(lane1 == sse_lane, sse, counts)[None]


def vector_quantizer_forward(inputs, embedding, commitment_cost, *,
                             tile_n=2048, core_parallel=False):
    """Pallas implementation of VectorQuantizer.forward (forward values only).

    inputs:    (..., D) float, D == embedding_dim
    embedding: (K, D)   float codebook
    Returns (quantized, loss, perplexity) matching the PyTorch forward.
    (.detach() / straight-through only affect gradients, not forward values.)

    core_parallel=True swaps the row-tile axis to pltpu.CORE_PARALLEL so the
    disjoint per-block outputs are sharded across v7x's 2 TensorCores.
    """
    assert tile_n % 8 == 0, "tile_n must be a multiple of 8 sublanes"
    input_shape = inputs.shape
    K, D = embedding.shape
    assert input_shape[-1] == D

    # No full-array cast / pad here: original dtype goes straight into the
    # kernel; the ragged last tile is handled via partial blocks + masking.
    flat = inputs.reshape(-1, D)
    N = flat.shape[0]

    # Lane-pad the codebook to a multiple of 128 and reserve one dummy lane to
    # carry the fused per-block SSE scalar.
    K_pad = _round_up(K, 128)
    if K_pad == K:
        K_pad += 128
    sse_lane = K_pad - 1

    emb = embedding.astype(jnp.float32)                       # (K, D) tiny
    emb_pad = jnp.zeros((K_pad, D), jnp.float32).at[:K].set(emb)
    neg2_et = (-2.0 * emb_pad).T                              # (D, K_pad), -2 folded in
    e2 = jnp.sum(emb_pad * emb_pad, axis=1)
    # Padded entries: huge-but-finite score so they never win argmin and no
    # Inf/NaN enters the scores vregs.
    e2 = jnp.where(jnp.arange(K_pad) < K, e2, jnp.float32(3e38)).reshape(1, K_pad)

    # Clamp the tile for tiny inputs so we don't allocate >N rows of VMEM.
    tn = min(tile_n, _round_up(max(N, 8), 8))
    grid = pl.cdiv(N, tn)

    kernel = functools.partial(_vq_kernel, n_valid=N, sse_lane=sse_lane)

    in_bytes = flat.dtype.itemsize
    cost = pl.CostEstimate(
        flops=4 * N * K_pad * D,                              # two (tn,K_pad,D) matmuls
        transcendentals=0,
        bytes_accessed=(N * D * (in_bytes + inputs.dtype.itemsize)
                        + (2 * K_pad * D + K_pad) * 4
                        + grid * K_pad * 4),
    )

    dim_sem = (pltpu.CORE_PARALLEL,) if core_parallel else (pltpu.PARALLEL,)

    q_flat, stats = pl.pallas_call(
        kernel,
        out_shape=(
            jax.ShapeDtypeStruct((N, D), inputs.dtype),
            jax.ShapeDtypeStruct((grid, 1, K_pad), jnp.float32),
        ),
        grid_spec=pltpu.PrefetchScalarGridSpec(
            num_scalar_prefetch=0,
            grid=(grid,),
            in_specs=[
                # If profiling on v7x shows the x DMA exposed, add
                # pipeline_mode=pl.Buffered(3) on the x/q streams.
                pl.BlockSpec((tn, D), lambda i: (i, 0)),      # x tile
                pl.BlockSpec((D, K_pad), lambda i: (0, 0)),   # -2 * codebook^T
                pl.BlockSpec((K_pad, D), lambda i: (0, 0)),   # codebook (padded)
                pl.BlockSpec((1, K_pad), lambda i: (0, 0)),   # ||e||^2 (+sentinels)
            ],
            out_specs=[
                pl.BlockSpec((tn, D), lambda i: (i, 0)),      # quantized tile
                pl.BlockSpec((1, 1, K_pad), lambda i: (i, 0, 0)),  # counts+sse partials
            ],
        ),
        compiler_params=pltpu.CompilerParams(
            # Each block writes disjoint output slices -> row axis is safe to
            # shard; CORE_PARALLEL is the v7x 2-TC knob (opt-in).
            dimension_semantics=dim_sem,
            # Actual VMEM use at tn=2048..4096, D=32, K_pad=128 is a few MiB
            # (double-buffered x/q + (tn,128) f32 temps) — well under 32 MiB
            # on v5e/v6e (128 MiB phys) and v7x (64 MiB phys).
            vmem_limit_bytes=32 * 1024 * 1024,
        ),
        cost_estimate=cost,
    )(flat, neg2_et, emb_pad, e2)

    quantized = q_flat.reshape(input_shape)

    # Scalar epilogue (plain JAX glue over (grid, K_pad) partials).
    stats_sum = jnp.sum(stats, axis=(0, 1))                   # (K_pad,)
    counts = stats_sum[:K]                                    # real codebook lanes
    sse = stats_sum[sse_lane]                                 # fused SSE lane
    mse = sse / (N * D)
    # e_latent_loss and q_latent_loss are numerically identical forward values.
    loss = (1.0 + commitment_cost) * mse

    avg_probs = counts / N
    perplexity = jnp.exp(-jnp.sum(avg_probs * jnp.log(avg_probs + 1e-10)))

    # Straight-through estimator: inputs + (quantized - inputs).detach() is
    # numerically just `quantized` in the forward pass.
    return quantized, loss, perplexity


def _reference_forward(inputs, embedding, commitment_cost):
    """Pure-JAX reference mirroring the PyTorch module (for self-check)."""
    D = embedding.shape[1]
    flat = inputs.reshape(-1, D)
    dist = (jnp.sum(flat ** 2, axis=1, keepdims=True)
            + jnp.sum(embedding ** 2, axis=1)
            - 2.0 * jnp.matmul(flat, embedding.T,
                               precision=jax.lax.Precision.HIGHEST))
    idx = jnp.argmin(dist, axis=1)
    enc = jax.nn.one_hot(idx, embedding.shape[0], dtype=jnp.float32)
    q = jnp.matmul(enc, embedding,
                   precision=jax.lax.Precision.HIGHEST).reshape(inputs.shape)
    mse = jnp.mean((q - inputs) ** 2)
    loss = (1.0 + commitment_cost) * mse
    avg_probs = jnp.mean(enc, axis=0)
    perplexity = jnp.exp(-jnp.sum(avg_probs * jnp.log(avg_probs + 1e-10)))
    return q, loss, perplexity


if __name__ == "__main__":
    # Module hyper-parameters (deterministic synthetic init).
    num_embeddings = 64
    embedding_dim = 32
    commitment_cost = 0.25

    key = jax.random.PRNGKey(0)
    k_emb, k_in = jax.random.split(key)

    # nn.Embedding weight ~ U(-1/K, 1/K), shape (K, D)
    embedding = jax.random.uniform(
        k_emb, (num_embeddings, embedding_dim),
        minval=-1.0 / num_embeddings, maxval=1.0 / num_embeddings,
        dtype=jnp.float32)

    # inputs: (B, H, W, D) channel-last, flattened to (B*H*W, D) = (384, 32) rows.
    B, H, W = 2, 12, 16
    x = jax.random.normal(k_in, (B, H, W, embedding_dim), dtype=jnp.float32) * 0.02

    q_ref, loss_ref, ppl_ref = _reference_forward(x, embedding, commitment_cost)

    # tile_n=2048: clamped to one exact 384-row block (default big-tile path).
    # tile_n=128 : 3 exact blocks (per-block partial-reduction path).
    # tile_n=256 : ragged last block (row masking + dropped OOB writes path).
    for tn in (2048, 128, 256):
        fwd = jax.jit(functools.partial(
            vector_quantizer_forward, commitment_cost=commitment_cost, tile_n=tn))
        quantized, loss, perplexity = fwd(x, embedding)
        jax.block_until_ready((quantized, loss, perplexity))

        assert quantized.shape == x.shape and quantized.dtype == x.dtype
        assert jnp.allclose(quantized, q_ref, atol=1e-5), f"quantized mismatch tile_n={tn}"
        assert jnp.allclose(loss, loss_ref, atol=5e-6), f"loss mismatch tile_n={tn}"
        assert jnp.allclose(perplexity, ppl_ref, atol=1e-4), f"perplexity mismatch tile_n={tn}"

    print("KERNEL_OK")
</pallas_src>

<mosaic_0001>
module attributes {stable_mosaic.version = 11 : i64} {
  func.func @_vq_kernel(%arg0: i32, %arg1: memref<384x32xf32, #tpu.memory_space<vmem>>, %arg2: memref<32x128xf32, #tpu.memory_space<vmem>>, %arg3: memref<128x32xf32, #tpu.memory_space<vmem>>, %arg4: memref<1x128xf32, #tpu.memory_space<vmem>>, %arg5: memref<384x32xf32, #tpu.memory_space<vmem>>, %arg6: memref<1x1x128xf32, #tpu.memory_space<vmem>>) attributes {dimension_semantics = [#tpu.dimension_semantics<parallel>], iteration_bounds = array<i64: 1>, scalar_prefetch = 0 : i64, scratch_operands = 0 : i64, tpu.core_type = #tpu.core_type<tc>, window_params = [{transform_indices = @transform_0, window_bounds = array<i64: 384, 32>}, {pipeline_mode = #tpu.pipeline_mode<synchronous>, transform_indices = @transform_1, window_bounds = array<i64: 32, 128>}, {pipeline_mode = #tpu.pipeline_mode<synchronous>, transform_indices = @transform_2, window_bounds = array<i64: 128, 32>}, {pipeline_mode = #tpu.pipeline_mode<synchronous>, transform_indices = @transform_3, window_bounds = array<i64: 1, 128>}, {transform_indices = @transform_4, window_bounds = array<i64: 384, 32>}, {transform_indices = @transform_5, window_bounds = array<i64: 1, 1, 128>}]} {
    %c0 = arith.constant 0 : index
    %c0_0 = arith.constant 0 : index
    %0 = vector.load %arg1[%c0, %c0_0] : memref<384x32xf32, #tpu.memory_space<vmem>>, vector<384x32xf32>
    %c0_1 = arith.constant 0 : index
    %c0_2 = arith.constant 0 : index
    %1 = vector.load %arg2[%c0_1, %c0_2] : memref<32x128xf32, #tpu.memory_space<vmem>>, vector<32x128xf32>
    %cst = arith.constant dense<0.000000e+00> : vector<384x128xf32>
    %2 = tpu.matmul %0, %1, %cst {dimension_numbers = #tpu.dot_dimension_numbers<[1], [0], [0], [1], [0, 0, 1, 1], [], []>, precision = #tpu.contract_precision<fp32>} : vector<384x32xf32>, vector<32x128xf32>, vector<384x128xf32> -> vector<384x128xf32>
    %c0_3 = arith.constant 0 : index
    %c0_4 = arith.constant 0 : index
    %3 = vector.load %arg4[%c0_3, %c0_4] : memref<1x128xf32, #tpu.memory_space<vmem>>, vector<1x128xf32>
    %4 = vector.broadcast %3 : vector<1x128xf32> to vector<384x128xf32>
    %5 = arith.addf %2, %4 : vector<384x128xf32>
    %cst_5 = arith.constant dense<0x7F800000> : vector<384xf32>
    %6 = vector.multi_reduction <minimumf>, %5, %cst_5 [1] : vector<384x128xf32> to vector<384xf32>
    %7 = vector.shape_cast %6 : vector<384xf32> to vector<384x1xf32>
    %8 = tpu.iota {dimensions = array<i32: 1>} : vector<384x128xi32>
    %9 = vector.broadcast %7 : vector<384x1xf32> to vector<384x128xf32>
    %10 = arith.cmpf oeq, %5, %9 : vector<384x128xf32>
    %c128_i32 = arith.constant 128 : i32
    %11 = vector.broadcast %c128_i32 : i32 to vector<384x128xi32>
    %12 = arith.select %10, %8, %11 : vector<384x128xi1>, vector<384x128xi32>
    %cst_6 = arith.constant dense<2147483647> : vector<384xi32>
    %13 = vector.multi_reduction <minsi>, %12, %cst_6 [1] : vector<384x128xi32> to vector<384xi32>
    %14 = vector.shape_cast %13 : vector<384xi32> to vector<384x1xi32>
    %15 = vector.broadcast %14 : vector<384x1xi32> to vector<384x128xi32>
    %16 = arith.cmpi eq, %8, %15 : vector<384x128xi32>
    %17 = arith.extui %16 : vector<384x128xi1> to vector<384x128xi32>
    %18 = arith.sitofp %17 : vector<384x128xi32> to vector<384x128xf32>
    %c0_7 = arith.constant 0 : index
    %c0_8 = arith.constant 0 : index
    %19 = vector.load %arg3[%c0_7, %c0_8] : memref<128x32xf32, #tpu.memory_space<vmem>>, vector<128x32xf32>
    %cst_9 = arith.constant dense<0.000000e+00> : vector<384x32xf32>
    %20 = tpu.matmul %18, %19, %cst_9 {dimension_numbers = #tpu.dot_dimension_numbers<[1], [0], [0], [1], [0, 0, 1, 1], [], []>, precision = #tpu.contract_precision<fp32>} : vector<384x128xf32>, vector<128x32xf32>, vector<384x32xf32> -> vector<384x32xf32>
    %c0_10 = arith.constant 0 : index
    %c0_11 = arith.constant 0 : index
    %21 = vector.load %arg5[%c0_10, %c0_11] : memref<384x32xf32, #tpu.memory_space<vmem>>, vector<384x32xf32>
    tpu.vector_store %arg5[%c0_10, %c0_11], %20 {strides = array<i32>} : memref<384x32xf32, #tpu.memory_space<vmem>>, vector<384x32xf32>,
    %c384_i32 = arith.constant 384 : i32
    %22 = arith.muli %arg0, %c384_i32 : i32
    %23 = tpu.iota {dimensions = array<i32: 0>} : vector<384x1xi32>
    %24 = vector.broadcast %22 : i32 to vector<384x1xi32>
    %25 = arith.addi %24, %23 : vector<384x1xi32>
    %c384_i32_12 = arith.constant 384 : i32
    %26 = vector.broadcast %c384_i32_12 : i32 to vector<384x1xi32>
    %27 = arith.cmpi slt, %25, %26 : vector<384x1xi32>
    %cst_13 = arith.constant 0.000000e+00 : f32
    %28 = vector.shape_cast %27 : vector<384x1xi1> to vector<384x1xi1>
    %29 = vector.broadcast %28 : vector<384x1xi1> to vector<384x128xi1>
    %30 = vector.broadcast %cst_13 : f32 to vector<384x128xf32>
    %31 = arith.select %29, %18, %30 : vector<384x128xi1>, vector<384x128xf32>
    %cst_14 = arith.constant dense<0.000000e+00> : vector<128xf32>
    %32 = vector.multi_reduction <add>, %31, %cst_14 [0] : vector<384x128xf32> to vector<128xf32>
    %33 = vector.shape_cast %32 : vector<128xf32> to vector<1x128xf32>
    %34 = arith.mulf %0, %0 : vector<384x32xf32>
    %cst_15 = arith.constant dense<0.000000e+00> : vector<384xf32>
    %35 = vector.multi_reduction <add>, %34, %cst_15 [1] : vector<384x32xf32> to vector<384xf32>
    %36 = vector.shape_cast %35 : vector<384xf32> to vector<384x1xf32>
    %37 = arith.addf %36, %7 : vector<384x1xf32>
    %cst_16 = arith.constant 0.000000e+00 : f32
    %38 = vector.broadcast %cst_16 : f32 to vector<384x1xf32>
    %39 = arith.maximumf %37, %38 : vector<384x1xf32>
    %cst_17 = arith.constant 0.000000e+00 : f32
    %40 = vector.broadcast %cst_17 : f32 to vector<384x1xf32>
    %41 = arith.select %27, %39, %40 : vector<384x1xi1>, vector<384x1xf32>
    %42 = vector.shape_cast %41 : vector<384x1xf32> to vector<1x384x1xf32>
    %cst_18 = arith.constant dense<0.000000e+00> : vector<1xf32>
    %43 = vector.multi_reduction <add>, %42, %cst_18 [1, 2] : vector<1x384x1xf32> to vector<1xf32>
    %44 = vector.shape_cast %43 : vector<1xf32> to vector<1x1x1xf32>
    %45 = vector.extract %44[0, 0, 0] : f32 from vector<1x1x1xf32>
    %46 = tpu.iota {dimensions = array<i32: 1>} : vector<1x128xi32>
    %c127_i32 = arith.constant 127 : i32
    %47 = vector.broadcast %c127_i32 : i32 to vector<1x128xi32>
    %48 = arith.cmpi eq, %46, %47 : vector<1x128xi32>
    %49 = vector.broadcast %45 : f32 to vector<1x128xf32>
    %50 = arith.select %48, %49, %33 : vector<1x128xi1>, vector<1x128xf32>
    %51 = vector.shape_cast %50 : vector<1x128xf32> to vector<1x1x128xf32>
    %c0_19 = arith.constant 0 : index
    %c0_20 = arith.constant 0 : index
    %c0_21 = arith.constant 0 : index
    %52 = vector.load %arg6[%c0_19, %c0_20, %c0_21] : memref<1x1x128xf32, #tpu.memory_space<vmem>>, vector<1x1x128xf32>
    tpu.vector_store %arg6[%c0_19, %c0_20, %c0_21], %51 {strides = array<i32>} : memref<1x1x128xf32, #tpu.memory_space<vmem>>, vector<1x1x128xf32>,
    return
  }
  func.func @transform_0(%arg0: i32) -> (i32, i32) {
    %c0_i32 = arith.constant 0 : i32
    %c0_i32_0 = arith.constant 0 : i32
    return %arg0, %c0_i32 : i32, i32
  }
  func.func @transform_1(%arg0: i32) -> (i32, i32) {
    %c0_i32 = arith.constant 0 : i32
    %c0_i32_0 = arith.constant 0 : i32
    %c0_i32_1 = arith.constant 0 : i32
    return %c0_i32, %c0_i32_0 : i32, i32
  }
  func.func @transform_2(%arg0: i32) -> (i32, i32) {
    %c0_i32 = arith.constant 0 : i32
    %c0_i32_0 = arith.constant 0 : i32
    %c0_i32_1 = arith.constant 0 : i32
    return %c0_i32, %c0_i32_0 : i32, i32
  }
  func.func @transform_3(%arg0: i32) -> (i32, i32) {
    %c0_i32 = arith.constant 0 : i32
    %c0_i32_0 = arith.constant 0 : i32
    %c0_i32_1 = arith.constant 0 : i32
    return %c0_i32, %c0_i32_0 : i32, i32
  }
  func.func @transform_4(%arg0: i32) -> (i32, i32) {
    %c0_i32 = arith.constant 0 : i32
    %c0_i32_0 = arith.constant 0 : i32
    return %arg0, %c0_i32 : i32, i32
  }
  func.func @transform_5(%arg0: i32) -> (i32, i32, i32) {
    %c0_i32 = arith.constant 0 : i32
    %c0_i32_0 = arith.constant 0 : i32
    %c0_i32_1 = arith.constant 0 : i32
    return %arg0, %c0_i32, %c0_i32_0 : i32, i32, i32
  }
}

</mosaic_0001>

<bundles_post_ra>
// kernel: vector_quantizer_forward.1
= control target key start
LH: loop header
LB: loop body
LE: loop exit
PB: predicated region body
PF: predicated region fallthrough
CT: control target
= control target key end

     0   :  { %vm76_vm0 = vcmask 261120   ;;  %s9863_s0 = inlined_call_operand.vmem [shape: f32[384,32], index: 0, kind: input, shape index: {}]   ;;  %s9864_s1 = inlined_call_operand.vmem [shape: f32[32,128], index: 1, kind: input, shape index: {}]   ;;  %s9865_s2 = inlined_call_operand.vmem [shape: f32[128,32], index: 2, kind: input, shape index: {}]   ;;  %s9866_s3 = inlined_call_operand.vmem [shape: f32[1,128], index: 3, kind: input, shape index: {}]   ;;  %s9867_s4 = inlined_call_operand.hbm [shape: f32[384,32], index: 4, kind: output, shape index: {0}]   ;;  %s9868_s5 = inlined_call_operand.vmem [shape: f32[1,1,128], index: 5, kind: output, shape index: {1}]  }
   0x1   :  { %v71_v0 = vld [vmem:[%s9864_s1 + $0x18] sm:$0xff]  ;;  %v70_v1 = vld [vmem:[%s9864_s1 + $0x10] sm:$0xff]  ;;  %v69_v2 = vld [vmem:[%s9864_s1 + $0x8] sm:$0xff] }
   0x2   :  { %v5866_v3 = vand.u32 4294901760, %v71_v0  ;;  %v5868_v4 = vand.u32 4294901760, %v70_v1  ;;  %v5870_v5 = vand.u32 4294901760, %v69_v2  ;;  %v68_v6 = vld [vmem:[%s9864_s1] sm:$0xff]  ;;  %v21_v8 = vld [vmem:[%s9863_s0 + $0x8] sm:$0xff]  ;;  %v22_v12 = vld [vmem:[%s9863_s0 + $0x10] sm:$0xff] }
   0x3   :  { %v20_v7 = vld [vmem:[%s9863_s0] sm:$0xff]  ;;  %v5881_v9 = vand.u32 4294901760, %v68_v6  ;;  %v81_v11 = vsel %vm76_vm0, %v21_v8, 0 }
   0x4   :  { %v78_v10 = vsel %vm76_vm0, %v20_v7, 0  ;;  %234 = vmatpush.msra.mxu0 %v5866_v3  ;;  %v639_v13 = vsub.f32 %v71_v0, %v5866_v3  ;;  %v645_v14 = vsub.f32 %v70_v1, %v5868_v4  ;;  %1133 = vmatpush.msra.mxu3 %v5866_v3  ;;  %v651_v15 = vsub.f32 %v69_v2, %v5870_v5 }
   0x5   :  { %v5893_v16 = vand.u32 4294901760, %v78_v10 }
   0x6   :  { %11 = vsyncpa [#allocation3], 0  ;;  %v657_v17 = vsub.f32 %v68_v6, %v5881_v9  ;;  %v5896_v18 = vand.u32 4294901760, %v81_v11  ;;  %v84_v19 = vsel %vm76_vm0, %v22_v12, 0  ;;  %236 = vmatpush.msra.mxu0 %v5868_v4  ;;  %869 = vmatpush.msra.mxu2 %v639_v13  ;;  %v640_v20 = vand.u32 4294901760, %v639_v13  ;;  %v23_v38 = vld [vmem:[%s9863_s0 + $0x18] sm:$0xff] }
   0x7   :  { %v242_v21 = vsub.f32 %v78_v10, %v5893_v16  ;;  %v646_v22 = vand.u32 4294901760, %v645_v14  ;;  %v652_v23 = vand.u32 4294901760, %v651_v15  ;;  %1135 = vmatpush.msra.mxu3 %v5868_v4  ;;  %v5905_v31 = vand.u32 4294901760, %v84_v19  ;;  %v24_v46 = vld [vmem:[%s9863_s0 + $0x20] sm:$0xff]  ;;  %v25_v53 = vld [vmem:[%s9863_s0 + $0x28] sm:$0xff]  ;;  %v26_v60 = vld [vmem:[%s9863_s0 + $0x30] sm:$0xff] }
   0x8   :  { %v658_v24 = vand.u32 4294901760, %v657_v17  ;;  %v250_v25 = vsub.f32 %v81_v11, %v5896_v18  ;;  %238 = vmatpush.msra.mxu0 %v5870_v5  ;;  %872 = vmatpush.msra.mxu2 %v645_v14  ;;  %v641_v26 = vsub.f32 %v639_v13, %v640_v20  ;;  %v87_v42 = vsel %vm76_vm0, %v23_v38, 0  ;;  %v28_v10 = vld [vmem:[%s9863_s0 + $0x40] sm:$0xff]  ;;  %s5530_s19 = sshll.u32 %s9867_s4, 4  ;;  %s5825_s20 = smov 128   ;;  %s5531_s19 = int_to_ptr.hbm [resolvable:$true] %s5530_s19 }
   0x9   :  { %v243_v27 = vand.u32 4294901760, %v242_v21  ;;  %v647_v28 = vsub.f32 %v645_v14, %v646_v22  ;;  %v653_v29 = vsub.f32 %v651_v15, %v652_v23  ;;  %1137 = vmatpush.msra.mxu3 %v5870_v5  ;;  %v258_v41 = vsub.f32 %v84_v19, %v5905_v31  ;;  %v29_v19 = vld [vmem:[%s9863_s0 + $0x48] sm:$0xff]  ;;  %s5826_s21 = smov 8  }
   0xa   :  { %v659_v30 = vsub.f32 %v657_v17, %v658_v24  ;;  %240 = vmatpush.msra.mxu0 %v5881_v9  ;;  %v642_v32 = vand.u32 4294901760, %v641_v26  ;;  %875 = vmatpush.msra.mxu2 %v651_v15  ;;  %v251_v35 = vand.u32 4294901760, %v250_v25  ;;  %v5914_v45 = vand.u32 4294901760, %v87_v42  ;;  %v30_v26 = vld [vmem:[%s9863_s0 + $0x50] sm:$0xff] }
   0xb   :  { %v244_v33 = vsub.f32 %v242_v21, %v243_v27  ;;  %v648_v34 = vand.u32 4294901760, %v647_v28  ;;  %1139 = vmatpush.msra.mxu3 %v5881_v9  ;;  %v654_v37 = vand.u32 4294901760, %v653_v29  ;;  %v259_v44 = vand.u32 4294901760, %v258_v41 }
   0xc   :  { %1444 = vmatpush.msrb.mxu0 %v640_v20  ;;  %643 = vmatpush.msra.mxu1 %v642_v32  ;;  %v660_v39 = vand.u32 4294901760, %v659_v30  ;;  %v252_v40 = vsub.f32 %v250_v25, %v251_v35  ;;  %v266_v48 = vsub.f32 %v87_v42, %v5914_v45  ;;  %v90_v49 = vsel %vm76_vm0, %v24_v46, 0 }
   0xd   :  { %v245_v36 = vand.u32 4294901760, %v244_v33  ;;  %878 = vmatpush.msra.mxu2 %v657_v17  ;;  %1143 = vmatmul.f32.vlgmr.msra.gmra.mxu3 %v243_v27  ;;  %v260_v47 = vsub.f32 %v258_v41, %v259_v44  ;;  %v5925_v52 = vand.u32 4294901760, %v90_v49  ;;  %v93_v56 = vsel %vm76_vm0, %v25_v53, 0 }
   0xe   :  { %881 = vmatmul.f32.vlgmr.msra.gmra.mxu2 %v242_v21  ;;  %649 = vmatpush.msra.mxu1 %v648_v34  ;;  %v253_v43 = vand.u32 4294901760, %v252_v40  ;;  %v267_v51 = vand.u32 4294901760, %v266_v48  ;;  %v5934_v59 = vand.u32 4294901760, %v93_v56  ;;  %v96_v63 = vsel %vm76_vm0, %v26_v60, 0  ;;  %v31_v34 = vld [vmem:[%s9863_s0 + $0x58] sm:$0xff] }
   0xf   :  { %246 = vmatmul.f32.vlgmr.msra.gmra.mxu0 %v245_v36  ;;  %v261_v50 = vand.u32 4294901760, %v260_v47  ;;  %v274_v55 = vsub.f32 %v90_v49, %v5925_v52  ;;  %v5942_v2 = vand.u32 4294901760, %v96_v63  ;;  %v102_v13 = vsel %vm76_vm0, %v28_v10, 0  ;;  %v33_v49 = vld [vmem:[%s9863_s0 + $0x68] sm:$0xff]  ;;  %v36_v10 = vld [vmem:[%s9863_s0 + $0x80] sm:$0xff] }
  0x10   :  { %1448 = vmatpush.msrb.mxu0 %v646_v22  ;;  %655 = vmatpush.msra.mxu1 %v654_v37  ;;  %v268_v54 = vsub.f32 %v266_v48, %v267_v51  ;;  %v282_v62 = vsub.f32 %v93_v56, %v5934_v59  ;;  %v5958_v17 = vand.u32 4294901760, %v102_v13  ;;  %v105_v22 = vsel %vm76_vm0, %v29_v19, 0 }
  0x11   :  { %v275_v58 = vand.u32 4294901760, %v274_v55  ;;  %v108_v29 = vsel %vm76_vm0, %v30_v26, 0  ;;  %v111_v37 = vsel %vm76_vm0, %v31_v34, 0  ;;  %v117_v53 = vsel %vm76_vm0, %v33_v49, 0  ;;  %v6041_v34 = vld [vmem:[%s9866_s3] ss:$0 sm:$0xff] }
  0x12   :  { %1452 = vmatpush.msrb.mxu0 %v652_v23  ;;  %661 = vmatpush.msra.mxu1 %v660_v39  ;;  %v269_v57 = vand.u32 4294901760, %v268_v54  ;;  %v283_v1 = vand.u32 4294901760, %v282_v62  ;;  %v306_v21 = vsub.f32 %v102_v13, %v5958_v17  ;;  %v5974_v33 = vand.u32 4294901760, %v108_v29 }
  0x13   :  { %663 = vmatmul.f32.vlgmr.msra.gmra.mxu1 %v5893_v16  ;;  %v276_v61 = vsub.f32 %v274_v55, %v275_v58  ;;  %v5982_v40 = vand.u32 4294901760, %v111_v37  ;;  %v5998_v56 = vand.u32 4294901760, %v117_v53  ;;  %v126_v13 = vsel %vm76_vm0, %v36_v10, 0 }
  0x14   :  { %1456 = vmatpush.msrb.mxu0 %v658_v24  ;;  %1663 = vmatpush.msrb.mxu1 %v5866_v3  ;;  %v27_v3 = vld [vmem:[%s9863_s0 + $0x38] sm:$0xff]  ;;  %v307_v24 = vand.u32 4294901760, %v306_v21  ;;  %v322_v36 = vsub.f32 %v108_v29, %v5974_v33  ;;  %v6022_v19 = vand.u32 4294901760, %v126_v13 }
  0x15   :  { %1149 = vmatmul.f32.gmra.mxu3 %v251_v35  ;;  %v277_v0 = vand.u32 4294901760, %v276_v61  ;;  %v99_v6 = vsel %vm76_vm0, %v27_v3, 0  ;;  %v346_v60 = vsub.f32 %v117_v53, %v5998_v56 }
  0x16   :  { %886 = vmatmul.f32.gmra.mxu2 %v250_v25  ;;  %1665 = vmatpush.msrb.mxu1 %v5868_v4  ;;  %v284_v4 = vsub.f32 %v282_v62, %v283_v1  ;;  %v5966_v25 = vand.u32 4294901760, %v105_v22  ;;  %v308_v27 = vsub.f32 %v306_v21, %v307_v24  ;;  %v323_v39 = vand.u32 4294901760, %v322_v36 }
  0x17   :  { %254 = vmatmul.f32.gmra.mxu0 %v253_v43  ;;  %v330_v43 = vsub.f32 %v111_v37, %v5982_v40 }
  0x18   :  { %1667 = vmatpush.msrb.mxu1 %v5870_v5  ;;  %v290_v5 = vsub.f32 %v96_v63, %v5942_v2  ;;  %v285_v7 = vand.u32 4294901760, %v284_v4  ;;  %v314_v28 = vsub.f32 %v105_v22, %v5966_v25  ;;  %v309_v30 = vand.u32 4294901760, %v308_v27 }
  0x19   :  { %v324_v42 = vsub.f32 %v322_v36, %v323_v39  ;;  %v331_v47 = vand.u32 4294901760, %v330_v43  ;;  %v347_v63 = vand.u32 4294901760, %v346_v60  ;;  %v370_v22 = vsub.f32 %v126_v13, %v6022_v19 }
  0x1a   :  { %1669 = vmatpush.msrb.mxu1 %v5881_v9  ;;  %v291_v8 = vand.u32 4294901760, %v290_v5  ;;  %v5950_v9 = vand.u32 4294901760, %v99_v6  ;;  %v315_v32 = vand.u32 4294901760, %v314_v28 }
  0x1b   :  { %667 = vmatmul.f32.gmra.mxu1 %v5896_v18  ;;  %v325_v46 = vand.u32 4294901760, %v324_v42  ;;  %v348_v3 = vsub.f32 %v346_v60, %v347_v63  ;;  %v371_v26 = vand.u32 4294901760, %v370_v22 }
  0x1c   :  { %v292_v11 = vsub.f32 %v290_v5, %v291_v8  ;;  %v298_v12 = vsub.f32 %v99_v6, %v5950_v9  ;;  %v316_v35 = vsub.f32 %v314_v28, %v315_v32 }
  0x1d   :  { %1155 = vmatmul.f32.gmra.mxu3 %v259_v44  ;;  %v349_v6 = vand.u32 4294901760, %v348_v3  ;;  %v372_v29 = vsub.f32 %v370_v22, %v371_v26 }
  0x1e   :  { %891 = vmatmul.f32.gmra.mxu2 %v258_v41  ;;  %v293_v14 = vand.u32 4294901760, %v292_v11  ;;  %v299_v15 = vand.u32 4294901760, %v298_v12  ;;  %v317_v38 = vand.u32 4294901760, %v316_v35  ;;  %v32_v41 = vld [vmem:[%s9863_s0 + $0x60] sm:$0xff] }
  0x1f   :  { %262 = vmatmul.f32.gmra.mxu0 %v261_v50  ;;  %v114_v44 = vsel %vm76_vm0, %v32_v41, 0  ;;  %v332_v50 = vsub.f32 %v330_v43, %v331_v47  ;;  %v373_v35 = vand.u32 4294901760, %v372_v29 }
  0x20   :  { %v300_v20 = vsub.f32 %v298_v12, %v299_v15 }
  0x21   :  { %v333_v54 = vand.u32 4294901760, %v332_v50 }
  0x22   :  { %v301_v23 = vand.u32 4294901760, %v300_v20  ;;  %v37_v20 = vld [vmem:[%s9863_s0 + $0x88] sm:$0xff] }
  0x23   :  { %671 = vmatmul.f32.gmra.mxu1 %v5905_v31 }
  0x25   :  { %1161 = vmatmul.f32.gmra.mxu3 %v267_v51 }
  0x26   :  { %896 = vmatmul.f32.gmra.mxu2 %v266_v48  ;;  %v5990_v48 = vand.u32 4294901760, %v114_v44 }
  0x27   :  { %270 = vmatmul.f32.gmra.mxu0 %v269_v57  ;;  %v34_v57 = vld [vmem:[%s9863_s0 + $0x70] sm:$0xff] }
  0x28   :  { %v338_v51 = vsub.f32 %v114_v44, %v5990_v48  ;;  %v120_v61 = vsel %vm76_vm0, %v34_v57, 0 }
  0x2b   :  { %675 = vmatmul.f32.gmra.mxu1 %v5914_v45 }
  0x2d   :  { %1167 = vmatmul.f32.gmra.mxu3 %v275_v58 }
  0x2e   :  { %901 = vmatmul.f32.gmra.mxu2 %v274_v55  ;;  %v339_v55 = vand.u32 4294901760, %v338_v51 }
  0x2f   :  { %278 = vmatmul.f32.gmra.mxu0 %v277_v0  ;;  %v6006_v0 = vand.u32 4294901760, %v120_v61 }
  0x30   :  { %v340_v58 = vsub.f32 %v338_v51, %v339_v55 }
  0x31   :  { %v354_v4 = vsub.f32 %v120_v61, %v6006_v0 }
  0x33   :  { %679 = vmatmul.f32.gmra.mxu1 %v5925_v52 }
  0x35   :  { %1173 = vmatmul.f32.gmra.mxu3 %v283_v1  ;;  %v35_v1 = vld [vmem:[%s9863_s0 + $0x78] sm:$0xff] }
  0x36   :  { %906 = vmatmul.f32.gmra.mxu2 %v282_v62  ;;  %v341_v62 = vand.u32 4294901760, %v340_v58  ;;  %v40_v58 = vld [vmem:[%s9863_s0 + $0xa0] sm:$0xff] }
  0x37   :  { %286 = vmatmul.f32.gmra.mxu0 %v285_v7  ;;  %v355_v7 = vand.u32 4294901760, %v354_v4 }
  0x39   :  { %v356_v11 = vsub.f32 %v354_v4, %v355_v7 }
  0x3b   :  { %683 = vmatmul.f32.gmra.mxu1 %v5934_v59 }
  0x3d   :  { %1179 = vmatmul.f32.gmra.mxu3 %v291_v8 }
  0x3e   :  { %911 = vmatmul.f32.gmra.mxu2 %v290_v5  ;;  %v123_v5 = vsel %vm76_vm0, %v35_v1, 0  ;;  %v138_v1 = vsel %vm76_vm0, %v40_v58, 0 }
  0x3f   :  { %294 = vmatmul.f32.gmra.mxu0 %v293_v14  ;;  %v6014_v8 = vand.u32 4294901760, %v123_v5  ;;  %v357_v14 = vand.u32 4294901760, %v356_v11  ;;  %v6063_v11 = vand.u32 4294901760, %v138_v1 }
  0x43   :  { %687 = vmatmul.f32.gmra.mxu1 %v5942_v2 }
  0x45   :  { %1185 = vmatmul.f32.gmra.mxu3 %v299_v15 }
  0x46   :  { %916 = vmatmul.f32.gmra.mxu2 %v298_v12  ;;  %v362_v12 = vsub.f32 %v123_v5, %v6014_v8 }
  0x47   :  { %302 = vmatmul.f32.gmra.mxu0 %v301_v23  ;;  %v129_v23 = vsel %vm76_vm0, %v37_v20, 0 }
  0x48   :  { %v363_v15 = vand.u32 4294901760, %v362_v12  ;;  %v6030_v27 = vand.u32 4294901760, %v129_v23 }
  0x4b   :  { %691 = vmatmul.f32.gmra.mxu1 %v5950_v9 }
  0x4d   :  { %1191 = vmatmul.f32.gmra.mxu3 %v307_v24 }
  0x4e   :  { %921 = vmatmul.f32.gmra.mxu2 %v306_v21  ;;  %v364_v21 = vsub.f32 %v362_v12, %v363_v15 }
  0x4f   :  { %310 = vmatmul.f32.gmra.mxu0 %v309_v30  ;;  %v378_v30 = vsub.f32 %v129_v23, %v6030_v27 }
  0x50   :  { %v365_v24 = vand.u32 4294901760, %v364_v21 }
  0x53   :  { %695 = vmatmul.f32.gmra.mxu1 %v5958_v17 }
  0x55   :  { %1197 = vmatmul.f32.gmra.mxu3 %v315_v32 }
  0x56   :  { %926 = vmatmul.f32.gmra.mxu2 %v314_v28  ;;  %v38_v28 = vld [vmem:[%s9863_s0 + $0x90] sm:$0xff] }
  0x57   :  { %318 = vmatmul.f32.gmra.mxu0 %v317_v38  ;;  %v132_v32 = vsel %vm76_vm0, %v38_v28, 0 }
  0x58   :  { %v6043_v37 = vand.u32 4294901760, %v132_v32 }
  0x5b   :  { %699 = vmatmul.f32.gmra.mxu1 %v5966_v25 }
  0x5d   :  { %1203 = vmatmul.f32.gmra.mxu3 %v323_v39  ;;  %v39_v39 = vld [vmem:[%s9863_s0 + $0x98] sm:$0xff] }
  0x5e   :  { %931 = vmatmul.f32.gmra.mxu2 %v322_v36  ;;  %v379_v36 = vand.u32 4294901760, %v378_v30  ;;  %v135_v44 = vsel %vm76_vm0, %v39_v39, 0  ;;  %v42_v39 = vld [vmem:[%s9863_s0 + $0xb0] sm:$0xff] }
  0x5f   :  { %326 = vmatmul.f32.gmra.mxu0 %v325_v46 }
  0x60   :  { %v380_v42 = vsub.f32 %v378_v30, %v379_v36 }
  0x63   :  { %703 = vmatmul.f32.gmra.mxu1 %v5974_v33 }
  0x65   :  { %1209 = vmatmul.f32.gmra.mxu3 %v331_v47 }
  0x66   :  { %936 = vmatmul.f32.gmra.mxu2 %v330_v43  ;;  %v386_v43 = vsub.f32 %v132_v32, %v6043_v37 }
  0x67   :  { %334 = vmatmul.f32.gmra.mxu0 %v333_v54  ;;  %v6052_v54 = vand.u32 4294901760, %v135_v44 }
  0x68   :  { %v387_v53 = vand.u32 4294901760, %v386_v43 }
  0x6b   :  { %707 = vmatmul.f32.gmra.mxu1 %v5982_v40 }
  0x6d   :  { %1215 = vmatmul.f32.gmra.mxu3 %v339_v55 }
  0x6e   :  { %941 = vmatmul.f32.gmra.mxu2 %v338_v51  ;;  %v381_v51 = vand.u32 4294901760, %v380_v42 }
  0x6f   :  { %342 = vmatmul.f32.gmra.mxu0 %v341_v62  ;;  %v388_v62 = vsub.f32 %v386_v43, %v387_v53 }
  0x73   :  { %711 = vmatmul.f32.gmra.mxu1 %v5990_v48 }
  0x75   :  { %1221 = vmatmul.f32.gmra.mxu3 %v347_v63  ;;  %v394_v63 = vsub.f32 %v135_v44, %v6052_v54 }
  0x76   :  { %946 = vmatmul.f32.gmra.mxu2 %v346_v60 }
  0x77   :  { %350 = vmatmul.f32.gmra.mxu0 %v349_v6  ;;  %v395_v10 = vand.u32 4294901760, %v394_v63 }
  0x79   :  { %v396_v21 = vsub.f32 %v394_v63, %v395_v10 }
  0x7b   :  { %715 = vmatmul.f32.gmra.mxu1 %v5998_v56 }
  0x7d   :  { %1227 = vmatmul.f32.gmra.mxu3 %v355_v7  ;;  %v389_v7 = vand.u32 4294901760, %v388_v62  ;;  %v43_v62 = vld [vmem:[%s9863_s0 + $0xb8] sm:$0xff] }
  0x7e   :  { %951 = vmatmul.f32.gmra.mxu2 %v354_v4 }
  0x7f   :  { %358 = vmatmul.f32.gmra.mxu0 %v357_v14  ;;  %v41_v14 = vld [vmem:[%s9863_s0 + $0xa8] sm:$0xff] }
  0x80   :  { %v141_v23 = vsel %vm76_vm0, %v41_v14, 0 }
  0x83   :  { %719 = vmatmul.f32.gmra.mxu1 %v6006_v0 }
  0x85   :  { %1233 = vmatmul.f32.gmra.mxu3 %v363_v15 }
  0x86   :  { %956 = vmatmul.f32.gmra.mxu2 %v362_v12 }
  0x87   :  { %366 = vmatmul.f32.gmra.mxu0 %v365_v24 }
  0x8b   :  { %723 = vmatmul.f32.gmra.mxu1 %v6014_v8 }
  0x8c   :  { %v247_v38 = vpop.f32.mrf.mxu0 }
  0x8d   :  { %v248_v41 = vadd.f32 %v6041_v34, %v247_v38  ;;  %1239 = vmatmul.f32.gmra.mxu3 %v371_v26 }
  0x8e   :  { %961 = vmatmul.f32.gmra.mxu2 %v370_v22  ;;  %v402_v22 = vsub.f32 %v138_v1, %v6063_v11 }
  0x8f   :  { %374 = vmatmul.f32.gmra.mxu0 %v373_v35  ;;  %v6074_v35 = vand.u32 4294901760, %v141_v23 }
  0x90   :  { %v664_v46 = vpop.f32.mrf.mxu1  ;;  %v1144_v50 = vpop.f32.mrf.mxu3  ;;  %v403_v32 = vand.u32 4294901760, %v402_v22 }
  0x91   :  { %v882_v47 = vpop.f32.mrf.mxu2  ;;  %v665_v49 = vadd.f32 %v664_v46, %v248_v41  ;;  %v410_v44 = vsub.f32 %v141_v23, %v6074_v35  ;;  %v144_v46 = vsel %vm76_vm0, %v42_v39, 0 }
  0x93   :  { %v883_v57 = vadd.f32 %v882_v47, %v665_v49  ;;  %727 = vmatmul.f32.gmra.mxu1 %v6022_v19 }
  0x94   :  { %v255_v55 = vpop.f32.mrf.mxu0 }
  0x95   :  { %v256_v60 = vadd.f32 %v6041_v34, %v255_v55  ;;  %v6059_v61 = vadd.f32 %v1144_v50, %v883_v57  ;;  %1245 = vmatmul.f32.gmra.mxu3 %v379_v36  ;;  %v411_v55 = vand.u32 4294901760, %v410_v44  ;;  %v6085_v57 = vand.u32 4294901760, %v144_v46 }
  0x96   :  { %966 = vmatmul.f32.gmra.mxu2 %v378_v30  ;;  %v397_v30 = vand.u32 4294901760, %v396_v21 }
  0x97   :  { %382 = vmatmul.f32.gmra.mxu0 %v381_v51 }
  0x98   :  { %v668_v3 = vpop.f32.mrf.mxu1  ;;  %v1150_v6 = vpop.f32.mrf.mxu3 }
  0x99   :  { %v887_v4 = vpop.f32.mrf.mxu2  ;;  %v669_v5 = vadd.f32 %v668_v3, %v256_v60  ;;  %v412_v3 = vsub.f32 %v410_v44, %v411_v55 }
  0x9b   :  { %v888_v13 = vadd.f32 %v887_v4, %v669_v5  ;;  %731 = vmatmul.f32.gmra.mxu1 %v6030_v27  ;;  %v418_v4 = vsub.f32 %v144_v46, %v6085_v57  ;;  %v147_v5 = vsel %vm76_vm0, %v43_v62, 0 }
  0x9c   :  { %v263_v12 = vpop.f32.mrf.mxu0 }
  0x9d   :  { %v264_v15 = vadd.f32 %v6041_v34, %v263_v12  ;;  %v6070_v20 = vadd.f32 %v1150_v6, %v888_v13  ;;  %1251 = vmatmul.f32.gmra.mxu3 %v387_v53  ;;  %v413_v13 = vand.u32 4294901760, %v412_v3  ;;  %v419_v14 = vand.u32 4294901760, %v418_v4 }
  0x9e   :  { %971 = vmatmul.f32.gmra.mxu2 %v386_v43  ;;  %v404_v43 = vsub.f32 %v402_v22, %v403_v32 }
  0x9f   :  { %390 = vmatmul.f32.gmra.mxu0 %v389_v7 }
  0xa0   :  { %v672_v24 = vpop.f32.mrf.mxu1  ;;  %v1156_v29 = vpop.f32.mrf.mxu3  ;;  %v405_v53 = vand.u32 4294901760, %v404_v43 }
  0xa1   :  { %v892_v26 = vpop.f32.mrf.mxu2  ;;  %v673_v28 = vadd.f32 %v672_v24, %v264_v15  ;;  %v6096_v15 = vand.u32 4294901760, %v147_v5 }
  0xa3   :  { %v893_v38 = vadd.f32 %v892_v26, %v673_v28  ;;  %735 = vmatmul.f32.gmra.mxu1 %v6043_v37  ;;  %v420_v28 = vsub.f32 %v418_v4, %v419_v14 }
  0xa4   :  { %v271_v36 = vpop.f32.mrf.mxu0 }
  0xa5   :  { %v272_v41 = vadd.f32 %v6041_v34, %v271_v36  ;;  %v6081_v42 = vadd.f32 %v1156_v29, %v893_v38  ;;  %1257 = vmatmul.f32.gmra.mxu3 %v395_v10  ;;  %v426_v29 = vsub.f32 %v147_v5, %v6096_v15 }
  0xa6   :  { %976 = vmatmul.f32.gmra.mxu2 %v394_v63 }
  0xa7   :  { %398 = vmatmul.f32.gmra.mxu0 %v397_v30  ;;  %v427_v43 = vand.u32 4294901760, %v426_v29 }
  0xa8   :  { %v676_v47 = vpop.f32.mrf.mxu1  ;;  %v1162_v51 = vpop.f32.mrf.mxu3 }
  0xa9   :  { %v897_v49 = vpop.f32.mrf.mxu2  ;;  %v677_v50 = vadd.f32 %v676_v47, %v272_v41  ;;  %v421_v41 = vand.u32 4294901760, %v420_v28 }
  0xab   :  { %v898_v60 = vadd.f32 %v897_v49, %v677_v50  ;;  %739 = vmatmul.f32.gmra.mxu1 %v6052_v54 }
  0xac   :  { %v279_v58 = vpop.f32.mrf.mxu0 }
  0xad   :  { %v280_v63 = vadd.f32 %v6041_v34, %v279_v58  ;;  %v6092_v1 = vadd.f32 %v1162_v51, %v898_v60  ;;  %1263 = vmatmul.f32.gmra.mxu3 %v403_v32 }
  0xae   :  { %981 = vmatmul.f32.gmra.mxu2 %v402_v22  ;;  %v44_v22 = vld [vmem:[%s9863_s0 + $0xc0] sm:$0xff] }
  0xaf   :  { %406 = vmatmul.f32.gmra.mxu0 %v405_v53  ;;  %v150_v30 = vsel %vm76_vm0, %v44_v22, 0  ;;  %v428_v53 = vsub.f32 %v426_v29, %v427_v43 }
  0xb0   :  { %v680_v6 = vpop.f32.mrf.mxu1  ;;  %v1168_v12 = vpop.f32.mrf.mxu3  ;;  %v6107_v46 = vand.u32 4294901760, %v150_v30 }
  0xb1   :  { %v902_v7 = vpop.f32.mrf.mxu2  ;;  %v681_v10 = vadd.f32 %v680_v6, %v280_v63  ;;  %v429_v5 = vand.u32 4294901760, %v428_v53 }
  0xb3   :  { %v903_v23 = vadd.f32 %v902_v7, %v681_v10  ;;  %743 = vmatmul.f32.gmra.mxu1 %v6063_v11 }
  0xb4   :  { %v287_v21 = vpop.f32.mrf.mxu0 }
  0xb5   :  { %v288_v24 = vadd.f32 %v6041_v34, %v287_v21  ;;  %v6103_v26 = vadd.f32 %v1168_v12, %v903_v23  ;;  %1269 = vmatmul.f32.gmra.mxu3 %v411_v55  ;;  %v434_v55 = vsub.f32 %v150_v30, %v6107_v46 }
  0xb6   :  { %986 = vmatmul.f32.gmra.mxu2 %v410_v44  ;;  %v45_v44 = vld [vmem:[%s9863_s0 + $0xc8] sm:$0xff] }
  0xb7   :  { %414 = vmatmul.f32.gmra.mxu0 %v413_v13  ;;  %v153_v58 = vsel %vm76_vm0, %v45_v44, 0  ;;  %v435_v6 = vand.u32 4294901760, %v434_v55 }
  0xb8   :  { %v684_v32 = vpop.f32.mrf.mxu1  ;;  %v1174_v39 = vpop.f32.mrf.mxu3  ;;  %v6118_v7 = vand.u32 4294901760, %v153_v58 }
  0xb9   :  { %v907_v36 = vpop.f32.mrf.mxu2  ;;  %v685_v38 = vadd.f32 %v684_v32, %v288_v24  ;;  %v436_v21 = vsub.f32 %v434_v55, %v435_v6 }
  0xba   :  { %v442_v23 = vsub.f32 %v153_v58, %v6118_v7 }
  0xbb   :  { %v908_v49 = vadd.f32 %v907_v36, %v685_v38  ;;  %747 = vmatmul.f32.gmra.mxu1 %v6074_v35  ;;  %v437_v36 = vand.u32 4294901760, %v436_v21 }
  0xbc   :  { %v295_v47 = vpop.f32.mrf.mxu0  ;;  %v443_v38 = vand.u32 4294901760, %v442_v23 }
  0xbd   :  { %v296_v50 = vadd.f32 %v6041_v34, %v295_v47  ;;  %v6114_v51 = vadd.f32 %v1174_v39, %v908_v49  ;;  %1275 = vmatmul.f32.gmra.mxu3 %v419_v14 }
  0xbe   :  { %991 = vmatmul.f32.gmra.mxu2 %v418_v4  ;;  %v46_v4 = vld [vmem:[%s9863_s0 + $0xd0] sm:$0xff]  ;;  %v444_v44 = vsub.f32 %v442_v23, %v443_v38 }
  0xbf   :  { %422 = vmatmul.f32.gmra.mxu0 %v421_v41  ;;  %v156_v22 = vsel %vm76_vm0, %v46_v4, 0 }
  0xc0   :  { %v688_v60 = vpop.f32.mrf.mxu1  ;;  %v1180_v3 = vpop.f32.mrf.mxu3  ;;  %v6129_v39 = vand.u32 4294901760, %v156_v22 }
  0xc1   :  { %v912_v62 = vpop.f32.mrf.mxu2  ;;  %v689_v63 = vadd.f32 %v688_v60, %v296_v50 }
  0xc2   :  { %v450_v50 = vsub.f32 %v156_v22, %v6129_v39 }
  0xc3   :  { %v913_v12 = vadd.f32 %v912_v62, %v689_v63  ;;  %751 = vmatmul.f32.gmra.mxu1 %v6085_v57 }
  0xc4   :  { %v303_v10 = vpop.f32.mrf.mxu0 }
  0xc5   :  { %v304_v13 = vadd.f32 %v6041_v34, %v303_v10  ;;  %v6125_v14 = vadd.f32 %v1180_v3, %v913_v12  ;;  %1281 = vmatmul.f32.gmra.mxu3 %v427_v43  ;;  %v445_v3 = vand.u32 4294901760, %v444_v44 }
  0xc6   :  { %996 = vmatmul.f32.gmra.mxu2 %v426_v29  ;;  %v47_v29 = vld [vmem:[%s9863_s0 + $0xd8] sm:$0xff] }
  0xc7   :  { %430 = vmatmul.f32.gmra.mxu0 %v429_v5  ;;  %v159_v53 = vsel %vm76_vm0, %v47_v29, 0  ;;  %v451_v5 = vand.u32 4294901760, %v450_v50 }
  0xc8   :  { %v692_v24 = vpop.f32.mrf.mxu1  ;;  %v1186_v32 = vpop.f32.mrf.mxu3  ;;  %v6140_v10 = vand.u32 4294901760, %v159_v53 }
  0xc9   :  { %v917_v28 = vpop.f32.mrf.mxu2  ;;  %v693_v30 = vadd.f32 %v692_v24, %v304_v13  ;;  %v452_v21 = vsub.f32 %v450_v50, %v451_v5 }
  0xca   :  { %v458_v22 = vsub.f32 %v159_v53, %v6140_v10 }
  0xcb   :  { %v918_v47 = vadd.f32 %v917_v28, %v693_v30  ;;  %755 = vmatmul.f32.gmra.mxu1 %v6096_v15 }
  0xcc   :  { %v311_v41 = vpop.f32.mrf.mxu0 }
  0xcd   :  { %v312_v43 = vadd.f32 %v6041_v34, %v311_v41  ;;  %v6136_v49 = vadd.f32 %v1186_v32, %v918_v47  ;;  %1287 = vmatmul.f32.gmra.mxu3 %v435_v6  ;;  %v453_v41 = vand.u32 4294901760, %v452_v21  ;;  %v459_v47 = vand.u32 4294901760, %v458_v22 }
  0xce   :  { %1001 = vmatmul.f32.gmra.mxu2 %v434_v55  ;;  %v48_v55 = vld [vmem:[%s9863_s0 + $0xe0] sm:$0xff] }
  0xcf   :  { %10103 = vst [vmem:[#allocation5_spill] sm:$0xff] %v6136_v49  ;;  %438 = vmatmul.f32.gmra.mxu0 %v437_v36  ;;  %v162_v24 = vsel %vm76_vm0, %v48_v55, 0 }
  0xd0   :  { %v696_v58 = vpop.f32.mrf.mxu1  ;;  %v1192_v63 = vpop.f32.mrf.mxu3  ;;  %v6151_v29 = vand.u32 4294901760, %v162_v24 }
  0xd1   :  { %v922_v60 = vpop.f32.mrf.mxu2  ;;  %v697_v62 = vadd.f32 %v696_v58, %v312_v43  ;;  %v460_v58 = vsub.f32 %v458_v22, %v459_v47 }
  0xd3   :  { %v923_v4 = vadd.f32 %v922_v60, %v697_v62  ;;  %759 = vmatmul.f32.gmra.mxu1 %v6107_v46  ;;  %v466_v60 = vsub.f32 %v162_v24, %v6151_v29  ;;  %v461_v55 = vand.u32 4294901760, %v460_v58 }
  0xd4   :  { %v319_v12 = vpop.f32.mrf.mxu0 }
  0xd5   :  { %v320_v6 = vadd.f32 %v6041_v34, %v319_v12  ;;  %v6147_v13 = vadd.f32 %v1192_v63, %v923_v4  ;;  %1293 = vmatmul.f32.gmra.mxu3 %v443_v38 }
  0xd6   :  { %1006 = vmatmul.f32.gmra.mxu2 %v442_v23  ;;  %v49_v23 = vld [vmem:[%s9863_s0 + $0xe8] sm:$0xff] }
  0xd7   :  { %10104 = vst [vmem:[#allocation6_spill] sm:$0xff] %v6147_v13  ;;  %446 = vmatmul.f32.gmra.mxu0 %v445_v3  ;;  %v165_v62 = vsel %vm76_vm0, %v49_v23, 0 }
  0xd8   :  { %v700_v28 = vpop.f32.mrf.mxu1  ;;  %v1198_v36 = vpop.f32.mrf.mxu3  ;;  %v6162_v21 = vand.u32 4294901760, %v165_v62 }
  0xd9   :  { %v927_v30 = vpop.f32.mrf.mxu2  ;;  %v701_v32 = vadd.f32 %v700_v28, %v320_v6  ;;  %v467_v6 = vand.u32 4294901760, %v466_v60 }
  0xdb   :  { %v928_v44 = vadd.f32 %v927_v30, %v701_v32  ;;  %763 = vmatmul.f32.gmra.mxu1 %v6118_v7  ;;  %v468_v32 = vsub.f32 %v466_v60, %v467_v6 }
  0xdc   :  { %v327_v43 = vpop.f32.mrf.mxu0 }
  0xdd   :  { %v328_v38 = vadd.f32 %v6041_v34, %v327_v43  ;;  %v6158_v53 = vadd.f32 %v1198_v36, %v928_v44  ;;  %1299 = vmatmul.f32.gmra.mxu3 %v451_v5  ;;  %v474_v36 = vsub.f32 %v165_v62, %v6162_v21  ;;  %v469_v58 = vand.u32 4294901760, %v468_v32 }
  0xde   :  { %1011 = vmatmul.f32.gmra.mxu2 %v450_v50  ;;  %v50_v50 = vld [vmem:[%s9863_s0 + $0xf0] sm:$0xff] }
  0xdf   :  { %10105 = vst [vmem:[#allocation7_spill] sm:$0xff] %v6158_v53  ;;  %454 = vmatmul.f32.gmra.mxu0 %v453_v41  ;;  %v168_v41 = vsel %vm76_vm0, %v50_v50, 0 }
  0xe0   :  { %v704_v63 = vpop.f32.mrf.mxu1  ;;  %v1204_v4 = vpop.f32.mrf.mxu3 }
  0xe1   :  { %v932_v3 = vpop.f32.mrf.mxu2  ;;  %v705_v12 = vadd.f32 %v704_v63, %v328_v38  ;;  %v475_v63 = vand.u32 4294901760, %v474_v36 }
  0xe3   :  { %v933_v30 = vadd.f32 %v932_v3, %v705_v12  ;;  %767 = vmatmul.f32.gmra.mxu1 %v6129_v39  ;;  %v6173_v3 = vand.u32 4294901760, %v168_v41 }
  0xe4   :  { %v335_v28 = vpop.f32.mrf.mxu0 }
  0xe5   :  { %v336_v5 = vadd.f32 %v6041_v34, %v335_v28  ;;  %v6169_v24 = vadd.f32 %v1204_v4, %v933_v30  ;;  %1305 = vmatmul.f32.gmra.mxu3 %v459_v47  ;;  %10107 = vst [vmem:[#allocation9_spill] sm:$0xff] %v6173_v3  ;;  %v476_v4 = vsub.f32 %v474_v36, %v475_v63 }
  0xe6   :  { %1016 = vmatmul.f32.gmra.mxu2 %v458_v22  ;;  %v51_v22 = vld [vmem:[%s9863_s0 + $0xf8] sm:$0xff] }
  0xe7   :  { %10106 = vst [vmem:[#allocation8_spill] sm:$0xff] %v6169_v24  ;;  %462 = vmatmul.f32.gmra.mxu0 %v461_v55  ;;  %v482_v55 = vsub.f32 %v168_v41, %v6173_v3  ;;  %v171_v30 = vsel %vm76_vm0, %v51_v22, 0 }
  0xe8   :  { %v708_v43 = vpop.f32.mrf.mxu1  ;;  %v1210_v38 = vpop.f32.mrf.mxu3  ;;  %v6184_v24 = vand.u32 4294901760, %v171_v30 }
  0xe9   :  { %v937_v44 = vpop.f32.mrf.mxu2  ;;  %v709_v23 = vadd.f32 %v708_v43, %v336_v5 }
  0xea   :  { %10109 = vst [vmem:[#allocation11_spill] sm:$0xff] %v6184_v24 }
  0xeb   :  { %v938_v28 = vadd.f32 %v937_v44, %v709_v23  ;;  %771 = vmatmul.f32.gmra.mxu1 %v6140_v10  ;;  %v477_v44 = vand.u32 4294901760, %v476_v4  ;;  %v483_v23 = vand.u32 4294901760, %v482_v55 }
  0xec   :  { %v343_v12 = vpop.f32.mrf.mxu0 }
  0xed   :  { %v344_v47 = vadd.f32 %v6041_v34, %v343_v12  ;;  %v6180_v62 = vadd.f32 %v1210_v38, %v938_v28  ;;  %1311 = vmatmul.f32.gmra.mxu3 %v467_v6  ;;  %v484_v38 = vsub.f32 %v482_v55, %v483_v23 }
  0xee   :  { %1021 = vmatmul.f32.gmra.mxu2 %v466_v60  ;;  %v52_v60 = vld [vmem:[%s9863_s0 + $0x100] sm:$0xff] }
  0xef   :  { %10108 = vst [vmem:[#allocation10_spill] sm:$0xff] %v6180_v62  ;;  %470 = vmatmul.f32.gmra.mxu0 %v469_v58  ;;  %v490_v58 = vsub.f32 %v171_v30, %v6184_v24  ;;  %v174_v28 = vsel %vm76_vm0, %v52_v60, 0 }
  0xf0   :  { %v712_v50 = vpop.f32.mrf.mxu1  ;;  %v1216_v43 = vpop.f32.mrf.mxu3  ;;  %v6195_v62 = vand.u32 4294901760, %v174_v28 }
  0xf1   :  { %v942_v5 = vpop.f32.mrf.mxu2  ;;  %v713_v32 = vadd.f32 %v712_v50, %v344_v47 }
  0xf2   :  { %10111 = vst [vmem:[#allocation13_spill] sm:$0xff] %v6195_v62 }
  0xf3   :  { %v943_v12 = vadd.f32 %v942_v5, %v713_v32  ;;  %775 = vmatmul.f32.gmra.mxu1 %v6151_v29  ;;  %v485_v5 = vand.u32 4294901760, %v484_v38  ;;  %v491_v32 = vand.u32 4294901760, %v490_v58 }
  0xf4   :  { %v351_v53 = vpop.f32.mrf.mxu0 }
  0xf5   :  { %v352_v6 = vadd.f32 %v6041_v34, %v351_v53  ;;  %v6191_v41 = vadd.f32 %v1216_v43, %v943_v12  ;;  %1317 = vmatmul.f32.gmra.mxu3 %v475_v63  ;;  %v492_v43 = vsub.f32 %v490_v58, %v491_v32 }
  0xf6   :  { %1026 = vmatmul.f32.gmra.mxu2 %v474_v36  ;;  %v53_v36 = vld [vmem:[%s9863_s0 + $0x108] sm:$0xff] }
  0xf7   :  { %10110 = vst [vmem:[#allocation12_spill] sm:$0xff] %v6191_v41  ;;  %478 = vmatmul.f32.gmra.mxu0 %v477_v44  ;;  %v498_v44 = vsub.f32 %v174_v28, %v6195_v62  ;;  %v177_v12 = vsel %vm76_vm0, %v53_v36, 0 }
  0xf8   :  { %v716_v22 = vpop.f32.mrf.mxu1  ;;  %v1222_v50 = vpop.f32.mrf.mxu3  ;;  %v6206_v41 = vand.u32 4294901760, %v177_v12 }
  0xf9   :  { %v947_v47 = vpop.f32.mrf.mxu2  ;;  %v717_v4 = vadd.f32 %v716_v22, %v352_v6 }
  0xfa   :  { %10113 = vst [vmem:[#allocation15_spill] sm:$0xff] %v6206_v41 }
  0xfb   :  { %v948_v53 = vadd.f32 %v947_v47, %v717_v4  ;;  %779 = vmatmul.f32.gmra.mxu1 %v6162_v21  ;;  %v493_v47 = vand.u32 4294901760, %v492_v43  ;;  %v499_v4 = vand.u32 4294901760, %v498_v44 }
  0xfc   :  { %v359_v13 = vpop.f32.mrf.mxu0 }
  0xfd   :  { %v360_v63 = vadd.f32 %v6041_v34, %v359_v13  ;;  %v6202_v30 = vadd.f32 %v1222_v50, %v948_v53  ;;  %1323 = vmatmul.f32.gmra.mxu3 %v483_v23  ;;  %v500_v50 = vsub.f32 %v498_v44, %v499_v4 }
  0xfe   :  { %1031 = vmatmul.f32.gmra.mxu2 %v482_v55  ;;  %v54_v55 = vld [vmem:[%s9863_s0 + $0x110] sm:$0xff] }
  0xff   :  { %10112 = vst [vmem:[#allocation14_spill] sm:$0xff] %v6202_v30  ;;  %486 = vmatmul.f32.gmra.mxu0 %v485_v5  ;;  %v506_v5 = vsub.f32 %v177_v12, %v6206_v41  ;;  %v180_v53 = vsel %vm76_vm0, %v54_v55, 0 }
 0x100   :  { %v720_v60 = vpop.f32.mrf.mxu1  ;;  %v1228_v22 = vpop.f32.mrf.mxu3  ;;  %v6217_v30 = vand.u32 4294901760, %v180_v53 }
 0x101   :  { %v952_v6 = vpop.f32.mrf.mxu2  ;;  %v721_v38 = vadd.f32 %v720_v60, %v360_v63 }
 0x102   :  { %10115 = vst [vmem:[#allocation17_spill] sm:$0xff] %v6217_v30 }
 0x103   :  { %v953_v13 = vadd.f32 %v952_v6, %v721_v38  ;;  %783 = vmatmul.f32.gmra.mxu1 %v6173_v3  ;;  %v501_v6 = vand.u32 4294901760, %v500_v50  ;;  %v507_v38 = vand.u32 4294901760, %v506_v5 }
 0x104   :  { %v367_v49 = vpop.f32.mrf.mxu0 }
 0x105   :  { %v368_v23 = vadd.f32 %v6041_v34, %v367_v49  ;;  %v6213_v28 = vadd.f32 %v1228_v22, %v953_v13  ;;  %1329 = vmatmul.f32.gmra.mxu3 %v491_v32  ;;  %v508_v22 = vsub.f32 %v506_v5, %v507_v38 }
 0x106   :  { %1036 = vmatmul.f32.gmra.mxu2 %v490_v58  ;;  %v55_v58 = vld [vmem:[%s9863_s0 + $0x118] sm:$0xff] }
 0x107   :  { %10114 = vst [vmem:[#allocation16_spill] sm:$0xff] %v6213_v28  ;;  %494 = vmatmul.f32.gmra.mxu0 %v493_v47  ;;  %v514_v47 = vsub.f32 %v180_v53, %v6217_v30  ;;  %v183_v13 = vsel %vm76_vm0, %v55_v58, 0 }
 0x108   :  { %v724_v36 = vpop.f32.mrf.mxu1  ;;  %v1234_v60 = vpop.f32.mrf.mxu3  ;;  %v6228_v28 = vand.u32 4294901760, %v183_v13 }
 0x109   :  { %v957_v63 = vpop.f32.mrf.mxu2  ;;  %v725_v43 = vadd.f32 %v724_v36, %v368_v23 }
 0x10a   :  { %10117 = vst [vmem:[#allocation19_spill] sm:$0xff] %v6228_v28 }
 0x10b   :  { %v958_v49 = vadd.f32 %v957_v63, %v725_v43  ;;  %787 = vmatmul.f32.gmra.mxu1 %v6184_v24  ;;  %v509_v63 = vand.u32 4294901760, %v508_v22  ;;  %v515_v43 = vand.u32 4294901760, %v514_v47 }
 0x10c   :  { %v375_v3 = vpop.f32.mrf.mxu0 }
 0x10d   :  { %v376_v32 = vadd.f32 %v6041_v34, %v375_v3  ;;  %v6224_v12 = vadd.f32 %v1234_v60, %v958_v49  ;;  %1335 = vmatmul.f32.gmra.mxu3 %v499_v4  ;;  %v516_v60 = vsub.f32 %v514_v47, %v515_v43 }
 0x10e   :  { %1041 = vmatmul.f32.gmra.mxu2 %v498_v44  ;;  %v56_v44 = vld [vmem:[%s9863_s0 + $0x120] sm:$0xff] }
 0x10f   :  { %10116 = vst [vmem:[#allocation18_spill] sm:$0xff] %v6224_v12  ;;  %502 = vmatmul.f32.gmra.mxu0 %v501_v6  ;;  %v522_v6 = vsub.f32 %v183_v13, %v6228_v28  ;;  %v186_v49 = vsel %vm76_vm0, %v56_v44, 0 }
 0x110   :  { %v728_v55 = vpop.f32.mrf.mxu1  ;;  %v1240_v36 = vpop.f32.mrf.mxu3  ;;  %v6239_v12 = vand.u32 4294901760, %v186_v49 }
 0x111   :  { %v962_v23 = vpop.f32.mrf.mxu2  ;;  %v729_v50 = vadd.f32 %v728_v55, %v376_v32 }
 0x112   :  { %10119 = vst [vmem:[#allocation21_spill] sm:$0xff] %v6239_v12 }
 0x113   :  { %v963_v3 = vadd.f32 %v962_v23, %v729_v50  ;;  %791 = vmatmul.f32.gmra.mxu1 %v6195_v62  ;;  %v517_v23 = vand.u32 4294901760, %v516_v60  ;;  %v523_v50 = vand.u32 4294901760, %v522_v6 }
 0x114   :  { %v383_v24 = vpop.f32.mrf.mxu0 }
 0x115   :  { %v384_v4 = vadd.f32 %v6041_v34, %v383_v24  ;;  %v6235_v53 = vadd.f32 %v1240_v36, %v963_v3  ;;  %1341 = vmatmul.f32.gmra.mxu3 %v507_v38  ;;  %v524_v36 = vsub.f32 %v522_v6, %v523_v50 }
 0x116   :  { %1046 = vmatmul.f32.gmra.mxu2 %v506_v5  ;;  %v57_v5 = vld [vmem:[%s9863_s0 + $0x128] sm:$0xff] }
 0x117   :  { %10118 = vst [vmem:[#allocation20_spill] sm:$0xff] %v6235_v53  ;;  %510 = vmatmul.f32.gmra.mxu0 %v509_v63  ;;  %v530_v63 = vsub.f32 %v186_v49, %v6239_v12  ;;  %v189_v3 = vsel %vm76_vm0, %v57_v5, 0 }
 0x118   :  { %v732_v58 = vpop.f32.mrf.mxu1  ;;  %v1246_v55 = vpop.f32.mrf.mxu3  ;;  %v6250_v53 = vand.u32 4294901760, %v189_v3 }
 0x119   :  { %v967_v32 = vpop.f32.mrf.mxu2  ;;  %v733_v22 = vadd.f32 %v732_v58, %v384_v4 }
 0x11a   :  { %10121 = vst [vmem:[#allocation23_spill] sm:$0xff] %v6250_v53 }
 0x11b   :  { %v968_v24 = vadd.f32 %v967_v32, %v733_v22  ;;  %795 = vmatmul.f32.gmra.mxu1 %v6206_v41  ;;  %v525_v32 = vand.u32 4294901760, %v524_v36  ;;  %v531_v22 = vand.u32 4294901760, %v530_v63 }
 0x11c   :  { %v391_v62 = vpop.f32.mrf.mxu0 }
 0x11d   :  { %v392_v38 = vadd.f32 %v6041_v34, %v391_v62  ;;  %v6246_v13 = vadd.f32 %v1246_v55, %v968_v24  ;;  %1347 = vmatmul.f32.gmra.mxu3 %v515_v43  ;;  %v532_v55 = vsub.f32 %v530_v63, %v531_v22 }
 0x11e   :  { %1051 = vmatmul.f32.gmra.mxu2 %v514_v47  ;;  %v58_v47 = vld [vmem:[%s9863_s0 + $0x130] sm:$0xff] }
 0x11f   :  { %10120 = vst [vmem:[#allocation22_spill] sm:$0xff] %v6246_v13  ;;  %518 = vmatmul.f32.gmra.mxu0 %v517_v23  ;;  %v538_v23 = vsub.f32 %v189_v3, %v6250_v53  ;;  %v192_v24 = vsel %vm76_vm0, %v58_v47, 0 }
 0x120   :  { %v736_v44 = vpop.f32.mrf.mxu1  ;;  %v1252_v58 = vpop.f32.mrf.mxu3  ;;  %v6261_v13 = vand.u32 4294901760, %v192_v24 }
 0x121   :  { %v972_v4 = vpop.f32.mrf.mxu2  ;;  %v737_v60 = vadd.f32 %v736_v44, %v392_v38 }
 0x122   :  { %10123 = vst [vmem:[#allocation25_spill] sm:$0xff] %v6261_v13 }
 0x123   :  { %v973_v62 = vadd.f32 %v972_v4, %v737_v60  ;;  %799 = vmatmul.f32.gmra.mxu1 %v6217_v30  ;;  %v533_v4 = vand.u32 4294901760, %v532_v55  ;;  %v539_v60 = vand.u32 4294901760, %v538_v23 }
 0x124   :  { %v399_v41 = vpop.f32.mrf.mxu0 }
 0x125   :  { %v400_v43 = vadd.f32 %v6041_v34, %v399_v41  ;;  %v6257_v49 = vadd.f32 %v1252_v58, %v973_v62  ;;  %1353 = vmatmul.f32.gmra.mxu3 %v523_v50  ;;  %v540_v58 = vsub.f32 %v538_v23, %v539_v60 }
 0x126   :  { %1056 = vmatmul.f32.gmra.mxu2 %v522_v6  ;;  %v59_v6 = vld [vmem:[%s9863_s0 + $0x138] sm:$0xff] }
 0x127   :  { %10122 = vst [vmem:[#allocation24_spill] sm:$0xff] %v6257_v49  ;;  %526 = vmatmul.f32.gmra.mxu0 %v525_v32  ;;  %v546_v32 = vsub.f32 %v192_v24, %v6261_v13  ;;  %v195_v62 = vsel %vm76_vm0, %v59_v6, 0 }
 0x128   :  { %v740_v5 = vpop.f32.mrf.mxu1  ;;  %v1258_v44 = vpop.f32.mrf.mxu3  ;;  %v6272_v49 = vand.u32 4294901760, %v195_v62 }
 0x129   :  { %v977_v38 = vpop.f32.mrf.mxu2  ;;  %v741_v36 = vadd.f32 %v740_v5, %v400_v43 }
 0x12b   :  { %v978_v41 = vadd.f32 %v977_v38, %v741_v36  ;;  %803 = vmatmul.f32.gmra.mxu1 %v6228_v28  ;;  %v541_v38 = vand.u32 4294901760, %v540_v58  ;;  %v547_v36 = vand.u32 4294901760, %v546_v32 }
 0x12c   :  { %v407_v30 = vpop.f32.mrf.mxu0 }
 0x12d   :  { %v408_v50 = vadd.f32 %v6041_v34, %v407_v30  ;;  %v6268_v3 = vadd.f32 %v1258_v44, %v978_v41  ;;  %1359 = vmatmul.f32.gmra.mxu3 %v531_v22  ;;  %v548_v44 = vsub.f32 %v546_v32, %v547_v36 }
 0x12e   :  { %1061 = vmatmul.f32.gmra.mxu2 %v530_v63  ;;  %v60_v63 = vld [vmem:[%s9863_s0 + $0x140] sm:$0xff] }
 0x12f   :  { %10124 = vst [vmem:[#allocation26_spill] sm:$0xff] %v6268_v3  ;;  %534 = vmatmul.f32.gmra.mxu0 %v533_v4  ;;  %v554_v4 = vsub.f32 %v195_v62, %v6272_v49  ;;  %v198_v41 = vsel %vm76_vm0, %v60_v63, 0 }
 0x130   :  { %v744_v47 = vpop.f32.mrf.mxu1  ;;  %v1264_v5 = vpop.f32.mrf.mxu3  ;;  %v6283_v3 = vand.u32 4294901760, %v198_v41 }
 0x131   :  { %v982_v43 = vpop.f32.mrf.mxu2  ;;  %v745_v55 = vadd.f32 %v744_v47, %v408_v50 }
 0x133   :  { %v983_v30 = vadd.f32 %v982_v43, %v745_v55  ;;  %807 = vmatmul.f32.gmra.mxu1 %v6239_v12  ;;  %v549_v43 = vand.u32 4294901760, %v548_v44  ;;  %v555_v55 = vand.u32 4294901760, %v554_v4 }
 0x134   :  { %v415_v28 = vpop.f32.mrf.mxu0 }
 0x135   :  { %v416_v22 = vadd.f32 %v6041_v34, %v415_v28  ;;  %v6279_v24 = vadd.f32 %v1264_v5, %v983_v30  ;;  %1365 = vmatmul.f32.gmra.mxu3 %v539_v60  ;;  %v556_v5 = vsub.f32 %v554_v4, %v555_v55 }
 0x136   :  { %1066 = vmatmul.f32.gmra.mxu2 %v538_v23  ;;  %v61_v23 = vld [vmem:[%s9863_s0 + $0x148] sm:$0xff] }
 0x137   :  { %10125 = vst [vmem:[#allocation27_spill] sm:$0xff] %v6279_v24  ;;  %542 = vmatmul.f32.gmra.mxu0 %v541_v38  ;;  %v562_v38 = vsub.f32 %v198_v41, %v6283_v3  ;;  %v201_v30 = vsel %vm76_vm0, %v61_v23, 0 }
 0x138   :  { %v748_v6 = vpop.f32.mrf.mxu1  ;;  %v1270_v47 = vpop.f32.mrf.mxu3  ;;  %v6294_v24 = vand.u32 4294901760, %v201_v30 }
 0x139   :  { %v987_v50 = vpop.f32.mrf.mxu2  ;;  %v749_v58 = vadd.f32 %v748_v6, %v416_v22 }
 0x13b   :  { %v988_v28 = vadd.f32 %v987_v50, %v749_v58  ;;  %811 = vmatmul.f32.gmra.mxu1 %v6250_v53  ;;  %v557_v50 = vand.u32 4294901760, %v556_v5  ;;  %v563_v58 = vand.u32 4294901760, %v562_v38 }
 0x13c   :  { %v423_v12 = vpop.f32.mrf.mxu0 }
 0x13d   :  { %v424_v60 = vadd.f32 %v6041_v34, %v423_v12  ;;  %v6290_v62 = vadd.f32 %v1270_v47, %v988_v28  ;;  %1371 = vmatmul.f32.gmra.mxu3 %v547_v36  ;;  %v564_v47 = vsub.f32 %v562_v38, %v563_v58 }
 0x13e   :  { %1071 = vmatmul.f32.gmra.mxu2 %v546_v32  ;;  %v62_v32 = vld [vmem:[%s9863_s0 + $0x150] sm:$0xff] }
 0x13f   :  { %10126 = vst [vmem:[#allocation28_spill] sm:$0xff] %v6290_v62  ;;  %550 = vmatmul.f32.gmra.mxu0 %v549_v43  ;;  %v570_v43 = vsub.f32 %v201_v30, %v6294_v24  ;;  %v204_v28 = vsel %vm76_vm0, %v62_v32, 0 }
 0x140   :  { %v752_v63 = vpop.f32.mrf.mxu1  ;;  %v1276_v6 = vpop.f32.mrf.mxu3  ;;  %v6305_v62 = vand.u32 4294901760, %v204_v28 }
 0x141   :  { %v992_v22 = vpop.f32.mrf.mxu2  ;;  %v753_v44 = vadd.f32 %v752_v63, %v424_v60 }
 0x142   :  { %v578_v30 = vsub.f32 %v204_v28, %v6305_v62 }
 0x143   :  { %v993_v12 = vadd.f32 %v992_v22, %v753_v44  ;;  %815 = vmatmul.f32.gmra.mxu1 %v6261_v13  ;;  %v565_v22 = vand.u32 4294901760, %v564_v47  ;;  %v571_v44 = vand.u32 4294901760, %v570_v43 }
 0x144   :  { %v431_v53 = vpop.f32.mrf.mxu0  ;;  %v579_v32 = vand.u32 4294901760, %v578_v30 }
 0x145   :  { %v432_v36 = vadd.f32 %v6041_v34, %v431_v53  ;;  %v6301_v41 = vadd.f32 %v1276_v6, %v993_v12  ;;  %1377 = vmatmul.f32.gmra.mxu3 %v555_v55  ;;  %v63_v53 = vld [vmem:[%s9863_s0 + $0x158] sm:$0xff]  ;;  %v572_v55 = vsub.f32 %v570_v43, %v571_v44 }
 0x146   :  { %1076 = vmatmul.f32.gmra.mxu2 %v554_v4  ;;  %v207_v6 = vsel %vm76_vm0, %v63_v53, 0 }
 0x147   :  { %558 = vmatmul.f32.gmra.mxu0 %v557_v50  ;;  %v573_v12 = vand.u32 4294901760, %v572_v55 }
 0x148   :  { %v756_v23 = vpop.f32.mrf.mxu1  ;;  %v1282_v63 = vpop.f32.mrf.mxu3 }
 0x149   :  { %v997_v60 = vpop.f32.mrf.mxu2  ;;  %v757_v5 = vadd.f32 %v756_v23, %v432_v36  ;;  %v6319_v36 = vand.u32 4294901760, %v207_v6 }
 0x14b   :  { %v998_v34 = vadd.f32 %v997_v60, %v757_v5  ;;  %819 = vmatmul.f32.gmra.mxu1 %v6272_v49  ;;  %v586_v28 = vsub.f32 %v207_v6, %v6319_v36 }
 0x14c   :  { %v6307_v13 = vpop.f32.mrf.mxu0 }
 0x14d   :  { %v6313_v4 = vadd.f32 %v1282_v63, %v998_v34  ;;  %1383 = vmatmul.f32.gmra.mxu3 %v563_v58  ;;  %v580_v58 = vsub.f32 %v578_v30, %v579_v32  ;;  %v587_v63 = vand.u32 4294901760, %v586_v28 }
 0x14e   :  { %1081 = vmatmul.f32.gmra.mxu2 %v562_v38  ;;  %v64_v38 = vld [vmem:[%s9863_s0 + $0x160] sm:$0xff] }
 0x14f   :  { %10127 = vst [vmem:[#allocation29_spill] sm:$0xff] %v6313_v4  ;;  %566 = vmatmul.f32.gmra.mxu0 %v565_v22  ;;  %v210_v23 = vsel %vm76_vm0, %v64_v38, 0  ;;  %v581_v5 = vand.u32 4294901760, %v580_v58 }
 0x150   :  { %v6317_v50 = vpop.f32.mrf.mxu1  ;;  %v6331_v22 = vand.u32 4294901760, %v210_v23 }
 0x152   :  { %v594_v53 = vsub.f32 %v210_v23, %v6331_v22 }
 0x153   :  { %823 = vmatmul.f32.gmra.mxu1 %v6283_v3 }
 0x154   :  { %v6321_v47 = vpop.f32.mrf.mxu0  ;;  %v595_v38 = vand.u32 4294901760, %v594_v53 }
 0x155   :  { %10128 = vst [vmem:[#allocation30_spill] sm:$0xff] %v6321_v47  ;;  %1389 = vmatmul.f32.gmra.mxu3 %v571_v44  ;;  %v588_v44 = vsub.f32 %v586_v28, %v587_v63 }
 0x156   :  { %1086 = vmatmul.f32.gmra.mxu2 %v570_v43  ;;  %v65_v43 = vld [vmem:[%s9863_s0 + $0x168] sm:$0xff] }
 0x157   :  { %574 = vmatmul.f32.gmra.mxu0 %v573_v12  ;;  %v213_v55 = vsel %vm76_vm0, %v65_v43, 0  ;;  %v589_v12 = vand.u32 4294901760, %v588_v44 }
 0x158   :  { %v6329_v60 = vpop.f32.mrf.mxu1  ;;  %v6343_v58 = vand.u32 4294901760, %v213_v55 }
 0x159   :  { %10129 = vst [vmem:[#allocation31_spill] sm:$0xff] %v6329_v60 }
 0x15a   :  { %v602_v23 = vsub.f32 %v213_v55, %v6343_v58 }
 0x15b   :  { %827 = vmatmul.f32.gmra.mxu1 %v6294_v24 }
 0x15c   :  { %v6333_v34 = vpop.f32.mrf.mxu0 }
 0x15d   :  { %10130 = vst [vmem:[#allocation32_spill] sm:$0xff] %v6333_v34  ;;  %1395 = vmatmul.f32.gmra.mxu3 %v579_v32  ;;  %v596_v32 = vsub.f32 %v594_v53, %v595_v38 }
 0x15e   :  { %1091 = vmatmul.f32.gmra.mxu2 %v578_v30  ;;  %v66_v30 = vld [vmem:[%s9863_s0 + $0x170] sm:$0xff] }
 0x15f   :  { %582 = vmatmul.f32.gmra.mxu0 %v581_v5  ;;  %v216_v5 = vsel %vm76_vm0, %v66_v30, 0  ;;  %v597_v44 = vand.u32 4294901760, %v596_v32 }
 0x160   :  { %v6341_v6 = vpop.f32.mrf.mxu1  ;;  %v6355_v60 = vand.u32 4294901760, %v216_v5 }
 0x161   :  { %10131 = vst [vmem:[#allocation33_spill] sm:$0xff] %v6341_v6  ;;  %v603_v6 = vand.u32 4294901760, %v602_v23 }
 0x162   :  { %v610_v55 = vsub.f32 %v216_v5, %v6355_v60 }
 0x163   :  { %831 = vmatmul.f32.gmra.mxu1 %v6305_v62 }
 0x164   :  { %v6345_v34 = vpop.f32.mrf.mxu0 }
 0x165   :  { %10132 = vst [vmem:[#allocation34_spill] sm:$0xff] %v6345_v34  ;;  %1401 = vmatmul.f32.gmra.mxu3 %v587_v63  ;;  %v604_v63 = vsub.f32 %v602_v23, %v603_v6 }
 0x166   :  { %1096 = vmatmul.f32.gmra.mxu2 %v586_v28  ;;  %v67_v28 = vld [vmem:[%s9863_s0 + $0x178] sm:$0xff] }
 0x167   :  { %590 = vmatmul.f32.gmra.mxu0 %v589_v12  ;;  %v219_v12 = vsel %vm76_vm0, %v67_v28, 0  ;;  %v605_v32 = vand.u32 4294901760, %v604_v63 }
 0x168   :  { %v6353_v43 = vpop.f32.mrf.mxu1  ;;  %v6367_v47 = vand.u32 4294901760, %v219_v12 }
 0x169   :  { %10133 = vst [vmem:[#allocation35_spill] sm:$0xff] %v6353_v43  ;;  %v611_v43 = vand.u32 4294901760, %v610_v55 }
 0x16b   :  { %835 = vmatmul.f32.gmra.mxu1 %v6319_v36 }
 0x16c   :  { %v6357_v34 = vpop.f32.mrf.mxu0 }
 0x16d   :  { %10134 = vst [vmem:[#allocation36_spill] sm:$0xff] %v6357_v34  ;;  %1407 = vmatmul.f32.gmra.mxu3 %v595_v38  ;;  %v618_v38 = vsub.f32 %v219_v12, %v6367_v47 }
 0x16e   :  { %1101 = vmatmul.f32.gmra.mxu2 %v594_v53  ;;  %v612_v53 = vsub.f32 %v610_v55, %v611_v43 }
 0x16f   :  { %598 = vmatmul.f32.gmra.mxu0 %v597_v44  ;;  %v619_v28 = vand.u32 4294901760, %v618_v38 }
 0x170   :  { %v6365_v30 = vpop.f32.mrf.mxu1  ;;  %v613_v5 = vand.u32 4294901760, %v612_v53 }
 0x171   :  { %v620_v63 = vsub.f32 %v618_v38, %v619_v28 }
 0x173   :  { %839 = vmatmul.f32.gmra.mxu1 %v6331_v22 }
 0x174   :  { %v6369_v34 = vpop.f32.mrf.mxu0 }
 0x175   :  { %10135 = vst [vmem:[#allocation37_spill] sm:$0xff] %v6369_v34  ;;  %1413 = vmatmul.f32.gmra.mxu3 %v603_v6 }
 0x176   :  { %1106 = vmatmul.f32.gmra.mxu2 %v602_v23  ;;  %v621_v23 = vand.u32 4294901760, %v620_v63 }
 0x177   :  { %606 = vmatmul.f32.gmra.mxu0 %v605_v32 }
 0x178   :  { %v6373_v44 = vpop.f32.mrf.mxu1 }
 0x17b   :  { %843 = vmatmul.f32.gmra.mxu1 %v6343_v58 }
 0x17c   :  { %v6375_v4 = vpop.f32.mrf.mxu0 }
 0x17d   :  { %1419 = vmatmul.f32.gmra.mxu3 %v611_v43 }
 0x17e   :  { %1111 = vmatmul.f32.gmra.mxu2 %v610_v55 }
 0x17f   :  { %614 = vmatmul.f32.gmra.mxu0 %v613_v5 }
 0x180   :  { %v6378_v34 = vpop.f32.mrf.mxu1 }
 0x183   :  { %847 = vmatmul.f32.gmra.mxu1 %v6355_v60 }
 0x184   :  { %v6380_v6 = vpop.f32.mrf.mxu0 }
 0x185   :  { %1425 = vmatmul.f32.gmra.mxu3 %v619_v28 }
 0x186   :  { %1116 = vmatmul.f32.gmra.mxu2 %v618_v38 }
 0x187   :  { %622 = vmatmul.f32.gmra.mxu0 %v621_v23 }
 0x188   :  { %v6383_v12 = vpop.f32.mrf.mxu1 }
 0x18b   :  { %851 = vmatmul.f32.gmra.mxu1 %v6367_v47 }
 0x18c   :  { %v6385_v32 = vpop.f32.mrf.mxu0 }
 0x18f   :  { %1458 = vmatmul.f32.vlgmr.msrb.gmra.mxu0 %v5893_v16 }
 0x190   :  { %v6389_v43 = vpop.f32.mrf.mxu1 }
 0x191   :  { %10136 = vst [vmem:[#allocation38_spill] sm:$0xff] %v6389_v43 }
 0x193   :  { %1671 = vmatmul.f32.vlgmr.msrb.gmra.mxu1 %v5893_v16 }
 0x194   :  { %v6391_v55 = vpop.f32.mrf.mxu0 }
 0x195   :  { %10137 = vst [vmem:[#allocation39_spill] sm:$0xff] %v6391_v55 }
 0x197   :  { %1462 = vmatmul.f32.gmra.mxu0 %v5896_v18 }
 0x198   :  { %v6395_v53 = vpop.f32.mrf.mxu1 }
 0x199   :  { %10138 = vst [vmem:[#allocation40_spill] sm:$0xff] %v6395_v53 }
 0x19b   :  { %1675 = vmatmul.f32.gmra.mxu1 %v5896_v18 }
 0x19c   :  { %v6397_v38 = vpop.f32.mrf.mxu0 }
 0x19d   :  { %10139 = vst [vmem:[#allocation41_spill] sm:$0xff] %v6397_v38 }
 0x19f   :  { %1466 = vmatmul.f32.gmra.mxu0 %v5905_v31 }
 0x1a0   :  { %v6401_v5 = vpop.f32.mrf.mxu1 }
 0x1a1   :  { %10140 = vst [vmem:[#allocation42_spill] sm:$0xff] %v6401_v5 }
 0x1a3   :  { %1679 = vmatmul.f32.gmra.mxu1 %v5905_v31 }
 0x1a4   :  { %v6403_v28 = vpop.f32.mrf.mxu0 }
 0x1a5   :  { %10141 = vst [vmem:[#allocation43_spill] sm:$0xff] %v6403_v28 }
 0x1a7   :  { %1470 = vmatmul.f32.gmra.mxu0 %v5914_v45 }
 0x1a8   :  { %v6407_v63 = vpop.f32.mrf.mxu1 }
 0x1a9   :  { %10142 = vst [vmem:[#allocation44_spill] sm:$0xff] %v6407_v63 }
 0x1ab   :  { %1683 = vmatmul.f32.gmra.mxu1 %v5914_v45 }
 0x1ac   :  { %v6409_v16 = vpop.f32.mrf.mxu0 }
 0x1ad   :  { %10143 = vst [vmem:[#allocation45_spill] sm:$0xff] %v6409_v16 }
 0x1af   :  { %1474 = vmatmul.f32.gmra.mxu0 %v5925_v52 }
 0x1b0   :  { %v6413_v23 = vpop.f32.mrf.mxu1 }
 0x1b1   :  { %10144 = vst [vmem:[#allocation46_spill] sm:$0xff] %v6413_v23 }
 0x1b3   :  { %1687 = vmatmul.f32.gmra.mxu1 %v5925_v52 }
 0x1b4   :  { %v6415_v18 = vpop.f32.mrf.mxu0 }
 0x1b5   :  { %10145 = vst [vmem:[#allocation47_spill] sm:$0xff] %v6415_v18 }
 0x1b7   :  { %1478 = vmatmul.f32.gmra.mxu0 %v5934_v59 }
 0x1b8   :  { %v6419_v28 = vpop.f32.mrf.mxu1 }
 0x1b9   :  { %10146 = vst [vmem:[#allocation48_spill] sm:$0xff] %v6419_v28 }
 0x1bb   :  { %1691 = vmatmul.f32.gmra.mxu1 %v5934_v59 }
 0x1bc   :  { %v6421_v31 = vpop.f32.mrf.mxu0 }
 0x1bd   :  { %10147 = vst [vmem:[#allocation49_spill] sm:$0xff] %v6421_v31 }
 0x1bf   :  { %1482 = vmatmul.f32.gmra.mxu0 %v5942_v2 }
 0x1c0   :  { %v6425_v16 = vpop.f32.mrf.mxu1 }
 0x1c1   :  { %10148 = vst [vmem:[#allocation50_spill] sm:$0xff] %v6425_v16 }
 0x1c3   :  { %1695 = vmatmul.f32.gmra.mxu1 %v5942_v2 }
 0x1c4   :  { %v6427_v45 = vpop.f32.mrf.mxu0 }
 0x1c5   :  { %10149 = vst [vmem:[#allocation51_spill] sm:$0xff] %v6427_v45 }
 0x1c7   :  { %1486 = vmatmul.f32.gmra.mxu0 %v5950_v9 }
 0x1c8   :  { %v6431_v18 = vpop.f32.mrf.mxu1 }
 0x1c9   :  { %10150 = vst [vmem:[#allocation52_spill] sm:$0xff] %v6431_v18 }
 0x1cb   :  { %1699 = vmatmul.f32.gmra.mxu1 %v5950_v9 }
 0x1cc   :  { %v6433_v52 = vpop.f32.mrf.mxu0 }
 0x1cd   :  { %10151 = vst [vmem:[#allocation53_spill] sm:$0xff] %v6433_v52 }
 0x1cf   :  { %1490 = vmatmul.f32.gmra.mxu0 %v5958_v17 }
 0x1d0   :  { %v6437_v31 = vpop.f32.mrf.mxu1 }
 0x1d1   :  { %10152 = vst [vmem:[#allocation54_spill] sm:$0xff] %v6437_v31  ;;  %v10175_v31 = vld [vmem:[#allocation5_spill] sm:$0xff] }
 0x1d3   :  { %1703 = vmatmul.f32.gmra.mxu1 %v5958_v17 }
 0x1d4   :  { %v6439_v59 = vpop.f32.mrf.mxu0 }
 0x1d5   :  { %10153 = vst [vmem:[#allocation55_spill] sm:$0xff] %v6439_v59 }
 0x1d7   :  { %1494 = vmatmul.f32.gmra.mxu0 %v5966_v25 }
 0x1d8   :  { %v6443_v45 = vpop.f32.mrf.mxu1 }
 0x1d9   :  { %10154 = vst [vmem:[#allocation56_spill] sm:$0xff] %v6443_v45 }
 0x1db   :  { %1707 = vmatmul.f32.gmra.mxu1 %v5966_v25 }
 0x1dc   :  { %v6445_v2 = vpop.f32.mrf.mxu0 }
 0x1dd   :  { %10155 = vst [vmem:[#allocation57_spill] sm:$0xff] %v6445_v2 }
 0x1df   :  { %1498 = vmatmul.f32.gmra.mxu0 %v5974_v33 }
 0x1e0   :  { %v6449_v52 = vpop.f32.mrf.mxu1 }
 0x1e1   :  { %10156 = vst [vmem:[#allocation58_spill] sm:$0xff] %v6449_v52 }
 0x1e3   :  { %1711 = vmatmul.f32.gmra.mxu1 %v5974_v33 }
 0x1e4   :  { %v6451_v9 = vpop.f32.mrf.mxu0 }
 0x1e5   :  { %10157 = vst [vmem:[#allocation59_spill] sm:$0xff] %v6451_v9 }
 0x1e7   :  { %1502 = vmatmul.f32.gmra.mxu0 %v5982_v40 }
 0x1e8   :  { %v6455_v59 = vpop.f32.mrf.mxu1 }
 0x1e9   :  { %10158 = vst [vmem:[#allocation60_spill] sm:$0xff] %v6455_v59  ;;  %v10170_v59 = vld [vmem:[#allocation11_spill] sm:$0xff] }
 0x1eb   :  { %1715 = vmatmul.f32.gmra.mxu1 %v5982_v40 }
 0x1ec   :  { %v6457_v17 = vpop.f32.mrf.mxu0 }
 0x1ed   :  { %10159 = vst [vmem:[#allocation61_spill] sm:$0xff] %v6457_v17 }
 0x1ef   :  { %1506 = vmatmul.f32.gmra.mxu0 %v5990_v48 }
 0x1f0   :  { %v6461_v2 = vpop.f32.mrf.mxu1 }
 0x1f1   :  { %10160 = vst [vmem:[#allocation62_spill] sm:$0xff] %v6461_v2 }
 0x1f3   :  { %1719 = vmatmul.f32.gmra.mxu1 %v5990_v48 }
 0x1f4   :  { %v6463_v25 = vpop.f32.mrf.mxu0 }
 0x1f5   :  { %10161 = vst [vmem:[#allocation63_spill] sm:$0xff] %v6463_v25 }
 0x1f7   :  { %1510 = vmatmul.f32.gmra.mxu0 %v5998_v56 }
 0x1f8   :  { %v6467_v9 = vpop.f32.mrf.mxu1 }
 0x1f9   :  { %10162 = vst [vmem:[#allocation64_spill] sm:$0xff] %v6467_v9 }
 0x1fb   :  { %1723 = vmatmul.f32.gmra.mxu1 %v5998_v56 }
 0x1fc   :  { %v6469_v33 = vpop.f32.mrf.mxu0 }
 0x1fd   :  { %10163 = vst [vmem:[#allocation65_spill] sm:$0xff] %v6469_v33 }
 0x1ff   :  { %1514 = vmatmul.f32.gmra.mxu0 %v6006_v0 }
 0x200   :  { %v6473_v17 = vpop.f32.mrf.mxu1 }
 0x201   :  { %10164 = vst [vmem:[#allocation66_spill] sm:$0xff] %v6473_v17 }
 0x203   :  { %1727 = vmatmul.f32.gmra.mxu1 %v6006_v0 }
 0x204   :  { %v6475_v40 = vpop.f32.mrf.mxu0 }
 0x205   :  { %10165 = vst [vmem:[#allocation67_spill] sm:$0xff] %v6475_v40 }
 0x207   :  { %1518 = vmatmul.f32.gmra.mxu0 %v6014_v8 }
 0x208   :  { %v6479_v25 = vpop.f32.mrf.mxu1 }
 0x209   :  { %10166 = vst [vmem:[#allocation68_spill] sm:$0xff] %v6479_v25 }
 0x20b   :  { %1731 = vmatmul.f32.gmra.mxu1 %v6014_v8 }
 0x20c   :  { %v1459_v48 = vpop.f32.mrf.mxu0 }
 0x20d   :  { %v1460_v33 = vadd.f32 %v1459_v48, %v6059_v61 }
 0x20f   :  { %1522 = vmatmul.f32.gmra.mxu0 %v6022_v19 }
 0x210   :  { %v1672_v56 = vpop.f32.mrf.mxu1 }
 0x211   :  { %v6484_v9 = vadd.f32 %v1672_v56, %v1460_v33 }
 0x213   :  { %1735 = vmatmul.f32.gmra.mxu1 %v6022_v19  ;;  %1863 = vmin.xlane.f32.xlu0 %v6484_v9 }
 0x214   :  { %v1463_v2 = vpop.f32.mrf.mxu0 }
 0x215   :  { %v1464_v0 = vadd.f32 %v1463_v2, %v6070_v20 }
 0x217   :  { %1526 = vmatmul.f32.gmra.mxu0 %v6030_v27 }
 0x218   :  { %v1676_v25 = vpop.f32.mrf.mxu1 }
 0x219   :  { %v6490_v40 = vadd.f32 %v1676_v25, %v1464_v0 }
 0x21b   :  { %1739 = vmatmul.f32.gmra.mxu1 %v6030_v27  ;;  %1865 = vmin.xlane.f32.xlu0 %v6490_v40 }
 0x21c   :  { %v1467_v8 = vpop.f32.mrf.mxu0 }
 0x21d   :  { %v1468_v61 = vadd.f32 %v1467_v8, %v6081_v42 }
 0x21f   :  { %1530 = vmatmul.f32.gmra.mxu0 %v6043_v37 }
 0x220   :  { %v1680_v33 = vpop.f32.mrf.mxu1 }
 0x221   :  { %v6496_v19 = vadd.f32 %v1680_v33, %v1468_v61 }
 0x223   :  { %1743 = vmatmul.f32.gmra.mxu1 %v6043_v37  ;;  %1867 = vmin.xlane.f32.xlu1 %v6496_v19 }
 0x224   :  { %v1471_v48 = vpop.f32.mrf.mxu0 }
 0x225   :  { %v1472_v20 = vadd.f32 %v1471_v48, %v6092_v1 }
 0x227   :  { %1534 = vmatmul.f32.gmra.mxu0 %v6052_v54 }
 0x228   :  { %v1684_v2 = vpop.f32.mrf.mxu1 }
 0x229   :  { %v6502_v27 = vadd.f32 %v1684_v2, %v1472_v20 }
 0x22b   :  { %1747 = vmatmul.f32.gmra.mxu1 %v6052_v54  ;;  %1869 = vmin.xlane.f32.xlu1 %v6502_v27 }
 0x22c   :  { %v1475_v25 = vpop.f32.mrf.mxu0 }
 0x22d   :  { %v1476_v42 = vadd.f32 %v1475_v25, %v6103_v26 }
 0x22f   :  { %1538 = vmatmul.f32.gmra.mxu0 %v6063_v11 }
 0x230   :  { %v1688_v56 = vpop.f32.mrf.mxu1 }
 0x231   :  { %v6508_v37 = vadd.f32 %v1688_v56, %v1476_v42 }
 0x233   :  { %1751 = vmatmul.f32.gmra.mxu1 %v6063_v11  ;;  %1871 = vmin.xlane.f32.xlu2 %v6508_v37 }
 0x234   :  { %v1479_v0 = vpop.f32.mrf.mxu0 }
 0x235   :  { %v1480_v1 = vadd.f32 %v1479_v0, %v6114_v51 }
 0x237   :  { %1542 = vmatmul.f32.gmra.mxu0 %v6074_v35 }
 0x238   :  { %v1692_v8 = vpop.f32.mrf.mxu1 }
 0x239   :  { %v6514_v54 = vadd.f32 %v1692_v8, %v1480_v1 }
 0x23b   :  { %1755 = vmatmul.f32.gmra.mxu1 %v6074_v35  ;;  %1873 = vmin.xlane.f32.xlu2 %v6514_v54 }
 0x23c   :  { %v1483_v61 = vpop.f32.mrf.mxu0 }
 0x23d   :  { %v1484_v26 = vadd.f32 %v1483_v61, %v6125_v14  ;;  %v10169_v61 = vld [vmem:[#allocation9_spill] sm:$0xff] }
 0x23f   :  { %1546 = vmatmul.f32.gmra.mxu0 %v6085_v57 }
 0x240   :  { %v1696_v33 = vpop.f32.mrf.mxu1 }
 0x241   :  { %v6520_v11 = vadd.f32 %v1696_v33, %v1484_v26  ;;  %v1959_v33 = vlaneseq }
 0x243   :  { %1759 = vmatmul.f32.gmra.mxu1 %v6085_v57  ;;  %1875 = vmin.xlane.f32.xlu1 %v6520_v11 }
 0x244   :  { %v1487_v48 = vpop.f32.mrf.mxu0 }
 0x245   :  { %v1488_v18 = vadd.f32 %v1487_v48, %v10175_v31  ;;  %v10177_v48 = vld [vmem:[#allocation15_spill] sm:$0xff] }
 0x247   :  { %1550 = vmatmul.f32.gmra.mxu0 %v6096_v15 }
 0x248   :  { %v6525_v51 = vpop.f32.mrf.mxu1 }
 0x24b   :  { %1763 = vmatmul.f32.gmra.mxu1 %v6096_v15 }
 0x24c   :  { %v6527_v20 = vpop.f32.mrf.mxu0 }
 0x24f   :  { %1554 = vmatmul.f32.gmra.mxu0 %v6107_v46 }
 0x250   :  { %v6531_v35 = vpop.f32.mrf.mxu1 }
 0x253   :  { %1767 = vmatmul.f32.gmra.mxu1 %v6107_v46 }
 0x254   :  { %v6533_v14 = vpop.f32.mrf.mxu0 }
 0x257   :  { %1558 = vmatmul.f32.gmra.mxu0 %v6118_v7 }
 0x258   :  { %v6537_v57 = vpop.f32.mrf.mxu1 }
 0x25b   :  { %1771 = vmatmul.f32.gmra.mxu1 %v6118_v7 }
 0x25c   :  { %v6540_v2 = vpop.f32.mrf.mxu0 }
 0x25f   :  { %1562 = vmatmul.f32.gmra.mxu0 %v6129_v39 }
 0x260   :  { %v6543_v25 = vpop.f32.mrf.mxu1 }
 0x263   :  { %1775 = vmatmul.f32.gmra.mxu1 %v6129_v39  ;;  %v2888_v39 = vld [vmem:[%s9865_s2 + $0x78] sm:$0xff] }
 0x264   :  { %v6546_v15 = vpop.f32.mrf.mxu0  ;;  %v6562_v56 = vand.u32 4294901760, %v2888_v39 }
 0x266   :  { %10167 = vst [vmem:[#allocation69_spill] sm:$0xff] %v6562_v56  ;;  %2890 = vmatpush.msrb.mxu2 %v6562_v56  ;;  %3885 = vmatpush.msra.mxu1 %v6562_v56 }
 0x267   :  { %1566 = vmatmul.f32.gmra.mxu0 %v6140_v10 }
 0x268   :  { %v6549_v42 = vpop.f32.mrf.mxu1 }
 0x26b   :  { %1779 = vmatmul.f32.gmra.mxu1 %v6140_v10  ;;  %v6566_v10 = vsub.f32 %v2888_v39, %v6562_v56 }
 0x26c   :  { %v6553_v46 = vpop.f32.mrf.mxu0 }
 0x26d   :  { %10168 = vst [vmem:[#allocation70_spill] sm:$0xff] %v6566_v10  ;;  %3597 = vmatpush.msra.mxu0 %v6566_v10 }
 0x26f   :  { %1570 = vmatmul.f32.gmra.mxu0 %v6151_v29 }
 0x270   :  { %v6555_v7 = vpop.f32.mrf.mxu1 }
 0x273   :  { %1783 = vmatmul.f32.gmra.mxu1 %v6151_v29  ;;  %v9887_v29 = vand.u32 4294901760, %v6566_v10 }
 0x274   :  { %v6569_v0 = vpop.f32.mrf.mxu0 }
 0x275   :  { %v3309_v8 = vsub.f32 %v6566_v10, %v9887_v29 }
 0x277   :  { %1574 = vmatmul.f32.gmra.mxu0 %v6162_v21  ;;  %v3310_v26 = vand.u32 4294901760, %v3309_v8 }
 0x278   :  { %v6574_v1 = vpop.f32.mrf.mxu1 }
 0x279   :  { %3311 = vmatpush.msrb.mxu3 %v3310_v26 }
 0x27b   :  { %1787 = vmatmul.f32.gmra.mxu1 %v6162_v21  ;;  %v6583_v21 = vand.u32 127, %v1959_v33  ;;  %v10172_v33 = vld [vmem:[#allocation13_spill] sm:$0xff] }
 0x27c   :  { %v6581_v39 = vpop.f32.mrf.mxu0 }
 0x27f   :  { %1578 = vmatmul.f32.gmra.mxu0 %v10169_v61 }
 0x280   :  { %v6585_v17 = vpop.f32.mrf.mxu1 }
 0x283   :  { %1791 = vmatmul.f32.gmra.mxu1 %v10169_v61 }
 0x284   :  { %v6600_v26 = vpop.f32.mrf.mxu0 }
 0x286   :  { %v6588_v52 = vpop.xlane.xlu0 %1863 }
 0x287   :  { %1582 = vmatmul.f32.gmra.mxu0 %v10170_v59  ;;  %10171 = vst [vmem:[#allocation9_spill] sm:$0xff] %v6588_v52  ;;  %vm1961_vm1 = vcmp.eq.f32.partialorder %v6484_v9, %v6588_v52  ;;  %v2887_v9 = vld [vmem:[%s9865_s2 + $0x70] sm:$0xff] }
 0x288   :  { %v6593_v29 = vsel %vm1961_vm1, %v6583_v21, 128  ;;  %v6610_v52 = vand.u32 4294901760, %v2887_v9 }
 0x289   :  { %v2058_v8 = vshra.s32 %v6593_v29, 16 }
 0x28a   :  { %10174 = vst [vmem:[#allocation13_spill] sm:$0xff] %v6610_v52  ;;  %2892 = vmatpush.msrb.mxu2 %v6610_v52  ;;  %v6621_v28 = vsub.f32 %v2887_v9, %v6610_v52  ;;  %3887 = vmatpush.msra.mxu1 %v6610_v52  ;;  %v10179_v9 = vld [vmem:[#allocation6_spill] sm:$0xff] }
 0x28b   :  { %1795 = vmatmul.f32.gmra.mxu1 %v10170_v59  ;;  %v6597_v61 = vcvt.s32.f32 %v2058_v8  ;;  %v6612_v59 = vpop.f32.mrf.mxu1  ;;  %v1492_v63 = vadd.f32 %v6527_v20, %v10179_v9 }
 0x28c   :  { %10176 = vst [vmem:[#allocation5_spill] sm:$0xff] %v6621_v28  ;;  %v9891_v23 = vand.u32 4294901760, %v6621_v28  ;;  %3600 = vmatpush.msra.mxu0 %v6621_v28 }
 0x28d   :  { %2061 = vmin.xlane.f32.xlu0 %v6597_v61 }
 0x28e   :  { %v6603_v45 = vpop.xlane.xlu0 %1865  ;;  %v3315_v31 = vsub.f32 %v6621_v28, %v9891_v23 }
 0x28f   :  { %1586 = vmatmul.f32.gmra.mxu0 %v10172_v33  ;;  %10173 = vst [vmem:[#allocation11_spill] sm:$0xff] %v6603_v45  ;;  %vm1962_vm2 = vcmp.eq.f32.partialorder %v6490_v40, %v6603_v45  ;;  %v6626_v40 = vadd.f32 %v6525_v51, %v1488_v18  ;;  %v6642_v18 = vpop.f32.mrf.mxu0 }
 0x290   :  { %v6615_v8 = vsel %vm1962_vm2, %v6583_v21, 128 }
 0x291   :  { %v2072_v16 = vshra.s32 %v6615_v8, 16 }
 0x293   :  { %1799 = vmatmul.f32.gmra.mxu1 %v10172_v33  ;;  %v6628_v45 = vcvt.s32.f32 %v2072_v16  ;;  %v3316_v16 = vand.u32 4294901760, %v3315_v31  ;;  %v6650_v23 = vpop.f32.mrf.mxu1  ;;  %v10180_v31 = vld [vmem:[#allocation17_spill] sm:$0xff] }
 0x295   :  { %1877 = vmin.xlane.f32.xlu0 %v6626_v40  ;;  %2075 = vmin.xlane.f32.xlu2 %v6628_v45 }
 0x296   :  { %v6638_v33 = vpop.xlane.xlu1 %1867  ;;  %3317 = vmatpush.msrb.mxu3 %v3316_v16 }
 0x297   :  { %1590 = vmatmul.f32.gmra.mxu0 %v10177_v48  ;;  %10178 = vst [vmem:[#allocation15_spill] sm:$0xff] %v6638_v33  ;;  %vm1963_vm3 = vcmp.eq.f32.partialorder %v6496_v19, %v6638_v33  ;;  %v6656_v19 = vadd.f32 %v6531_v35, %v1492_v63  ;;  %v6671_v35 = vpop.f32.mrf.mxu0 }
 0x298   :  { %v6645_v51 = vsel %vm1963_vm3, %v6583_v21, 128 }
 0x299   :  { %v2086_v52 = vshra.s32 %v6645_v51, 16 }
 0x29b   :  { %1803 = vmatmul.f32.gmra.mxu1 %v10177_v48  ;;  %v6653_v5 = vcvt.s32.f32 %v2086_v52  ;;  %v10182_v48 = vld [vmem:[#allocation7_spill] sm:$0xff]  ;;  %v6679_v56 = vpop.f32.mrf.mxu1 }
 0x29c   :  { %v1496_v52 = vadd.f32 %v6533_v14, %v10182_v48  ;;  %v2886_v48 = vld [vmem:[%s9865_s2 + $0x68] sm:$0xff] }
 0x29d   :  { %2089 = vmin.xlane.f32.xlu1 %v6653_v5  ;;  %1879 = vmin.xlane.f32.xlu2 %v6656_v19 }
 0x29e   :  { %v6661_v33 = vpop.xlane.xlu1 %1869  ;;  %v6675_v16 = vadd.f32 %v6537_v57, %v1496_v52  ;;  %v6691_v57 = vand.u32 4294901760, %v2886_v48  ;;  %v10186_v52 = vld [vmem:[#allocation8_spill] sm:$0xff] }
 0x29f   :  { %1594 = vmatmul.f32.gmra.mxu0 %v10180_v31  ;;  %10181 = vst [vmem:[#allocation6_spill] sm:$0xff] %v6661_v33  ;;  %vm1964_vm4 = vcmp.eq.f32.partialorder %v6502_v27, %v6661_v33  ;;  %v10183_v27 = vld [vmem:[#allocation19_spill] sm:$0xff] }
 0x2a0   :  { %v6666_v20 = vsel %vm1964_vm4, %v6583_v21, 128  ;;  %10185 = vst [vmem:[#allocation7_spill] sm:$0xff] %v6691_v57  ;;  %2894 = vmatpush.msrb.mxu2 %v6691_v57  ;;  %v6701_v28 = vsub.f32 %v2886_v48, %v6691_v57  ;;  %3889 = vmatpush.msra.mxu1 %v6691_v57  ;;  %v10190_v57 = vld [vmem:[#allocation10_spill] sm:$0xff] }
 0x2a1   :  { %v2100_v63 = vshra.s32 %v6666_v20, 16  ;;  %v1504_v10 = vadd.f32 %v6546_v15, %v10190_v57 }
 0x2a2   :  { %10187 = vst [vmem:[#allocation19_spill] sm:$0xff] %v6701_v28  ;;  %v9899_v38 = vand.u32 4294901760, %v6701_v28  ;;  %3603 = vmatpush.msra.mxu0 %v6701_v28 }
 0x2a3   :  { %1807 = vmatmul.f32.gmra.mxu1 %v10180_v31  ;;  %v6677_v9 = vcvt.s32.f32 %v2100_v63  ;;  %v1500_v63 = vadd.f32 %v6540_v2, %v10186_v52  ;;  %v6712_v2 = vpop.f32.mrf.mxu0 }
 0x2a4   :  { %v3321_v48 = vsub.f32 %v6701_v28, %v9899_v38  ;;  %v6736_v28 = vadd.f32 %v6549_v42, %v1504_v10  ;;  %v10193_v42 = vld [vmem:[#allocation12_spill] sm:$0xff] }
 0x2a5   :  { %1881 = vmin.xlane.f32.xlu1 %v6675_v16  ;;  %2103 = vmin.xlane.f32.xlu0 %v6677_v9  ;;  %v1508_v10 = vadd.f32 %v6553_v46, %v10193_v42 }
 0x2a6   :  { %v6684_v14 = vpop.xlane.xlu2 %1871  ;;  %v3322_v52 = vand.u32 4294901760, %v3321_v48  ;;  %v10191_v48 = vld [vmem:[#allocation23_spill] sm:$0xff] }
 0x2a7   :  { %1598 = vmatmul.f32.gmra.mxu0 %v10183_v27  ;;  %10184 = vst [vmem:[#allocation17_spill] sm:$0xff] %v6684_v14  ;;  %vm1965_vm5 = vcmp.eq.f32.partialorder %v6508_v37, %v6684_v14  ;;  %v6706_v37 = vadd.f32 %v6543_v25, %v1500_v63  ;;  %v10188_v25 = vld [vmem:[#allocation21_spill] sm:$0xff] }
 0x2a8   :  { %v6694_v31 = vsel %vm1965_vm5, %v6583_v21, 128  ;;  %3323 = vmatpush.msrb.mxu3 %v3322_v52  ;;  %v6759_v52 = vadd.f32 %v6555_v7, %v1508_v10 }
 0x2a9   :  { %v2114_v33 = vshra.s32 %v6694_v31, 16 }
 0x2ab   :  { %1811 = vmatmul.f32.gmra.mxu1 %v10183_v27  ;;  %v6708_v14 = vcvt.s32.f32 %v2114_v33  ;;  %v6719_v27 = vpop.f32.mrf.mxu1 }
 0x2ad   :  { %1883 = vmin.xlane.f32.xlu0 %v6706_v37  ;;  %2117 = vmin.xlane.f32.xlu2 %v6708_v14 }
 0x2ae   :  { %v6722_v33 = vpop.xlane.xlu2 %1873 }
 0x2af   :  { %1602 = vmatmul.f32.gmra.mxu0 %v10188_v25  ;;  %10189 = vst [vmem:[#allocation8_spill] sm:$0xff] %v6722_v33  ;;  %vm1966_vm6 = vcmp.eq.f32.partialorder %v6514_v54, %v6722_v33  ;;  %v6740_v54 = vpop.f32.mrf.mxu0 }
 0x2b0   :  { %v6727_v63 = vsel %vm1966_vm6, %v6583_v21, 128 }
 0x2b1   :  { %v2128_v53 = vshra.s32 %v6727_v63, 16 }
 0x2b3   :  { %1815 = vmatmul.f32.gmra.mxu1 %v10188_v25  ;;  %v6733_v38 = vcvt.s32.f32 %v2128_v53  ;;  %v6747_v15 = vpop.f32.mrf.mxu1 }
 0x2b5   :  { %2131 = vmin.xlane.f32.xlu1 %v6733_v38  ;;  %1885 = vmin.xlane.f32.xlu2 %v6736_v28 }
 0x2b6   :  { %v6743_v33 = vpop.xlane.xlu1 %1875 }
 0x2b7   :  { %1606 = vmatmul.f32.gmra.mxu0 %v10191_v48  ;;  %10192 = vst [vmem:[#allocation21_spill] sm:$0xff] %v6743_v33  ;;  %vm1967_vm7 = vcmp.eq.f32.partialorder %v6520_v11, %v6743_v33  ;;  %v10194_v11 = vld [vmem:[#allocation25_spill] sm:$0xff]  ;;  %v6769_v42 = vpop.f32.mrf.mxu0 }
 0x2b8   :  { %v6750_v53 = vsel %vm1967_vm7, %v6583_v21, 128  ;;  %v2885_v33 = vld [vmem:[%s9865_s2 + $0x60] sm:$0xff] }
 0x2b9   :  { %v2142_v57 = vshra.s32 %v6750_v53, 16  ;;  %v6767_v46 = vand.u32 4294901760, %v2885_v33 }
 0x2bb   :  { %1819 = vmatmul.f32.gmra.mxu1 %v10191_v48  ;;  %v6756_v25 = vcvt.s32.f32 %v2142_v57  ;;  %10195 = vst [vmem:[#allocation10_spill] sm:$0xff] %v6767_v46  ;;  %v10196_v48 = vld [vmem:[#allocation14_spill] sm:$0xff]  ;;  %2896 = vmatpush.msrb.mxu2 %v6767_v46  ;;  %v6775_v7 = vsub.f32 %v2885_v33, %v6767_v46  ;;  %v6778_v10 = vpop.f32.mrf.mxu1 }
 0x2bc   :  { %v1512_v57 = vadd.f32 %v6569_v0, %v10196_v48  ;;  %3891 = vmatpush.msra.mxu1 %v6767_v46  ;;  %v10198_v48 = vld [vmem:[#allocation16_spill] sm:$0xff] }
 0x2bd   :  { %2145 = vmin.xlane.f32.xlu1 %v6756_v25  ;;  %1887 = vmin.xlane.f32.xlu2 %v6759_v52  ;;  %10197 = vst [vmem:[#allocation23_spill] sm:$0xff] %v6775_v7  ;;  %v9904_v43 = vand.u32 4294901760, %v6775_v7  ;;  %v1516_v46 = vadd.f32 %v6581_v39, %v10198_v48 }
 0x2be   :  { %v6782_v55 = vadd.f32 %v6574_v1, %v1512_v57  ;;  %3606 = vmatpush.msra.mxu0 %v6775_v7 }
 0x2bf   :  { %1610 = vmatmul.f32.gmra.mxu0 %v10194_v11  ;;  %v3327_v0 = vsub.f32 %v6775_v7, %v9904_v43  ;;  %v6797_v1 = vadd.f32 %v6585_v17, %v1516_v46  ;;  %v10199_v43 = vld [vmem:[#allocation18_spill] sm:$0xff]  ;;  %v2884_v17 = vld [vmem:[%s9865_s2 + $0x58] sm:$0xff] }
 0x2c0   :  { %v6818_v46 = vand.u32 4294901760, %v2884_v17 }
 0x2c1   :  { %v3328_v33 = vand.u32 4294901760, %v3327_v0  ;;  %v1520_v0 = vadd.f32 %v6600_v26, %v10199_v43  ;;  %v10201_v43 = vld [vmem:[#allocation20_spill] sm:$0xff] }
 0x2c2   :  { %10200 = vst [vmem:[#allocation12_spill] sm:$0xff] %v6818_v46  ;;  %2898 = vmatpush.msrb.mxu2 %v6818_v46  ;;  %v6824_v26 = vsub.f32 %v2884_v17, %v6818_v46  ;;  %3893 = vmatpush.msra.mxu1 %v6818_v46 }
 0x2c3   :  { %1823 = vmatmul.f32.gmra.mxu1 %v10194_v11  ;;  %3329 = vmatpush.msrb.mxu3 %v3328_v33  ;;  %v6793_v11 = vpop.f32.mrf.mxu0  ;;  %v6799_v57 = vpop.f32.mrf.mxu1  ;;  %v6807_v39 = vadd.f32 %v6612_v59, %v1520_v0 }
 0x2c4   :  { %10202 = vst [vmem:[#allocation25_spill] sm:$0xff] %v6824_v26  ;;  %v9906_v48 = vand.u32 4294901760, %v6824_v26  ;;  %3609 = vmatpush.msra.mxu0 %v6824_v26 }
 0x2c5   :  { %1889 = vmin.xlane.f32.xlu2 %v6782_v55 }
 0x2c7   :  { %1614 = vmatmul.f32.gmra.mxu0 %v6272_v49 }
 0x2cb   :  { %1827 = vmatmul.f32.gmra.mxu1 %v6272_v49  ;;  %v6809_v33 = vpop.f32.mrf.mxu0  ;;  %v6812_v49 = vpop.f32.mrf.mxu1 }
 0x2cd   :  { %1891 = vmin.xlane.f32.xlu2 %v6797_v1 }
 0x2cf   :  { %1618 = vmatmul.f32.gmra.mxu0 %v6283_v3 }
 0x2d3   :  { %1831 = vmatmul.f32.gmra.mxu1 %v6283_v3  ;;  %v1524_v3 = vadd.f32 %v6642_v18, %v10201_v43  ;;  %v3333_v18 = vsub.f32 %v6824_v26, %v9906_v48  ;;  %v6837_v0 = vpop.f32.mrf.mxu0  ;;  %v6840_v43 = vpop.f32.mrf.mxu1  ;;  %v10206_v26 = vld [vmem:[#allocation24_spill] sm:$0xff] }
 0x2d4   :  { %v6851_v48 = vpop.f32.mrf.mxu3  ;;  %v1532_v7 = vadd.f32 %v6712_v2, %v10206_v26 }
 0x2d5   :  { %1893 = vmin.xlane.f32.xlu2 %v6807_v39  ;;  %v6829_v59 = vadd.f32 %v6650_v23, %v1524_v3  ;;  %v3334_v17 = vand.u32 4294901760, %v3333_v18  ;;  %v6844_v3 = vpop.f32.mrf.mxu2 }
 0x2d7   :  { %1622 = vmatmul.f32.gmra.mxu0 %v6294_v24  ;;  %10203 = vst [vmem:[#allocation14_spill] sm:$0xff] %v6829_v59  ;;  %3335 = vmatpush.msrb.mxu3 %v3334_v17  ;;  %v2883_v17 = vld [vmem:[%s9865_s2 + $0x50] sm:$0xff] }
 0x2db   :  { %1835 = vmatmul.f32.gmra.mxu1 %v6294_v24  ;;  %v10204_v24 = vld [vmem:[#allocation22_spill] sm:$0xff]  ;;  %v6854_v18 = vpop.f32.mrf.mxu0 }
 0x2dc   :  { %v1528_v23 = vadd.f32 %v6671_v35, %v10204_v24  ;;  %v6858_v35 = vpop.f32.mrf.mxu1  ;;  %v6870_v24 = vand.u32 4294901760, %v2883_v17 }
 0x2dd   :  { %1895 = vmin.xlane.f32.xlu2 %v6829_v59 }
 0x2de   :  { %v6848_v46 = vadd.f32 %v6679_v56, %v1528_v23  ;;  %v6864_v56 = vpop.f32.mrf.mxu2  ;;  %10208 = vst [vmem:[#allocation20_spill] sm:$0xff] %v6870_v24  ;;  %2900 = vmatpush.msrb.mxu2 %v6870_v24  ;;  %v6875_v2 = vsub.f32 %v2883_v17, %v6870_v24  ;;  %3895 = vmatpush.msra.mxu1 %v6870_v24 }
 0x2df   :  { %1626 = vmatmul.f32.gmra.mxu0 %v6305_v62 }
 0x2e0   :  { %10205 = vst [vmem:[#allocation16_spill] sm:$0xff] %v6848_v46  ;;  %v9913_v26 = vand.u32 4294901760, %v6875_v2  ;;  %3612 = vmatpush.msra.mxu0 %v6875_v2 }
 0x2e2   :  { %v3339_v17 = vsub.f32 %v6875_v2, %v9913_v26  ;;  %v2057_v26 = vand.u32 65535, %v6593_v29 }
 0x2e3   :  { %1839 = vmatmul.f32.gmra.mxu1 %v6305_v62  ;;  %v6862_v62 = vadd.f32 %v6719_v27, %v1532_v7  ;;  %v10209_v27 = vld [vmem:[#allocation26_spill] sm:$0xff]  ;;  %v6884_v23 = vpop.f32.mrf.mxu0 }
 0x2e4   :  { %v1536_v7 = vadd.f32 %v6740_v54, %v10209_v27  ;;  %v6893_v24 = vpop.f32.mrf.mxu1  ;;  %v3340_v54 = vand.u32 4294901760, %v3339_v17 }
 0x2e5   :  { %1897 = vmin.xlane.f32.xlu2 %v6848_v46  ;;  %10207 = vst [vmem:[#allocation18_spill] sm:$0xff] %v6862_v62  ;;  %v10211_v46 = vld [vmem:[#allocation27_spill] sm:$0xff] }
 0x2e6   :  { %v6896_v27 = vpop.f32.mrf.mxu2  ;;  %3341 = vmatpush.msrb.mxu3 %v3340_v54 }
 0x2e7   :  { %1630 = vmatmul.f32.gmra.mxu0 %v6319_v36 }
 0x2eb   :  { %1843 = vmatmul.f32.gmra.mxu1 %v6319_v36  ;;  %v6878_v36 = vpop.f32.mrf.mxu3 }
 0x2ec   :  { %v6911_v17 = vpop.f32.mrf.mxu1 }
 0x2ed   :  { %1899 = vmin.xlane.f32.xlu2 %v6862_v62  ;;  %v6888_v62 = vadd.f32 %v6747_v15, %v1536_v7  ;;  %v6907_v7 = vpop.f32.mrf.mxu0 }
 0x2ee   :  { %v6914_v54 = vpop.f32.mrf.mxu2 }
 0x2ef   :  { %1634 = vmatmul.f32.gmra.mxu0 %v6331_v22  ;;  %10210 = vst [vmem:[#allocation22_spill] sm:$0xff] %v6888_v62 }
 0x2f3   :  { %1847 = vmatmul.f32.gmra.mxu1 %v6331_v22  ;;  %v1540_v22 = vadd.f32 %v6769_v42, %v10211_v46  ;;  %v6901_v59 = vpop.f32.mrf.mxu3  ;;  %v2059_v46 = vcvt.s32.f32 %v2057_v26  ;;  %v2882_v26 = vld [vmem:[%s9865_s2 + $0x48] sm:$0xff] }
 0x2f5   :  { %1901 = vmin.xlane.f32.xlu2 %v6888_v62  ;;  %v6905_v15 = vadd.f32 %v6778_v10, %v1540_v22  ;;  %v10214_v62 = vld [vmem:[#allocation28_spill] sm:$0xff] }
 0x2f7   :  { %1638 = vmatmul.f32.gmra.mxu0 %v6343_v58  ;;  %10212 = vst [vmem:[#allocation24_spill] sm:$0xff] %v6905_v15 }
 0x2fb   :  { %1851 = vmatmul.f32.gmra.mxu1 %v6343_v58  ;;  %v1544_v58 = vadd.f32 %v6793_v11, %v10214_v62  ;;  %v6926_v22 = vpop.f32.mrf.mxu3  ;;  %v6933_v11 = vand.u32 4294901760, %v2882_v26 }
 0x2fd   :  { %1903 = vmin.xlane.f32.xlu2 %v6905_v15  ;;  %v6924_v29 = vadd.f32 %v6799_v57, %v1544_v58  ;;  %v2071_v15 = vand.u32 65535, %v6615_v8  ;;  %2902 = vmatpush.msrb.mxu2 %v6933_v11  ;;  %v6943_v8 = vpop.f32.mrf.mxu1 }
 0x2fe   :  { %3897 = vmatpush.msra.mxu1 %v6933_v11 }
 0x2ff   :  { %1642 = vmatmul.f32.gmra.mxu0 %v6355_v60  ;;  %10215 = vst [vmem:[#allocation27_spill] sm:$0xff] %v6924_v29  ;;  %v2073_v62 = vcvt.s32.f32 %v2071_v15  ;;  %v6962_v15 = vld [vmem:[%s9866_s3] ss:$0 sm:$0xff] }
 0x300   :  { %v6916_v42 = vpop.xlane.xlu0 %2061 }
 0x301   :  { %10213 = vst [vmem:[#allocation26_spill] sm:$0xff] %v6916_v42  ;;  %vm2063_vm8 = vcmp.eq.f32.partialorder %v6597_v61, %v6916_v42  ;;  %v6935_v61 = vpop.f32.mrf.mxu0 }
 0x302   :  { %v2064_v10 = vsel %vm2063_vm8, %v2059_v46, inf  ;;  %v1548_v46 = vadd.f32 %v6809_v33, %v6301_v41  ;;  %v440_v41 = vadd.f32 %v6962_v15, %v6307_v13 }
 0x303   :  { %1855 = vmatmul.f32.gmra.mxu1 %v6355_v60  ;;  %2065 = vmin.xlane.f32.xlu0 %v2064_v10  ;;  %v6940_v60 = vsub.f32 %v2882_v26, %v6933_v11  ;;  %v6955_v26 = vpop.f32.mrf.mxu2 }
 0x305   :  { %1905 = vmin.xlane.f32.xlu2 %v6924_v29  ;;  %v9919_v10 = vand.u32 4294901760, %v6940_v60  ;;  %3615 = vmatpush.msra.mxu0 %v6940_v60 }
 0x307   :  { %1646 = vmatmul.f32.gmra.mxu0 %v6367_v47 }
 0x308   :  { %v6945_v57 = vpop.xlane.xlu2 %2075  ;;  %v6949_v58 = vpop.xlane.xlu0 %1877 }
 0x309   :  { %10216 = vst [vmem:[#allocation28_spill] sm:$0xff] %v6945_v57  ;;  %vm2077_vm9 = vcmp.eq.f32.partialorder %v6628_v45, %v6945_v57  ;;  %vm1968_vm10 = vcmp.eq.f32.partialorder %v6626_v40, %v6949_v58  ;;  %v6968_v45 = vadd.f32 %v6812_v49, %v1548_v46  ;;  %v3345_v40 = vsub.f32 %v6940_v60, %v9919_v10  ;;  %v6979_v57 = vpop.f32.mrf.mxu3 }
 0x30a   :  { %10217 = vst [vmem:[#allocation71_spill] sm:$0xff] %v6949_v58  ;;  %v2078_v29 = vsel %vm2077_vm9, %v2073_v62, inf  ;;  %v6971_v33 = vsel %vm1968_vm10, %v6583_v21, 128  ;;  %v2085_v58 = vand.u32 65535, %v6645_v51  ;;  %v761_v49 = vadd.f32 %v6317_v50, %v440_v41  ;;  %v10221_v41 = vld [vmem:[#allocation30_spill] sm:$0xff] }
 0x30b   :  { %1859 = vmatmul.f32.gmra.mxu1 %v6367_v47  ;;  %2079 = vmin.xlane.f32.xlu0 %v2078_v29  ;;  %10218 = vst [vmem:[#allocation72_spill] sm:$0xff] %v6971_v33  ;;  %v2156_v62 = vshra.s32 %v6971_v33, 16  ;;  %v3346_v13 = vand.u32 4294901760, %v3345_v40  ;;  %v6984_v29 = vpop.f32.mrf.mxu0  ;;  %v10219_v33 = vld [vmem:[#allocation29_spill] sm:$0xff]  ;;  %v6995_v40 = vpop.f32.mrf.mxu1 }
 0x30c   :  { %v2087_v10 = vcvt.s32.f32 %v2085_v58  ;;  %v1552_v51 = vadd.f32 %v6837_v0, %v10219_v33  ;;  %v7008_v33 = vpop.f32.mrf.mxu2 }
 0x30d   :  { %1907 = vmin.xlane.f32.xlu2 %v6968_v45  ;;  %v6981_v47 = vcvt.s32.f32 %v2156_v62  ;;  %3347 = vmatpush.msrb.mxu3 %v3346_v13  ;;  %v448_v62 = vadd.f32 %v6962_v15, %v10221_v41  ;;  %v1003_v13 = vadd.f32 %v6844_v3, %v761_v49  ;;  %v10223_v3 = vld [vmem:[#allocation31_spill] sm:$0xff] }
 0x30e   :  { %v7003_v58 = vadd.f32 %v6840_v43, %v1552_v51 }
 0x30f   :  { %2159 = vmin.xlane.f32.xlu1 %v6981_v47  ;;  %v1289_v41 = vadd.f32 %v6851_v48, %v1003_v13  ;;  %v765_v49 = vadd.f32 %v10223_v3, %v448_v62  ;;  %v2113_v3 = vand.u32 65535, %v6694_v31 }
 0x310   :  { %v6987_v46 = vpop.xlane.xlu1 %2089  ;;  %v6991_v42 = vpop.xlane.xlu2 %1879  ;;  %10222 = vst [vmem:[#allocation30_spill] sm:$0xff] %v7003_v58 }
 0x311   :  { %10220 = vst [vmem:[#allocation29_spill] sm:$0xff] %v6991_v42  ;;  %vm2091_vm11 = vcmp.eq.f32.partialorder %v6653_v5, %v6987_v46  ;;  %vm1969_vm12 = vcmp.eq.f32.partialorder %v6656_v19, %v6991_v42  ;;  %v2099_v19 = vand.u32 65535, %v6666_v20  ;;  %v1556_v51 = vadd.f32 %v6854_v18, %v1289_v41 }
 0x312   :  { %v2092_v50 = vsel %vm2091_vm11, %v2087_v10, inf  ;;  %v7006_v0 = vsel %vm1969_vm12, %v6583_v21, 128  ;;  %v1008_v13 = vadd.f32 %v6864_v56, %v765_v49  ;;  %v10228_v49 = vld [vmem:[#allocation33_spill] sm:$0xff] }
 0x313   :  { %2093 = vmin.xlane.f32.xlu0 %v2092_v50  ;;  %v2170_v5 = vshra.s32 %v7006_v0, 16  ;;  %v7017_v50 = vpop.f32.mrf.mxu3  ;;  %v2101_v20 = vcvt.s32.f32 %v2099_v19  ;;  %v7029_v48 = vpop.f32.mrf.mxu0  ;;  %v7038_v41 = vadd.f32 %v6858_v35, %v1556_v51 }
 0x314   :  { %v7041_v19 = vpop.f32.mrf.mxu1  ;;  %v7053_v51 = vpop.f32.mrf.mxu2 }
 0x315   :  { %1909 = vmin.xlane.f32.xlu2 %v7003_v58  ;;  %v7013_v10 = vcvt.s32.f32 %v2170_v5  ;;  %v10225_v5 = vld [vmem:[#allocation32_spill] sm:$0xff] }
 0x316   :  { %v456_v58 = vadd.f32 %v6962_v15, %v10225_v5  ;;  %10226 = vst [vmem:[#allocation32_spill] sm:$0xff] %v7038_v41 }
 0x317   :  { %2173 = vmin.xlane.f32.xlu1 %v7013_v10 }
 0x318   :  { %v7020_v43 = vpop.xlane.xlu1 %1881  ;;  %v7025_v42 = vpop.xlane.xlu0 %2103  ;;  %v769_v35 = vadd.f32 %v10228_v49, %v456_v58 }
 0x319   :  { %10224 = vst [vmem:[#allocation31_spill] sm:$0xff] %v7020_v43  ;;  %vm1970_vm13 = vcmp.eq.f32.partialorder %v6675_v16, %v7020_v43  ;;  %vm2105_vm14 = vcmp.eq.f32.partialorder %v6677_v9, %v7025_v42  ;;  %v2881_v9 = vld [vmem:[%s9865_s2 + $0x40] sm:$0xff] }
 0x31a   :  { %v7034_v62 = vsel %vm1970_vm13, %v6583_v21, 128  ;;  %v2106_v18 = vsel %vm2105_vm14, %v2101_v20, inf  ;;  %v7050_v56 = vand.u32 4294901760, %v2881_v9  ;;  %v1295_v20 = vadd.f32 %v6878_v36, %v1008_v13 }
 0x31b   :  { %v2184_v16 = vshra.s32 %v7034_v62, 16  ;;  %2107 = vmin.xlane.f32.xlu0 %v2106_v18  ;;  %v1013_v58 = vadd.f32 %v6896_v27, %v769_v35  ;;  %v7072_v13 = vpop.f32.mrf.mxu3  ;;  %v7087_v27 = vpop.f32.mrf.mxu0 }
 0x31c   :  { %2904 = vmatpush.msrb.mxu2 %v7050_v56  ;;  %v7058_v31 = vsub.f32 %v2881_v9, %v7050_v56  ;;  %3899 = vmatpush.msra.mxu1 %v7050_v56  ;;  %v1560_v43 = vadd.f32 %v6884_v23, %v1295_v20 }
 0x31d   :  { %1911 = vmin.xlane.f32.xlu2 %v7038_v41  ;;  %v7048_v5 = vcvt.s32.f32 %v2184_v16  ;;  %v2115_v16 = vcvt.s32.f32 %v2113_v3  ;;  %v10230_v3 = vld [vmem:[#allocation34_spill] sm:$0xff] }
 0x31e   :  { %v9928_v36 = vand.u32 4294901760, %v7058_v31  ;;  %3618 = vmatpush.msra.mxu0 %v7058_v31  ;;  %v464_v23 = vadd.f32 %v6962_v15, %v10230_v3  ;;  %v7079_v49 = vadd.f32 %v6893_v24, %v1560_v43  ;;  %v7092_v3 = vpop.f32.mrf.mxu1  ;;  %v1301_v43 = vadd.f32 %v6901_v59, %v1013_v58 }
 0x31f   :  { %10227 = vst [vmem:[#allocation73_spill] sm:$0xff] %v7048_v5  ;;  %2187 = vmin.xlane.f32.xlu1 %v7048_v5 }
 0x320   :  { %v7062_v18 = vpop.xlane.xlu2 %2117  ;;  %v7065_v41 = vpop.xlane.xlu0 %1883  ;;  %10231 = vst [vmem:[#allocation34_spill] sm:$0xff] %v7079_v49  ;;  %v3351_v20 = vsub.f32 %v7058_v31, %v9928_v36 }
 0x321   :  { %10229 = vst [vmem:[#allocation33_spill] sm:$0xff] %v7065_v41  ;;  %vm2119_vm15 = vcmp.eq.f32.partialorder %v6708_v14, %v7062_v18  ;;  %vm1971_vm1 = vcmp.eq.f32.partialorder %v6706_v37, %v7065_v41  ;;  %v2127_v37 = vand.u32 65535, %v6727_v63  ;;  %v10233_v41 = vld [vmem:[#allocation35_spill] sm:$0xff]  ;;  %v7098_v36 = vpop.f32.mrf.mxu2  ;;  %v1564_v63 = vadd.f32 %v6907_v7, %v1301_v43 }
 0x322   :  { %v2120_v9 = vsel %vm2119_vm15, %v2115_v16, inf  ;;  %v7082_v14 = vsel %vm1971_vm1, %v6583_v21, 128  ;;  %v3352_v16 = vand.u32 4294901760, %v3351_v20  ;;  %v773_v5 = vadd.f32 %v10233_v41, %v464_v23  ;;  %v10235_v41 = vld [vmem:[#allocation36_spill] sm:$0xff] }
 0x323   :  { %10232 = vst [vmem:[#allocation74_spill] sm:$0xff] %v7082_v14  ;;  %2121 = vmin.xlane.f32.xlu0 %v2120_v9  ;;  %v2198_v35 = vshra.s32 %v7082_v14, 16  ;;  %v2129_v14 = vcvt.s32.f32 %v2127_v37  ;;  %v472_v58 = vadd.f32 %v6962_v15, %v10235_v41  ;;  %v7114_v20 = vadd.f32 %v6911_v17, %v1564_v63  ;;  %v7119_v7 = vpop.f32.mrf.mxu3 }
 0x324   :  { %3353 = vmatpush.msrb.mxu3 %v3352_v16  ;;  %v1018_v23 = vadd.f32 %v6914_v54, %v773_v5  ;;  %v2141_v37 = vand.u32 65535, %v6750_v53 }
 0x325   :  { %1913 = vmin.xlane.f32.xlu2 %v7079_v49  ;;  %v7094_v24 = vcvt.s32.f32 %v2198_v35  ;;  %v777_v17 = vadd.f32 %v6365_v30, %v472_v58 }
 0x326   :  { %v1307_v54 = vadd.f32 %v6926_v22, %v1018_v23  ;;  %v7130_v5 = vpop.f32.mrf.mxu1  ;;  %v2143_v43 = vcvt.s32.f32 %v2141_v37 }
 0x327   :  { %2201 = vmin.xlane.f32.xlu1 %v7094_v24  ;;  %v1023_v58 = vadd.f32 %v6955_v26, %v777_v17 }
 0x328   :  { %v7101_v9 = vpop.xlane.xlu1 %2131  ;;  %v7104_v49 = vpop.xlane.xlu2 %1885  ;;  %v1568_v63 = vadd.f32 %v6935_v61, %v1307_v54 }
 0x329   :  { %10234 = vst [vmem:[#allocation35_spill] sm:$0xff] %v7104_v49  ;;  %vm2133_vm2 = vcmp.eq.f32.partialorder %v6733_v38, %v7101_v9  ;;  %vm1972_vm3 = vcmp.eq.f32.partialorder %v6736_v28, %v7104_v49  ;;  %v7124_v28 = vpop.f32.mrf.mxu0  ;;  %v7142_v22 = vpop.f32.mrf.mxu2  ;;  %v1313_v54 = vadd.f32 %v6979_v57, %v1023_v58 }
 0x32a   :  { %v2134_v59 = vsel %vm2133_vm2, %v2129_v14, inf  ;;  %v7117_v35 = vsel %vm1972_vm3, %v6583_v21, 128  ;;  %v7148_v23 = vadd.f32 %v6943_v8, %v1568_v63 }
 0x32b   :  { %2135 = vmin.xlane.f32.xlu0 %v2134_v59  ;;  %v2212_v38 = vshra.s32 %v7117_v35, 16  ;;  %v10239_v59 = vld [vmem:[#allocation37_spill] sm:$0xff]  ;;  %v7161_v26 = vpop.f32.mrf.mxu3  ;;  %v1572_v63 = vadd.f32 %v6984_v29, %v1313_v54 }
 0x32c   :  { %v480_v41 = vadd.f32 %v6962_v15, %v10239_v59  ;;  %10240 = vst [vmem:[#allocation37_spill] sm:$0xff] %v7148_v23 }
 0x32d   :  { %1915 = vmin.xlane.f32.xlu2 %v7114_v20  ;;  %v7126_v14 = vcvt.s32.f32 %v2212_v38  ;;  %v2880_v38 = vld [vmem:[%s9865_s2 + $0x38] sm:$0xff]  ;;  %v7187_v58 = vadd.f32 %v6995_v40, %v1572_v63 }
 0x32e   :  { %v7158_v37 = vand.u32 4294901760, %v2880_v38 }
 0x32f   :  { %10236 = vst [vmem:[#allocation36_spill] sm:$0xff] %v7126_v14  ;;  %2215 = vmin.xlane.f32.xlu1 %v7126_v14 }
 0x330   :  { %v7133_v16 = vpop.xlane.xlu1 %2145  ;;  %v7136_v53 = vpop.xlane.xlu2 %1887  ;;  %2906 = vmatpush.msrb.mxu2 %v7158_v37  ;;  %v7168_v17 = vsub.f32 %v2880_v38, %v7158_v37  ;;  %3901 = vmatpush.msra.mxu1 %v7158_v37  ;;  %10244 = vst [vmem:[#allocation80_spill] sm:$0xff] %v7187_v58 }
 0x331   :  { %10237 = vst [vmem:[#allocation75_spill] sm:$0xff] %v7133_v16  ;;  %vm2147_vm4 = vcmp.eq.f32.partialorder %v6756_v25, %v7133_v16  ;;  %vm1973_vm5 = vcmp.eq.f32.partialorder %v6759_v52, %v7136_v53  ;;  %v781_v52 = vadd.f32 %v6373_v44, %v480_v41  ;;  %v7180_v41 = vpop.f32.mrf.mxu1  ;;  %v7195_v38 = vpop.f32.mrf.mxu2 }
 0x332   :  { %10238 = vst [vmem:[#allocation76_spill] sm:$0xff] %v7136_v53  ;;  %v2148_v30 = vsel %vm2147_vm4, %v2143_v43, inf  ;;  %v7151_v61 = vsel %vm1973_vm5, %v6583_v21, 128  ;;  %v7171_v43 = vpop.f32.mrf.mxu0  ;;  %v9931_v59 = vand.u32 4294901760, %v7168_v17  ;;  %3621 = vmatpush.msra.mxu0 %v7168_v17 }
 0x333   :  { %10241 = vst [vmem:[#allocation77_spill] sm:$0xff] %v7151_v61  ;;  %2149 = vmin.xlane.f32.xlu0 %v2148_v30  ;;  %v2226_v25 = vshra.s32 %v7151_v61, 16  ;;  %v1028_v57 = vadd.f32 %v7008_v33, %v781_v52  ;;  %v488_v30 = vadd.f32 %v6962_v15, %v6375_v4  ;;  %v7203_v54 = vpop.f32.mrf.mxu3 }
 0x335   :  { %1917 = vmin.xlane.f32.xlu2 %v7148_v23  ;;  %v7163_v8 = vcvt.s32.f32 %v2226_v25  ;;  %v3357_v25 = vsub.f32 %v7168_v17, %v9931_v59  ;;  %v1319_v4 = vadd.f32 %v7017_v50, %v1028_v57  ;;  %v785_v40 = vadd.f32 %v6378_v34, %v488_v30 }
 0x337   :  { %10242 = vst [vmem:[#allocation78_spill] sm:$0xff] %v7163_v8  ;;  %2229 = vmin.xlane.f32.xlu1 %v7163_v8  ;;  %v1576_v63 = vadd.f32 %v7029_v48, %v1319_v4  ;;  %v1033_v50 = vadd.f32 %v7053_v51, %v785_v40  ;;  %v2878_v4 = vld [vmem:[%s9865_s2 + $0x28] sm:$0xff]  ;;  %v504_v40 = vadd.f32 %v6962_v15, %v6385_v32 }
 0x338   :  { %v7175_v44 = vpop.xlane.xlu2 %1889 }
 0x339   :  { %10243 = vst [vmem:[#allocation79_spill] sm:$0xff] %v7175_v44  ;;  %vm1974_vm6 = vcmp.eq.f32.partialorder %v6782_v55, %v7175_v44  ;;  %v3358_v55 = vand.u32 4294901760, %v3357_v25  ;;  %v496_v25 = vadd.f32 %v6962_v15, %v6380_v6  ;;  %v7217_v34 = vadd.f32 %v7041_v19, %v1576_v63  ;;  %v7222_v30 = vpop.f32.mrf.mxu1 }
 0x33a   :  { %v7190_v29 = vsel %vm1974_vm6, %v6583_v21, 128  ;;  %v7209_v44 = vpop.f32.mrf.mxu0  ;;  %v1325_v19 = vadd.f32 %v7072_v13, %v1033_v50 }
 0x33b   :  { %10245 = vst [vmem:[#allocation81_spill] sm:$0xff] %v7190_v29  ;;  %v2240_v33 = vshra.s32 %v7190_v29, 16  ;;  %3359 = vmatpush.msrb.mxu3 %v3358_v55  ;;  %v789_v55 = vadd.f32 %v6383_v12, %v496_v25  ;;  %v2877_v12 = vld [vmem:[%s9865_s2 + $0x20] sm:$0xff]  ;;  %v7256_v32 = vpop.f32.mrf.mxu3 }
 0x33c   :  { %10248 = vst [vmem:[#allocation84_spill] sm:$0xff] %v7217_v34  ;;  %v1580_v13 = vadd.f32 %v7087_v27, %v1325_v19  ;;  %v7265_v27 = vand.u32 4294901760, %v2877_v12 }
 0x33d   :  { %1919 = vmin.xlane.f32.xlu2 %v7187_v58  ;;  %v7199_v52 = vcvt.s32.f32 %v2240_v33  ;;  %v7229_v33 = vpop.f32.mrf.mxu2  ;;  %v1038_v19 = vadd.f32 %v7098_v36, %v789_v55 }
 0x33f   :  { %10246 = vst [vmem:[#allocation82_spill] sm:$0xff] %v7199_v52  ;;  %2243 = vmin.xlane.f32.xlu1 %v7199_v52 }
 0x340   :  { %v7207_v59 = vpop.xlane.xlu2 %1891 }
 0x341   :  { %10247 = vst [vmem:[#allocation83_spill] sm:$0xff] %v7207_v59  ;;  %vm1975_vm7 = vcmp.eq.f32.partialorder %v6797_v1, %v7207_v59  ;;  %v2879_v1 = vld [vmem:[%s9865_s2 + $0x30] sm:$0xff]  ;;  %v7270_v59 = vadd.f32 %v7092_v3, %v1580_v13  ;;  %v7291_v13 = vsub.f32 %v2877_v12, %v7265_v27  ;;  %v1331_v12 = vadd.f32 %v7119_v7, %v1038_v19 }
 0x342   :  { %v7220_v57 = vsel %vm1975_vm7, %v6583_v21, 128  ;;  %v7233_v51 = vand.u32 4294901760, %v2879_v1 }
 0x343   :  { %10249 = vst [vmem:[#allocation85_spill] sm:$0xff] %v7220_v57  ;;  %v2254_v48 = vshra.s32 %v7220_v57, 16  ;;  %v10258_v57 = vld [vmem:[#allocation39_spill] sm:$0xff]  ;;  %v1584_v29 = vadd.f32 %v7124_v28, %v1331_v12 }
 0x344   :  { %2908 = vmatpush.msrb.mxu2 %v7233_v51  ;;  %v7245_v63 = vsub.f32 %v2879_v1, %v7233_v51  ;;  %3903 = vmatpush.msra.mxu1 %v7233_v51  ;;  %10252 = vst [vmem:[#allocation88_spill] sm:$0xff] %v7270_v59  ;;  %v512_v58 = vadd.f32 %v6962_v15, %v10258_v57 }
 0x345   :  { %1921 = vmin.xlane.f32.xlu2 %v7217_v34  ;;  %v7231_v6 = vcvt.s32.f32 %v2254_v48  ;;  %v7247_v48 = vand.u32 4294901760, %v2878_v4  ;;  %v7351_v12 = vadd.f32 %v7130_v5, %v1584_v29 }
 0x346   :  { %3624 = vmatpush.msra.mxu0 %v7245_v63  ;;  %v10255_v36 = vand.u32 4294901760, %v7245_v63 }
 0x347   :  { %10250 = vst [vmem:[#allocation86_spill] sm:$0xff] %v7231_v6  ;;  %2257 = vmin.xlane.f32.xlu1 %v7231_v6  ;;  %v7262_v1 = vsub.f32 %v2878_v4, %v7247_v48  ;;  %2910 = vmatpush.msrb.mxu2 %v7247_v48  ;;  %v10254_v4 = vld [vmem:[#allocation38_spill] sm:$0xff] }
 0x348   :  { %v7250_v50 = vpop.xlane.xlu2 %1893  ;;  %3905 = vmatpush.msra.mxu1 %v7247_v48  ;;  %v793_v25 = vadd.f32 %v10254_v4, %v504_v40  ;;  %v3363_v3 = vsub.f32 %v7245_v63, %v10255_v36  ;;  %v2875_v4 = vld [vmem:[%s9865_s2 + $0x10] sm:$0xff]  ;;  %v7299_v36 = vpop.f32.mrf.mxu1 }
 0x349   :  { %10251 = vst [vmem:[#allocation87_spill] sm:$0xff] %v7250_v50  ;;  %vm1976_vm8 = vcmp.eq.f32.partialorder %v6807_v39, %v7250_v50  ;;  %v2876_v39 = vld [vmem:[%s9865_s2 + $0x18] sm:$0xff]  ;;  %v7280_v50 = vpop.f32.mrf.mxu0  ;;  %3627 = vmatpush.msra.mxu0 %v7262_v1  ;;  %2912 = vmatpush.msrb.mxu2 %v7265_v27  ;;  %v10257_v6 = vand.u32 4294901760, %v7262_v1  ;;  %v7306_v34 = vand.u32 4294901760, %v2875_v4 }
 0x34a   :  { %v7273_v49 = vsel %vm1976_vm8, %v6583_v21, 128  ;;  %v7293_v40 = vand.u32 4294901760, %v2876_v39  ;;  %3907 = vmatpush.msra.mxu1 %v7265_v27 }
 0x34b   :  { %10253 = vst [vmem:[#allocation89_spill] sm:$0xff] %v7273_v49  ;;  %v2268_v53 = vshra.s32 %v7273_v49, 16  ;;  %v3364_v49 = vand.u32 4294901760, %v3363_v3  ;;  %3630 = vmatpush.msra.mxu0 %v7291_v13  ;;  %v1043_v3 = vadd.f32 %v7142_v22, %v793_v25  ;;  %v7323_v19 = vsub.f32 %v2875_v4, %v7306_v34 }
 0x34c   :  { %v7311_v52 = vsub.f32 %v2876_v39, %v7293_v40  ;;  %3909 = vmatpush.msra.mxu1 %v7293_v40  ;;  %v10260_v22 = vand.u32 4294901760, %v7291_v13  ;;  %2914 = vmatpush.msrb.mxu2 %v7293_v40 }
 0x34d   :  { %1923 = vmin.xlane.f32.xlu2 %v7270_v59  ;;  %v7301_v55 = vcvt.s32.f32 %v2268_v53  ;;  %v3369_v59 = vsub.f32 %v7262_v1, %v10257_v6  ;;  %v2874_v53 = vld [vmem:[%s9865_s2 + $0x8] sm:$0xff]  ;;  %v7319_v6 = vpop.f32.mrf.mxu2  ;;  %3365 = vmatpush.msrb.mxu3 %v3364_v49  ;;  %v2873_v49 = vld [vmem:[%s9865_s2] sm:$0xff]  ;;  %v9953_v28 = vand.u32 4294901760, %v7323_v19 }
 0x34e   :  { %v7325_v39 = vand.u32 4294901760, %v2874_v53  ;;  %v3375_v25 = vsub.f32 %v7291_v13, %v10260_v22  ;;  %3633 = vmatpush.msra.mxu0 %v7311_v52  ;;  %3911 = vmatpush.msra.mxu1 %v7306_v34  ;;  %v7347_v4 = vand.u32 4294901760, %v2873_v49  ;;  %v10264_v23 = vand.u32 4294901760, %v7311_v52 }
 0x34f   :  { %10256 = vst [vmem:[#allocation38_spill] sm:$0xff] %v7301_v55  ;;  %2271 = vmin.xlane.f32.xlu1 %v7301_v55  ;;  %v3370_v7 = vand.u32 4294901760, %v3369_v59  ;;  %v10261_v59 = vld [vmem:[#allocation14_spill] sm:$0xff]  ;;  %v3387_v5 = vsub.f32 %v7323_v19, %v9953_v28  ;;  %2916 = vmatpush.msrb.mxu2 %v7306_v34 }
 0x350   :  { %v7330_v8 = vpop.xlane.xlu2 %1895  ;;  %v7345_v57 = vsub.f32 %v2874_v53, %v7325_v39  ;;  %10262 = vst [vmem:[#allocation14_spill] sm:$0xff] %v7351_v12  ;;  %v3376_v55 = vand.u32 4294901760, %v3375_v25  ;;  %3636 = vmatpush.msra.mxu0 %v7323_v19  ;;  %3913 = vmatpush.msra.mxu1 %v7325_v39  ;;  %v7361_v53 = vpop.f32.mrf.mxu3  ;;  %v7371_v25 = vsub.f32 %v2873_v49, %v7347_v4 }
 0x351   :  { %10259 = vst [vmem:[#allocation39_spill] sm:$0xff] %v7330_v8  ;;  %vm1977_vm9 = vcmp.eq.f32.partialorder %v10261_v59, %v7330_v8  ;;  %3371 = vmatpush.msrb.mxu3 %v3370_v7  ;;  %v3381_v7 = vsub.f32 %v7311_v52, %v10264_v23  ;;  %v10265_v8 = vld [vmem:[#allocation40_spill] sm:$0xff]  ;;  %v7374_v14 = vpop.f32.mrf.mxu0  ;;  %v3388_v16 = vand.u32 4294901760, %v3387_v5  ;;  %2918 = vmatpush.msrb.mxu2 %v7325_v39 }
 0x352   :  { %v7354_v22 = vsel %vm1977_vm9, %v6583_v21, 128  ;;  %v9954_v29 = vand.u32 4294901760, %v7345_v57  ;;  %v797_v61 = vadd.f32 %v10265_v8, %v512_v58  ;;  %3639 = vmatpush.msra.mxu0 %v7345_v57  ;;  %3915 = vmatpush.msra.mxu1 %v7347_v4  ;;  %v9955_v49 = vand.u32 4294901760, %v7371_v25  ;;  %v7386_v8 = vpop.f32.mrf.mxu1 }
 0x353   :  { %10263 = vst [vmem:[#allocation90_spill] sm:$0xff] %v7354_v22  ;;  %v2282_v59 = vshra.s32 %v7354_v22, 16  ;;  %3377 = vmatpush.msrb.mxu3 %v3376_v55  ;;  %v3382_v23 = vand.u32 4294901760, %v3381_v7  ;;  %v1337_v55 = vadd.f32 %v7161_v26, %v1043_v3  ;;  %2920 = vmatpush.msrb.mxu2 %v7347_v4 }
 0x354   :  { %v3393_v28 = vsub.f32 %v7345_v57, %v9954_v29  ;;  %3642 = vmatpush.msra.mxu0 %v7371_v25  ;;  %v3399_v26 = vsub.f32 %v7371_v25, %v9955_v49  ;;  %v1048_v3 = vadd.f32 %v7195_v38, %v797_v61  ;;  %v10273_v38 = vld [vmem:[#allocation5_spill] sm:$0xff] }
 0x355   :  { %1925 = vmin.xlane.f32.xlu2 %v7351_v12  ;;  %v7376_v22 = vcvt.s32.f32 %v2282_v59  ;;  %3383 = vmatpush.msrb.mxu3 %v3382_v23  ;;  %v1588_v7 = vadd.f32 %v7171_v43, %v1337_v55  ;;  %v7398_v5 = vpop.f32.mrf.mxu2  ;;  %v10268_v23 = vld [vmem:[#allocation16_spill] sm:$0xff]  ;;  %v10271_v43 = vld [vmem:[#allocation41_spill] sm:$0xff]  ;;  %v10274_v12 = vand.u32 4294901760, %v10273_v38 }
 0x356   :  { %v3394_v58 = vand.u32 4294901760, %v3393_v28  ;;  %v10269_v28 = vld [vmem:[#allocation70_spill] sm:$0xff]  ;;  %v520_v55 = vadd.f32 %v6962_v15, %v10271_v43 }
 0x357   :  { %10266 = vst [vmem:[#allocation40_spill] sm:$0xff] %v7376_v22  ;;  %2285 = vmin.xlane.f32.xlu1 %v7376_v22  ;;  %3389 = vmatpush.msrb.mxu3 %v3388_v16  ;;  %v10270_v29 = vand.u32 4294901760, %v10269_v28  ;;  %v7407_v16 = vadd.f32 %v7180_v41, %v1588_v7  ;;  %v3400_v22 = vand.u32 4294901760, %v3399_v26  ;;  %v10275_v28 = vld [vmem:[#allocation69_spill] sm:$0xff]  ;;  %v10276_v41 = vld [vmem:[#allocation19_spill] sm:$0xff]  ;;  %v10278_v26 = vld [vmem:[#allocation42_spill] sm:$0xff] }
 0x358   :  { %v7391_v59 = vpop.xlane.xlu2 %1897  ;;  %v10277_v7 = vand.u32 4294901760, %v10276_v41  ;;  %v801_v43 = vadd.f32 %v10278_v26, %v520_v55  ;;  %v10283_v41 = vld [vmem:[#allocation18_spill] sm:$0xff] }
 0x359   :  { %10267 = vst [vmem:[#allocation91_spill] sm:$0xff] %v7391_v59  ;;  %vm1978_vm10 = vcmp.eq.f32.partialorder %v10268_v23, %v7391_v59  ;;  %4208 = vmatpush.msra.mxu2 %v10270_v29  ;;  %3395 = vmatpush.msrb.mxu3 %v3394_v58  ;;  %v7416_v29 = vpop.f32.mrf.mxu3  ;;  %v1343_v58 = vadd.f32 %v7203_v54, %v1048_v3  ;;  %v7425_v59 = vpop.f32.mrf.mxu0  ;;  %v10284_v54 = vld [vmem:[#allocation7_spill] sm:$0xff] }
 0x35a   :  { %10272 = vst [vmem:[#allocation16_spill] sm:$0xff] %v7407_v16  ;;  %v7410_v49 = vsel %vm1978_vm10, %v6583_v21, 128  ;;  %v10285_v3 = vld [vmem:[#allocation43_spill] sm:$0xff] }
 0x35b   :  { %v2296_v61 = vshra.s32 %v7410_v49, 16  ;;  %4212 = vmatpush.msra.mxu2 %v10274_v12  ;;  %3401 = vmatpush.msrb.mxu3 %v3400_v22  ;;  %v10279_v12 = vld [vmem:[#allocation13_spill] sm:$0xff]  ;;  %v1592_v22 = vadd.f32 %v7209_v44, %v1343_v58  ;;  %v528_v55 = vadd.f32 %v6962_v15, %v10285_v3 }
 0x35c   :  { %v10286_v58 = vld [vmem:[#allocation25_spill] sm:$0xff] }
 0x35d   :  { %1927 = vmin.xlane.f32.xlu2 %v7407_v16  ;;  %v7418_v23 = vcvt.s32.f32 %v2296_v61  ;;  %4463 = vmatpush.msra.mxu3 %v10275_v28  ;;  %v10281_v61 = vld [vmem:[#allocation23_spill] sm:$0xff]  ;;  %v7434_v28 = vpop.f32.mrf.mxu1  ;;  %v7443_v26 = vadd.f32 %v7222_v30, %v1592_v22  ;;  %v10290_v30 = vld [vmem:[#allocation12_spill] sm:$0xff] }
 0x35e   :  { %4216 = vmatpush.msra.mxu2 %v10277_v7  ;;  %v10282_v16 = vand.u32 4294901760, %v10281_v61  ;;  %v1053_v7 = vadd.f32 %v7229_v33, %v801_v43  ;;  %v10291_v22 = vld [vmem:[#allocation44_spill] sm:$0xff] }
 0x35f   :  { %2299 = vmin.xlane.f32.xlu1 %v7418_v23  ;;  %4465 = vmatpush.msra.mxu3 %v10279_v12  ;;  %v7450_v12 = vpop.f32.mrf.mxu2  ;;  %v805_v3 = vadd.f32 %v10291_v22, %v528_v55 }
 0x360   :  { %v7430_v38 = vpop.xlane.xlu2 %1899  ;;  %4220 = vmatpush.msra.mxu2 %v10282_v16  ;;  %v10287_v16 = vand.u32 4294901760, %v10286_v58  ;;  %v1349_v43 = vadd.f32 %v7256_v32, %v1053_v7  ;;  %v10292_v58 = vand.u32 4294901760, %v6940_v60  ;;  %v10296_v32 = vld [vmem:[#allocation22_spill] sm:$0xff]  ;;  %v10297_v60 = vld [vmem:[#allocation45_spill] sm:$0xff] }
 0x361   :  { %10280 = vst [vmem:[#allocation70_spill] sm:$0xff] %v7430_v38  ;;  %vm1979_vm11 = vcmp.eq.f32.partialorder %v10283_v41, %v7430_v38  ;;  %4467 = vmatpush.msra.mxu3 %v10284_v54  ;;  %v10288_v41 = vld [vmem:[#allocation10_spill] sm:$0xff]  ;;  %v10289_v54 = vand.u32 4294901760, %v6875_v2  ;;  %v536_v55 = vadd.f32 %v6962_v15, %v10297_v60  ;;  %v1058_v7 = vadd.f32 %v7319_v6, %v805_v3  ;;  %v10305_v60 = vld [vmem:[#allocation24_spill] sm:$0xff] }
 0x362   :  { %v7446_v44 = vsel %vm1979_vm11, %v6583_v21, 128  ;;  %4224 = vmatpush.msra.mxu2 %v10287_v16  ;;  %v7464_v16 = vpop.f32.mrf.mxu3  ;;  %v1596_v2 = vadd.f32 %v7280_v50, %v1349_v43  ;;  %v10300_v3 = vld [vmem:[#allocation46_spill] sm:$0xff] }
 0x363   :  { %v2310_v61 = vshra.s32 %v7446_v44, 16  ;;  %4469 = vmatpush.msra.mxu3 %v10288_v41  ;;  %v10293_v41 = vld [vmem:[#allocation20_spill] sm:$0xff] }
 0x364   :  { %4228 = vmatpush.msra.mxu2 %v10289_v54  ;;  %v7482_v22 = vadd.f32 %v7299_v36, %v1596_v2  ;;  %v10301_v2 = vand.u32 4294901760, %v7262_v1 }
 0x365   :  { %1929 = vmin.xlane.f32.xlu2 %v7443_v26  ;;  %v7457_v33 = vcvt.s32.f32 %v2310_v61  ;;  %4471 = vmatpush.msra.mxu3 %v10290_v30  ;;  %v10295_v61 = vand.u32 4294901760, %v7058_v31  ;;  %v7473_v30 = vpop.f32.mrf.mxu0  ;;  %v10298_v31 = vand.u32 4294901760, %v7168_v17  ;;  %v7489_v43 = vpop.f32.mrf.mxu1  ;;  %v1355_v17 = vadd.f32 %v7361_v53, %v1058_v7 }
 0x366   :  { %4232 = vmatpush.msra.mxu2 %v10292_v58  ;;  %v10307_v7 = vand.u32 4294901760, %v7311_v52 }
 0x367   :  { %2313 = vmin.xlane.f32.xlu1 %v7457_v33  ;;  %4473 = vmatpush.msra.mxu3 %v10293_v41  ;;  %v7496_v6 = vpop.f32.mrf.mxu2  ;;  %v809_v41 = vadd.f32 %v10300_v3, %v536_v55 }
 0x368   :  { %v7469_v54 = vpop.xlane.xlu2 %1901  ;;  %4236 = vmatpush.msra.mxu2 %v10295_v61  ;;  %v10303_v61 = vand.u32 4294901760, %v7291_v13 }
 0x369   :  { %10294 = vst [vmem:[#allocation41_spill] sm:$0xff] %v7469_v54  ;;  %vm1980_vm12 = vcmp.eq.f32.partialorder %v10296_v32, %v7469_v54  ;;  %4475 = vmatpush.msra.mxu3 %v6933_v11  ;;  %v10299_v11 = vand.u32 4294901760, %v7245_v63  ;;  %v10304_v32 = vld [vmem:[#allocation47_spill] sm:$0xff]  ;;  %v1063_v1 = vadd.f32 %v7398_v5, %v809_v41  ;;  %v10309_v5 = vld [vmem:[#allocation48_spill] sm:$0xff] }
 0x36a   :  { %v7485_v50 = vsel %vm1980_vm12, %v6583_v21, 128  ;;  %4240 = vmatpush.msra.mxu2 %v10298_v31  ;;  %v7514_v53 = vpop.f32.mrf.mxu3 }
 0x36b   :  { %v2324_v58 = vshra.s32 %v7485_v50, 16  ;;  %4477 = vmatpush.msra.mxu3 %v7050_v56  ;;  %v1600_v56 = vadd.f32 %v7374_v14, %v1355_v17  ;;  %v1361_v52 = vadd.f32 %v7416_v29, %v1063_v1  ;;  %v10314_v29 = vand.u32 4294901760, %v7371_v25  ;;  %v10316_v1 = vld [vmem:[#allocation28_spill] sm:$0xff] }
 0x36c   :  { %4244 = vmatpush.msra.mxu2 %v10299_v11 }
 0x36d   :  { %1931 = vmin.xlane.f32.xlu2 %v7482_v22  ;;  %v7498_v36 = vcvt.s32.f32 %v2324_v58  ;;  %4479 = vmatpush.msra.mxu3 %v7158_v37  ;;  %v544_v37 = vadd.f32 %v6962_v15, %v10304_v32  ;;  %v7522_v14 = vadd.f32 %v7386_v8, %v1600_v56  ;;  %v7529_v31 = vpop.f32.mrf.mxu0  ;;  %v7537_v11 = vpop.f32.mrf.mxu1  ;;  %v10311_v56 = vld [vmem:[#allocation49_spill] sm:$0xff]  ;;  %v1604_v32 = vadd.f32 %v7425_v59, %v1361_v52  ;;  %v10318_v52 = vld [vmem:[#allocation72_spill] sm:$0xff] }
 0x36e   :  { %4248 = vmatpush.msra.mxu2 %v10301_v2 }
 0x36f   :  { %2327 = vmin.xlane.f32.xlu1 %v7498_v36  ;;  %4481 = vmatpush.msra.mxu3 %v7233_v51  ;;  %v10306_v51 = vld [vmem:[#allocation26_spill] sm:$0xff]  ;;  %v813_v8 = vadd.f32 %v10309_v5, %v544_v37  ;;  %v7569_v59 = vadd.f32 %v7434_v28, %v1604_v32 }
 0x370   :  { %v7508_v63 = vpop.xlane.xlu2 %1903  ;;  %4252 = vmatpush.msra.mxu2 %v10303_v61  ;;  %v2068_v55 = vcvt.f32.s32 %v10306_v51  ;;  %v7547_v61 = vpop.f32.mrf.mxu2  ;;  %v2082_v51 = vcvt.f32.s32 %v10316_v1 }
 0x371   :  { %10302 = vst [vmem:[#allocation5_spill] sm:$0xff] %v7508_v63  ;;  %vm1981_vm13 = vcmp.eq.f32.partialorder %v10305_v60, %v7508_v63  ;;  %4483 = vmatpush.msra.mxu3 %v7247_v48  ;;  %v10308_v48 = vand.u32 4294901760, %v7323_v19  ;;  %v552_v19 = vadd.f32 %v6962_v15, %v10311_v56  ;;  %v10315_v60 = vld [vmem:[#allocation27_spill] sm:$0xff] }
 0x372   :  { %v7525_v13 = vsel %vm1981_vm13, %v6583_v21, 128  ;;  %4256 = vmatpush.msra.mxu2 %v10307_v7  ;;  %v2069_v41 = vshll.u32 %v2068_v55, 16  ;;  %v7571_v25 = vpop.f32.mrf.mxu3  ;;  %v9960_v55 = vmov 0.0  }
 0x373   :  { %v2338_v58 = vshra.s32 %v7525_v13, 16  ;;  %4485 = vmatpush.msra.mxu3 %v7265_v27  ;;  %v10310_v27 = vand.u32 4294901760, %v7345_v57  ;;  %v1068_v57 = vadd.f32 %v7450_v12, %v813_v8 }
 0x374   :  { %4260 = vmatpush.msra.mxu2 %v10308_v48 }
 0x375   :  { %1933 = vmin.xlane.f32.xlu2 %v7522_v14  ;;  %v7539_v3 = vcvt.s32.f32 %v2338_v58  ;;  %4487 = vmatpush.msra.mxu3 %v7293_v40  ;;  %v10317_v58 = vld [vmem:[#allocation50_spill] sm:$0xff]  ;;  %v7585_v5 = vpop.f32.mrf.mxu0 }
 0x376   :  { %v2066_v17 = vpop.xlane.xlu0 %2065  ;;  %4264 = vmatpush.msra.mxu2 %v10310_v27  ;;  %v817_v48 = vadd.f32 %v10317_v58, %v552_v19  ;;  %v2083_v27 = vshll.u32 %v2082_v51, 16  ;;  %v10321_v58 = vld [vmem:[#allocation51_spill] sm:$0xff]  ;;  %v2096_v51 = vcvt.f32.s32 %v6987_v46 }
 0x377   :  { %v2067_v2 = vcvt.f32.s32 %v2066_v17  ;;  %2341 = vmin.xlane.f32.xlu1 %v7539_v3  ;;  %4489 = vmatpush.msra.mxu3 %v7306_v34 }
 0x378   :  { %v7554_v40 = vpop.xlane.xlu2 %1905  ;;  %4268 = vmatpush.msra.mxu2 %v10314_v29  ;;  %v7591_v29 = vpop.f32.mrf.mxu1  ;;  %v1073_v19 = vadd.f32 %v7496_v6, %v817_v48 }
 0x379   :  { %v7552_v37 = vadd.s32 %v2069_v41, %v2067_v2  ;;  %10313 = vst [vmem:[#allocation19_spill] sm:$0xff] %v7554_v40  ;;  %vm1982_vm14 = vcmp.eq.f32.partialorder %v10315_v60, %v7554_v40  ;;  %4491 = vmatpush.msra.mxu3 %v7325_v39  ;;  %v9962_v39 = vmov 1.0   ;;  %v2155_v41 = vand.u32 65535, %v10318_v52  ;;  %v10322_v52 = vld [vmem:[#allocation52_spill] sm:$0xff] }
 0x37a   :  { %v7564_v34 = vsel %vm1982_vm14, %v6583_v21, 128  ;;  %v1367_v2 = vadd.f32 %v7464_v16, %v1068_v57  ;;  %v560_v16 = vadd.f32 %v6962_v15, %v10321_v58  ;;  %v7602_v57 = vpop.f32.mrf.mxu2 }
 0x37b   :  { %10312 = vst [vmem:[#allocation69_spill] sm:$0xff] %v7552_v37  ;;  %vm2729_vm15 = vcmp.eq.s32.totalorder %v6583_v21, %v7552_v37  ;;  %v2352_v7 = vshra.s32 %v7564_v34, 16  ;;  %4493 = vmatpush.msra.mxu3 %v7347_v4 }
 0x37c   :  { %v5546_v12 = vsel %vm2729_vm15, 1.0, %v9960_v55  ;;  %5594 = vmatmul.msk.f32.vlgmr.msrb.gmra.mxu3 %vm2729_vm15, %v9962_v39  ;;  %v1608_v4 = vadd.f32 %v7473_v30, %v1367_v2  ;;  %v7630_v2 = vpop.f32.mrf.mxu3 }
 0x37d   :  { %v2922_v28 = vsub.f32 %v5546_v12, %v5546_v12  ;;  %1935 = vmin.xlane.f32.xlu2 %v7569_v59  ;;  %v7587_v17 = vcvt.s32.f32 %v2352_v7 }
 0x37e   :  { %v2080_v8 = vpop.xlane.xlu0 %2079  ;;  %v7615_v48 = vadd.f32 %v7489_v43, %v1608_v4  ;;  %v1373_v4 = vadd.f32 %v7514_v53, %v1073_v19 }
 0x37f   :  { %v2081_v56 = vcvt.f32.s32 %v2080_v8  ;;  %3645 = vmatmul.f32.vlgmr.msra.gmra.mxu0 %v2922_v28  ;;  %v2923_v32 = vand.u32 4294901760, %v2922_v28  ;;  %2355 = vmin.xlane.f32.xlu1 %v7587_v17  ;;  %v2157_v8 = vcvt.s32.f32 %v2155_v41  ;;  %v821_v41 = vadd.f32 %v10322_v52, %v560_v16 }
 0x380   :  { %v7598_v1 = vpop.xlane.xlu2 %1907  ;;  %v1612_v52 = vadd.f32 %v7529_v31, %v1373_v4  ;;  %v7647_v19 = vpop.f32.mrf.mxu1 }
 0x381   :  { %v7596_v60 = vadd.s32 %v2083_v27, %v2081_v56  ;;  %10320 = vst [vmem:[#allocation13_spill] sm:$0xff] %v7598_v1  ;;  %3919 = vmatmul.f32.vlgmr.msra.gmra.mxu1 %v2923_v32  ;;  %v2924_v7 = vsub.f32 %v2922_v28, %v2923_v32  ;;  %vm1983_vm1 = vcmp.eq.f32.partialorder %v6968_v45, %v7598_v1 }
 0x382   :  { %v7608_v6 = vsel %vm1983_vm1, %v6583_v21, 128  ;;  %v7610_v30 = vpop.xlane.xlu1 %2159  ;;  %v1078_v53 = vadd.f32 %v7547_v61, %v821_v41  ;;  %v7661_v61 = vpop.f32.mrf.mxu2  ;;  %v2110_v41 = vcvt.f32.s32 %v7025_v42  ;;  %v10328_v42 = vld [vmem:[#allocation54_spill] sm:$0xff] }
 0x383   :  { %10319 = vst [vmem:[#allocation42_spill] sm:$0xff] %v7596_v60  ;;  %vm2730_vm2 = vcmp.eq.s32.totalorder %v6583_v21, %v7596_v60  ;;  %v2925_v28 = vand.u32 4294901760, %v2924_v7  ;;  %vm2161_vm3 = vcmp.eq.f32.partialorder %v6981_v47, %v7610_v30  ;;  %v2366_v45 = vshra.s32 %v7608_v6, 16 }
 0x384   :  { %5595 = vmatmul.msk.f32.gmra.mxu3 %vm2730_vm2, %v9962_v39  ;;  %v2162_v46 = vsel %vm2161_vm3, %v2157_v8, inf  ;;  %v5547_v43 = vsel %vm2730_vm2, 1.0, %v9960_v55  ;;  %v2097_v7 = vshll.u32 %v2096_v51, 16  ;;  %v2169_v8 = vand.u32 65535, %v7006_v0  ;;  %v10325_v55 = vld [vmem:[#allocation53_spill] sm:$0xff]  ;;  %v10326_v0 = vld [vmem:[#allocation30_spill] sm:$0xff] }
 0x385   :  { %1937 = vmin.xlane.f32.xlu2 %v7615_v48  ;;  %2926 = vmatmul.f32.vlgmr.msrb.gmra.mxu2 %v2925_v28  ;;  %v7632_v56 = vcvt.s32.f32 %v2366_v45  ;;  %v2930_v47 = vsub.f32 %v5547_v43, %v5547_v43  ;;  %v5026_v32 = vadd.f32 %v5547_v43, %v5546_v12  ;;  %v7636_v28 = vpop.f32.mrf.mxu0  ;;  %v568_v12 = vadd.f32 %v6962_v15, %v10325_v55 }
 0x386   :  { %2163 = vmin.xlane.f32.xlu0 %v2162_v46  ;;  %v2094_v27 = vpop.xlane.xlu0 %2093  ;;  %v2171_v55 = vcvt.s32.f32 %v2169_v8 }
 0x387   :  { %v2095_v58 = vcvt.f32.s32 %v2094_v27  ;;  %2369 = vmin.xlane.f32.xlu1 %v7632_v56  ;;  %3650 = vmatmul.f32.gmra.mxu0 %v2930_v47  ;;  %v2931_v16 = vand.u32 4294901760, %v2930_v47  ;;  %v7659_v27 = vadd.f32 %v7537_v11, %v1612_v52  ;;  %v825_v8 = vadd.f32 %v10328_v42, %v568_v12 }
 0x388   :  { %v7642_v45 = vpop.xlane.xlu2 %1909 }
 0x389   :  { %v7640_v46 = vadd.s32 %v2097_v7, %v2095_v58  ;;  %10324 = vst [vmem:[#allocation18_spill] sm:$0xff] %v7642_v45  ;;  %vm1984_vm4 = vcmp.eq.f32.partialorder %v10326_v0, %v7642_v45  ;;  %3925 = vmatmul.f32.gmra.mxu1 %v2931_v16  ;;  %v2932_v51 = vsub.f32 %v2930_v47, %v2931_v16  ;;  %v10327_v7 = vmov 0.0   ;;  %v7681_v45 = vpop.f32.mrf.mxu3 }
 0x38a   :  { %v7652_v43 = vsel %vm1984_vm4, %v6583_v21, 128  ;;  %v7654_v31 = vpop.xlane.xlu1 %2173 }
 0x38b   :  { %10323 = vst [vmem:[#allocation23_spill] sm:$0xff] %v7640_v46  ;;  %vm2731_vm5 = vcmp.eq.s32.totalorder %v6583_v21, %v7640_v46  ;;  %vm2175_vm6 = vcmp.eq.f32.partialorder %v7013_v10, %v7654_v31  ;;  %v2933_v47 = vand.u32 4294901760, %v2932_v51  ;;  %v2380_v4 = vshra.s32 %v7652_v43, 16 }
 0x38c   :  { %5596 = vmatmul.msk.f32.gmra.mxu3 %vm2731_vm5, %v9962_v39  ;;  %v2176_v11 = vsel %vm2175_vm6, %v2171_v55, inf  ;;  %v5548_v58 = vsel %vm2731_vm5, 1.0, %v10327_v7  ;;  %v1379_v10 = vadd.f32 %v7571_v25, %v1078_v53  ;;  %v2183_v39 = vand.u32 65535, %v7034_v62  ;;  %v10331_v62 = vld [vmem:[#allocation32_spill] sm:$0xff] }
 0x38d   :  { %1939 = vmin.xlane.f32.xlu2 %v7659_v27  ;;  %2934 = vmatmul.f32.gmra.mxu2 %v2933_v47  ;;  %v7677_v16 = vcvt.s32.f32 %v2380_v4  ;;  %v2938_v52 = vsub.f32 %v5548_v58, %v5548_v58  ;;  %v5027_v0 = vadd.f32 %v5548_v58, %v5026_v32  ;;  %v2111_v55 = vshll.u32 %v2110_v41, 16  ;;  %v7688_v32 = vpop.f32.mrf.mxu0  ;;  %v10332_v41 = vld [vmem:[#allocation55_spill] sm:$0xff] }
 0x38e   :  { %2177 = vmin.xlane.f32.xlu0 %v2176_v11  ;;  %v2108_v51 = vpop.xlane.xlu0 %2107  ;;  %v1616_v12 = vadd.f32 %v7585_v5, %v1379_v10  ;;  %v1083_v4 = vadd.f32 %v7602_v57, %v825_v8  ;;  %v576_v11 = vadd.f32 %v6962_v15, %v10332_v41  ;;  %v2185_v57 = vcvt.s32.f32 %v2183_v39  ;;  %v7705_v8 = vpop.f32.mrf.mxu1 }
 0x38f   :  { %v2109_v1 = vcvt.f32.s32 %v2108_v51  ;;  %2383 = vmin.xlane.f32.xlu1 %v7677_v16  ;;  %3655 = vmatmul.f32.gmra.mxu0 %v2938_v52  ;;  %v2939_v63 = vand.u32 4294901760, %v2938_v52  ;;  %v1092_v10 = vpop.f32.mrf.mxu2 }
 0x390   :  { %v7685_v47 = vpop.xlane.xlu2 %1911  ;;  %v7702_v42 = vadd.f32 %v7591_v29, %v1616_v12  ;;  %v1385_v12 = vadd.f32 %v7630_v2, %v1083_v4  ;;  %v7733_v2 = vld [vmem:[%s9866_s3] ss:$0 sm:$0xff] }
 0x391   :  { %10329 = vst [vmem:[#allocation7_spill] sm:$0xff] %v7685_v47  ;;  %v7690_v25 = vadd.s32 %v2111_v55, %v2109_v1  ;;  %vm1985_vm7 = vcmp.eq.f32.partialorder %v10331_v62, %v7685_v47  ;;  %3931 = vmatmul.f32.gmra.mxu1 %v2939_v63  ;;  %v2940_v53 = vsub.f32 %v2938_v52, %v2939_v63  ;;  %v2124_v1 = vcvt.f32.s32 %v7062_v18  ;;  %v10333_v63 = vld [vmem:[#allocation73_spill] sm:$0xff]  ;;  %v10335_v62 = vld [vmem:[#allocation56_spill] sm:$0xff] }
 0x392   :  { %v7697_v58 = vsel %vm1985_vm7, %v6583_v21, 128  ;;  %v7699_v5 = vpop.xlane.xlu1 %2187  ;;  %v10334_v52 = vmov 1.0  }
 0x393   :  { %10330 = vst [vmem:[#allocation43_spill] sm:$0xff] %v7690_v25  ;;  %vm2732_vm8 = vcmp.eq.s32.totalorder %v6583_v21, %v7690_v25  ;;  %vm2189_vm9 = vcmp.eq.f32.partialorder %v10333_v63, %v7699_v5  ;;  %v2941_v15 = vand.u32 4294901760, %v2940_v53  ;;  %v2394_v39 = vshra.s32 %v7697_v58, 16 }
 0x394   :  { %5597 = vmatmul.msk.f32.gmra.mxu3 %vm2732_vm8, %v10334_v52  ;;  %v2190_v29 = vsel %vm2189_vm9, %v2185_v57, inf  ;;  %v5549_v18 = vsel %vm2732_vm8, 1.0, %v10327_v7  ;;  %v829_v53 = vadd.f32 %v10335_v62, %v576_v11  ;;  %v10336_v57 = vld [vmem:[#allocation74_spill] sm:$0xff]  ;;  %v2125_v40 = vshll.u32 %v2124_v1, 16  ;;  %v7737_v11 = vpop.f32.mrf.mxu3 }
 0x395   :  { %1941 = vmin.xlane.f32.xlu2 %v7702_v42  ;;  %2942 = vmatmul.f32.gmra.mxu2 %v2941_v15  ;;  %v2946_v51 = vsub.f32 %v5549_v18, %v5549_v18  ;;  %v5028_v55 = vadd.f32 %v5549_v18, %v5027_v0  ;;  %v7723_v63 = vcvt.s32.f32 %v2394_v39  ;;  %v2197_v47 = vand.u32 65535, %v10336_v57  ;;  %v10338_v0 = vld [vmem:[#allocation57_spill] sm:$0xff] }
 0x396   :  { %2191 = vmin.xlane.f32.xlu0 %v2190_v29  ;;  %v2122_v41 = vpop.xlane.xlu0 %2121  ;;  %v1620_v25 = vadd.f32 %v7636_v28, %v1385_v12  ;;  %v584_v4 = vadd.f32 %v7733_v2, %v10338_v0  ;;  %v10340_v29 = vld [vmem:[#allocation34_spill] sm:$0xff]  ;;  %v1088_v39 = vadd.f32 %v7661_v61, %v829_v53  ;;  %v2138_v57 = vcvt.f32.s32 %v7101_v9 }
 0x397   :  { %v2123_v54 = vcvt.f32.s32 %v2122_v41  ;;  %3660 = vmatmul.f32.gmra.mxu0 %v2946_v51  ;;  %v2947_v38 = vand.u32 4294901760, %v2946_v51  ;;  %2397 = vmin.xlane.f32.xlu1 %v7723_v63  ;;  %v2199_v41 = vcvt.s32.f32 %v2197_v47  ;;  %v10341_v61 = vld [vmem:[#allocation58_spill] sm:$0xff] }
 0x398   :  { %v7728_v15 = vpop.xlane.xlu2 %1913  ;;  %v7750_v62 = vadd.f32 %v7647_v19, %v1620_v25  ;;  %v833_v47 = vadd.f32 %v10341_v61, %v584_v4  ;;  %v7768_v25 = vpop.f32.mrf.mxu1  ;;  %v1391_v53 = vadd.f32 %v7681_v45, %v1088_v39 }
 0x399   :  { %10337 = vst [vmem:[#allocation25_spill] sm:$0xff] %v7728_v15  ;;  %v7739_v1 = vadd.s32 %v2125_v40, %v2123_v54  ;;  %vm1986_vm10 = vcmp.eq.f32.partialorder %v10340_v29, %v7728_v15  ;;  %3937 = vmatmul.f32.gmra.mxu1 %v2947_v38  ;;  %v2948_v28 = vsub.f32 %v2946_v51, %v2947_v38  ;;  %v1627_v54 = vpop.f32.mrf.mxu0  ;;  %v2139_v15 = vshll.u32 %v2138_v57, 16 }
 0x39a   :  { %v7745_v18 = vsel %vm1986_vm10, %v6583_v21, 128  ;;  %v7747_v12 = vpop.xlane.xlu1 %2201  ;;  %v1624_v4 = vadd.f32 %v7688_v32, %v1391_v53 }
 0x39b   :  { %10339 = vst [vmem:[#allocation10_spill] sm:$0xff] %v7739_v1  ;;  %vm2733_vm11 = vcmp.eq.s32.totalorder %v6583_v21, %v7739_v1  ;;  %vm2203_vm12 = vcmp.eq.f32.partialorder %v7094_v24, %v7747_v12  ;;  %v2949_v38 = vand.u32 4294901760, %v2948_v28  ;;  %v2408_v19 = vshra.s32 %v7745_v18, 16 }
 0x39c   :  { %5598 = vmatmul.msk.f32.gmra.mxu3 %vm2733_vm11, %v10334_v52  ;;  %v2204_v40 = vsel %vm2203_vm12, %v2199_v41, inf  ;;  %v5550_v9 = vsel %vm2733_vm11, 1.0, %v10327_v7  ;;  %v2211_v28 = vand.u32 65535, %v7117_v35  ;;  %v1097_v41 = vpop.f32.mrf.mxu2  ;;  %v10344_v35 = vld [vmem:[#allocation59_spill] sm:$0xff]  ;;  %v7790_v32 = vadd.f32 %v7705_v8, %v1624_v4  ;;  %v10348_v4 = vld [vmem:[#allocation60_spill] sm:$0xff] }
 0x39d   :  { %1943 = vmin.xlane.f32.xlu2 %v7750_v62  ;;  %2950 = vmatmul.f32.gmra.mxu2 %v2949_v38  ;;  %v2954_v24 = vsub.f32 %v5550_v9, %v5550_v9  ;;  %v5029_v51 = vadd.f32 %v5550_v9, %v5028_v55  ;;  %v7771_v29 = vcvt.s32.f32 %v2408_v19  ;;  %v1093_v38 = vadd.f32 %v1092_v10, %v833_v47  ;;  %v1402_v10 = vpop.f32.mrf.mxu3 }
 0x39e   :  { %2205 = vmin.xlane.f32.xlu0 %v2204_v40  ;;  %v2136_v0 = vpop.xlane.xlu0 %2135  ;;  %v592_v39 = vadd.f32 %v7733_v2, %v10344_v35  ;;  %10345 = vst [vmem:[#allocation20_spill] sm:$0xff] %v7790_v32  ;;  %v2213_v9 = vcvt.s32.f32 %v2211_v28 }
 0x39f   :  { %v2137_v46 = vcvt.f32.s32 %v2136_v0  ;;  %3665 = vmatmul.f32.gmra.mxu0 %v2954_v24  ;;  %v2955_v1 = vand.u32 4294901760, %v2954_v24  ;;  %2411 = vmin.xlane.f32.xlu1 %v7771_v29  ;;  %v1397_v28 = vadd.f32 %v7737_v11, %v1093_v38 }
 0x3a0   :  { %v7776_v40 = vpop.xlane.xlu2 %1915  ;;  %v1844_v60 = vpop.f32.mrf.mxu1 }
 0x3a1   :  { %10342 = vst [vmem:[#allocation12_spill] sm:$0xff] %v7776_v40  ;;  %v7778_v55 = vadd.s32 %v2139_v15, %v2137_v46  ;;  %vm1987_vm13 = vcmp.eq.f32.partialorder %v7114_v20, %v7776_v40  ;;  %3943 = vmatmul.f32.gmra.mxu1 %v2955_v1  ;;  %v2956_v45 = vsub.f32 %v2954_v24, %v2955_v1  ;;  %v10346_v46 = vld [vmem:[#allocation75_spill] sm:$0xff]  ;;  %v10347_v20 = vld [vmem:[#allocation36_spill] sm:$0xff]  ;;  %v1631_v24 = vpop.f32.mrf.mxu0 }
 0x3a2   :  { %v7785_v57 = vsel %vm1987_vm13, %v6583_v21, 128  ;;  %v7787_v19 = vpop.xlane.xlu1 %2215  ;;  %v2152_v15 = vcvt.f32.s32 %v10346_v46 }
 0x3a3   :  { %10343 = vst [vmem:[#allocation44_spill] sm:$0xff] %v7778_v55  ;;  %vm2734_vm14 = vcmp.eq.s32.totalorder %v6583_v21, %v7778_v55  ;;  %vm2217_vm1 = vcmp.eq.f32.partialorder %v10347_v20, %v7787_v19  ;;  %v2957_v1 = vand.u32 4294901760, %v2956_v45  ;;  %v2422_v61 = vshra.s32 %v7785_v57, 16 }
 0x3a4   :  { %5599 = vmatmul.msk.f32.gmra.mxu3 %vm2734_vm14, %v10334_v52  ;;  %v2218_v8 = vsel %vm2217_vm1, %v2213_v9, inf  ;;  %v5551_v47 = vsel %vm2734_vm14, 1.0, %v10327_v7  ;;  %v837_v45 = vadd.f32 %v10348_v4, %v592_v39  ;;  %v10349_v9 = vld [vmem:[#allocation77_spill] sm:$0xff]  ;;  %v2153_v40 = vshll.u32 %v2152_v15, 16  ;;  %v1102_v38 = vpop.f32.mrf.mxu2 }
 0x3a5   :  { %1945 = vmin.xlane.f32.xlu2 %v7790_v32  ;;  %2958 = vmatmul.f32.gmra.mxu2 %v2957_v1  ;;  %v2962_v53 = vsub.f32 %v5551_v47, %v5551_v47  ;;  %v5030_v0 = vadd.f32 %v5551_v47, %v5029_v51  ;;  %v7809_v46 = vcvt.s32.f32 %v2422_v61  ;;  %v2225_v20 = vand.u32 65535, %v10349_v9  ;;  %v10351_v51 = vld [vmem:[#allocation61_spill] sm:$0xff] }
 0x3a6   :  { %2219 = vmin.xlane.f32.xlu0 %v2218_v8  ;;  %v2150_v35 = vpop.xlane.xlu0 %2149  ;;  %v1628_v32 = vadd.f32 %v1627_v54, %v1397_v28  ;;  %v600_v11 = vadd.f32 %v7733_v2, %v10351_v51  ;;  %v10353_v8 = vld [vmem:[#allocation37_spill] sm:$0xff]  ;;  %v1098_v61 = vadd.f32 %v1097_v41, %v837_v45  ;;  %v1408_v45 = vpop.f32.mrf.mxu3 }
 0x3a7   :  { %v2151_v37 = vcvt.f32.s32 %v2150_v35  ;;  %3670 = vmatmul.f32.gmra.mxu0 %v2962_v53  ;;  %v2963_v55 = vand.u32 4294901760, %v2962_v53  ;;  %2425 = vmin.xlane.f32.xlu1 %v7809_v46  ;;  %v2227_v4 = vcvt.s32.f32 %v2225_v20 }
 0x3a8   :  { %v7813_v1 = vpop.xlane.xlu2 %1917  ;;  %v7827_v28 = vadd.f32 %v7768_v25, %v1628_v32  ;;  %v10355_v32 = vld [vmem:[#allocation62_spill] sm:$0xff]  ;;  %v1403_v20 = vadd.f32 %v1402_v10, %v1098_v61  ;;  %v10360_v10 = vld [vmem:[#allocation63_spill] sm:$0xff] }
 0x3a9   :  { %10350 = vst [vmem:[#allocation22_spill] sm:$0xff] %v7813_v1  ;;  %v7817_v39 = vadd.s32 %v2153_v40, %v2151_v37  ;;  %vm1988_vm3 = vcmp.eq.f32.partialorder %v10353_v8, %v7813_v1  ;;  %3949 = vmatmul.f32.gmra.mxu1 %v2963_v55  ;;  %v2964_v15 = vsub.f32 %v2962_v53, %v2963_v55  ;;  %v10354_v37 = vld [vmem:[#allocation78_spill] sm:$0xff]  ;;  %v10357_v8 = vld [vmem:[#allocation81_spill] sm:$0xff] }
 0x3aa   :  { %v7822_v47 = vsel %vm1988_vm3, %v6583_v21, 128  ;;  %v7824_v54 = vpop.xlane.xlu1 %2229  ;;  %v841_v53 = vadd.f32 %v10355_v32, %v600_v11  ;;  %v1632_v1 = vadd.f32 %v1631_v24, %v1403_v20  ;;  %v1848_v32 = vpop.f32.mrf.mxu1  ;;  %v608_v61 = vadd.f32 %v7733_v2, %v10360_v10  ;;  %v10364_v10 = vld [vmem:[#allocation64_spill] sm:$0xff] }
 0x3ab   :  { %10352 = vst [vmem:[#allocation45_spill] sm:$0xff] %v7817_v39  ;;  %vm2735_vm4 = vcmp.eq.s32.totalorder %v6583_v21, %v7817_v39  ;;  %vm2231_vm6 = vcmp.eq.f32.partialorder %v10354_v37, %v7824_v54  ;;  %v2965_v40 = vand.u32 4294901760, %v2964_v15  ;;  %v2436_v55 = vshra.s32 %v7822_v47, 16 }
 0x3ac   :  { %5600 = vmatmul.msk.f32.gmra.mxu3 %vm2735_vm4, %v10334_v52  ;;  %v2232_v41 = vsel %vm2231_vm6, %v2227_v4, inf  ;;  %v5552_v25 = vsel %vm2735_vm4, 1.0, %v10327_v7  ;;  %v2239_v15 = vand.u32 65535, %v10357_v8  ;;  %v1635_v4 = vpop.f32.mrf.mxu0  ;;  %v1103_v11 = vadd.f32 %v1102_v38, %v841_v53  ;;  %v1107_v20 = vpop.f32.mrf.mxu2  ;;  %v10363_v38 = vld [vmem:[#allocation82_spill] sm:$0xff] }
 0x3ad   :  { %1947 = vmin.xlane.f32.xlu2 %v7827_v28  ;;  %2966 = vmatmul.f32.gmra.mxu2 %v2965_v40  ;;  %v2970_v35 = vsub.f32 %v5552_v25, %v5552_v25  ;;  %v7844_v9 = vadd.f32 %v5552_v25, %v5030_v0  ;;  %v7846_v51 = vcvt.s32.f32 %v2436_v55  ;;  %v10359_v40 = vld [vmem:[#allocation80_spill] sm:$0xff]  ;;  %v7861_v24 = vadd.f32 %v1844_v60, %v1632_v1  ;;  %v10365_v60 = vld [vmem:[#allocation85_spill] sm:$0xff] }
 0x3ae   :  { %2233 = vmin.xlane.f32.xlu0 %v2232_v41  ;;  %v2241_v25 = vcvt.s32.f32 %v2239_v15  ;;  %v2253_v1 = vand.u32 65535, %v10365_v60  ;;  %v1414_v15 = vpop.f32.mrf.mxu3  ;;  %v10373_v60 = vld [vmem:[#allocation66_spill] sm:$0xff] }
 0x3af   :  { %10356 = vst [vmem:[#allocation46_spill] sm:$0xff] %v7846_v51  ;;  %3675 = vmatmul.f32.gmra.mxu0 %v2970_v35  ;;  %v2971_v37 = vand.u32 4294901760, %v2970_v35  ;;  %2439 = vmin.xlane.f32.xlu1 %v7846_v51 }
 0x3b0   :  { %v7850_v39 = vpop.xlane.xlu2 %1919  ;;  %10362 = vst [vmem:[#allocation26_spill] sm:$0xff] %v7861_v24 }
 0x3b1   :  { %10358 = vst [vmem:[#allocation47_spill] sm:$0xff] %v7850_v39  ;;  %vm1989_vm7 = vcmp.eq.f32.partialorder %v10359_v40, %v7850_v39  ;;  %3955 = vmatmul.f32.gmra.mxu1 %v2971_v37  ;;  %v2972_v0 = vsub.f32 %v2970_v35, %v2971_v37  ;;  %v1409_v40 = vadd.f32 %v1408_v45, %v1103_v11 }
 0x3b2   :  { %v7857_v41 = vsel %vm1989_vm7, %v6583_v21, 128  ;;  %v7859_v55 = vpop.xlane.xlu1 %2243  ;;  %v845_v39 = vadd.f32 %v10364_v10, %v608_v61 }
 0x3b3   :  { %10361 = vst [vmem:[#allocation24_spill] sm:$0xff] %v7857_v41  ;;  %vm2245_vm9 = vcmp.eq.f32.partialorder %v10363_v38, %v7859_v55  ;;  %v2973_v53 = vand.u32 4294901760, %v2972_v0  ;;  %v2450_v8 = vshra.s32 %v7857_v41, 16  ;;  %v1636_v51 = vadd.f32 %v1635_v4, %v1409_v40  ;;  %v10367_v0 = vld [vmem:[#allocation65_spill] sm:$0xff] }
 0x3b4   :  { %v2246_v35 = vsel %vm2245_vm9, %v2241_v25, inf  ;;  %v616_v41 = vadd.f32 %v7733_v2, %v10367_v0  ;;  %v10368_v25 = vld [vmem:[#allocation84_spill] sm:$0xff]  ;;  %v2255_v4 = vcvt.s32.f32 %v2253_v1 }
 0x3b5   :  { %1949 = vmin.xlane.f32.xlu2 %v7861_v24  ;;  %2974 = vmatmul.f32.gmra.mxu2 %v2973_v53  ;;  %v7867_v37 = vcvt.s32.f32 %v2450_v8  ;;  %v1639_v24 = vpop.f32.mrf.mxu0  ;;  %v1108_v53 = vadd.f32 %v1107_v20, %v845_v39  ;;  %v7883_v61 = vadd.f32 %v1848_v32, %v1636_v51  ;;  %v1852_v8 = vpop.f32.mrf.mxu1 }
 0x3b6   :  { %2247 = vmin.xlane.f32.xlu0 %v2246_v35  ;;  %v10372_v35 = vld [vmem:[#allocation86_spill] sm:$0xff]  ;;  %v849_v0 = vadd.f32 %v10373_v60, %v616_v41  ;;  %v1112_v39 = vpop.f32.mrf.mxu2 }
 0x3b7   :  { %2453 = vmin.xlane.f32.xlu1 %v7867_v37  ;;  %10371 = vst [vmem:[#allocation28_spill] sm:$0xff] %v7883_v61 }
 0x3b8   :  { %v7872_v38 = vpop.xlane.xlu2 %1921 }
 0x3b9   :  { %10366 = vst [vmem:[#allocation48_spill] sm:$0xff] %v7872_v38  ;;  %vm1990_vm10 = vcmp.eq.f32.partialorder %v10368_v25, %v7872_v38  ;;  %v1415_v25 = vadd.f32 %v1414_v15, %v1108_v53  ;;  %v10374_v38 = vld [vmem:[#allocation89_spill] sm:$0xff]  ;;  %v10379_v53 = vld [vmem:[#allocation38_spill] sm:$0xff] }
 0x3ba   :  { %v7879_v45 = vsel %vm1990_vm10, %v6583_v21, 128  ;;  %v7881_v11 = vpop.xlane.xlu1 %2257  ;;  %v2267_v51 = vand.u32 65535, %v10374_v38 }
 0x3bb   :  { %10369 = vst [vmem:[#allocation49_spill] sm:$0xff] %v7879_v45  ;;  %vm2259_vm12 = vcmp.eq.f32.partialorder %v10372_v35, %v7881_v11  ;;  %v2464_v40 = vshra.s32 %v7879_v45, 16  ;;  %v1640_v32 = vadd.f32 %v1639_v24, %v1415_v25  ;;  %v1113_v35 = vadd.f32 %v1112_v39, %v849_v0  ;;  %v10376_v45 = vld [vmem:[#allocation88_spill] sm:$0xff] }
 0x3bc   :  { %10370 = vst [vmem:[#allocation27_spill] sm:$0xff] %v7881_v11  ;;  %v2260_v10 = vsel %vm2259_vm12, %v2255_v4, inf  ;;  %v1420_v11 = vpop.f32.mrf.mxu3  ;;  %v10377_v4 = vld [vmem:[#allocation67_spill] sm:$0xff]  ;;  %v2269_v24 = vcvt.s32.f32 %v2267_v51  ;;  %v10380_v25 = vld [vmem:[#allocation68_spill] sm:$0xff] }
 0x3bd   :  { %1951 = vmin.xlane.f32.xlu2 %v7883_v61  ;;  %v7890_v20 = vcvt.s32.f32 %v2464_v40  ;;  %v624_v41 = vadd.f32 %v7733_v2, %v10377_v4  ;;  %v7905_v15 = vadd.f32 %v1852_v8, %v1640_v32  ;;  %v1643_v38 = vpop.f32.mrf.mxu0  ;;  %v1856_v0 = vpop.f32.mrf.mxu1  ;;  %v1421_v39 = vadd.f32 %v1420_v11, %v1113_v35 }
 0x3be   :  { %2261 = vmin.xlane.f32.xlu0 %v2260_v10  ;;  %v1117_v32 = vpop.f32.mrf.mxu2 }
 0x3bf   :  { %2467 = vmin.xlane.f32.xlu1 %v7890_v20  ;;  %10378 = vst [vmem:[#allocation72_spill] sm:$0xff] %v7905_v15  ;;  %v853_v4 = vadd.f32 %v10380_v25, %v624_v41  ;;  %v1644_v51 = vadd.f32 %v1643_v38, %v1421_v39 }
 0x3c0   :  { %v7894_v1 = vpop.xlane.xlu2 %1923 }
 0x3c1   :  { %10375 = vst [vmem:[#allocation50_spill] sm:$0xff] %v7894_v1  ;;  %vm1991_vm13 = vcmp.eq.f32.partialorder %v10376_v45, %v7894_v1  ;;  %v10381_v1 = vld [vmem:[#allocation90_spill] sm:$0xff]  ;;  %v7925_v11 = vadd.f32 %v1856_v0, %v1644_v51  ;;  %v10386_v51 = vld [vmem:[#allocation16_spill] sm:$0xff] }
 0x3c2   :  { %v7901_v10 = vsel %vm1991_vm13, %v6583_v21, 128  ;;  %v7903_v40 = vpop.xlane.xlu1 %2271  ;;  %v2281_v8 = vand.u32 65535, %v10381_v1  ;;  %v10384_v1 = vld [vmem:[#allocation40_spill] sm:$0xff] }
 0x3c3   :  { %vm2273_vm1 = vcmp.eq.f32.partialorder %v10379_v53, %v7903_v40  ;;  %v2478_v60 = vshra.s32 %v7901_v10, 16  ;;  %v10383_v53 = vld [vmem:[#allocation14_spill] sm:$0xff] }
 0x3c4   :  { %v2274_v45 = vsel %vm2273_vm1, %v2269_v24, inf  ;;  %v2283_v35 = vcvt.s32.f32 %v2281_v8  ;;  %v1426_v41 = vpop.f32.mrf.mxu3 }
 0x3c5   :  { %1953 = vmin.xlane.f32.xlu2 %v7905_v15  ;;  %v7911_v2 = vcvt.s32.f32 %v2478_v60  ;;  %v1118_v15 = vadd.f32 %v1117_v32, %v853_v4  ;;  %v1647_v39 = vpop.f32.mrf.mxu0  ;;  %v2295_v32 = vand.u32 65535, %v7410_v49 }
 0x3c6   :  { %2275 = vmin.xlane.f32.xlu0 %v2274_v45 }
 0x3c7   :  { %2481 = vmin.xlane.f32.xlu1 %v7911_v2  ;;  %v1427_v4 = vadd.f32 %v1426_v41, %v1118_v15 }
 0x3c8   :  { %v7916_v61 = vpop.xlane.xlu2 %1925 }
 0x3c9   :  { %10382 = vst [vmem:[#allocation51_spill] sm:$0xff] %v7916_v61  ;;  %vm1992_vm3 = vcmp.eq.f32.partialorder %v10383_v53, %v7916_v61  ;;  %v1860_v53 = vpop.f32.mrf.mxu1  ;;  %v1648_v0 = vadd.f32 %v1647_v39, %v1427_v4  ;;  %v2309_v39 = vand.u32 65535, %v7446_v44 }
 0x3ca   :  { %v7921_v24 = vsel %vm1992_vm3, %v6583_v21, 128  ;;  %v7923_v60 = vpop.xlane.xlu1 %2285 }
 0x3cb   :  { %vm2287_vm6 = vcmp.eq.f32.partialorder %v10384_v1, %v7923_v60  ;;  %v2492_v38 = vshra.s32 %v7921_v24, 16 }
 0x3cc   :  { %v2288_v45 = vsel %vm2287_vm6, %v2283_v35, inf }
 0x3cd   :  { %1955 = vmin.xlane.f32.xlu2 %v7925_v11  ;;  %v7931_v25 = vcvt.s32.f32 %v2492_v38  ;;  %v2297_v38 = vcvt.s32.f32 %v2295_v32 }
 0x3ce   :  { %2289 = vmin.xlane.f32.xlu0 %v2288_v45  ;;  %v7944_v45 = vadd.f32 %v1860_v53, %v1648_v0  ;;  %v2311_v53 = vcvt.s32.f32 %v2309_v39 }
 0x3cf   :  { %2495 = vmin.xlane.f32.xlu1 %v7931_v25 }
 0x3d0   :  { %v7935_v8 = vpop.xlane.xlu2 %1927 }
 0x3d1   :  { %10385 = vst [vmem:[#allocation52_spill] sm:$0xff] %v7935_v8  ;;  %vm1993_vm7 = vcmp.eq.f32.partialorder %v10386_v51, %v7935_v8 }
 0x3d2   :  { %v7940_v1 = vsel %vm1993_vm7, %v6583_v21, 128  ;;  %v7942_v35 = vpop.xlane.xlu1 %2299 }
 0x3d3   :  { %vm2301_vm9 = vcmp.eq.f32.partialorder %v7418_v23, %v7942_v35  ;;  %v2506_v49 = vshra.s32 %v7940_v1, 16 }
 0x3d4   :  { %v2302_v15 = vsel %vm2301_vm9, %v2297_v38, inf  ;;  %v2323_v38 = vand.u32 65535, %v7485_v50 }
 0x3d5   :  { %1957 = vmin.xlane.f32.xlu2 %v7944_v45  ;;  %v7950_v41 = vcvt.s32.f32 %v2506_v49 }
 0x3d6   :  { %2303 = vmin.xlane.f32.xlu0 %v2302_v15 }
 0x3d7   :  { %2509 = vmin.xlane.f32.xlu1 %v7950_v41 }
 0x3d8   :  { %v7954_v4 = vpop.xlane.xlu2 %1929 }
 0x3d9   :  { %10387 = vst [vmem:[#allocation53_spill] sm:$0xff] %v7954_v4  ;;  %vm1994_vm10 = vcmp.eq.f32.partialorder %v7443_v26, %v7954_v4 }
 0x3da   :  { %v7959_v32 = vsel %vm1994_vm10, %v6583_v21, 128  ;;  %v7961_v23 = vpop.xlane.xlu1 %2313 }
 0x3db   :  { %vm2315_vm12 = vcmp.eq.f32.partialorder %v7457_v33, %v7961_v23  ;;  %v2520_v0 = vshra.s32 %v7959_v32, 16  ;;  %v2325_v33 = vcvt.s32.f32 %v2323_v38 }
 0x3dc   :  { %v2316_v51 = vsel %vm2315_vm12, %v2311_v53, inf }
 0x3dd   :  { %v7966_v44 = vcvt.s32.f32 %v2520_v0  ;;  %v2337_v0 = vand.u32 65535, %v7525_v13 }
 0x3de   :  { %2317 = vmin.xlane.f32.xlu0 %v2316_v51 }
 0x3df   :  { %2523 = vmin.xlane.f32.xlu1 %v7966_v44 }
 0x3e0   :  { %v7970_v26 = vpop.xlane.xlu2 %1931 }
 0x3e1   :  { %10388 = vst [vmem:[#allocation30_spill] sm:$0xff] %v7970_v26  ;;  %vm1995_vm13 = vcmp.eq.f32.partialorder %v7482_v22, %v7970_v26  ;;  %v2365_v26 = vand.u32 65535, %v7608_v6 }
 0x3e2   :  { %v7975_v49 = vsel %vm1995_vm13, %v6583_v21, 128  ;;  %v7977_v15 = vpop.xlane.xlu1 %2327 }
 0x3e3   :  { %vm2329_vm1 = vcmp.eq.f32.partialorder %v7498_v36, %v7977_v15  ;;  %v2534_v39 = vshra.s32 %v7975_v49, 16  ;;  %v2339_v36 = vcvt.s32.f32 %v2337_v0 }
 0x3e4   :  { %v2330_v53 = vsel %vm2329_vm1, %v2325_v33, inf }
 0x3e5   :  { %v7982_v50 = vcvt.s32.f32 %v2534_v39 }
 0x3e6   :  { %2331 = vmin.xlane.f32.xlu0 %v2330_v53  ;;  %v2351_v53 = vand.u32 65535, %v7564_v34  ;;  %v2166_v34 = vcvt.f32.s32 %v7610_v30  ;;  %v2367_v30 = vcvt.s32.f32 %v2365_v26 }
 0x3e7   :  { %2537 = vmin.xlane.f32.xlu1 %v7982_v50 }
 0x3e8   :  { %v7986_v22 = vpop.xlane.xlu2 %1933  ;;  %v2167_v8 = vshll.u32 %v2166_v34, 16  ;;  %v2180_v34 = vcvt.f32.s32 %v7654_v31 }
 0x3e9   :  { %10389 = vst [vmem:[#allocation54_spill] sm:$0xff] %v7986_v22  ;;  %vm1996_vm3 = vcmp.eq.f32.partialorder %v7522_v14, %v7986_v22 }
 0x3ea   :  { %v7991_v51 = vsel %vm1996_vm3, %v6583_v21, 128  ;;  %v7993_v38 = vpop.xlane.xlu1 %2341 }
 0x3eb   :  { %vm2343_vm6 = vcmp.eq.f32.partialorder %v7539_v3, %v7993_v38  ;;  %v2548_v33 = vshra.s32 %v7991_v51, 16  ;;  %v2353_v3 = vcvt.s32.f32 %v2351_v53 }
 0x3ec   :  { %v2344_v39 = vsel %vm2343_vm6, %v2339_v36, inf }
 0x3ed   :  { %v7998_v13 = vcvt.s32.f32 %v2548_v33 }
 0x3ee   :  { %2345 = vmin.xlane.f32.xlu0 %v2344_v39 }
 0x3ef   :  { %2551 = vmin.xlane.f32.xlu1 %v7998_v13 }
 0x3f0   :  { %v8002_v14 = vpop.xlane.xlu2 %1935 }
 0x3f1   :  { %10390 = vst [vmem:[#allocation32_spill] sm:$0xff] %v8002_v14  ;;  %vm1997_vm7 = vcmp.eq.f32.partialorder %v7569_v59, %v8002_v14 }
 0x3f2   :  { %v8007_v0 = vsel %vm1997_vm7, %v6583_v21, 128  ;;  %v8009_v22 = vpop.xlane.xlu1 %2355 }
 0x3f3   :  { %vm2357_vm9 = vcmp.eq.f32.partialorder %v7587_v17, %v8009_v22  ;;  %v2562_v36 = vshra.s32 %v8007_v0, 16 }
 0x3f4   :  { %v2358_v33 = vsel %vm2357_vm9, %v2353_v3, inf }
 0x3f5   :  { %v8015_v39 = vcvt.s32.f32 %v2562_v36 }
 0x3f6   :  { %2359 = vmin.xlane.f32.xlu0 %v2358_v33 }
 0x3f7   :  { %2565 = vmin.xlane.f32.xlu1 %v8015_v39 }
 0x3f8   :  { %v8019_v59 = vpop.xlane.xlu2 %1937 }
 0x3f9   :  { %10391 = vst [vmem:[#allocation55_spill] sm:$0xff] %v8019_v59  ;;  %v2164_v14 = vpop.xlane.xlu0 %2163  ;;  %vm1998_vm10 = vcmp.eq.f32.partialorder %v7615_v48, %v8019_v59 }
 0x3fa   :  { %v2165_v17 = vcvt.f32.s32 %v2164_v14  ;;  %v8024_v53 = vsel %vm1998_vm10, %v6583_v21, 128  ;;  %v8026_v3 = vpop.xlane.xlu1 %2369 }
 0x3fb   :  { %vm2371_vm12 = vcmp.eq.f32.partialorder %v7632_v56, %v8026_v3  ;;  %v2576_v6 = vshra.s32 %v8024_v53, 16 }
 0x3fc   :  { %v8028_v36 = vadd.s32 %v2167_v8, %v2165_v17  ;;  %v2372_v33 = vsel %vm2371_vm12, %v2367_v30, inf  ;;  %v2379_v8 = vand.u32 65535, %v7652_v43  ;;  %v2181_v30 = vshll.u32 %v2180_v34, 16 }
 0x3fd   :  { %v8036_v48 = vcvt.s32.f32 %v2576_v6 }
 0x3fe   :  { %2373 = vmin.xlane.f32.xlu0 %v2372_v33  ;;  %vm2736_vm13 = vcmp.eq.s32.totalorder %v6583_v21, %v8028_v36  ;;  %v2381_v43 = vcvt.s32.f32 %v2379_v8 }
 0x3ff   :  { %5601 = vmatmul.msk.f32.gmra.mxu3 %vm2736_vm13, %v10334_v52  ;;  %v5553_v56 = vsel %vm2736_vm13, 1.0, %v10327_v7  ;;  %2579 = vmin.xlane.f32.xlu1 %v8036_v48 }
 0x400   :  { %v2978_v26 = vsub.f32 %v5553_v56, %v5553_v56  ;;  %v5032_v31 = vadd.f32 %v5553_v56, %v7844_v9  ;;  %v8049_v14 = vpop.xlane.xlu2 %1939 }
 0x401   :  { %10392 = vst [vmem:[#allocation73_spill] sm:$0xff] %v8049_v14  ;;  %v2178_v17 = vpop.xlane.xlu0 %2177  ;;  %vm1999_vm1 = vcmp.eq.f32.partialorder %v7659_v27, %v8049_v14  ;;  %v2194_v27 = vcvt.f32.s32 %v7699_v5  ;;  %v2393_v5 = vand.u32 65535, %v7697_v58 }
 0x402   :  { %v2179_v6 = vcvt.f32.s32 %v2178_v17  ;;  %3680 = vmatmul.f32.gmra.mxu0 %v2978_v26  ;;  %v2979_v33 = vand.u32 4294901760, %v2978_v26  ;;  %v8054_v59 = vsel %vm1999_vm1, %v6583_v21, 128  ;;  %v8056_v4 = vpop.xlane.xlu1 %2383 }
 0x403   :  { %vm2385_vm3 = vcmp.eq.f32.partialorder %v7677_v16, %v8056_v4  ;;  %v2590_v9 = vshra.s32 %v8054_v59, 16  ;;  %v2395_v58 = vcvt.s32.f32 %v2393_v5 }
 0x404   :  { %v8058_v61 = vadd.s32 %v2181_v30, %v2179_v6  ;;  %3961 = vmatmul.f32.gmra.mxu1 %v2979_v33  ;;  %v2386_v34 = vsel %vm2385_vm3, %v2381_v43, inf  ;;  %v2980_v56 = vsub.f32 %v2978_v26, %v2979_v33  ;;  %v2195_v43 = vshll.u32 %v2194_v27, 16 }
 0x405   :  { %v8066_v17 = vcvt.s32.f32 %v2590_v9 }
 0x406   :  { %10393 = vst [vmem:[#allocation56_spill] sm:$0xff] %v8058_v61  ;;  %2387 = vmin.xlane.f32.xlu0 %v2386_v34  ;;  %vm2737_vm6 = vcmp.eq.s32.totalorder %v6583_v21, %v8058_v61  ;;  %v2981_v8 = vand.u32 4294901760, %v2980_v56  ;;  %v10406_v61 = vld [vmem:[#allocation27_spill] sm:$0xff] }
 0x407   :  { %5602 = vmatmul.msk.f32.gmra.mxu3 %vm2737_vm6, %v10334_v52  ;;  %v5554_v16 = vsel %vm2737_vm6, 1.0, %v10327_v7  ;;  %2593 = vmin.xlane.f32.xlu1 %v8066_v17 }
 0x408   :  { %v2986_v26 = vsub.f32 %v5554_v16, %v5554_v16  ;;  %v5033_v30 = vadd.f32 %v5554_v16, %v5032_v31  ;;  %2982 = vmatmul.f32.gmra.mxu2 %v2981_v8  ;;  %v8078_v6 = vpop.xlane.xlu2 %1941 }
 0x409   :  { %10394 = vst [vmem:[#allocation74_spill] sm:$0xff] %v8078_v6  ;;  %v2192_v33 = vpop.xlane.xlu0 %2191  ;;  %vm2000_vm7 = vcmp.eq.f32.partialorder %v7702_v42, %v8078_v6 }
 0x40a   :  { %v2193_v9 = vcvt.f32.s32 %v2192_v33  ;;  %3685 = vmatmul.f32.gmra.mxu0 %v2986_v26  ;;  %v2987_v34 = vand.u32 4294901760, %v2986_v26  ;;  %v8083_v56 = vsel %vm2000_vm7, %v6583_v21, 128  ;;  %v8087_v31 = vpop.xlane.xlu1 %2397 }
 0x40b   :  { %v2604_v8 = vshra.s32 %v8083_v56, 16  ;;  %vm2399_vm9 = vcmp.eq.f32.partialorder %v7723_v63, %v8087_v31 }
 0x40c   :  { %v8085_v14 = vadd.s32 %v2195_v43, %v2193_v9  ;;  %3967 = vmatmul.f32.gmra.mxu1 %v2987_v34  ;;  %v2988_v16 = vsub.f32 %v2986_v26, %v2987_v34  ;;  %v2400_v27 = vsel %vm2399_vm9, %v2395_v58, inf  ;;  %v2208_v43 = vcvt.f32.s32 %v7747_v12 }
 0x40d   :  { %v8094_v42 = vcvt.s32.f32 %v2604_v8  ;;  %v2407_v9 = vand.u32 65535, %v7745_v18 }
 0x40e   :  { %10395 = vst [vmem:[#allocation57_spill] sm:$0xff] %v8085_v14  ;;  %vm2738_vm10 = vcmp.eq.s32.totalorder %v6583_v21, %v8085_v14  ;;  %v2989_v33 = vand.u32 4294901760, %v2988_v16  ;;  %2401 = vmin.xlane.f32.xlu0 %v2400_v27  ;;  %v2209_v8 = vshll.u32 %v2208_v43, 16  ;;  %v2222_v14 = vcvt.f32.s32 %v7787_v19 }
 0x40f   :  { %5603 = vmatmul.msk.f32.gmra.mxu3 %vm2738_vm10, %v10334_v52  ;;  %v5555_v63 = vsel %vm2738_vm10, 1.0, %v10327_v7  ;;  %2607 = vmin.xlane.f32.xlu1 %v8094_v42  ;;  %v2409_v18 = vcvt.s32.f32 %v2407_v9 }
 0x410   :  { %v2994_v26 = vsub.f32 %v5555_v63, %v5555_v63  ;;  %v5034_v5 = vadd.f32 %v5555_v63, %v5033_v30  ;;  %2990 = vmatmul.f32.gmra.mxu2 %v2989_v33  ;;  %v8107_v34 = vpop.xlane.xlu2 %1943 }
 0x411   :  { %10396 = vst [vmem:[#allocation34_spill] sm:$0xff] %v8107_v34  ;;  %vm2001_vm12 = vcmp.eq.f32.partialorder %v7750_v62, %v8107_v34  ;;  %v2206_v12 = vpop.xlane.xlu0 %2205 }
 0x412   :  { %3690 = vmatmul.f32.gmra.mxu0 %v2994_v26  ;;  %v2995_v58 = vand.u32 4294901760, %v2994_v26  ;;  %v8112_v16 = vsel %vm2001_vm12, %v6583_v21, 128  ;;  %v2207_v27 = vcvt.f32.s32 %v2206_v12  ;;  %v8114_v6 = vpop.xlane.xlu1 %2411 }
 0x413   :  { %v2618_v30 = vshra.s32 %v8112_v16, 16  ;;  %vm2413_vm1 = vcmp.eq.f32.partialorder %v7771_v29, %v8114_v6 }
 0x414   :  { %3973 = vmatmul.f32.gmra.mxu1 %v2995_v58  ;;  %v2996_v33 = vsub.f32 %v2994_v26, %v2995_v58  ;;  %v8117_v63 = vadd.s32 %v2209_v8, %v2207_v27  ;;  %v2414_v62 = vsel %vm2413_vm1, %v2409_v18, inf  ;;  %v2421_v26 = vand.u32 65535, %v7785_v57  ;;  %v10399_v58 = vld [vmem:[#allocation20_spill] sm:$0xff] }
 0x415   :  { %v8121_v34 = vcvt.s32.f32 %v2618_v30  ;;  %v2223_v27 = vshll.u32 %v2222_v14, 16 }
 0x416   :  { %10397 = vst [vmem:[#allocation58_spill] sm:$0xff] %v8117_v63  ;;  %v2997_v43 = vand.u32 4294901760, %v2996_v33  ;;  %2415 = vmin.xlane.f32.xlu0 %v2414_v62  ;;  %vm2739_vm3 = vcmp.eq.s32.totalorder %v6583_v21, %v8117_v63  ;;  %v2423_v57 = vcvt.s32.f32 %v2421_v26  ;;  %v2435_v26 = vand.u32 65535, %v7822_v47 }
 0x417   :  { %5604 = vmatmul.msk.f32.gmra.mxu3 %vm2739_vm3, %v10334_v52  ;;  %v5556_v29 = vsel %vm2739_vm3, 1.0, %v10327_v7  ;;  %2621 = vmin.xlane.f32.xlu1 %v8121_v34 }
 0x418   :  { %2998 = vmatmul.f32.gmra.mxu2 %v2997_v43  ;;  %v8136_v19 = vpop.xlane.xlu2 %1945  ;;  %v3002_v9 = vsub.f32 %v5556_v29, %v5556_v29  ;;  %v5035_v12 = vadd.f32 %v5556_v29, %v5034_v5  ;;  %v2437_v47 = vcvt.s32.f32 %v2435_v26 }
 0x419   :  { %10398 = vst [vmem:[#allocation59_spill] sm:$0xff] %v8136_v19  ;;  %vm2002_vm7 = vcmp.eq.f32.partialorder %v10399_v58, %v8136_v19  ;;  %v2220_v8 = vpop.xlane.xlu0 %2219  ;;  %v2236_v58 = vcvt.f32.s32 %v7824_v54 }
 0x41a   :  { %v8141_v18 = vsel %vm2002_vm7, %v6583_v21, 128  ;;  %v2221_v30 = vcvt.f32.s32 %v2220_v8  ;;  %3695 = vmatmul.f32.gmra.mxu0 %v3002_v9  ;;  %v3003_v33 = vand.u32 4294901760, %v3002_v9  ;;  %v8143_v62 = vpop.xlane.xlu1 %2425 }
 0x41b   :  { %v2632_v43 = vshra.s32 %v8141_v18, 16  ;;  %vm2427_vm9 = vcmp.eq.f32.partialorder %v7809_v46, %v8143_v62 }
 0x41c   :  { %v8146_v63 = vadd.s32 %v2223_v27, %v2221_v30  ;;  %3979 = vmatmul.f32.gmra.mxu1 %v3003_v33  ;;  %v3004_v5 = vsub.f32 %v3002_v9, %v3003_v33  ;;  %v2428_v29 = vsel %vm2427_vm9, %v2423_v57, inf  ;;  %v2237_v33 = vshll.u32 %v2236_v58, 16 }
 0x41d   :  { %v8150_v14 = vcvt.s32.f32 %v2632_v43 }
 0x41e   :  { %10400 = vst [vmem:[#allocation75_spill] sm:$0xff] %v8146_v63  ;;  %2429 = vmin.xlane.f32.xlu0 %v2428_v29  ;;  %vm2740_vm12 = vcmp.eq.s32.totalorder %v6583_v21, %v8146_v63  ;;  %v3005_v8 = vand.u32 4294901760, %v3004_v5 }
 0x41f   :  { %5605 = vmatmul.msk.f32.gmra.mxu3 %vm2740_vm12, %v10334_v52  ;;  %v5557_v46 = vsel %vm2740_vm12, 1.0, %v10327_v7  ;;  %2635 = vmin.xlane.f32.xlu1 %v8150_v14 }
 0x420   :  { %3006 = vmatmul.f32.gmra.mxu2 %v3005_v8  ;;  %v8165_v54 = vpop.xlane.xlu2 %1947  ;;  %v3010_v9 = vsub.f32 %v5557_v46, %v5557_v46  ;;  %v5036_v27 = vadd.f32 %v5557_v46, %v5035_v12  ;;  %v10403_v12 = vld [vmem:[#allocation46_spill] sm:$0xff] }
 0x421   :  { %10401 = vst [vmem:[#allocation36_spill] sm:$0xff] %v8165_v54  ;;  %vm2003_vm1 = vcmp.eq.f32.partialorder %v7827_v28, %v8165_v54  ;;  %v2234_v30 = vpop.xlane.xlu0 %2233  ;;  %v2250_v54 = vcvt.f32.s32 %v7859_v55 }
 0x422   :  { %v8170_v57 = vsel %vm2003_vm1, %v6583_v21, 128  ;;  %v2235_v43 = vcvt.f32.s32 %v2234_v30  ;;  %3700 = vmatmul.f32.gmra.mxu0 %v3010_v9  ;;  %v3011_v5 = vand.u32 4294901760, %v3010_v9  ;;  %v8172_v29 = vpop.xlane.xlu1 %2439 }
 0x423   :  { %v2646_v8 = vshra.s32 %v8170_v57, 16  ;;  %vm2441_vm7 = vcmp.eq.f32.partialorder %v10403_v12, %v8172_v29 }
 0x424   :  { %v8175_v19 = vadd.s32 %v2237_v33, %v2235_v43  ;;  %3985 = vmatmul.f32.gmra.mxu1 %v3011_v5  ;;  %v3012_v28 = vsub.f32 %v3010_v9, %v3011_v5  ;;  %v2442_v46 = vsel %vm2441_vm7, %v2437_v47, inf  ;;  %v10404_v9 = vld [vmem:[#allocation24_spill] sm:$0xff]  ;;  %v2251_v47 = vshll.u32 %v2250_v54, 16 }
 0x425   :  { %v8179_v58 = vcvt.s32.f32 %v2646_v8  ;;  %v2449_v33 = vand.u32 65535, %v10404_v9 }
 0x426   :  { %10402 = vst [vmem:[#allocation60_spill] sm:$0xff] %v8175_v19  ;;  %2443 = vmin.xlane.f32.xlu0 %v2442_v46  ;;  %vm10033_vm9 = vcmp.eq.s32.totalorder %v6583_v21, %v8175_v19  ;;  %v3013_v30 = vand.u32 4294901760, %v3012_v28 }
 0x427   :  { %5606 = vmatmul.msk.f32.gmra.mxu3 %vm10033_vm9, %v10334_v52  ;;  %v5558_v26 = vsel %vm10033_vm9, 1.0, %v10327_v7  ;;  %2649 = vmin.xlane.f32.xlu1 %v8179_v58  ;;  %v2451_v46 = vcvt.s32.f32 %v2449_v33 }
 0x428   :  { %3014 = vmatmul.f32.gmra.mxu2 %v3013_v30  ;;  %v3018_v55 = vsub.f32 %v5558_v26, %v5558_v26  ;;  %v5037_v43 = vadd.f32 %v5558_v26, %v5036_v27  ;;  %v2264_v30 = vcvt.f32.s32 %v10406_v61 }
 0x429   :  { %v2248_v5 = vpop.xlane.xlu0 %2247 }
 0x42a   :  { %v2249_v8 = vcvt.f32.s32 %v2248_v5  ;;  %3705 = vmatmul.f32.gmra.mxu0 %v3018_v55  ;;  %v3019_v12 = vand.u32 4294901760, %v3018_v55  ;;  %v8194_v28 = vpop.xlane.xlu1 %2453 }
 0x42b   :  { %vm2455_vm1 = vcmp.eq.f32.partialorder %v7867_v37, %v8194_v28  ;;  %v10407_v37 = vld [vmem:[#allocation49_spill] sm:$0xff] }
 0x42c   :  { %v8196_v63 = vadd.s32 %v2251_v47, %v2249_v8  ;;  %3991 = vmatmul.f32.gmra.mxu1 %v3019_v12  ;;  %v3020_v9 = vsub.f32 %v3018_v55, %v3019_v12  ;;  %v2456_v19 = vsel %vm2455_vm1, %v2451_v46, inf  ;;  %v2463_v26 = vand.u32 65535, %v10407_v37 }
 0x42d   :  { %v2265_v55 = vshll.u32 %v2264_v30, 16 }
 0x42e   :  { %10405 = vst [vmem:[#allocation77_spill] sm:$0xff] %v8196_v63  ;;  %2457 = vmin.xlane.f32.xlu0 %v2456_v19  ;;  %vm10023_vm7 = vcmp.eq.s32.totalorder %v6583_v21, %v8196_v63  ;;  %v3021_v54 = vand.u32 4294901760, %v3020_v9  ;;  %v2465_v12 = vcvt.s32.f32 %v2463_v26  ;;  %v8230_v26 = vpop.f32.mrf.mxu0 }
 0x42f   :  { %5607 = vmatmul.msk.f32.gmra.mxu3 %vm10023_vm7, %v10334_v52  ;;  %v5559_v27 = vsel %vm10023_vm7, 1.0, %v10327_v7  ;;  %10408 = vst [vmem:[#allocation61_spill] sm:$0xff] %v8230_v26 }
 0x430   :  { %3022 = vmatmul.f32.gmra.mxu2 %v3021_v54  ;;  %v3026_v33 = vsub.f32 %v5559_v27, %v5559_v27  ;;  %v5038_v61 = vadd.f32 %v5559_v27, %v5037_v43  ;;  %v2278_v54 = vcvt.f32.s32 %v7903_v40 }
 0x431   :  { %v2262_v19 = vpop.xlane.xlu0 %2261 }
 0x432   :  { %v2263_v5 = vcvt.f32.s32 %v2262_v19  ;;  %3710 = vmatmul.f32.gmra.mxu0 %v3026_v33  ;;  %v3027_v47 = vand.u32 4294901760, %v3026_v33  ;;  %v8212_v8 = vpop.xlane.xlu1 %2467  ;;  %v2279_v37 = vshll.u32 %v2278_v54, 16  ;;  %v2292_v54 = vcvt.f32.s32 %v7923_v60 }
 0x433   :  { %vm2469_vm1 = vcmp.eq.f32.partialorder %v7890_v20, %v8212_v8  ;;  %v2477_v20 = vand.u32 65535, %v7901_v10 }
 0x434   :  { %v8214_v46 = vadd.s32 %v2265_v55, %v2263_v5  ;;  %3997 = vmatmul.f32.gmra.mxu1 %v3027_v47  ;;  %v3028_v9 = vsub.f32 %v3026_v33, %v3027_v47  ;;  %v2470_v63 = vsel %vm2469_vm1, %v2465_v12, inf  ;;  %v8234_v47 = vpop.f32.mrf.mxu1  ;;  %v8236_v12 = vpop.f32.mrf.mxu3 }
 0x435   :  { %v2479_v5 = vcvt.s32.f32 %v2477_v20  ;;  %10409 = vst [vmem:[#allocation37_spill] sm:$0xff] %v8234_v47 }
 0x436   :  { %2471 = vmin.xlane.f32.xlu0 %v2470_v63  ;;  %vm10024_vm7 = vcmp.eq.s32.totalorder %v6583_v21, %v8214_v46  ;;  %v3029_v43 = vand.u32 4294901760, %v3028_v9  ;;  %10410 = vst [vmem:[#allocation78_spill] sm:$0xff] %v8236_v12 }
 0x437   :  { %5608 = vmatmul.msk.f32.gmra.mxu3 %vm10024_vm7, %v10334_v52  ;;  %v5560_v30 = vsel %vm10024_vm7, 1.0, %v10327_v7 }
 0x438   :  { %3030 = vmatmul.f32.gmra.mxu2 %v3029_v43  ;;  %v3034_v27 = vsub.f32 %v5560_v30, %v5560_v30  ;;  %v5039_v40 = vadd.f32 %v5560_v30, %v5038_v61 }
 0x439   :  { %v2276_v63 = vpop.xlane.xlu0 %2275 }
 0x43a   :  { %v2277_v33 = vcvt.f32.s32 %v2276_v63  ;;  %3715 = vmatmul.f32.gmra.mxu0 %v3034_v27  ;;  %v3035_v19 = vand.u32 4294901760, %v3034_v27  ;;  %v8232_v55 = vpop.xlane.xlu1 %2481  ;;  %v2293_v63 = vshll.u32 %v2292_v54, 16 }
 0x43b   :  { %vm2483_vm1 = vcmp.eq.f32.partialorder %v7911_v2, %v8232_v55  ;;  %v2491_v2 = vand.u32 65535, %v7921_v24 }
 0x43c   :  { %v8238_v9 = vadd.s32 %v2279_v37, %v2277_v33  ;;  %4003 = vmatmul.f32.gmra.mxu1 %v3035_v19  ;;  %v3036_v10 = vsub.f32 %v3034_v27, %v3035_v19  ;;  %v2484_v61 = vsel %vm2483_vm1, %v2479_v5, inf  ;;  %v8265_v54 = vpop.f32.mrf.mxu3 }
 0x43d   :  { %v2493_v5 = vcvt.s32.f32 %v2491_v2  ;;  %10413 = vst [vmem:[#allocation80_spill] sm:$0xff] %v8265_v54 }
 0x43e   :  { %2485 = vmin.xlane.f32.xlu0 %v2484_v61  ;;  %vm10025_vm7 = vcmp.eq.s32.totalorder %v6583_v21, %v8238_v9  ;;  %v3037_v43 = vand.u32 4294901760, %v3036_v10  ;;  %v8256_v10 = vpop.f32.mrf.mxu0 }
 0x43f   :  { %5609 = vmatmul.msk.f32.gmra.mxu3 %vm10025_vm7, %v10334_v52  ;;  %v5561_v30 = vsel %vm10025_vm7, 1.0, %v10327_v7  ;;  %10411 = vst [vmem:[#allocation62_spill] sm:$0xff] %v8256_v10 }
 0x440   :  { %3038 = vmatmul.f32.gmra.mxu2 %v3037_v43  ;;  %v3042_v20 = vsub.f32 %v5561_v30, %v5561_v30  ;;  %v5040_v60 = vadd.f32 %v5561_v30, %v5039_v40  ;;  %v2306_v40 = vcvt.f32.s32 %v7942_v35  ;;  %v8263_v30 = vpop.f32.mrf.mxu1  ;;  %v2505_v35 = vand.u32 65535, %v7940_v1 }
 0x441   :  { %v2290_v27 = vpop.xlane.xlu0 %2289  ;;  %10412 = vst [vmem:[#allocation81_spill] sm:$0xff] %v8263_v30  ;;  %v2320_v1 = vcvt.f32.s32 %v7961_v23 }
 0x442   :  { %v2291_v37 = vcvt.f32.s32 %v2290_v27  ;;  %3720 = vmatmul.f32.gmra.mxu0 %v3042_v20  ;;  %v3043_v33 = vand.u32 4294901760, %v3042_v20  ;;  %v8254_v19 = vpop.xlane.xlu1 %2495  ;;  %v8269_v27 = vpop.f32.mrf.mxu2  ;;  %v2507_v30 = vcvt.s32.f32 %v2505_v35 }
 0x443   :  { %vm2497_vm1 = vcmp.eq.f32.partialorder %v7931_v25, %v8254_v19  ;;  %10414 = vst [vmem:[#allocation63_spill] sm:$0xff] %v8269_v27 }
 0x444   :  { %v8258_v61 = vadd.s32 %v2293_v63, %v2291_v37  ;;  %4009 = vmatmul.f32.gmra.mxu1 %v3043_v33  ;;  %v3044_v24 = vsub.f32 %v3042_v20, %v3043_v33  ;;  %v2498_v43 = vsel %vm2497_vm1, %v2493_v5, inf  ;;  %v2307_v33 = vshll.u32 %v2306_v40, 16 }
 0x445   :  { %v2519_v40 = vand.u32 65535, %v7959_v32 }
 0x446   :  { %2499 = vmin.xlane.f32.xlu0 %v2498_v43  ;;  %vm10026_vm7 = vcmp.eq.s32.totalorder %v6583_v21, %v8258_v61  ;;  %v3045_v2 = vand.u32 4294901760, %v3044_v24 }
 0x447   :  { %5610 = vmatmul.msk.f32.gmra.mxu3 %vm10026_vm7, %v10334_v52  ;;  %v5562_v25 = vsel %vm10026_vm7, 1.0, %v10327_v7 }
 0x448   :  { %3046 = vmatmul.f32.gmra.mxu2 %v3045_v2  ;;  %v3050_v20 = vsub.f32 %v5562_v25, %v5562_v25  ;;  %v5041_v63 = vadd.f32 %v5562_v25, %v5040_v60  ;;  %v8287_v2 = vpop.f32.mrf.mxu0  ;;  %v8300_v23 = vpop.f32.mrf.mxu1 }
 0x449   :  { %v2304_v37 = vpop.xlane.xlu0 %2303  ;;  %10416 = vst [vmem:[#allocation64_spill] sm:$0xff] %v8287_v2 }
 0x44a   :  { %v2305_v5 = vcvt.f32.s32 %v2304_v37  ;;  %3725 = vmatmul.f32.gmra.mxu0 %v3050_v20  ;;  %v3051_v24 = vand.u32 4294901760, %v3050_v20  ;;  %v8280_v43 = vpop.xlane.xlu1 %2509  ;;  %10417 = vst [vmem:[#allocation85_spill] sm:$0xff] %v8300_v23 }
 0x44b   :  { %vm2511_vm1 = vcmp.eq.f32.partialorder %v7950_v41, %v8280_v43 }
 0x44c   :  { %v8282_v10 = vadd.s32 %v2307_v33, %v2305_v5  ;;  %4015 = vmatmul.f32.gmra.mxu1 %v3051_v24  ;;  %v3052_v47 = vsub.f32 %v3050_v20, %v3051_v24  ;;  %v2512_v54 = vsel %vm2511_vm1, %v2507_v30, inf  ;;  %v8302_v30 = vpop.f32.mrf.mxu3  ;;  %v2321_v20 = vshll.u32 %v2320_v1, 16 }
 0x44d   :  { %10418 = vst [vmem:[#allocation65_spill] sm:$0xff] %v8302_v30  ;;  %v2521_v24 = vcvt.s32.f32 %v2519_v40 }
 0x44e   :  { %10415 = vst [vmem:[#allocation82_spill] sm:$0xff] %v8282_v10  ;;  %2513 = vmin.xlane.f32.xlu0 %v2512_v54  ;;  %vm10027_vm7 = vcmp.eq.s32.totalorder %v6583_v21, %v8282_v10  ;;  %v3053_v60 = vand.u32 4294901760, %v3052_v47  ;;  %v8304_v47 = vpop.f32.mrf.mxu2 }
 0x44f   :  { %5611 = vmatmul.msk.f32.gmra.mxu3 %vm10027_vm7, %v10334_v52  ;;  %v5563_v41 = vsel %vm10027_vm7, 1.0, %v10327_v7  ;;  %10419 = vst [vmem:[#allocation84_spill] sm:$0xff] %v8304_v47 }
 0x450   :  { %3054 = vmatmul.f32.gmra.mxu2 %v3053_v60  ;;  %v3058_v54 = vsub.f32 %v5563_v41, %v5563_v41  ;;  %v5042_v25 = vadd.f32 %v5563_v41, %v5041_v63  ;;  %v2334_v63 = vcvt.f32.s32 %v7977_v15  ;;  %v8324_v40 = vpop.f32.mrf.mxu0 }
 0x451   :  { %v2318_v35 = vpop.xlane.xlu0 %2317  ;;  %10421 = vst [vmem:[#allocation66_spill] sm:$0xff] %v8324_v40 }
 0x452   :  { %v2319_v37 = vcvt.f32.s32 %v2318_v35  ;;  %3730 = vmatmul.f32.gmra.mxu0 %v3058_v54  ;;  %v3059_v33 = vand.u32 4294901760, %v3058_v54  ;;  %v8306_v5 = vpop.xlane.xlu1 %2523 }
 0x453   :  { %vm2525_vm1 = vcmp.eq.f32.partialorder %v7966_v44, %v8306_v5  ;;  %v2533_v44 = vand.u32 65535, %v7975_v49 }
 0x454   :  { %v8308_v2 = vadd.s32 %v2321_v20, %v2319_v37  ;;  %4021 = vmatmul.f32.gmra.mxu1 %v3059_v33  ;;  %v3060_v32 = vsub.f32 %v3058_v54, %v3059_v33  ;;  %v2526_v60 = vsel %vm2525_vm1, %v2521_v24, inf  ;;  %v2335_v20 = vshll.u32 %v2334_v63, 16  ;;  %v8326_v37 = vpop.f32.mrf.mxu1  ;;  %v8328_v33 = vpop.f32.mrf.mxu3 }
 0x455   :  { %10422 = vst [vmem:[#allocation89_spill] sm:$0xff] %v8326_v37  ;;  %v2535_v30 = vcvt.s32.f32 %v2533_v44 }
 0x456   :  { %10420 = vst [vmem:[#allocation86_spill] sm:$0xff] %v8308_v2  ;;  %2527 = vmin.xlane.f32.xlu0 %v2526_v60  ;;  %vm10028_vm7 = vcmp.eq.s32.totalorder %v6583_v21, %v8308_v2  ;;  %v3061_v1 = vand.u32 4294901760, %v3060_v32  ;;  %v8330_v60 = vpop.f32.mrf.mxu2 }
 0x457   :  { %5612 = vmatmul.msk.f32.gmra.mxu3 %vm10028_vm7, %v10334_v52  ;;  %v5564_v41 = vsel %vm10028_vm7, 1.0, %v10327_v7  ;;  %10423 = vst [vmem:[#allocation88_spill] sm:$0xff] %v8328_v33 }
 0x458   :  { %3062 = vmatmul.f32.gmra.mxu2 %v3061_v1  ;;  %v3066_v15 = vsub.f32 %v5564_v41, %v5564_v41  ;;  %v5043_v54 = vadd.f32 %v5564_v41, %v5042_v25  ;;  %10424 = vst [vmem:[#allocation67_spill] sm:$0xff] %v8330_v60  ;;  %v2348_v1 = vcvt.f32.s32 %v7993_v38 }
 0x459   :  { %v2332_v35 = vpop.xlane.xlu0 %2331 }
 0x45a   :  { %v2333_v24 = vcvt.f32.s32 %v2332_v35  ;;  %3735 = vmatmul.f32.gmra.mxu0 %v3066_v15  ;;  %v3067_v32 = vand.u32 4294901760, %v3066_v15  ;;  %v8332_v23 = vpop.xlane.xlu1 %2537  ;;  %v8341_v35 = vpop.xlane.xlu2 %1949 }
 0x45b   :  { %vm2539_vm1 = vcmp.eq.f32.partialorder %v7982_v50, %v8332_v23 }
 0x45c   :  { %v8334_v49 = vadd.s32 %v2335_v20, %v2333_v24  ;;  %4027 = vmatmul.f32.gmra.mxu1 %v3067_v32  ;;  %v3068_v25 = vsub.f32 %v3066_v15, %v3067_v32  ;;  %v2540_v63 = vsel %vm2539_vm1, %v2535_v30, inf  ;;  %v2547_v30 = vand.u32 65535, %v7991_v51  ;;  %v8352_v24 = vpop.f32.mrf.mxu0  ;;  %v8356_v40 = vpop.f32.mrf.mxu1 }
 0x45d   :  { %v2349_v20 = vshll.u32 %v2348_v1, 16  ;;  %10426 = vst [vmem:[#allocation68_spill] sm:$0xff] %v8352_v24  ;;  %v8358_v33 = vpop.f32.mrf.mxu3 }
 0x45e   :  { %10425 = vst [vmem:[#allocation38_spill] sm:$0xff] %v8334_v49  ;;  %2541 = vmin.xlane.f32.xlu0 %v2540_v63  ;;  %vm10031_vm7 = vcmp.eq.s32.totalorder %v6583_v21, %v8334_v49  ;;  %v3069_v41 = vand.u32 4294901760, %v3068_v25  ;;  %v2549_v37 = vcvt.s32.f32 %v2547_v30  ;;  %v2561_v30 = vand.u32 65535, %v8007_v0 }
 0x45f   :  { %5613 = vmatmul.msk.f32.gmra.mxu3 %vm10031_vm7, %v10334_v52  ;;  %v5565_v50 = vsel %vm10031_vm7, 1.0, %v10327_v7  ;;  %10427 = vst [vmem:[#allocation90_spill] sm:$0xff] %v8356_v40 }
 0x460   :  { %3070 = vmatmul.f32.gmra.mxu2 %v3069_v41  ;;  %v3074_v38 = vsub.f32 %v5565_v50, %v5565_v50  ;;  %v5044_v44 = vadd.f32 %v5565_v50, %v5043_v54  ;;  %10428 = vst [vmem:[#allocation14_spill] sm:$0xff] %v8358_v33  ;;  %v8364_v54 = vpop.f32.mrf.mxu2  ;;  %v2362_v41 = vcvt.f32.s32 %v8009_v22  ;;  %v2563_v40 = vcvt.s32.f32 %v2561_v30 }
 0x461   :  { %v2346_v15 = vpop.xlane.xlu0 %2345  ;;  %10430 = vst [vmem:[#allocation16_spill] sm:$0xff] %v8364_v54 }
 0x462   :  { %v2347_v32 = vcvt.f32.s32 %v2346_v15  ;;  %3740 = vmatmul.f32.gmra.mxu0 %v3074_v38  ;;  %v3075_v25 = vand.u32 4294901760, %v3074_v38  ;;  %v8354_v63 = vpop.xlane.xlu1 %2551 }
 0x463   :  { %vm2553_vm1 = vcmp.eq.f32.partialorder %v7998_v13, %v8354_v63 }
 0x464   :  { %v8360_v49 = vadd.s32 %v2349_v20, %v2347_v32  ;;  %4033 = vmatmul.f32.gmra.mxu1 %v3075_v25  ;;  %v3076_v51 = vsub.f32 %v3074_v38, %v3075_v25  ;;  %v2554_v1 = vsel %vm2553_vm1, %v2549_v37, inf  ;;  %v8378_v38 = vpop.xlane.xlu2 %1951  ;;  %v2363_v20 = vshll.u32 %v2362_v41, 16  ;;  %v10431_v32 = vld [vmem:[#allocation26_spill] sm:$0xff]  ;;  %v8384_v24 = vpop.f32.mrf.mxu0 }
 0x465   :  { %vm2004_vm1 = vcmp.eq.f32.partialorder %v10431_v32, %v8341_v35  ;;  %10432 = vst [vmem:[#allocation20_spill] sm:$0xff] %v8384_v24 }
 0x466   :  { %10429 = vst [vmem:[#allocation40_spill] sm:$0xff] %v8360_v49  ;;  %2555 = vmin.xlane.f32.xlu0 %v2554_v1  ;;  %vm10032_vm7 = vcmp.eq.s32.totalorder %v6583_v21, %v8360_v49  ;;  %v3077_v50 = vand.u32 4294901760, %v3076_v51 }
 0x467   :  { %5614 = vmatmul.msk.f32.gmra.mxu3 %vm10032_vm7, %v10334_v52  ;;  %v5566_v13 = vsel %vm10032_vm7, 1.0, %v10327_v7 }
 0x468   :  { %3078 = vmatmul.f32.gmra.mxu2 %v3077_v50  ;;  %v3082_v37 = vsub.f32 %v5566_v13, %v5566_v13  ;;  %v5045_v22 = vadd.f32 %v5566_v13, %v5044_v44  ;;  %v8391_v44 = vsel %vm2004_vm1, %v6583_v21, 128  ;;  %v2376_v50 = vcvt.f32.s32 %v8026_v3  ;;  %v8394_v13 = vpop.f32.mrf.mxu1 }
 0x469   :  { %v2360_v15 = vpop.xlane.xlu0 %2359  ;;  %10434 = vst [vmem:[#allocation24_spill] sm:$0xff] %v8394_v13  ;;  %v2575_v3 = vand.u32 65535, %v8024_v53  ;;  %v2660_v32 = vshra.s32 %v8391_v44, 16 }
 0x46a   :  { %v2361_v25 = vcvt.f32.s32 %v2360_v15  ;;  %3745 = vmatmul.f32.gmra.mxu0 %v3082_v37  ;;  %v3083_v51 = vand.u32 4294901760, %v3082_v37  ;;  %v8382_v1 = vpop.xlane.xlu1 %2565  ;;  %v8396_v15 = vpop.f32.mrf.mxu3 }
 0x46b   :  { %vm2567_vm7 = vcmp.eq.f32.partialorder %v8015_v39, %v8382_v1  ;;  %10435 = vst [vmem:[#allocation27_spill] sm:$0xff] %v8396_v15  ;;  %v8422_v53 = vcvt.s32.f32 %v2660_v32 }
 0x46c   :  { %v8386_v33 = vadd.s32 %v2363_v20, %v2361_v25  ;;  %4039 = vmatmul.f32.gmra.mxu1 %v3083_v51  ;;  %v3084_v0 = vsub.f32 %v3082_v37, %v3083_v51  ;;  %v2568_v41 = vsel %vm2567_vm7, %v2563_v40, inf  ;;  %v8400_v20 = vpop.f32.mrf.mxu2  ;;  %v2377_v51 = vshll.u32 %v2376_v50, 16  ;;  %v8414_v24 = vpop.xlane.xlu2 %1953 }
 0x46d   :  { %10436 = vst [vmem:[#allocation49_spill] sm:$0xff] %v8400_v20 }
 0x46e   :  { %10433 = vst [vmem:[#allocation46_spill] sm:$0xff] %v8386_v33  ;;  %2569 = vmin.xlane.f32.xlu0 %v2568_v41  ;;  %vm10036_vm9 = vcmp.eq.s32.totalorder %v6583_v21, %v8386_v33  ;;  %v3085_v30 = vand.u32 4294901760, %v3084_v0  ;;  %v10437_v0 = vld [vmem:[#allocation28_spill] sm:$0xff]  ;;  %v2577_v33 = vcvt.s32.f32 %v2575_v3 }
 0x46f   :  { %5615 = vmatmul.msk.f32.gmra.mxu3 %vm10036_vm9, %v10334_v52  ;;  %v5567_v39 = vsel %vm10036_vm9, 1.0, %v10327_v7  ;;  %vm2005_vm7 = vcmp.eq.f32.partialorder %v10437_v0, %v8378_v38 }
 0x470   :  { %3086 = vmatmul.f32.gmra.mxu2 %v3085_v30  ;;  %v3090_v40 = vsub.f32 %v5567_v39, %v5567_v39  ;;  %v5046_v37 = vadd.f32 %v5567_v39, %v5045_v22  ;;  %v8425_v50 = vsel %vm2005_vm7, %v6583_v21, 128  ;;  %v2390_v39 = vcvt.f32.s32 %v8056_v4 }
 0x471   :  { %v2374_v25 = vpop.xlane.xlu0 %2373  ;;  %v2589_v4 = vand.u32 65535, %v8054_v59 }
 0x472   :  { %v2375_v41 = vcvt.f32.s32 %v2374_v25  ;;  %3750 = vmatmul.f32.gmra.mxu0 %v3090_v40  ;;  %v3091_v13 = vand.u32 4294901760, %v3090_v40  ;;  %v8416_v15 = vpop.xlane.xlu1 %2579  ;;  %v8428_v25 = vpop.f32.mrf.mxu0 }
 0x473   :  { %vm2581_vm1 = vcmp.eq.f32.partialorder %v8036_v48, %v8416_v15  ;;  %10439 = vst [vmem:[#allocation28_spill] sm:$0xff] %v8428_v25 }
 0x474   :  { %v8418_v20 = vadd.s32 %v2377_v51, %v2375_v41  ;;  %4045 = vmatmul.f32.gmra.mxu1 %v3091_v13  ;;  %v3092_v22 = vsub.f32 %v3090_v40, %v3091_v13  ;;  %v2582_v30 = vsel %vm2581_vm1, %v2577_v33, inf  ;;  %v8442_v33 = vpop.f32.mrf.mxu1  ;;  %v8444_v13 = vpop.f32.mrf.mxu3  ;;  %v2674_v51 = vshra.s32 %v8425_v50, 16 }
 0x475   :  { %2583 = vmin.xlane.f32.xlu2 %v2582_v30  ;;  %10440 = vst [vmem:[#allocation92_spill] sm:$0xff] %v8442_v33  ;;  %v8447_v0 = vpop.f32.mrf.mxu2  ;;  %v10443_v30 = vld [vmem:[#allocation72_spill] sm:$0xff]  ;;  %v2591_v33 = vcvt.s32.f32 %v2589_v4 }
 0x476   :  { %10438 = vst [vmem:[#allocation26_spill] sm:$0xff] %v8418_v20  ;;  %2663 = vmin.xlane.f32.xlu0 %v8422_v53  ;;  %vm10041_vm9 = vcmp.eq.s32.totalorder %v6583_v21, %v8418_v20  ;;  %v3093_v3 = vand.u32 4294901760, %v3092_v22  ;;  %v2391_v22 = vshll.u32 %v2390_v39, 16  ;;  %vm2006_vm7 = vcmp.eq.f32.partialorder %v10443_v30, %v8414_v24 }
 0x477   :  { %5616 = vmatmul.msk.f32.gmra.mxu3 %vm10041_vm9, %v10334_v52  ;;  %v5568_v48 = vsel %vm10041_vm9, 1.0, %v10327_v7  ;;  %10441 = vst [vmem:[#allocation93_spill] sm:$0xff] %v8444_v13  ;;  %v8460_v39 = vsel %vm2006_vm7, %v6583_v21, 128  ;;  %v2404_v30 = vcvt.f32.s32 %v8087_v31  ;;  %v2603_v31 = vand.u32 65535, %v8083_v56 }
 0x478   :  { %3094 = vmatmul.f32.gmra.mxu2 %v3093_v3  ;;  %v3098_v40 = vsub.f32 %v5568_v48, %v5568_v48  ;;  %v5047_v32 = vadd.f32 %v5568_v48, %v5046_v37  ;;  %10442 = vst [vmem:[#allocation94_spill] sm:$0xff] %v8447_v0  ;;  %v8455_v3 = vcvt.s32.f32 %v2674_v51  ;;  %v8462_v48 = vpop.xlane.xlu2 %1955  ;;  %v2688_v51 = vshra.s32 %v8460_v39, 16 }
 0x479   :  { %v2388_v41 = vpop.xlane.xlu0 %2387  ;;  %vm2007_vm7 = vcmp.eq.f32.partialorder %v7925_v11, %v8462_v48  ;;  %v2605_v56 = vcvt.s32.f32 %v2603_v31 }
 0x47a   :  { %v2389_v25 = vcvt.f32.s32 %v2388_v41  ;;  %3755 = vmatmul.f32.gmra.mxu0 %v3098_v40  ;;  %v3099_v20 = vand.u32 4294901760, %v3098_v40  ;;  %v8451_v59 = vpop.xlane.xlu1 %2593 }
 0x47b   :  { %vm2595_vm1 = vcmp.eq.f32.partialorder %v8066_v17, %v8451_v59 }
 0x47c   :  { %v8453_v49 = vadd.s32 %v2391_v22, %v2389_v25  ;;  %4051 = vmatmul.f32.gmra.mxu1 %v3099_v20  ;;  %v3100_v37 = vsub.f32 %v3098_v40, %v3099_v20  ;;  %v2596_v41 = vsel %vm2595_vm1, %v2591_v33, inf }
 0x47d   :  { %2677 = vmin.xlane.f32.xlu2 %v8455_v3  ;;  %2597 = vmin.xlane.f32.xlu1 %v2596_v41  ;;  %v2405_v41 = vshll.u32 %v2404_v30, 16 }
 0x47e   :  { %10444 = vst [vmem:[#allocation72_spill] sm:$0xff] %v8453_v49  ;;  %vm10044_vm9 = vcmp.eq.s32.totalorder %v6583_v21, %v8453_v49  ;;  %v3101_v4 = vand.u32 4294901760, %v3100_v37  ;;  %v8482_v49 = vpop.f32.mrf.mxu2 }
 0x47f   :  { %v3681_v25 = vpop.f32.mrf.mxu0  ;;  %5617 = vmatmul.msk.f32.gmra.mxu3 %vm10044_vm9, %v10334_v52  ;;  %v5569_v17 = vsel %vm10044_vm9, 1.0, %v10327_v7  ;;  %10445 = vst [vmem:[#allocation95_spill] sm:$0xff] %v8482_v49 }
 0x480   :  { %3102 = vmatmul.f32.gmra.mxu2 %v3101_v4  ;;  %v3106_v33 = vsub.f32 %v5569_v17, %v5569_v17  ;;  %v5048_v40 = vadd.f32 %v5569_v17, %v5047_v32  ;;  %v8488_v32 = vcvt.s32.f32 %v2688_v51  ;;  %v8493_v17 = vsel %vm2007_vm7, %v6583_v21, 128  ;;  %v8499_v51 = vpop.xlane.xlu2 %1957 }
 0x481   :  { %v8477_v20 = vpop.f32.mrf.mxu1  ;;  %v2402_v22 = vpop.xlane.xlu0 %2401  ;;  %vm2008_vm7 = vcmp.eq.f32.partialorder %v7944_v45, %v8499_v51 }
 0x482   :  { %v3432_v37 = vpop.f32.mrf.mxu3  ;;  %v2403_v13 = vcvt.f32.s32 %v2402_v22  ;;  %3760 = vmatmul.f32.gmra.mxu0 %v3106_v33  ;;  %v3107_v0 = vand.u32 4294901760, %v3106_v33  ;;  %v8484_v54 = vpop.xlane.xlu1 %2607  ;;  %v2418_v22 = vcvt.f32.s32 %v8114_v6 }
 0x483   :  { %vm2609_vm1 = vcmp.eq.f32.partialorder %v8094_v42, %v8484_v54  ;;  %v2617_v42 = vand.u32 65535, %v8112_v16 }
 0x484   :  { %v8486_v4 = vadd.s32 %v2405_v41, %v2403_v13  ;;  %4057 = vmatmul.f32.gmra.mxu1 %v3107_v0  ;;  %v3108_v30 = vsub.f32 %v3106_v33, %v3107_v0  ;;  %v2610_v11 = vsel %vm2609_vm1, %v2605_v56, inf  ;;  %v2702_v56 = vshra.s32 %v8493_v17, 16 }
 0x485   :  { %2691 = vmin.xlane.f32.xlu1 %v8488_v32  ;;  %2611 = vmin.xlane.f32.xlu0 %v2610_v11  ;;  %v2419_v49 = vshll.u32 %v2418_v22, 16  ;;  %v2619_v16 = vcvt.s32.f32 %v2617_v42  ;;  %v8524_v22 = vsel %vm2008_vm7, %v6583_v21, 128 }
 0x486   :  { %10446 = vst [vmem:[#allocation96_spill] sm:$0xff] %v8486_v4  ;;  %vm10051_vm9 = vcmp.eq.s32.totalorder %v6583_v21, %v8486_v4  ;;  %v3109_v31 = vand.u32 4294901760, %v3108_v30 }
 0x487   :  { %v3686_v13 = vpop.f32.mrf.mxu0  ;;  %5618 = vmatmul.msk.f32.gmra.mxu3 %vm10051_vm9, %v10334_v52  ;;  %v5570_v6 = vsel %vm10051_vm9, 1.0, %v10327_v7 }
 0x488   :  { %3110 = vmatmul.f32.gmra.mxu2 %v3109_v31  ;;  %v3114_v33 = vsub.f32 %v5570_v6, %v5570_v6  ;;  %v5049_v41 = vadd.f32 %v5570_v6, %v5048_v40  ;;  %v8521_v40 = vcvt.s32.f32 %v2702_v56 }
 0x489   :  { %v8510_v0 = vpop.f32.mrf.mxu1  ;;  %v2416_v30 = vpop.xlane.xlu0 %2415 }
 0x48a   :  { %v3436_v11 = vpop.f32.mrf.mxu3  ;;  %v2417_v60 = vcvt.f32.s32 %v2416_v30  ;;  %3765 = vmatmul.f32.gmra.mxu0 %v3114_v33  ;;  %v3115_v2 = vand.u32 4294901760, %v3114_v33  ;;  %v8515_v4 = vpop.xlane.xlu1 %2621  ;;  %v2432_v30 = vcvt.f32.s32 %v8143_v62  ;;  %v2631_v62 = vand.u32 65535, %v8141_v18 }
 0x48b   :  { %v2983_v47 = vpop.f32.mrf.mxu2  ;;  %vm2623_vm1 = vcmp.eq.f32.partialorder %v8121_v34, %v8515_v4 }
 0x48c   :  { %v8517_v31 = vadd.s32 %v2419_v49, %v2417_v60  ;;  %v3433_v10 = vadd.f32 %v3432_v37, %v2983_v47  ;;  %4063 = vmatmul.f32.gmra.mxu1 %v3115_v2  ;;  %v2624_v45 = vsel %vm2623_vm1, %v2619_v16, inf  ;;  %v3116_v6 = vsub.f32 %v3114_v33, %v3115_v2 }
 0x48d   :  { %2625 = vmin.xlane.f32.xlu2 %v2624_v45  ;;  %2705 = vmin.xlane.f32.xlu0 %v8521_v40  ;;  %v2433_v56 = vshll.u32 %v2432_v30, 16  ;;  %v2633_v12 = vcvt.s32.f32 %v2631_v62  ;;  %v2446_v30 = vcvt.f32.s32 %v8172_v29  ;;  %v2645_v29 = vand.u32 65535, %v8170_v57 }
 0x48e   :  { %10447 = vst [vmem:[#allocation97_spill] sm:$0xff] %v8517_v31  ;;  %v3682_v26 = vadd.f32 %v3681_v25, %v3433_v10  ;;  %vm2754_vm9 = vcmp.eq.s32.totalorder %v6583_v21, %v8517_v31  ;;  %v3117_v34 = vand.u32 4294901760, %v3116_v6  ;;  %v2716_v25 = vshra.s32 %v8524_v22, 16 }
 0x48f   :  { %v3691_v47 = vpop.f32.mrf.mxu0  ;;  %5619 = vmatmul.msk.f32.gmra.mxu3 %vm2754_vm9, %v10334_v52  ;;  %v5571_v2 = vsel %vm2754_vm9, 1.0, %v10327_v7 }
 0x490   :  { %v3122_v60 = vsub.f32 %v5571_v2, %v5571_v2  ;;  %v5050_v49 = vadd.f32 %v5571_v2, %v5049_v41  ;;  %v8541_v37 = vadd.f32 %v8477_v20, %v3682_v26  ;;  %3118 = vmatmul.f32.gmra.mxu2 %v3117_v34  ;;  %v8547_v41 = vcvt.s32.f32 %v2716_v25 }
 0x491   :  { %v3974_v10 = vpop.f32.mrf.mxu1  ;;  %v2430_v42 = vpop.xlane.xlu0 %2429 }
 0x492   :  { %v3440_v33 = vpop.f32.mrf.mxu3  ;;  %v2431_v16 = vcvt.f32.s32 %v2430_v42  ;;  %3770 = vmatmul.f32.gmra.mxu0 %v3122_v60  ;;  %v3123_v45 = vand.u32 4294901760, %v3122_v60  ;;  %v8543_v6 = vpop.xlane.xlu1 %2635 }
 0x493   :  { %v2991_v31 = vpop.f32.mrf.mxu2  ;;  %vm2637_vm7 = vcmp.eq.f32.partialorder %v8150_v14, %v8543_v6 }
 0x494   :  { %v8545_v18 = vadd.s32 %v2433_v56, %v2431_v16  ;;  %v3437_v27 = vadd.f32 %v3436_v11, %v2991_v31  ;;  %4069 = vmatmul.f32.gmra.mxu1 %v3123_v45  ;;  %v2638_v26 = vsel %vm2637_vm7, %v2633_v12, inf  ;;  %v3124_v20 = vsub.f32 %v3122_v60, %v3123_v45 }
 0x495   :  { %2719 = vmin.xlane.f32.xlu2 %v8547_v41  ;;  %2639 = vmin.xlane.f32.xlu1 %v2638_v26  ;;  %v2447_v60 = vshll.u32 %v2446_v30, 16  ;;  %v2647_v26 = vcvt.s32.f32 %v2645_v29 }
 0x496   :  { %v3687_v34 = vadd.f32 %v3686_v13, %v3437_v27  ;;  %vm10054_vm1 = vcmp.eq.s32.totalorder %v6583_v21, %v8545_v18  ;;  %v3125_v31 = vand.u32 4294901760, %v3124_v20 }
 0x497   :  { %5620 = vmatmul.msk.f32.gmra.mxu3 %vm10054_vm1, %v10334_v52  ;;  %v3696_v11 = vpop.f32.mrf.mxu0  ;;  %v5572_v14 = vsel %vm10054_vm1, 1.0, %v10327_v7 }
 0x498   :  { %v3130_v12 = vsub.f32 %v5572_v14, %v5572_v14  ;;  %v5051_v27 = vadd.f32 %v5572_v14, %v5050_v49  ;;  %v8565_v13 = vadd.f32 %v8510_v0, %v3687_v34  ;;  %3126 = vmatmul.f32.gmra.mxu2 %v3125_v31  ;;  %v2460_v34 = vcvt.f32.s32 %v8194_v28 }
 0x499   :  { %v3980_v2 = vpop.f32.mrf.mxu1  ;;  %v2444_v62 = vpop.xlane.xlu0 %2443 }
 0x49a   :  { %v2445_v25 = vcvt.f32.s32 %v2444_v62  ;;  %v3444_v42 = vpop.f32.mrf.mxu3  ;;  %3775 = vmatmul.f32.gmra.mxu0 %v3130_v12  ;;  %v3131_v56 = vand.u32 4294901760, %v3130_v12  ;;  %v8567_v16 = vpop.xlane.xlu1 %2649  ;;  %v2461_v62 = vshll.u32 %v2460_v34, 16 }
 0x49b   :  { %v2999_v45 = vpop.f32.mrf.mxu2  ;;  %vm2651_vm7 = vcmp.eq.f32.partialorder %v8179_v58, %v8567_v16 }
 0x49c   :  { %v8569_v20 = vadd.s32 %v2447_v60, %v2445_v25  ;;  %v3441_v57 = vadd.f32 %v3440_v33, %v2999_v45  ;;  %4075 = vmatmul.f32.gmra.mxu1 %v3131_v56  ;;  %v2652_v0 = vsel %vm2651_vm7, %v2647_v26, inf  ;;  %v3132_v49 = vsub.f32 %v3130_v12, %v3131_v56 }
 0x49d   :  { %2653 = vmin.xlane.f32.xlu0 %v2652_v0 }
 0x49e   :  { %10448 = vst [vmem:[#allocation98_spill] sm:$0xff] %v8569_v20  ;;  %v3692_v30 = vadd.f32 %v3691_v47, %v3441_v57  ;;  %vm10071_vm1 = vcmp.eq.s32.totalorder %v6583_v21, %v8569_v20  ;;  %v3133_v33 = vand.u32 4294901760, %v3132_v49  ;;  %v2474_v49 = vcvt.f32.s32 %v8212_v8 }
 0x49f   :  { %5621 = vmatmul.msk.f32.gmra.mxu3 %vm10071_vm1, %v10334_v52  ;;  %v3701_v31 = vpop.f32.mrf.mxu0  ;;  %v5573_v58 = vsel %vm10071_vm1, 1.0, %v10327_v7 }
 0x4a0   :  { %v3138_v14 = vsub.f32 %v5573_v58, %v5573_v58  ;;  %v5052_v29 = vadd.f32 %v5573_v58, %v5051_v27  ;;  %v8584_v28 = vadd.f32 %v3974_v10, %v3692_v30  ;;  %3134 = vmatmul.f32.gmra.mxu2 %v3133_v33  ;;  %v2475_v33 = vshll.u32 %v2474_v49, 16 }
 0x4a1   :  { %v3986_v47 = vpop.f32.mrf.mxu1  ;;  %v2458_v12 = vpop.xlane.xlu0 %2457 }
 0x4a2   :  { %v2459_v60 = vcvt.f32.s32 %v2458_v12  ;;  %v3448_v25 = vpop.f32.mrf.mxu3  ;;  %3780 = vmatmul.f32.gmra.mxu0 %v3138_v14  ;;  %v3139_v56 = vand.u32 4294901760, %v3138_v14 }
 0x4a3   :  { %v3007_v45 = vpop.f32.mrf.mxu2 }
 0x4a4   :  { %v8586_v26 = vadd.s32 %v2461_v62, %v2459_v60  ;;  %v3445_v57 = vadd.f32 %v3444_v42, %v3007_v45  ;;  %4081 = vmatmul.f32.gmra.mxu1 %v3139_v56  ;;  %v3140_v0 = vsub.f32 %v3138_v14, %v3139_v56 }
 0x4a6   :  { %v3697_v20 = vadd.f32 %v3696_v11, %v3445_v57  ;;  %vm10057_vm7 = vcmp.eq.s32.totalorder %v6583_v21, %v8586_v26  ;;  %v3141_v10 = vand.u32 4294901760, %v3140_v0  ;;  %v2488_v0 = vcvt.f32.s32 %v8232_v55 }
 0x4a7   :  { %5622 = vmatmul.msk.f32.gmra.mxu3 %vm10057_vm7, %v10334_v52  ;;  %v5574_v27 = vsel %vm10057_vm7, 1.0, %v10327_v7  ;;  %v3706_v8 = vpop.f32.mrf.mxu0 }
 0x4a8   :  { %v3146_v42 = vsub.f32 %v5574_v27, %v5574_v27  ;;  %v5053_v34 = vadd.f32 %v5574_v27, %v5052_v29  ;;  %v8599_v30 = vadd.f32 %v3980_v2, %v3697_v20  ;;  %3142 = vmatmul.f32.gmra.mxu2 %v3141_v10 }
 0x4a9   :  { %v2472_v11 = vpop.xlane.xlu0 %2471  ;;  %v3992_v62 = vpop.f32.mrf.mxu1 }
 0x4aa   :  { %v2473_v58 = vcvt.f32.s32 %v2472_v11  ;;  %v3452_v14 = vpop.f32.mrf.mxu3  ;;  %3785 = vmatmul.f32.gmra.mxu0 %v3146_v42  ;;  %v3147_v12 = vand.u32 4294901760, %v3146_v42 }
 0x4ab   :  { %v3015_v60 = vpop.f32.mrf.mxu2 }
 0x4ac   :  { %v8601_v56 = vadd.s32 %v2475_v33, %v2473_v58  ;;  %v3449_v45 = vadd.f32 %v3448_v25, %v3015_v60  ;;  %4087 = vmatmul.f32.gmra.mxu1 %v3147_v12  ;;  %v3148_v57 = vsub.f32 %v3146_v42, %v3147_v12 }
 0x4ae   :  { %10449 = vst [vmem:[#allocation99_spill] sm:$0xff] %v8601_v56  ;;  %v3702_v29 = vadd.f32 %v3701_v31, %v3449_v45  ;;  %vm10060_vm7 = vcmp.eq.s32.totalorder %v6583_v21, %v8601_v56  ;;  %v3149_v2 = vand.u32 4294901760, %v3148_v57  ;;  %v2489_v31 = vshll.u32 %v2488_v0, 16 }
 0x4af   :  { %5623 = vmatmul.msk.f32.gmra.mxu3 %vm10060_vm7, %v10334_v52  ;;  %v5575_v20 = vsel %vm10060_vm7, 1.0, %v10327_v7  ;;  %v3711_v33 = vpop.f32.mrf.mxu0  ;;  %v2502_v56 = vcvt.f32.s32 %v8254_v19 }
 0x4b0   :  { %v3154_v25 = vsub.f32 %v5575_v20, %v5575_v20  ;;  %v5054_v49 = vadd.f32 %v5575_v20, %v5053_v34  ;;  %v8614_v10 = vadd.f32 %v3986_v47, %v3702_v29  ;;  %3150 = vmatmul.f32.gmra.mxu2 %v3149_v2 }
 0x4b1   :  { %v2486_v55 = vpop.xlane.xlu0 %2485  ;;  %v3998_v57 = vpop.f32.mrf.mxu1 }
 0x4b2   :  { %v2487_v27 = vcvt.f32.s32 %v2486_v55  ;;  %v3456_v42 = vpop.f32.mrf.mxu3  ;;  %3790 = vmatmul.f32.gmra.mxu0 %v3154_v25  ;;  %v3155_v11 = vand.u32 4294901760, %v3154_v25 }
 0x4b3   :  { %v3023_v58 = vpop.f32.mrf.mxu2 }
 0x4b4   :  { %v8616_v12 = vadd.s32 %v2489_v31, %v2487_v27  ;;  %v3453_v60 = vadd.f32 %v3452_v14, %v3023_v58  ;;  %4093 = vmatmul.f32.gmra.mxu1 %v3155_v11  ;;  %v3156_v45 = vsub.f32 %v3154_v25, %v3155_v11 }
 0x4b6   :  { %10450 = vst [vmem:[#allocation100_spill] sm:$0xff] %v8616_v12  ;;  %v3707_v34 = vadd.f32 %v3706_v8, %v3453_v60  ;;  %vm10063_vm7 = vcmp.eq.s32.totalorder %v6583_v21, %v8616_v12  ;;  %v3157_v47 = vand.u32 4294901760, %v3156_v45  ;;  %v2503_v8 = vshll.u32 %v2502_v56, 16 }
 0x4b7   :  { %5624 = vmatmul.msk.f32.gmra.mxu3 %vm10063_vm7, %v10334_v52  ;;  %v5576_v14 = vsel %vm10063_vm7, 1.0, %v10327_v7  ;;  %v3716_v60 = vpop.f32.mrf.mxu0  ;;  %v2516_v45 = vcvt.f32.s32 %v8280_v43 }
 0x4b8   :  { %v3162_v0 = vsub.f32 %v5576_v14, %v5576_v14  ;;  %v5055_v29 = vadd.f32 %v5576_v14, %v5054_v49  ;;  %v8629_v2 = vadd.f32 %v3992_v62, %v3707_v34  ;;  %3158 = vmatmul.f32.gmra.mxu2 %v3157_v47 }
 0x4b9   :  { %v2500_v19 = vpop.xlane.xlu0 %2499  ;;  %v4004_v49 = vpop.f32.mrf.mxu1 }
 0x4ba   :  { %v2501_v20 = vcvt.f32.s32 %v2500_v19  ;;  %3795 = vmatmul.f32.gmra.mxu0 %v3162_v0  ;;  %v3163_v25 = vand.u32 4294901760, %v3162_v0  ;;  %v3460_v55 = vpop.f32.mrf.mxu3 }
 0x4bb   :  { %v3031_v31 = vpop.f32.mrf.mxu2 }
 0x4bc   :  { %v8631_v27 = vadd.s32 %v2503_v8, %v2501_v20  ;;  %v3457_v11 = vadd.f32 %v3456_v42, %v3031_v31  ;;  %4099 = vmatmul.f32.gmra.mxu1 %v3163_v25  ;;  %v3164_v58 = vsub.f32 %v3162_v0, %v3163_v25 }
 0x4be   :  { %v3712_v12 = vadd.f32 %v3711_v33, %v3457_v11  ;;  %vm10064_vm7 = vcmp.eq.s32.totalorder %v6583_v21, %v8631_v27  ;;  %v3165_v62 = vand.u32 4294901760, %v3164_v58  ;;  %v2517_v33 = vshll.u32 %v2516_v45, 16 }
 0x4bf   :  { %5625 = vmatmul.msk.f32.gmra.mxu3 %vm10064_vm7, %v10334_v52  ;;  %v5577_v56 = vsel %vm10064_vm7, 1.0, %v10327_v7  ;;  %v2530_v11 = vcvt.f32.s32 %v8306_v5 }
 0x4c0   :  { %v3170_v42 = vsub.f32 %v5577_v56, %v5577_v56  ;;  %v5056_v34 = vadd.f32 %v5577_v56, %v5055_v29  ;;  %v8644_v47 = vadd.f32 %v3998_v57, %v3712_v12  ;;  %3166 = vmatmul.f32.gmra.mxu2 %v3165_v62  ;;  %v3721_v57 = vpop.f32.mrf.mxu0 }
 0x4c1   :  { %v2514_v43 = vpop.xlane.xlu0 %2513  ;;  %v4010_v5 = vpop.f32.mrf.mxu1  ;;  %v2531_v56 = vshll.u32 %v2530_v11, 16 }
 0x4c2   :  { %v2515_v14 = vcvt.f32.s32 %v2514_v43  ;;  %3800 = vmatmul.f32.gmra.mxu0 %v3170_v42  ;;  %v3171_v0 = vand.u32 4294901760, %v3170_v42  ;;  %v3464_v31 = vpop.f32.mrf.mxu3 }
 0x4c3   :  { %v3039_v19 = vpop.f32.mrf.mxu2 }
 0x4c4   :  { %v8646_v8 = vadd.s32 %v2517_v33, %v2515_v14  ;;  %v3461_v20 = vadd.f32 %v3460_v55, %v3039_v19  ;;  %4105 = vmatmul.f32.gmra.mxu1 %v3171_v0  ;;  %v3172_v25 = vsub.f32 %v3170_v42, %v3171_v0 }
 0x4c6   :  { %v3717_v58 = vadd.f32 %v3716_v60, %v3461_v20  ;;  %vm10065_vm7 = vcmp.eq.s32.totalorder %v6583_v21, %v8646_v8  ;;  %v3173_v12 = vand.u32 4294901760, %v3172_v25  ;;  %v2544_v20 = vcvt.f32.s32 %v8332_v23 }
 0x4c7   :  { %5626 = vmatmul.msk.f32.gmra.mxu3 %vm10065_vm7, %v10334_v52  ;;  %v5578_v29 = vsel %vm10065_vm7, 1.0, %v10327_v7 }
 0x4c8   :  { %v3178_v55 = vsub.f32 %v5578_v29, %v5578_v29  ;;  %v5057_v45 = vadd.f32 %v5578_v29, %v5056_v34  ;;  %v8659_v62 = vadd.f32 %v4004_v49, %v3717_v58  ;;  %3174 = vmatmul.f32.gmra.mxu2 %v3173_v12  ;;  %v3726_v23 = vpop.f32.mrf.mxu0  ;;  %v2545_v29 = vshll.u32 %v2544_v20, 16 }
 0x4c9   :  { %v2528_v60 = vpop.xlane.xlu0 %2527 }
 0x4ca   :  { %v2529_v42 = vcvt.f32.s32 %v2528_v60  ;;  %3805 = vmatmul.f32.gmra.mxu0 %v3178_v55  ;;  %v3179_v43 = vand.u32 4294901760, %v3178_v55  ;;  %v3468_v34 = vpop.f32.mrf.mxu3 }
 0x4cb   :  { %v3047_v33 = vpop.f32.mrf.mxu2 }
 0x4cc   :  { %v8661_v14 = vadd.s32 %v2531_v56, %v2529_v42  ;;  %v3465_v0 = vadd.f32 %v3464_v31, %v3047_v33  ;;  %4111 = vmatmul.f32.gmra.mxu1 %v3179_v43  ;;  %v3180_v19 = vsub.f32 %v3178_v55, %v3179_v43  ;;  %v4016_v56 = vpop.f32.mrf.mxu1 }
 0x4ce   :  { %10451 = vst [vmem:[#allocation101_spill] sm:$0xff] %v8661_v14  ;;  %v3722_v25 = vadd.f32 %v3721_v57, %v3465_v0  ;;  %vm10068_vm7 = vcmp.eq.s32.totalorder %v6583_v21, %v8661_v14  ;;  %v3181_v49 = vand.u32 4294901760, %v3180_v19  ;;  %v2558_v19 = vcvt.f32.s32 %v8354_v63 }
 0x4cf   :  { %5627 = vmatmul.msk.f32.gmra.mxu3 %vm10068_vm7, %v10334_v52  ;;  %v5579_v31 = vsel %vm10068_vm7, 1.0, %v10327_v7 }
 0x4d0   :  { %v3186_v11 = vsub.f32 %v5579_v31, %v5579_v31  ;;  %v5058_v58 = vadd.f32 %v5579_v31, %v5057_v45  ;;  %v8674_v12 = vadd.f32 %v4010_v5, %v3722_v25  ;;  %3182 = vmatmul.f32.gmra.mxu2 %v3181_v49  ;;  %v2559_v31 = vshll.u32 %v2558_v19, 16 }
 0x4d1   :  { %v2542_v57 = vpop.xlane.xlu0 %2541 }
 0x4d2   :  { %v2543_v55 = vcvt.f32.s32 %v2542_v57  ;;  %3810 = vmatmul.f32.gmra.mxu0 %v3186_v11  ;;  %v3187_v60 = vand.u32 4294901760, %v3186_v11  ;;  %v3472_v63 = vpop.f32.mrf.mxu3  ;;  %v3731_v57 = vpop.f32.mrf.mxu0 }
 0x4d3   :  { %v3055_v42 = vpop.f32.mrf.mxu2 }
 0x4d4   :  { %v8676_v43 = vadd.s32 %v2545_v29, %v2543_v55  ;;  %v3469_v33 = vadd.f32 %v3468_v34, %v3055_v42  ;;  %4117 = vmatmul.f32.gmra.mxu1 %v3187_v60  ;;  %v3188_v0 = vsub.f32 %v3186_v11, %v3187_v60 }
 0x4d6   :  { %v3727_v14 = vadd.f32 %v3726_v23, %v3469_v33  ;;  %vm10069_vm7 = vcmp.eq.s32.totalorder %v6583_v21, %v8676_v43  ;;  %v3189_v45 = vand.u32 4294901760, %v3188_v0  ;;  %v4022_v33 = vpop.f32.mrf.mxu1  ;;  %v2572_v0 = vcvt.f32.s32 %v8382_v1 }
 0x4d7   :  { %5628 = vmatmul.msk.f32.gmra.mxu3 %vm10069_vm7, %v10334_v52  ;;  %v5580_v5 = vsel %vm10069_vm7, 1.0, %v10327_v7 }
 0x4d8   :  { %v3194_v20 = vsub.f32 %v5580_v5, %v5580_v5  ;;  %v5059_v25 = vadd.f32 %v5580_v5, %v5058_v58  ;;  %v8689_v49 = vadd.f32 %v4016_v56, %v3727_v14  ;;  %3190 = vmatmul.f32.gmra.mxu2 %v3189_v45 }
 0x4d9   :  { %v2556_v34 = vpop.xlane.xlu0 %2555 }
 0x4da   :  { %v2557_v11 = vcvt.f32.s32 %v2556_v34  ;;  %3815 = vmatmul.f32.gmra.mxu0 %v3194_v20  ;;  %v3195_v23 = vand.u32 4294901760, %v3194_v20 }
 0x4db   :  { %v3063_v29 = vpop.f32.mrf.mxu2 }
 0x4dc   :  { %v8691_v55 = vadd.s32 %v2559_v31, %v2557_v11  ;;  %v3473_v60 = vadd.f32 %v3472_v63, %v3063_v29  ;;  %4123 = vmatmul.f32.gmra.mxu1 %v3195_v23  ;;  %v3196_v42 = vsub.f32 %v3194_v20, %v3195_v23  ;;  %v2573_v20 = vshll.u32 %v2572_v0, 16  ;;  %v3476_v31 = vpop.f32.mrf.mxu3 }
 0x4de   :  { %v3732_v58 = vadd.f32 %v3731_v57, %v3473_v60  ;;  %vm10070_vm7 = vcmp.eq.s32.totalorder %v6583_v21, %v8691_v55  ;;  %v3197_v14 = vand.u32 4294901760, %v3196_v42  ;;  %v3736_v60 = vpop.f32.mrf.mxu0  ;;  %v2659_v42 = vand.u32 65535, %v8391_v44 }
 0x4df   :  { %5629 = vmatmul.msk.f32.gmra.mxu3 %vm10070_vm7, %v10334_v52  ;;  %v5581_v56 = vsel %vm10070_vm7, 1.0, %v10327_v7 }
 0x4e0   :  { %v3202_v19 = vsub.f32 %v5581_v56, %v5581_v56  ;;  %v5060_v45 = vadd.f32 %v5581_v56, %v5059_v25  ;;  %v8704_v5 = vadd.f32 %v4022_v33, %v3732_v58  ;;  %3198 = vmatmul.f32.gmra.mxu2 %v3197_v14  ;;  %v2586_v25 = vcvt.f32.s32 %v8416_v15  ;;  %v4028_v58 = vpop.f32.mrf.mxu1 }
 0x4e1   :  { %v2570_v1 = vpop.xlane.xlu0 %2569 }
 0x4e2   :  { %v2571_v63 = vcvt.f32.s32 %v2570_v1  ;;  %3820 = vmatmul.f32.gmra.mxu0 %v3202_v19  ;;  %v3203_v34 = vand.u32 4294901760, %v3202_v19  ;;  %v2587_v1 = vshll.u32 %v2586_v25, 16 }
 0x4e3   :  { %v3071_v11 = vpop.f32.mrf.mxu2 }
 0x4e4   :  { %v8706_v23 = vadd.s32 %v2573_v20, %v2571_v63  ;;  %v3477_v57 = vadd.f32 %v3476_v31, %v3071_v11  ;;  %4129 = vmatmul.f32.gmra.mxu1 %v3203_v34  ;;  %v3204_v29 = vsub.f32 %v3202_v19, %v3203_v34  ;;  %v2661_v31 = vcvt.s32.f32 %v2659_v42 }
 0x4e6   :  { %v3737_v33 = vadd.f32 %v3736_v60, %v3477_v57  ;;  %vm10072_vm7 = vcmp.eq.s32.totalorder %v6583_v21, %v8706_v23  ;;  %v3205_v0 = vand.u32 4294901760, %v3204_v29  ;;  %v2600_v60 = vcvt.f32.s32 %v8451_v59 }
 0x4e7   :  { %5630 = vmatmul.msk.f32.gmra.mxu3 %vm10072_vm7, %v10334_v52  ;;  %v5582_v14 = vsel %vm10072_vm7, 1.0, %v10327_v7 }
 0x4e8   :  { %v3210_v56 = vsub.f32 %v5582_v14, %v5582_v14  ;;  %v5061_v44 = vadd.f32 %v5582_v14, %v5060_v45  ;;  %v8720_v19 = vadd.f32 %v4028_v58, %v3737_v33  ;;  %3206 = vmatmul.f32.gmra.mxu2 %v3205_v0  ;;  %v2584_v15 = vpop.xlane.xlu2 %2583  ;;  %v2673_v45 = vand.u32 65535, %v8425_v50 }
 0x4e9   :  { %v2585_v20 = vcvt.f32.s32 %v2584_v15  ;;  %v8722_v63 = vpop.xlane.xlu0 %2663  ;;  %v2601_v58 = vshll.u32 %v2600_v60, 16 }
 0x4ea   :  { %3825 = vmatmul.f32.gmra.mxu0 %v3210_v56  ;;  %v3211_v34 = vand.u32 4294901760, %v3210_v56  ;;  %vm2665_vm1 = vcmp.eq.f32.partialorder %v8422_v53, %v8722_v63  ;;  %v2675_v0 = vcvt.s32.f32 %v2673_v45 }
 0x4eb   :  { %v8726_v11 = vadd.s32 %v2587_v1, %v2585_v20  ;;  %v2666_v57 = vsel %vm2665_vm1, %v2661_v31, inf }
 0x4ec   :  { %4135 = vmatmul.f32.gmra.mxu1 %v3211_v34  ;;  %v3212_v29 = vsub.f32 %v3210_v56, %v3211_v34  ;;  %2667 = vmin.xlane.f32.xlu1 %v2666_v57  ;;  %v2614_v34 = vcvt.f32.s32 %v8484_v54 }
 0x4ed   :  { %vm10073_vm7 = vcmp.eq.s32.totalorder %v6583_v21, %v8726_v11 }
 0x4ee   :  { %v3213_v25 = vand.u32 4294901760, %v3212_v29  ;;  %v5583_v53 = vsel %vm10073_vm7, 1.0, %v10327_v7  ;;  %v2615_v60 = vshll.u32 %v2614_v34, 16 }
 0x4ef   :  { %5631 = vmatmul.msk.f32.gmra.mxu3 %vm10073_vm7, %v10334_v52  ;;  %v3218_v42 = vsub.f32 %v5583_v53, %v5583_v53  ;;  %v5062_v33 = vadd.f32 %v5583_v53, %v5061_v44  ;;  %v2687_v44 = vand.u32 65535, %v8460_v39 }
 0x4f0   :  { %3214 = vmatmul.f32.gmra.mxu2 %v3213_v25  ;;  %v8740_v50 = vpop.xlane.xlu2 %2677  ;;  %v2598_v59 = vpop.xlane.xlu1 %2597 }
 0x4f1   :  { %v2599_v14 = vcvt.f32.s32 %v2598_v59  ;;  %vm2679_vm1 = vcmp.eq.f32.partialorder %v8455_v3, %v8740_v50  ;;  %v3219_v56 = vand.u32 4294901760, %v3218_v42  ;;  %v2689_v45 = vcvt.s32.f32 %v2687_v44 }
 0x4f2   :  { %3830 = vmatmul.f32.gmra.mxu0 %v3218_v42  ;;  %v2680_v15 = vsel %vm2679_vm1, %v2675_v0, inf }
 0x4f3   :  { %v8744_v1 = vadd.s32 %v2601_v58, %v2599_v14  ;;  %2681 = vmin.xlane.f32.xlu2 %v2680_v15  ;;  %v3220_v20 = vsub.f32 %v3218_v42, %v3219_v56  ;;  %v8762_v42 = vpop.f32.mrf.mxu3  ;;  %v5748_v58 = vld [vmem:[%s9863_s0] sm:$0xff]  ;;  %v2628_v15 = vcvt.f32.s32 %v8515_v4 }
 0x4f4   :  { %4141 = vmatmul.f32.gmra.mxu1 %v3219_v56  ;;  %v5079_v14 = vmul.f32 %v5748_v58, %v5748_v58  ;;  %v2701_v56 = vand.u32 65535, %v8493_v17  ;;  %v2715_v58 = vand.u32 65535, %v8524_v22 }
 0x4f5   :  { %10452 = vst [vmem:[#allocation102_spill] sm:$0xff] %v8744_v1  ;;  %vm10074_vm7 = vcmp.eq.s32.totalorder %v6583_v21, %v8744_v1  ;;  %v3221_v31 = vand.u32 4294901760, %v3220_v20 }
 0x4f6   :  { %v5584_v3 = vsel %vm10074_vm7, 1.0, %v10327_v7  ;;  %v5127_v4 = vsel %vm76_vm0, %v5079_v14, 0.0  ;;  %v5749_v14 = vld [vmem:[%s9863_s0 + $0x18] sm:$0xff] }
 0x4f7   :  { %5632 = vmatmul.msk.f32.gmra.mxu3 %vm10074_vm7, %v10334_v52  ;;  %v3226_v57 = vsub.f32 %v5584_v3, %v5584_v3  ;;  %v5063_v29 = vadd.f32 %v5584_v3, %v5062_v33  ;;  %v2703_v3 = vcvt.s32.f32 %v2701_v56 }
 0x4f8   :  { %3222 = vmatmul.f32.gmra.mxu2 %v3221_v31  ;;  %v8758_v39 = vpop.xlane.xlu1 %2691  ;;  %v2612_v54 = vpop.xlane.xlu0 %2611 }
 0x4f9   :  { %v2613_v25 = vcvt.f32.s32 %v2612_v54  ;;  %vm2693_vm1 = vcmp.eq.f32.partialorder %v8488_v32, %v8758_v39  ;;  %v3227_v53 = vand.u32 4294901760, %v3226_v57 }
 0x4fa   :  { %3835 = vmatmul.f32.gmra.mxu0 %v3226_v57  ;;  %v2694_v59 = vsel %vm2693_vm1, %v2689_v45, inf }
 0x4fb   :  { %v8764_v0 = vadd.s32 %v2615_v60, %v2613_v25  ;;  %2695 = vmin.xlane.f32.xlu0 %v2694_v59  ;;  %v3228_v33 = vsub.f32 %v3226_v57, %v3227_v53  ;;  %v2629_v57 = vshll.u32 %v2628_v15, 16  ;;  %v8786_v60 = vpop.f32.mrf.mxu2  ;;  %v2642_v59 = vcvt.f32.s32 %v8543_v6  ;;  %v5750_v15 = vld [vmem:[%s9863_s0 + $0x8] sm:$0xff] }
 0x4fc   :  { %4147 = vmatmul.f32.gmra.mxu1 %v3227_v53 }
 0x4fd   :  { %10453 = vst [vmem:[#allocation103_spill] sm:$0xff] %v8764_v0  ;;  %vm10075_vm7 = vcmp.eq.s32.totalorder %v6583_v21, %v8764_v0  ;;  %v3229_v32 = vand.u32 4294901760, %v3228_v33  ;;  %v8791_v33 = vpop.f32.mrf.mxu3 }
 0x4fe   :  { %v5585_v20 = vsel %vm10075_vm7, 1.0, %v10327_v7 }
 0x4ff   :  { %5633 = vmatmul.msk.f32.gmra.mxu3 %vm10075_vm7, %v10334_v52  ;;  %v3234_v44 = vsub.f32 %v5585_v20, %v5585_v20  ;;  %v5064_v34 = vadd.f32 %v5585_v20, %v5063_v29 }
 0x500   :  { %3230 = vmatmul.f32.gmra.mxu2 %v3229_v32  ;;  %v2626_v17 = vpop.xlane.xlu2 %2625  ;;  %v8781_v31 = vpop.xlane.xlu0 %2705  ;;  %v5080_v32 = vmul.f32 %v5750_v15, %v5750_v15  ;;  %v2656_v15 = vcvt.f32.s32 %v8567_v16 }
 0x501   :  { %v2627_v54 = vcvt.f32.s32 %v2626_v17  ;;  %v3235_v45 = vand.u32 4294901760, %v3234_v44  ;;  %vm2707_vm1 = vcmp.eq.f32.partialorder %v8521_v40, %v8781_v31  ;;  %v5082_v40 = vmul.f32 %v5749_v14, %v5749_v14 }
 0x502   :  { %3840 = vmatmul.f32.gmra.mxu0 %v3234_v44  ;;  %v2708_v25 = vsel %vm2707_vm1, %v2703_v3, inf  ;;  %v2717_v3 = vcvt.s32.f32 %v2715_v58  ;;  %v5751_v58 = vld [vmem:[%s9863_s0 + $0x10] sm:$0xff] }
 0x503   :  { %v8788_v53 = vadd.s32 %v2629_v57, %v2627_v54  ;;  %5128 = vadd.xlane.f32.xlu0 %v5127_v4  ;;  %v3236_v29 = vsub.f32 %v3234_v44, %v3235_v45  ;;  %2709 = vmin.xlane.f32.xlu1 %v2708_v25  ;;  %v2643_v44 = vshll.u32 %v2642_v59, 16  ;;  %v5136_v57 = vsel %vm76_vm0, %v5082_v40, 0.0  ;;  %v8818_v59 = vpop.f32.mrf.mxu2 }
 0x504   :  { %4153 = vmatmul.f32.gmra.mxu1 %v3235_v45  ;;  %v5130_v25 = vsel %vm76_vm0, %v5080_v32, 0.0  ;;  %v5081_v40 = vmul.f32 %v5751_v58, %v5751_v58 }
 0x505   :  { %10454 = vst [vmem:[#allocation104_spill] sm:$0xff] %v8788_v53  ;;  %vm10100_vm1 = vcmp.eq.s32.totalorder %v6583_v21, %v8788_v53  ;;  %v3237_v56 = vand.u32 4294901760, %v3236_v29  ;;  %v9014_v53 = vpop.f32.mrf.mxu1 }
 0x506   :  { %v5586_v22 = vsel %vm10100_vm1, 1.0, %v10327_v7 }
 0x507   :  { %5634 = vmatmul.msk.f32.gmra.mxu3 %vm10100_vm1, %v10334_v52  ;;  %v3242_v6 = vsub.f32 %v5586_v22, %v5586_v22  ;;  %v5065_v20 = vadd.f32 %v5586_v22, %v5064_v34  ;;  %v5753_v22 = vld [vmem:[%s9863_s0 + $0x20] sm:$0xff]  ;;  %vm5415_vm1 = vcmask 7168  }
 0x508   :  { %3238 = vmatmul.f32.gmra.mxu2 %v3237_v56  ;;  %v8810_v17 = vpop.xlane.xlu2 %2719  ;;  %v2640_v4 = vpop.xlane.xlu1 %2639 }
 0x509   :  { %v2641_v54 = vcvt.f32.s32 %v2640_v4  ;;  %vm2721_vm7 = vcmp.eq.f32.partialorder %v8547_v41, %v8810_v17  ;;  %v3243_v45 = vand.u32 4294901760, %v3242_v6  ;;  %v5752_v41 = vld [vmem:[%s9863_s0 + $0x30] sm:$0xff] }
 0x50a   :  { %3845 = vmatmul.f32.gmra.mxu0 %v3242_v6  ;;  %v2722_v29 = vsel %vm2721_vm7, %v2717_v3, inf  ;;  %v5085_v56 = vmul.f32 %v5752_v41, %v5752_v41 }
 0x50b   :  { %v8816_v14 = vadd.s32 %v2643_v44, %v2641_v54  ;;  %2723 = vmin.xlane.f32.xlu2 %v2722_v29  ;;  %5137 = vadd.xlane.f32.xlu0 %v5136_v57  ;;  %v3244_v34 = vsub.f32 %v3242_v6, %v3243_v45  ;;  %v5083_v6 = vmul.f32 %v5753_v22, %v5753_v22  ;;  %v8832_v44 = vpop.f32.mrf.mxu3  ;;  %v5133_v54 = vsel %vm76_vm0, %v5081_v40, 0.0 }
 0x50c   :  { %4159 = vmatmul.f32.gmra.mxu1 %v3243_v45  ;;  %5131 = vadd.xlane.f32.xlu1 %v5130_v25  ;;  %v5145_v45 = vsel %vm76_vm0, %v5085_v56, 0.0  ;;  %v2657_v25 = vshll.u32 %v2656_v15, 16  ;;  %v5755_v56 = vld [vmem:[%s9863_s0 + $0x48] sm:$0xff] }
 0x50d   :  { %10455 = vst [vmem:[#allocation105_spill] sm:$0xff] %v8816_v14  ;;  %vm10076_vm7 = vcmp.eq.s32.totalorder %v6583_v21, %v8816_v14  ;;  %v3245_v32 = vand.u32 4294901760, %v3244_v34  ;;  %v5139_v58 = vsel %vm76_vm0, %v5083_v6, 0.0  ;;  %v5088_v15 = vmul.f32 %v5755_v56, %v5755_v56  ;;  %v5756_v6 = vld [vmem:[%s9863_s0 + $0x38] sm:$0xff] }
 0x50e   :  { %v5587_v16 = vsel %vm10076_vm7, 1.0, %v10327_v7 }
 0x50f   :  { %5635 = vmatmul.msk.f32.gmra.mxu3 %vm10076_vm7, %v10334_v52  ;;  %v3250_v4 = vsub.f32 %v5587_v16, %v5587_v16  ;;  %v5066_v3 = vadd.f32 %v5587_v16, %v5065_v20  ;;  %v5754_v20 = vld [vmem:[%s9863_s0 + $0x28] sm:$0xff]  ;;  %v5086_v16 = vmul.f32 %v5756_v6, %v5756_v6  ;;  %v5759_v6 = vld [vmem:[%s9863_s0 + $0x50] sm:$0xff] }
 0x510   :  { %3246 = vmatmul.f32.gmra.mxu2 %v3245_v32  ;;  %v2654_v57 = vpop.xlane.xlu0 %2653  ;;  %v5084_v40 = vmul.f32 %v5754_v20, %v5754_v20 }
 0x511   :  { %v2655_v29 = vcvt.f32.s32 %v2654_v57  ;;  %v3251_v34 = vand.u32 4294901760, %v3250_v4 }
 0x512   :  { %3850 = vmatmul.f32.gmra.mxu0 %v3250_v4 }
 0x513   :  { %v8845_v41 = vadd.s32 %v2657_v25, %v2655_v29  ;;  %5134 = vadd.xlane.f32.xlu2 %v5133_v54  ;;  %5146 = vadd.xlane.f32.xlu0 %v5145_v45  ;;  %v3252_v22 = vsub.f32 %v3250_v4, %v3251_v34  ;;  %v8858_v4 = vpop.f32.mrf.mxu2  ;;  %v8870_v25 = vpop.f32.mrf.mxu3  ;;  %v5142_v29 = vsel %vm76_vm0, %v5084_v40, 0.0  ;;  %v5758_v40 = vld [vmem:[%s9863_s0 + $0x60] sm:$0xff] }
 0x514   :  { %4165 = vmatmul.f32.gmra.mxu1 %v3251_v34  ;;  %5140 = vadd.xlane.f32.xlu1 %v5139_v58  ;;  %10457 = vst [vmem:[#allocation107_spill] sm:$0xff] %v8870_v25  ;;  %v5154_v34 = vsel %vm76_vm0, %v5088_v15, 0.0  ;;  %v5148_v58 = vsel %vm76_vm0, %v5086_v16, 0.0  ;;  %v5089_v16 = vmul.f32 %v5759_v6, %v5759_v6 }
 0x515   :  { %10456 = vst [vmem:[#allocation106_spill] sm:$0xff] %v8845_v41  ;;  %vm10083_vm7 = vcmp.eq.s32.totalorder %v6583_v21, %v8845_v41  ;;  %v3253_v32 = vand.u32 4294901760, %v3252_v22 }
 0x516   :  { %v5588_v57 = vsel %vm10083_vm7, 1.0, %v10327_v7 }
 0x517   :  { %5636 = vmatmul.msk.f32.gmra.mxu3 %vm10083_vm7, %v10334_v52  ;;  %v3258_v54 = vsub.f32 %v5588_v57, %v5588_v57  ;;  %v8868_v45 = vadd.f32 %v5588_v57, %v5066_v3  ;;  %v5757_v3 = vld [vmem:[%s9863_s0 + $0x40] sm:$0xff] }
 0x518   :  { %3254 = vmatmul.f32.gmra.mxu2 %v3253_v32  ;;  %v5087_v56 = vmul.f32 %v5757_v3, %v5757_v3  ;;  %v5091_v32 = vmul.f32 %v5758_v40, %v5758_v40  ;;  %v5761_v3 = vld [vmem:[%s9863_s0 + $0x78] sm:$0xff] }
 0x519   :  { %v3259_v22 = vand.u32 4294901760, %v3258_v54  ;;  %v5094_v40 = vmul.f32 %v5761_v3, %v5761_v3 }
 0x51a   :  { %3855 = vmatmul.f32.gmra.mxu0 %v3258_v54 }
 0x51b   :  { %5143 = vadd.xlane.f32.xlu2 %v5142_v29  ;;  %5155 = vadd.xlane.f32.xlu0 %v5154_v34  ;;  %v3260_v20 = vsub.f32 %v3258_v54, %v3259_v22  ;;  %v8884_v57 = vpop.f32.mrf.mxu2  ;;  %v5151_v54 = vsel %vm76_vm0, %v5087_v56, 0.0  ;;  %v5163_v29 = vsel %vm76_vm0, %v5091_v32, 0.0  ;;  %v5157_v34 = vsel %vm76_vm0, %v5089_v16, 0.0  ;;  %v5762_v56 = vld [vmem:[%s9863_s0 + $0x68] sm:$0xff] }
 0x51c   :  { %5149 = vadd.xlane.f32.xlu1 %v5148_v58  ;;  %4171 = vmatmul.f32.gmra.mxu1 %v3259_v22  ;;  %10458 = vst [vmem:[#allocation108_spill] sm:$0xff] %v8884_v57  ;;  %v8889_v58 = vpop.f32.mrf.mxu3  ;;  %v5760_v22 = vld [vmem:[%s9863_s0 + $0x58] sm:$0xff]  ;;  %v5092_v32 = vmul.f32 %v5762_v56, %v5762_v56  ;;  %v5172_v6 = vsel %vm76_vm0, %v5094_v40, 0.0  ;;  %v5765_v40 = vld [vmem:[%s9863_s0 + $0x80] sm:$0xff] }
 0x51d   :  { %v3261_v15 = vand.u32 4294901760, %v3260_v20  ;;  %10459 = vst [vmem:[#allocation109_spill] sm:$0xff] %v8889_v58  ;;  %v5090_v20 = vmul.f32 %v5760_v22, %v5760_v22  ;;  %v5095_v56 = vmul.f32 %v5765_v40, %v5765_v40  ;;  %v5767_v40 = vld [vmem:[%s9863_s0 + $0xa8] sm:$0xff]  ;;  %v2684_v58 = vcvt.f32.s32 %v8740_v50 }
 0x51e   :  { %v5166_v16 = vsel %vm76_vm0, %v5092_v32, 0.0  ;;  %v5100_v41 = vmul.f32 %v5767_v40, %v5767_v40 }
 0x520   :  { %3262 = vmatmul.f32.gmra.mxu2 %v3261_v15  ;;  %v5160_v15 = vsel %vm76_vm0, %v5090_v20, 0.0  ;;  %v5764_v20 = vld [vmem:[%s9863_s0 + $0x90] sm:$0xff] }
 0x521   :  { %v5097_v3 = vmul.f32 %v5764_v20, %v5764_v20 }
 0x523   :  { %5152 = vadd.xlane.f32.xlu2 %v5151_v54  ;;  %5164 = vadd.xlane.f32.xlu0 %v5163_v29  ;;  %v8903_v54 = vpop.f32.mrf.mxu2 }
 0x524   :  { %5158 = vadd.xlane.f32.xlu1 %v5157_v34  ;;  %10460 = vst [vmem:[#allocation110_spill] sm:$0xff] %v8903_v54  ;;  %v8905_v29 = vpop.f32.mrf.mxu3  ;;  %v5763_v34 = vld [vmem:[%s9863_s0 + $0x70] sm:$0xff] }
 0x525   :  { %10461 = vst [vmem:[#allocation111_spill] sm:$0xff] %v8905_v29  ;;  %v5093_v22 = vmul.f32 %v5763_v34, %v5763_v34  ;;  %v5766_v34 = vld [vmem:[%s9863_s0 + $0x88] sm:$0xff] }
 0x526   :  { %v5096_v20 = vmul.f32 %v5766_v34, %v5766_v34  ;;  %v5769_v34 = vld [vmem:[%s9863_s0 + $0xa0] sm:$0xff] }
 0x527   :  { %v5169_v32 = vsel %vm76_vm0, %v5093_v22, 0.0  ;;  %v5768_v22 = vld [vmem:[%s9863_s0 + $0x98] sm:$0xff]  ;;  %v5099_v40 = vmul.f32 %v5769_v34, %v5769_v34 }
 0x528   :  { %v5772_v34 = vld [vmem:[%s9863_s0 + $0xb8] sm:$0xff] }
 0x52b   :  { %5161 = vadd.xlane.f32.xlu2 %v5160_v15  ;;  %5173 = vadd.xlane.f32.xlu0 %v5172_v6  ;;  %v5181_v15 = vsel %vm76_vm0, %v5097_v3, 0.0  ;;  %v5175_v6 = vsel %vm76_vm0, %v5095_v56, 0.0  ;;  %v5098_v3 = vmul.f32 %v5768_v22, %v5768_v22  ;;  %v5770_v22 = vld [vmem:[%s9863_s0 + $0xc0] sm:$0xff] }
 0x52c   :  { %5167 = vadd.xlane.f32.xlu1 %v5166_v16  ;;  %v8919_v16 = vpop.f32.mrf.mxu2  ;;  %v8930_v56 = vpop.f32.mrf.mxu3  ;;  %v5103_v14 = vmul.f32 %v5770_v22, %v5770_v22  ;;  %v5102_v22 = vmul.f32 %v5772_v34, %v5772_v34  ;;  %v5775_v34 = vld [vmem:[%s9863_s0 + $0xd0] sm:$0xff] }
 0x52d   :  { %10462 = vst [vmem:[#allocation112_spill] sm:$0xff] %v8919_v16 }
 0x52e   :  { %10463 = vst [vmem:[#allocation113_spill] sm:$0xff] %v8930_v56 }
 0x533   :  { %5170 = vadd.xlane.f32.xlu2 %v5169_v32  ;;  %5182 = vadd.xlane.f32.xlu0 %v5181_v15  ;;  %v5178_v32 = vsel %vm76_vm0, %v5096_v20, 0.0  ;;  %v5190_v15 = vsel %vm76_vm0, %v5100_v41, 0.0  ;;  %v5771_v20 = vld [vmem:[%s9863_s0 + $0xb0] sm:$0xff] }
 0x534   :  { %5176 = vadd.xlane.f32.xlu1 %v5175_v6  ;;  %v5184_v6 = vsel %vm76_vm0, %v5098_v3, 0.0  ;;  %v5101_v41 = vmul.f32 %v5771_v20, %v5771_v20  ;;  %v8944_v56 = vpop.f32.mrf.mxu2  ;;  %v8946_v3 = vpop.f32.mrf.mxu3  ;;  %v5773_v20 = vld [vmem:[%s9863_s0 + $0xd8] sm:$0xff] }
 0x535   :  { %10464 = vst [vmem:[#allocation114_spill] sm:$0xff] %v8944_v56  ;;  %v5106_v56 = vmul.f32 %v5773_v20, %v5773_v20  ;;  %v5105_v20 = vmul.f32 %v5775_v34, %v5775_v34 }
 0x536   :  { %10465 = vst [vmem:[#allocation115_spill] sm:$0xff] %v8946_v3 }
 0x53b   :  { %5179 = vadd.xlane.f32.xlu2 %v5178_v32  ;;  %5191 = vadd.xlane.f32.xlu0 %v5190_v15  ;;  %v5187_v32 = vsel %vm76_vm0, %v5099_v40, 0.0  ;;  %v5199_v15 = vsel %vm76_vm0, %v5103_v14, 0.0  ;;  %v5774_v40 = vld [vmem:[%s9863_s0 + $0xc8] sm:$0xff] }
 0x53c   :  { %5185 = vadd.xlane.f32.xlu1 %v5184_v6  ;;  %v5193_v6 = vsel %vm76_vm0, %v5101_v41, 0.0  ;;  %v5104_v14 = vmul.f32 %v5774_v40, %v5774_v40  ;;  %v8960_v3 = vpop.f32.mrf.mxu2  ;;  %v5196_v41 = vsel %vm76_vm0, %v5102_v22, 0.0  ;;  %v5776_v40 = vld [vmem:[%s9863_s0 + $0xf0] sm:$0xff] }
 0x53d   :  { %10466 = vst [vmem:[#allocation116_spill] sm:$0xff] %v8960_v3  ;;  %v5109_v3 = vmul.f32 %v5776_v40, %v5776_v40  ;;  %v5778_v40 = vld [vmem:[%s9863_s0 + $0xe8] sm:$0xff] }
 0x543   :  { %5188 = vadd.xlane.f32.xlu2 %v5187_v32  ;;  %5200 = vadd.xlane.f32.xlu0 %v5199_v15  ;;  %v5208_v32 = vsel %vm76_vm0, %v5106_v56, 0.0  ;;  %v5202_v15 = vsel %vm76_vm0, %v5104_v14, 0.0  ;;  %v5777_v56 = vld [vmem:[%s9863_s0 + $0xe0] sm:$0xff]  ;;  %v5205_v14 = vsel %vm76_vm0, %v5105_v20, 0.0  ;;  %v5779_v20 = vld [vmem:[%s9863_s0 + $0x108] sm:$0xff] }
 0x544   :  { %5194 = vadd.xlane.f32.xlu1 %v5193_v6  ;;  %v8965_v6 = vpop.f32.mrf.mxu3  ;;  %v5107_v22 = vmul.f32 %v5777_v56, %v5777_v56  ;;  %v5112_v56 = vmul.f32 %v5779_v20, %v5779_v20  ;;  %v5781_v20 = vld [vmem:[%s9863_s0 + $0x100] sm:$0xff] }
 0x545   :  { %10467 = vst [vmem:[#allocation117_spill] sm:$0xff] %v8965_v6  ;;  %v5108_v6 = vmul.f32 %v5778_v40, %v5778_v40  ;;  %v2670_v40 = vcvt.f32.s32 %v8722_v63 }
 0x54b   :  { %5197 = vadd.xlane.f32.xlu2 %v5196_v41  ;;  %5209 = vadd.xlane.f32.xlu0 %v5208_v32  ;;  %v5217_v41 = vsel %vm76_vm0, %v5109_v3, 0.0  ;;  %v5211_v32 = vsel %vm76_vm0, %v5107_v22, 0.0  ;;  %v5780_v3 = vld [vmem:[%s9863_s0 + $0xf8] sm:$0xff] }
 0x54c   :  { %5203 = vadd.xlane.f32.xlu1 %v5202_v15  ;;  %v8979_v15 = vpop.f32.mrf.mxu2  ;;  %v8981_v34 = vpop.f32.mrf.mxu3  ;;  %v5110_v22 = vmul.f32 %v5780_v3, %v5780_v3 }
 0x54d   :  { %10468 = vst [vmem:[#allocation118_spill] sm:$0xff] %v8979_v15  ;;  %v5111_v15 = vmul.f32 %v5781_v20, %v5781_v20 }
 0x54e   :  { %10469 = vst [vmem:[#allocation119_spill] sm:$0xff] %v8981_v34 }
 0x54f   :  { %v5223_v29 = vsel %vm76_vm0, %v5111_v15, 0.0  ;;  %v5784_v15 = vld [vmem:[%s9863_s0 + $0x118] sm:$0xff] }
 0x553   :  { %5206 = vadd.xlane.f32.xlu2 %v5205_v14  ;;  %5218 = vadd.xlane.f32.xlu0 %v5217_v41  ;;  %v5214_v14 = vsel %vm76_vm0, %v5108_v6, 0.0  ;;  %v5226_v41 = vsel %vm76_vm0, %v5112_v56, 0.0  ;;  %v5782_v6 = vld [vmem:[%s9863_s0 + $0x120] sm:$0xff]  ;;  %v5783_v56 = vld [vmem:[%s9863_s0 + $0x110] sm:$0xff] }
 0x554   :  { %5212 = vadd.xlane.f32.xlu1 %v5211_v32  ;;  %v5220_v32 = vsel %vm76_vm0, %v5110_v22, 0.0  ;;  %v8996_v34 = vpop.f32.mrf.mxu2  ;;  %v5115_v3 = vmul.f32 %v5782_v6, %v5782_v6  ;;  %v5113_v22 = vmul.f32 %v5783_v56, %v5783_v56 }
 0x555   :  { %10470 = vst [vmem:[#allocation120_spill] sm:$0xff] %v8996_v34 }
 0x556   :  { %v5235_v20 = vsel %vm76_vm0, %v5115_v3, 0.0  ;;  %v5229_v16 = vsel %vm76_vm0, %v5113_v22, 0.0  ;;  %v5785_v3 = vld [vmem:[%s9863_s0 + $0x138] sm:$0xff] }
 0x557   :  { %v5118_v56 = vmul.f32 %v5785_v3, %v5785_v3 }
 0x559   :  { %v5244_v54 = vsel %vm76_vm0, %v5118_v56, 0.0 }
 0x55b   :  { %5215 = vadd.xlane.f32.xlu2 %v5214_v14  ;;  %5227 = vadd.xlane.f32.xlu0 %v5226_v41  ;;  %v9007_v14 = vpop.f32.mrf.mxu3  ;;  %v9009_v41 = vpop.f32.mrf.mxu0 }
 0x55c   :  { %5221 = vadd.xlane.f32.xlu1 %v5220_v32  ;;  %10471 = vst [vmem:[#allocation121_spill] sm:$0xff] %v9007_v14  ;;  %v2671_v32 = vshll.u32 %v2670_v40, 16  ;;  %v5114_v40 = vmul.f32 %v5784_v15, %v5784_v15 }
 0x55f   :  { %v2668_v63 = vpop.xlane.xlu1 %2667 }
 0x560   :  { %v2669_v34 = vcvt.f32.s32 %v2668_v63 }
 0x562   :  { %v9016_v6 = vadd.s32 %v2671_v32, %v2669_v34  ;;  %v9038_v34 = vpop.f32.mrf.mxu2 }
 0x563   :  { %5224 = vadd.xlane.f32.xlu2 %v5223_v29  ;;  %5236 = vadd.xlane.f32.xlu0 %v5235_v20  ;;  %v5786_v29 = vld [vmem:[%s9863_s0 + $0x128] sm:$0xff]  ;;  %10473 = vst [vmem:[#allocation123_spill] sm:$0xff] %v9038_v34  ;;  %v2685_v20 = vshll.u32 %v2684_v58, 16  ;;  %v9041_v3 = vpop.f32.mrf.mxu3  ;;  %v9048_v25 = vpop.f32.mrf.mxu0 }
 0x564   :  { %10472 = vst [vmem:[#allocation122_spill] sm:$0xff] %v9016_v6  ;;  %5230 = vadd.xlane.f32.xlu1 %v5229_v16  ;;  %vm10088_vm7 = vcmp.eq.s32.totalorder %v6583_v21, %v9016_v6  ;;  %v5116_v16 = vmul.f32 %v5786_v29, %v5786_v29  ;;  %v5232_v6 = vsel %vm76_vm0, %v5114_v40, 0.0  ;;  %v9053_v58 = vpop.f32.mrf.mxu1 }
 0x565   :  { %5637 = vmatmul.msk.f32.gmra.mxu3 %vm10088_vm7, %v10334_v52  ;;  %v5589_v50 = vsel %vm10088_vm7, 1.0, %v10327_v7  ;;  %10474 = vst [vmem:[#allocation124_spill] sm:$0xff] %v9041_v3 }
 0x566   :  { %v2682_v22 = vpop.xlane.xlu2 %2681  ;;  %v3266_v63 = vsub.f32 %v5589_v50, %v5589_v50  ;;  %v5068_v32 = vadd.f32 %v5589_v50, %v8868_v45  ;;  %v5238_v29 = vsel %vm76_vm0, %v5116_v16, 0.0  ;;  %v2698_v45 = vcvt.f32.s32 %v8758_v39  ;;  %10476 = vst [vmem:[#allocation126_spill] sm:$0xff] %v9053_v58  ;;  %v5788_v39 = vld [vmem:[%s9863_s0 + $0x150] sm:$0xff] }
 0x567   :  { %v2683_v15 = vcvt.f32.s32 %v2682_v22 }
 0x568   :  { %3860 = vmatmul.f32.gmra.mxu0 %v3266_v63  ;;  %v3267_v14 = vand.u32 4294901760, %v3266_v63 }
 0x569   :  { %v9045_v0 = vadd.s32 %v2685_v20, %v2683_v15  ;;  %v2699_v20 = vshll.u32 %v2698_v45, 16 }
 0x56a   :  { %4177 = vmatmul.f32.gmra.mxu1 %v3267_v14  ;;  %v3268_v34 = vsub.f32 %v3266_v63, %v3267_v14  ;;  %v5787_v14 = vld [vmem:[%s9863_s0 + $0x130] sm:$0xff] }
 0x56b   :  { %10475 = vst [vmem:[#allocation125_spill] sm:$0xff] %v9045_v0  ;;  %5233 = vadd.xlane.f32.xlu2 %v5232_v6  ;;  %5245 = vadd.xlane.f32.xlu0 %v5244_v54  ;;  %vm10091_vm7 = vcmp.eq.s32.totalorder %v6583_v21, %v9045_v0  ;;  %v5117_v50 = vmul.f32 %v5787_v14, %v5787_v14  ;;  %v9072_v14 = vpop.f32.mrf.mxu2  ;;  %v9079_v57 = vpop.f32.mrf.mxu3 }
 0x56c   :  { %5239 = vadd.xlane.f32.xlu1 %v5238_v29  ;;  %v3269_v40 = vand.u32 4294901760, %v3268_v34  ;;  %v5590_v56 = vsel %vm10091_vm7, 1.0, %v10327_v7  ;;  %v5121_v54 = vmul.f32 %v5788_v39, %v5788_v39  ;;  %v5789_v34 = vld [vmem:[%s9863_s0 + $0x140] sm:$0xff]  ;;  %10477 = vst [vmem:[#allocation127_spill] sm:$0xff] %v9072_v14 }
 0x56d   :  { %5638 = vmatmul.msk.f32.gmra.mxu3 %vm10091_vm7, %v10334_v52  ;;  %v3274_v6 = vsub.f32 %v5590_v56, %v5590_v56  ;;  %v5069_v16 = vadd.f32 %v5590_v56, %v5068_v32  ;;  %v5119_v22 = vmul.f32 %v5789_v34, %v5789_v34  ;;  %v5241_v39 = vsel %vm76_vm0, %v5117_v50, 0.0  ;;  %10479 = vst [vmem:[#allocation129_spill] sm:$0xff] %v9079_v57 }
 0x56e   :  { %3270 = vmatmul.f32.gmra.mxu2 %v3269_v40  ;;  %v2696_v63 = vpop.xlane.xlu0 %2695  ;;  %v5253_v3 = vsel %vm76_vm0, %v5121_v54, 0.0  ;;  %v9083_v40 = vpop.f32.mrf.mxu0  ;;  %v2712_v50 = vcvt.f32.s32 %v8781_v31 }
 0x56f   :  { %v2697_v15 = vcvt.f32.s32 %v2696_v63  ;;  %v3275_v29 = vand.u32 4294901760, %v3274_v6  ;;  %v5247_v32 = vsel %vm76_vm0, %v5119_v22, 0.0  ;;  %10480 = vst [vmem:[#allocation130_spill] sm:$0xff] %v9083_v40  ;;  %v10488_v40 = vld [vmem:[#allocation9_spill] sm:$0xff] }
 0x570   :  { %3865 = vmatmul.f32.gmra.mxu0 %v3274_v6 }
 0x571   :  { %v9076_v0 = vadd.s32 %v2699_v20, %v2697_v15  ;;  %v3276_v56 = vsub.f32 %v3274_v6, %v3275_v29  ;;  %v5790_v6 = vld [vmem:[%s9863_s0 + $0x148] sm:$0xff]  ;;  %v5792_v20 = vld [vmem:[%s9863_s0 + $0x158] sm:$0xff] }
 0x572   :  { %4183 = vmatmul.f32.gmra.mxu1 %v3275_v29  ;;  %v5120_v34 = vmul.f32 %v5790_v6, %v5790_v6  ;;  %v5122_v15 = vmul.f32 %v5792_v20, %v5792_v20  ;;  %v9103_v29 = vpop.f32.mrf.mxu1  ;;  %v2713_v6 = vshll.u32 %v2712_v50, 16 }
 0x573   :  { %10478 = vst [vmem:[#allocation128_spill] sm:$0xff] %v9076_v0  ;;  %5242 = vadd.xlane.f32.xlu2 %v5241_v39  ;;  %5254 = vadd.xlane.f32.xlu0 %v5253_v3  ;;  %vm10096_vm7 = vcmp.eq.s32.totalorder %v6583_v21, %v9076_v0  ;;  %v3277_v45 = vand.u32 4294901760, %v3276_v56  ;;  %v5791_v3 = vld [vmem:[%s9863_s0 + $0x168] sm:$0xff]  ;;  %v9108_v0 = vpop.f32.mrf.mxu2  ;;  %v9113_v50 = vpop.f32.mrf.mxu3 }
 0x574   :  { %5248 = vadd.xlane.f32.xlu1 %v5247_v32  ;;  %v5591_v54 = vsel %vm10096_vm7, 1.0, %v10327_v7  ;;  %v5124_v22 = vmul.f32 %v5791_v3, %v5791_v3  ;;  %10481 = vst [vmem:[#allocation131_spill] sm:$0xff] %v9103_v29  ;;  %v5250_v57 = vsel %vm76_vm0, %v5120_v34, 0.0  ;;  %v5793_v34 = vld [vmem:[%s9863_s0 + $0x160] sm:$0xff] }
 0x575   :  { %5639 = vmatmul.msk.f32.gmra.mxu3 %vm10096_vm7, %v10334_v52  ;;  %v3282_v31 = vsub.f32 %v5591_v54, %v5591_v54  ;;  %v5070_v63 = vadd.f32 %v5591_v54, %v5069_v16  ;;  %v5256_v16 = vsel %vm76_vm0, %v5122_v15, 0.0  ;;  %10482 = vst [vmem:[#allocation132_spill] sm:$0xff] %v9108_v0 }
 0x576   :  { %3278 = vmatmul.f32.gmra.mxu2 %v3277_v45  ;;  %v5129_v39 = vpop.xlane.xlu0 %5128  ;;  %v2710_v32 = vpop.xlane.xlu1 %2709  ;;  %v5262_v14 = vsel %vm76_vm0, %v5124_v22, 0.0  ;;  %v2726_v45 = vcvt.f32.s32 %v8810_v17  ;;  %10484 = vst [vmem:[#allocation134_spill] sm:$0xff] %v9113_v50  ;;  %v5123_v22 = vmul.f32 %v5793_v34, %v5793_v34  ;;  %v10487_v50 = vld [vmem:[#allocation11_spill] sm:$0xff] }
 0x577   :  { %v3283_v56 = vand.u32 4294901760, %v3282_v31  ;;  %v2711_v3 = vcvt.f32.s32 %v2710_v32 }
 0x578   :  { %3870 = vmatmul.f32.gmra.mxu0 %v3282_v31  ;;  %v5259_v29 = vsel %vm76_vm0, %v5123_v22, 0.0  ;;  %v5795_v22 = vld [vmem:[%s9863_s0 + $0x178] sm:$0xff] }
 0x579   :  { %v3284_v54 = vsub.f32 %v3282_v31, %v3283_v56  ;;  %v9110_v1 = vadd.s32 %v2713_v6, %v2711_v3  ;;  %v9131_v31 = vpop.f32.mrf.mxu0  ;;  %v2727_v6 = vshll.u32 %v2726_v45, 16 }
 0x57a   :  { %4189 = vmatmul.f32.gmra.mxu1 %v3283_v56  ;;  %10485 = vst [vmem:[#allocation135_spill] sm:$0xff] %v9131_v31  ;;  %v9133_v34 = vpop.f32.mrf.mxu1  ;;  %v10496_v31 = vld [vmem:[#allocation21_spill] sm:$0xff] }
 0x57b   :  { %10483 = vst [vmem:[#allocation133_spill] sm:$0xff] %v9110_v1  ;;  %5251 = vadd.xlane.f32.xlu2 %v5250_v57  ;;  %5263 = vadd.xlane.f32.xlu0 %v5262_v14  ;;  %v3285_v20 = vand.u32 4294901760, %v3284_v54  ;;  %vm10099_vm7 = vcmp.eq.s32.totalorder %v6583_v21, %v9110_v1  ;;  %v5794_v57 = vld [vmem:[%s9863_s0 + $0x170] sm:$0xff] }
 0x57c   :  { %5257 = vadd.xlane.f32.xlu1 %v5256_v16  ;;  %v5592_v17 = vsel %vm10099_vm7, 1.0, %v10327_v7  ;;  %v5125_v14 = vmul.f32 %v5794_v57, %v5794_v57  ;;  %10486 = vst [vmem:[#allocation136_spill] sm:$0xff] %v9133_v34  ;;  %v5271_v57 = vadd.f32 %v5129_v39, %v10488_v40  ;;  %v5126_v40 = vmul.f32 %v5795_v22, %v5795_v22 }
 0x57d   :  { %5640 = vmatmul.msk.f32.gmra.mxu3 %vm10099_vm7, %v10334_v52  ;;  %v3290_v32 = vsub.f32 %v5592_v17, %v5592_v17  ;;  %v5071_v56 = vadd.f32 %v5592_v17, %v5070_v63  ;;  %v9143_v17 = vpop.f32.mrf.mxu2 }
 0x57e   :  { %3286 = vmatmul.f32.gmra.mxu2 %v3285_v20  ;;  %v2724_v15 = vpop.xlane.xlu2 %2723  ;;  %v5138_v54 = vpop.xlane.xlu0 %5137  ;;  %v5265_v20 = vsel %vm76_vm0, %v5125_v14, 0.0  ;;  %10490 = vst [vmem:[#allocation9_spill] sm:$0xff] %v9143_v17  ;;  %v5319_v39 = vmax.f32 %v5271_v57, 0.0  ;;  %v10495_v17 = vld [vmem:[#allocation17_spill] sm:$0xff] }
 0x57f   :  { %v2725_v3 = vcvt.f32.s32 %v2724_v15  ;;  %v5132_v16 = vpop.xlane.xlu1 %5131  ;;  %v3291_v1 = vand.u32 4294901760, %v3290_v32  ;;  %v10491_v15 = vld [vmem:[#allocation6_spill] sm:$0xff] }
 0x580   :  { %v5272_v0 = vadd.f32 %v5132_v16, %v10487_v50  ;;  %3875 = vmatmul.f32.gmra.mxu0 %v3290_v32  ;;  %v10493_v16 = vld [vmem:[#allocation15_spill] sm:$0xff] }
 0x581   :  { %v9138_v58 = vadd.s32 %v2727_v6, %v2725_v3  ;;  %v3292_v63 = vsub.f32 %v3290_v32, %v3291_v1  ;;  %v5274_v6 = vadd.f32 %v5138_v54, %v10491_v15  ;;  %v5416_v15 = vsel %vm5415_vm1, %v5319_v39, 0.0 }
 0x582   :  { %4195 = vmatmul.f32.gmra.mxu1 %v3291_v1  ;;  %v5320_v45 = vmax.f32 %v5272_v0, 0.0  ;;  %v9157_v0 = vpop.f32.mrf.mxu3 }
 0x583   :  { %10489 = vst [vmem:[#allocation11_spill] sm:$0xff] %v9138_v58  ;;  %5260 = vadd.xlane.f32.xlu2 %v5259_v29  ;;  %vm2776_vm7 = vcmp.eq.s32.totalorder %v6583_v21, %v9138_v58  ;;  %v3293_v50 = vand.u32 4294901760, %v3292_v63  ;;  %v9163_v63 = vpop.f32.mrf.mxu0 }
 0x584   :  { %5266 = vadd.xlane.f32.xlu1 %v5265_v20  ;;  %v5593_v1 = vsel %vm2776_vm7, 1.0, %v10327_v7  ;;  %10492 = vst [vmem:[#allocation6_spill] sm:$0xff] %v9157_v0  ;;  %v5417_v3 = vsel %vm5415_vm1, %v5320_v45, 0.0  ;;  %v5268_v7 = vsel %vm76_vm0, %v5126_v40, 0.0  ;;  %v5322_v0 = vmax.f32 %v5274_v6, 0.0 }
 0x585   :  { %5641 = vmatmul.msk.f32.gmra.mxu3 %vm2776_vm7, %v10334_v52  ;;  %v3298_v14 = vsub.f32 %v5593_v1, %v5593_v1  ;;  %v9159_v32 = vadd.f32 %v5593_v1, %v5071_v56  ;;  %10494 = vst [vmem:[#allocation15_spill] sm:$0xff] %v9163_v63  ;;  %v9168_v56 = vpop.f32.mrf.mxu1  ;;  %v5418_v1 = vadd.f32 %v5417_v3, %v5416_v15  ;;  %v9177_v6 = vpop.f32.mrf.mxu2 }
 0x586   :  { %3294 = vmatmul.f32.gmra.mxu2 %v3293_v50  ;;  %v5135_v29 = vpop.xlane.xlu2 %5134  ;;  %v5147_v20 = vpop.xlane.xlu0 %5146  ;;  %v5421_v63 = vsel %vm5415_vm1, %v5322_v0, 0.0  ;;  %10498 = vst [vmem:[#allocation17_spill] sm:$0xff] %v9177_v6 }
 0x587   :  { %v5273_v54 = vadd.f32 %v5135_v29, %v10493_v16  ;;  %v5141_v57 = vpop.xlane.xlu1 %5140  ;;  %v3299_v22 = vand.u32 4294901760, %v3298_v14  ;;  %v5277_v40 = vadd.f32 %v5147_v20, %v10496_v31  ;;  %v10501_v20 = vld [vmem:[#allocation71_spill] sm:$0xff] }
 0x588   :  { %3880 = vmatmul.f32.gmra.mxu0 %v3298_v14  ;;  %v5275_v58 = vadd.f32 %v5141_v57, %v10495_v17 }
 0x589   :  { %v5321_v50 = vmax.f32 %v5273_v54, 0.0  ;;  %v3300_v45 = vsub.f32 %v3298_v14, %v3299_v22  ;;  %v10499_v14 = vld [vmem:[#allocation8_spill] sm:$0xff]  ;;  %v5325_v31 = vmax.f32 %v5277_v40, 0.0  ;;  %v10504_v40 = vld [vmem:[#allocation29_spill] sm:$0xff] }
 0x58a   :  { %4201 = vmatmul.f32.gmra.mxu1 %v3299_v22  ;;  %v5323_v34 = vmax.f32 %v5275_v58, 0.0  ;;  %v9180_v15 = vpop.f32.mrf.mxu3 }
 0x58b   :  { %v5419_v29 = vsel %vm5415_vm1, %v5321_v50, 0.0  ;;  %5269 = vadd.xlane.f32.xlu2 %v5268_v7  ;;  %v3301_v17 = vand.u32 4294901760, %v3300_v45  ;;  %10500 = vst [vmem:[#allocation21_spill] sm:$0xff] %v9180_v15 }
 0x58c   :  { %v5420_v16 = vadd.f32 %v5419_v29, %v5418_v1  ;;  %v5423_v58 = vsel %vm5415_vm1, %v5323_v34, 0.0 }
 0x58d   :  { %5690 = vmatmul.msk.f32.vlgmr.msra.gmra.mxu3 %vm2729_vm15, %v10334_v52 }
 0x58e   :  { %v5422_v3 = vadd.f32 %v5421_v63, %v5420_v16  ;;  %v5144_v54 = vpop.xlane.xlu2 %5143  ;;  %3302 = vmatmul.f32.gmra.mxu2 %v3301_v17  ;;  %v5156_v7 = vpop.xlane.xlu0 %5155  ;;  %v5427_v63 = vsel %vm5415_vm1, %v5325_v31, 0.0  ;;  %v10502_v17 = vld [vmem:[#allocation31_spill] sm:$0xff] }
 0x58f   :  { %v5276_v57 = vadd.f32 %v5144_v54, %v10499_v14  ;;  %v5150_v22 = vpop.xlane.xlu1 %5149  ;;  %v5280_v6 = vadd.f32 %v5156_v7, %v10502_v17 }
 0x590   :  { %v5278_v50 = vadd.f32 %v5150_v22, %v10501_v20  ;;  %v5424_v1 = vadd.f32 %v5423_v58, %v5422_v3  ;;  %v9196_v58 = vpop.f32.mrf.mxu2  ;;  %v10506_v20 = vld [vmem:[#allocation33_spill] sm:$0xff] }
 0x591   :  { %v5324_v0 = vmax.f32 %v5276_v57, 0.0  ;;  %10505 = vst [vmem:[#allocation69_spill] sm:$0xff] %v9196_v58  ;;  %v5328_v31 = vmax.f32 %v5280_v6, 0.0 }
 0x592   :  { %v5326_v16 = vmax.f32 %v5278_v50, 0.0 }
 0x593   :  { %v5425_v45 = vsel %vm5415_vm1, %v5324_v0, 0.0  ;;  %v5433_v39 = vsel %vm5415_vm1, %v5328_v31, 0.0 }
 0x594   :  { %v5426_v29 = vadd.f32 %v5425_v45, %v5424_v1  ;;  %v5429_v7 = vsel %vm5415_vm1, %v5326_v16, 0.0  ;;  %v9200_v1 = vpop.f32.mrf.mxu3 }
 0x595   :  { %5691 = vmatmul.msk.f32.gmra.mxu3 %vm2730_vm2, %v10334_v52  ;;  %10507 = vst [vmem:[#allocation8_spill] sm:$0xff] %v9200_v1 }
 0x596   :  { %v5428_v14 = vadd.f32 %v5427_v63, %v5426_v29  ;;  %v5153_v34 = vpop.xlane.xlu2 %5152  ;;  %5642 = vmatmul.msk.f32.vlgmr.msra.gmra.mxu2 %vm2729_vm15, %v10334_v52  ;;  %v5165_v22 = vpop.xlane.xlu0 %5164 }
 0x597   :  { %v5279_v3 = vadd.f32 %v5153_v34, %v10504_v40  ;;  %v5159_v57 = vpop.xlane.xlu1 %5158  ;;  %v10508_v34 = vld [vmem:[#allocation76_spill] sm:$0xff] }
 0x598   :  { %v5281_v50 = vadd.f32 %v5159_v57, %v10506_v20  ;;  %v5430_v45 = vadd.f32 %v5429_v7, %v5428_v14  ;;  %v5283_v40 = vadd.f32 %v5165_v22, %v10508_v34  ;;  %v10510_v14 = vld [vmem:[#allocation35_spill] sm:$0xff] }
 0x599   :  { %v5327_v0 = vmax.f32 %v5279_v3, 0.0  ;;  %v10511_v20 = vld [vmem:[#allocation79_spill] sm:$0xff] }
 0x59a   :  { %v5329_v17 = vmax.f32 %v5281_v50, 0.0 }
 0x59b   :  { %v5431_v29 = vsel %vm5415_vm1, %v5327_v0, 0.0  ;;  %v5331_v0 = vmax.f32 %v5283_v40, 0.0 }
 0x59c   :  { %v5432_v63 = vadd.f32 %v5431_v29, %v5430_v45  ;;  %v5435_v31 = vsel %vm5415_vm1, %v5329_v17, 0.0  ;;  %v9216_v45 = vpop.f32.mrf.mxu2 }
 0x59d   :  { %5692 = vmatmul.msk.f32.gmra.mxu3 %vm2731_vm5, %v10334_v52  ;;  %10512 = vst [vmem:[#allocation71_spill] sm:$0xff] %v9216_v45  ;;  %v5439_v54 = vsel %vm5415_vm1, %v5331_v0, 0.0  ;;  %v10519_v45 = vld [vmem:[#allocation70_spill] sm:$0xff] }
 0x59e   :  { %v5434_v6 = vadd.f32 %v5433_v39, %v5432_v63  ;;  %v5162_v16 = vpop.xlane.xlu2 %5161  ;;  %5643 = vmatmul.msk.f32.gmra.mxu2 %vm2730_vm2, %v10334_v52  ;;  %v5174_v7 = vpop.xlane.xlu0 %5173 }
 0x59f   :  { %v5282_v3 = vadd.f32 %v5162_v16, %v10510_v14  ;;  %v5168_v57 = vpop.xlane.xlu1 %5167  ;;  %v9219_v39 = vpop.f32.mrf.mxu3  ;;  %v10514_v16 = vld [vmem:[#allocation87_spill] sm:$0xff] }
 0x5a0   :  { %v5284_v50 = vadd.f32 %v5168_v57, %v10511_v20  ;;  %v5436_v29 = vadd.f32 %v5435_v31, %v5434_v6  ;;  %10513 = vst [vmem:[#allocation31_spill] sm:$0xff] %v9219_v39  ;;  %v5286_v14 = vadd.f32 %v5174_v7, %v10514_v16  ;;  %v10516_v6 = vld [vmem:[#allocation83_spill] sm:$0xff] }
 0x5a1   :  { %v5330_v22 = vmax.f32 %v5282_v3, 0.0 }
 0x5a2   :  { %v5332_v1 = vmax.f32 %v5284_v50, 0.0  ;;  %v5334_v20 = vmax.f32 %v5286_v14, 0.0  ;;  %v10517_v50 = vld [vmem:[#allocation39_spill] sm:$0xff] }
 0x5a3   :  { %v5437_v63 = vsel %vm5415_vm1, %v5330_v22, 0.0 }
 0x5a4   :  { %v5438_v34 = vadd.f32 %v5437_v63, %v5436_v29  ;;  %v5441_v0 = vsel %vm5415_vm1, %v5332_v1, 0.0  ;;  %v5445_v39 = vsel %vm5415_vm1, %v5334_v20, 0.0 }
 0x5a5   :  { %5693 = vmatmul.msk.f32.gmra.mxu3 %vm2732_vm8, %v10334_v52 }
 0x5a6   :  { %v5440_v40 = vadd.f32 %v5439_v54, %v5438_v34  ;;  %v5171_v3 = vpop.xlane.xlu2 %5170  ;;  %5644 = vmatmul.msk.f32.gmra.mxu2 %vm2731_vm5, %v10334_v52  ;;  %v5183_v22 = vpop.xlane.xlu0 %5182 }
 0x5a7   :  { %v5285_v57 = vadd.f32 %v5171_v3, %v10516_v6  ;;  %v5177_v31 = vpop.xlane.xlu1 %5176  ;;  %v9235_v34 = vpop.f32.mrf.mxu2  ;;  %v5289_v58 = vadd.f32 %v5183_v22, %v10519_v45 }
 0x5a8   :  { %v5287_v29 = vadd.f32 %v5177_v31, %v10517_v50  ;;  %v5442_v63 = vadd.f32 %v5441_v0, %v5440_v40  ;;  %10518 = vst [vmem:[#allocation42_spill] sm:$0xff] %v9235_v34  ;;  %v9243_v1 = vpop.f32.mrf.mxu3  ;;  %v10522_v40 = vld [vmem:[#allocation91_spill] sm:$0xff] }
 0x5a9   :  { %v5333_v7 = vmax.f32 %v5285_v57, 0.0  ;;  %10521 = vst [vmem:[#allocation29_spill] sm:$0xff] %v9243_v1  ;;  %v5337_v22 = vmax.f32 %v5289_v58, 0.0  ;;  %v10524_v1 = vld [vmem:[#allocation19_spill] sm:$0xff] }
 0x5aa   :  { %v5335_v15 = vmax.f32 %v5287_v29, 0.0 }
 0x5ab   :  { %v5443_v16 = vsel %vm5415_vm1, %v5333_v7, 0.0  ;;  %v10523_v7 = vld [vmem:[#allocation41_spill] sm:$0xff] }
 0x5ac   :  { %v5444_v54 = vadd.f32 %v5443_v16, %v5442_v63  ;;  %v5447_v45 = vsel %vm5415_vm1, %v5335_v15, 0.0  ;;  %v5451_v16 = vsel %vm5415_vm1, %v5337_v22, 0.0 }
 0x5ad   :  { %5694 = vmatmul.msk.f32.gmra.mxu3 %vm2733_vm11, %v10334_v52 }
 0x5ae   :  { %v5446_v14 = vadd.f32 %v5445_v39, %v5444_v54  ;;  %v5180_v6 = vpop.xlane.xlu2 %5179  ;;  %5645 = vmatmul.msk.f32.gmra.mxu2 %vm2732_vm8, %v10334_v52  ;;  %v5192_v0 = vpop.xlane.xlu0 %5191  ;;  %vm10568_vm8 = vcmp.eq.s32.totalorder %v6583_v21, %v8214_v46 }
 0x5af   :  { %v5288_v57 = vadd.f32 %v5180_v6, %v10522_v40  ;;  %v5186_v31 = vpop.xlane.xlu1 %5185  ;;  %v5292_v17 = vadd.f32 %v5192_v0, %v10524_v1  ;;  %v9259_v40 = vpop.f32.mrf.mxu2 }
 0x5b0   :  { %v5290_v50 = vadd.f32 %v5186_v31, %v10523_v7  ;;  %v5448_v29 = vadd.f32 %v5447_v45, %v5446_v14  ;;  %10526 = vst [vmem:[#allocation33_spill] sm:$0xff] %v9259_v40  ;;  %v10527_v14 = vld [vmem:[#allocation5_spill] sm:$0xff]  ;;  %v9266_v22 = vpop.f32.mrf.mxu3  ;;  %v10530_v40 = vld [vmem:[#allocation7_spill] sm:$0xff] }
 0x5b1   :  { %v5336_v20 = vmax.f32 %v5288_v57, 0.0  ;;  %10528 = vst [vmem:[#allocation76_spill] sm:$0xff] %v9266_v22  ;;  %v5340_v0 = vmax.f32 %v5292_v17, 0.0  ;;  %v10529_v7 = vld [vmem:[#allocation13_spill] sm:$0xff]  ;;  %v10532_v17 = vld [vmem:[#allocation18_spill] sm:$0xff] }
 0x5b2   :  { %v5338_v54 = vmax.f32 %v5290_v50, 0.0 }
 0x5b3   :  { %v5449_v63 = vsel %vm5415_vm1, %v5336_v20, 0.0 }
 0x5b4   :  { %v5450_v39 = vadd.f32 %v5449_v63, %v5448_v29  ;;  %v5453_v1 = vsel %vm5415_vm1, %v5338_v54, 0.0 }
 0x5b5   :  { %5695 = vmatmul.msk.f32.gmra.mxu3 %vm2734_vm14, %v10334_v52 }
 0x5b6   :  { %v5452_v58 = vadd.f32 %v5451_v16, %v5450_v39  ;;  %v5189_v15 = vpop.xlane.xlu2 %5188  ;;  %5646 = vmatmul.msk.f32.gmra.mxu2 %vm2733_vm11, %v10334_v52  ;;  %v5201_v45 = vpop.xlane.xlu0 %5200  ;;  %v5457_v16 = vsel %vm5415_vm1, %v5340_v0, 0.0 }
 0x5b7   :  { %v5291_v57 = vadd.f32 %v5189_v15, %v10527_v14  ;;  %v5195_v31 = vpop.xlane.xlu1 %5194  ;;  %v5295_v34 = vadd.f32 %v5201_v45, %v10530_v40 }
 0x5b8   :  { %v5293_v50 = vadd.f32 %v5195_v31, %v10529_v7  ;;  %v5454_v29 = vadd.f32 %v5453_v1, %v5452_v58  ;;  %v9282_v1 = vpop.f32.mrf.mxu2 }
 0x5b9   :  { %v5339_v20 = vmax.f32 %v5291_v57, 0.0  ;;  %v5343_v45 = vmax.f32 %v5295_v34, 0.0 }
 0x5ba   :  { %v5341_v3 = vmax.f32 %v5293_v50, 0.0  ;;  %v9286_v50 = vpop.f32.mrf.mxu3 }
 0x5bb   :  { %v5455_v63 = vsel %vm5415_vm1, %v5339_v20, 0.0  ;;  %v10533_v20 = vld [vmem:[#allocation25_spill] sm:$0xff]  ;;  %10534 = vst [vmem:[#allocation23_spill] sm:$0xff] %v9286_v50  ;;  %v5463_v6 = vsel %vm5415_vm1, %v5343_v45, 0.0 }
 0x5bc   :  { %v5456_v39 = vadd.f32 %v5455_v63, %v5454_v29  ;;  %v5459_v40 = vsel %vm5415_vm1, %v5341_v3, 0.0 }
 0x5bd   :  { %5696 = vmatmul.msk.f32.gmra.mxu3 %vm2735_vm4, %v10334_v52 }
 0x5be   :  { %v5458_v14 = vadd.f32 %v5457_v16, %v5456_v39  ;;  %v5198_v54 = vpop.xlane.xlu2 %5197  ;;  %5647 = vmatmul.msk.f32.gmra.mxu2 %vm2734_vm14, %v10334_v52  ;;  %v5210_v31 = vpop.xlane.xlu0 %5209  ;;  %vm10570_vm14 = vcmp.eq.s32.totalorder %v6583_v21, %v8238_v9 }
 0x5bf   :  { %v5294_v58 = vadd.f32 %v5198_v54, %v10532_v17  ;;  %v5204_v57 = vpop.xlane.xlu1 %5203  ;;  %v10535_v54 = vld [vmem:[#allocation22_spill] sm:$0xff] }
 0x5c0   :  { %v5296_v7 = vadd.f32 %v5204_v57, %v10533_v20  ;;  %v5460_v29 = vadd.f32 %v5459_v40, %v5458_v14  ;;  %v5298_v17 = vadd.f32 %v5210_v31, %v10535_v54  ;;  %v10536_v14 = vld [vmem:[#allocation12_spill] sm:$0xff]  ;;  %v10537_v20 = vld [vmem:[#allocation47_spill] sm:$0xff] }
 0x5c1   :  { %v5342_v0 = vmax.f32 %v5294_v58, 0.0 }
 0x5c2   :  { %v5344_v16 = vmax.f32 %v5296_v7, 0.0 }
 0x5c3   :  { %v5461_v63 = vsel %vm5415_vm1, %v5342_v0, 0.0  ;;  %v5346_v0 = vmax.f32 %v5298_v17, 0.0 }
 0x5c4   :  { %v5462_v39 = vadd.f32 %v5461_v63, %v5460_v29  ;;  %v5465_v45 = vsel %vm5415_vm1, %v5344_v16, 0.0  ;;  %v9302_v29 = vpop.f32.mrf.mxu2 }
 0x5c5   :  { %5697 = vmatmul.msk.f32.gmra.mxu3 %vm2736_vm13, %v10334_v52  ;;  %10538 = vst [vmem:[#allocation35_spill] sm:$0xff] %v9302_v29  ;;  %v5469_v15 = vsel %vm5415_vm1, %v5346_v0, 0.0  ;;  %v10545_v29 = vld [vmem:[#allocation53_spill] sm:$0xff] }
 0x5c6   :  { %v5464_v34 = vadd.f32 %v5463_v6, %v5462_v39  ;;  %v5207_v3 = vpop.xlane.xlu2 %5206  ;;  %5648 = vmatmul.msk.f32.gmra.mxu2 %vm2735_vm4, %v10334_v52  ;;  %v5219_v40 = vpop.xlane.xlu0 %5218  ;;  %vm10571_vm4 = vmmov %vm10568_vm8 }
 0x5c7   :  { %v5297_v58 = vadd.f32 %v5207_v3, %v10536_v14  ;;  %v5213_v57 = vpop.xlane.xlu1 %5212  ;;  %v9305_v6 = vpop.f32.mrf.mxu3  ;;  %v10540_v3 = vld [vmem:[#allocation50_spill] sm:$0xff] }
 0x5c8   :  { %v5299_v7 = vadd.f32 %v5213_v57, %v10537_v20  ;;  %v5466_v63 = vadd.f32 %v5465_v45, %v5464_v34  ;;  %10539 = vst [vmem:[#allocation79_spill] sm:$0xff] %v9305_v6  ;;  %v5301_v14 = vadd.f32 %v5219_v40, %v10540_v3  ;;  %v10542_v34 = vld [vmem:[#allocation48_spill] sm:$0xff] }
 0x5c9   :  { %v5345_v31 = vmax.f32 %v5297_v58, 0.0 }
 0x5ca   :  { %v5347_v50 = vmax.f32 %v5299_v7, 0.0  ;;  %v5349_v20 = vmax.f32 %v5301_v14, 0.0  ;;  %v10543_v7 = vld [vmem:[#allocation51_spill] sm:$0xff] }
 0x5cb   :  { %v5467_v39 = vsel %vm5415_vm1, %v5345_v31, 0.0 }
 0x5cc   :  { %v5468_v54 = vadd.f32 %v5467_v39, %v5466_v63  ;;  %v5471_v0 = vsel %vm5415_vm1, %v5347_v50, 0.0  ;;  %v5475_v6 = vsel %vm5415_vm1, %v5349_v20, 0.0 }
 0x5cd   :  { %5698 = vmatmul.msk.f32.gmra.mxu3 %vm2737_vm6, %v10334_v52 }
 0x5ce   :  { %v5470_v17 = vadd.f32 %v5469_v15, %v5468_v54  ;;  %v5216_v58 = vpop.xlane.xlu2 %5215  ;;  %5649 = vmatmul.msk.f32.gmra.mxu2 %vm2736_vm13, %v10334_v52  ;;  %v5228_v31 = vpop.xlane.xlu0 %5227  ;;  %vm10572_vm13 = vcmp.eq.s32.totalorder %v6583_v21, %v8258_v61 }
 0x5cf   :  { %v5300_v57 = vadd.f32 %v5216_v58, %v10542_v34  ;;  %v5222_v45 = vpop.xlane.xlu1 %5221  ;;  %v9321_v54 = vpop.f32.mrf.mxu2  ;;  %v5304_v22 = vadd.f32 %v5228_v31, %v10545_v29 }
 0x5d0   :  { %v5302_v63 = vadd.f32 %v5222_v45, %v10543_v7  ;;  %v5472_v39 = vadd.f32 %v5471_v0, %v5470_v17  ;;  %10544 = vst [vmem:[#allocation87_spill] sm:$0xff] %v9321_v54  ;;  %v9329_v50 = vpop.f32.mrf.mxu3  ;;  %v10548_v17 = vld [vmem:[#allocation52_spill] sm:$0xff] }
 0x5d1   :  { %v5348_v40 = vmax.f32 %v5300_v57, 0.0  ;;  %10547 = vst [vmem:[#allocation43_spill] sm:$0xff] %v9329_v50  ;;  %v5352_v31 = vmax.f32 %v5304_v22, 0.0  ;;  %v10550_v50 = vld [vmem:[#allocation32_spill] sm:$0xff] }
 0x5d2   :  { %v5350_v36 = vmax.f32 %v5302_v63, 0.0 }
 0x5d3   :  { %v5473_v3 = vsel %vm5415_vm1, %v5348_v40, 0.0  ;;  %v10549_v40 = vld [vmem:[#allocation30_spill] sm:$0xff] }
 0x5d4   :  { %v5474_v15 = vadd.f32 %v5473_v3, %v5472_v39  ;;  %v5477_v29 = vsel %vm5415_vm1, %v5350_v36, 0.0  ;;  %v5481_v3 = vsel %vm5415_vm1, %v5352_v31, 0.0 }
 0x5d5   :  { %5699 = vmatmul.msk.f32.gmra.mxu3 %vm2738_vm10, %v10334_v52 }
 0x5d6   :  { %v5476_v14 = vadd.f32 %v5475_v6, %v5474_v15  ;;  %v5225_v34 = vpop.xlane.xlu2 %5224  ;;  %5650 = vmatmul.msk.f32.gmra.mxu2 %vm2737_vm6, %v10334_v52  ;;  %v5237_v0 = vpop.xlane.xlu0 %5236  ;;  %vm10573_vm6 = vmmov %vm10570_vm14 }
 0x5d7   :  { %v5303_v57 = vadd.f32 %v5225_v34, %v10548_v17  ;;  %v5231_v45 = vpop.xlane.xlu1 %5230  ;;  %v5307_v16 = vadd.f32 %v5237_v0, %v10550_v50  ;;  %v9345_v17 = vpop.f32.mrf.mxu2 }
 0x5d8   :  { %v5305_v7 = vadd.f32 %v5231_v45, %v10549_v40  ;;  %v5478_v63 = vadd.f32 %v5477_v29, %v5476_v14  ;;  %10552 = vst [vmem:[#allocation83_spill] sm:$0xff] %v9345_v17  ;;  %v10553_v14 = vld [vmem:[#allocation54_spill] sm:$0xff]  ;;  %v9352_v31 = vpop.f32.mrf.mxu3  ;;  %v10555_v40 = vld [vmem:[#allocation55_spill] sm:$0xff] }
 0x5d9   :  { %v5351_v20 = vmax.f32 %v5303_v57, 0.0  ;;  %10554 = vst [vmem:[#allocation39_spill] sm:$0xff] %v9352_v31  ;;  %v5355_v0 = vmax.f32 %v5307_v16, 0.0  ;;  %v10556_v17 = vld [vmem:[#allocation74_spill] sm:$0xff]  ;;  %v10558_v16 = vld [vmem:[#allocation73_spill] sm:$0xff]  ;;  %v10561_v31 = vld [vmem:[#allocation36_spill] sm:$0xff] }
 0x5da   :  { %v5353_v15 = vmax.f32 %v5305_v7, 0.0 }
 0x5db   :  { %v5479_v39 = vsel %vm5415_vm1, %v5351_v20, 0.0 }
 0x5dc   :  { %v5480_v6 = vadd.f32 %v5479_v39, %v5478_v63  ;;  %v5483_v50 = vsel %vm5415_vm1, %v5353_v15, 0.0 }
 0x5dd   :  { %5700 = vmatmul.msk.f32.gmra.mxu3 %vm2739_vm3, %v10334_v52 }
 0x5de   :  { %v5482_v22 = vadd.f32 %v5481_v3, %v5480_v6  ;;  %v5234_v36 = vpop.xlane.xlu2 %5233  ;;  %5651 = vmatmul.msk.f32.gmra.mxu2 %vm2738_vm10, %v10334_v52  ;;  %v5246_v29 = vpop.xlane.xlu0 %5245  ;;  %v5487_v3 = vsel %vm5415_vm1, %v5355_v0, 0.0 }
 0x5df   :  { %v5306_v57 = vadd.f32 %v5234_v36, %v10553_v14  ;;  %v5240_v45 = vpop.xlane.xlu1 %5239  ;;  %v5310_v54 = vadd.f32 %v5246_v29, %v10556_v17  ;;  %v9368_v0 = vpop.f32.mrf.mxu2 }
 0x5e0   :  { %v5308_v7 = vadd.f32 %v5240_v45, %v10555_v40  ;;  %v5484_v63 = vadd.f32 %v5483_v50, %v5482_v22  ;;  %10559 = vst [vmem:[#allocation70_spill] sm:$0xff] %v9368_v0  ;;  %v10560_v40 = vld [vmem:[#allocation34_spill] sm:$0xff] }
 0x5e1   :  { %v5354_v20 = vmax.f32 %v5306_v57, 0.0  ;;  %v5358_v29 = vmax.f32 %v5310_v54, 0.0  ;;  %v10564_v54 = vld [vmem:[#allocation59_spill] sm:$0xff] }
 0x5e2   :  { %v5356_v58 = vmax.f32 %v5308_v7, 0.0 }
 0x5e3   :  { %v5485_v39 = vsel %vm5415_vm1, %v5354_v20, 0.0  ;;  %v5493_v34 = vsel %vm5415_vm1, %v5358_v29, 0.0 }
 0x5e4   :  { %v5486_v6 = vadd.f32 %v5485_v39, %v5484_v63  ;;  %v5489_v17 = vsel %vm5415_vm1, %v5356_v58, 0.0 }
 0x5e5   :  { %5701 = vmatmul.msk.f32.gmra.mxu3 %vm2740_vm12, %v10334_v52 }
 0x5e6   :  { %v5488_v14 = vadd.f32 %v5487_v3, %v5486_v6  ;;  %v5243_v15 = vpop.xlane.xlu2 %5242  ;;  %5652 = vmatmul.msk.f32.gmra.mxu2 %vm2739_vm3, %v10334_v52  ;;  %v5255_v45 = vpop.xlane.xlu0 %5254  ;;  %vm10579_vm3 = vmmov %vm10572_vm13 }
 0x5e7   :  { %v5309_v22 = vadd.f32 %v5243_v15, %v10558_v16  ;;  %v5249_v57 = vpop.xlane.xlu1 %5248  ;;  %v5313_v15 = vadd.f32 %v5255_v45, %v10561_v31  ;;  %v10562_v16 = vld [vmem:[#allocation60_spill] sm:$0xff] }
 0x5e8   :  { %v3576_v50 = vpop.f32.mrf.mxu3  ;;  %v5311_v7 = vadd.f32 %v5249_v57, %v10560_v40  ;;  %v5490_v63 = vadd.f32 %v5489_v17, %v5488_v14  ;;  %vm10563_vm15 = vcmp.eq.s32.totalorder %v6583_v21, %v10562_v16 }
 0x5e9   :  { %v5357_v20 = vmax.f32 %v5309_v22, 0.0  ;;  %v5361_v29 = vmax.f32 %v5313_v15, 0.0  ;;  %vm10567_vm5 = vmmov %vm10563_vm15 }
 0x5ea   :  { %v5359_v3 = vmax.f32 %v5311_v7, 0.0 }
 0x5eb   :  { %v5491_v39 = vsel %vm5415_vm1, %v5357_v20, 0.0  ;;  %v5499_v36 = vsel %vm5415_vm1, %v5361_v29, 0.0 }
 0x5ec   :  { %v5492_v6 = vadd.f32 %v5491_v39, %v5490_v63  ;;  %v5495_v17 = vsel %vm5415_vm1, %v5359_v3, 0.0  ;;  %v10565_v3 = vld [vmem:[#allocation77_spill] sm:$0xff] }
 0x5ed   :  { %5702 = vmatmul.msk.f32.gmra.mxu3 %vm10563_vm15, %v10334_v52  ;;  %vm10566_vm2 = vcmp.eq.s32.totalorder %v6583_v21, %v10565_v3 }
 0x5ee   :  { %v5494_v0 = vadd.f32 %v5493_v34, %v5492_v6  ;;  %v5252_v58 = vpop.xlane.xlu2 %5251  ;;  %5653 = vmatmul.msk.f32.gmra.mxu2 %vm2740_vm12, %v10334_v52  ;;  %v5264_v7 = vpop.xlane.xlu0 %5263  ;;  %vm10569_vm11 = vmmov %vm10566_vm2 }
 0x5ef   :  { %v5312_v14 = vadd.f32 %v5252_v58, %v10564_v54  ;;  %v5258_v22 = vpop.xlane.xlu1 %5257  ;;  %v5316_v58 = vadd.f32 %v5264_v7, %v8414_v24 }
 0x5f0   :  { %v3580_v57 = vpop.f32.mrf.mxu3  ;;  %v5314_v45 = vadd.f32 %v5258_v22, %v8341_v35  ;;  %v5496_v40 = vadd.f32 %v5495_v17, %v5494_v0 }
 0x5f1   :  { %v5360_v31 = vmax.f32 %v5312_v14, 0.0  ;;  %v3271_v20 = vpop.f32.mrf.mxu2  ;;  %v5364_v22 = vmax.f32 %v5316_v58, 0.0 }
 0x5f2   :  { %v9386_v63 = vadd.f32 %v3576_v50, %v3271_v20  ;;  %v5362_v34 = vmax.f32 %v5314_v45, 0.0 }
 0x5f3   :  { %v5497_v39 = vsel %vm5415_vm1, %v5360_v31, 0.0  ;;  %v5505_v16 = vsel %vm5415_vm1, %v5364_v22, 0.0  ;;  %v10575_v22 = vld [vmem:[#allocation78_spill] sm:$0xff] }
 0x5f4   :  { %v5498_v6 = vadd.f32 %v5497_v39, %v5496_v40  ;;  %v5501_v14 = vsel %vm5415_vm1, %v5362_v34, 0.0 }
 0x5f5   :  { %5703 = vmatmul.msk.f32.gmra.mxu3 %vm10566_vm2, %v10334_v52 }
 0x5f6   :  { %v5500_v15 = vadd.f32 %v5499_v36, %v5498_v6  ;;  %v5261_v35 = vpop.xlane.xlu2 %5260  ;;  %5654 = vmatmul.msk.f32.gmra.mxu2 %vm10567_vm5, %v10334_v52 }
 0x5f7   :  { %v5315_v50 = vadd.f32 %v5261_v35, %v8378_v38  ;;  %v5267_v0 = vpop.xlane.xlu1 %5266 }
 0x5f8   :  { %v3584_v54 = vpop.f32.mrf.mxu3  ;;  %v5317_v17 = vadd.f32 %v5267_v0, %v8462_v48  ;;  %v5502_v31 = vadd.f32 %v5501_v14, %v5500_v15  ;;  %v10574_v14 = vld [vmem:[#allocation63_spill] sm:$0xff] }
 0x5f9   :  { %v5363_v24 = vmax.f32 %v5315_v50, 0.0  ;;  %v3279_v29 = vpop.f32.mrf.mxu2 }
 0x5fa   :  { %v9402_v45 = vadd.f32 %v3580_v57, %v3279_v29  ;;  %v5365_v7 = vmax.f32 %v5317_v17, 0.0  ;;  %v10576_v29 = vld [vmem:[#allocation61_spill] sm:$0xff] }
 0x5fb   :  { %v5503_v20 = vsel %vm5415_vm1, %v5363_v24, 0.0  ;;  %v3405_v24 = vadd.f32 %v10575_v22, %v10574_v14 }
 0x5fc   :  { %v5504_v40 = vadd.f32 %v5503_v20, %v5502_v31  ;;  %v5507_v6 = vsel %vm5415_vm1, %v5365_v7, 0.0  ;;  %v10577_v20 = vld [vmem:[#allocation82_spill] sm:$0xff] }
 0x5fd   :  { %5704 = vmatmul.msk.f32.gmra.mxu3 %vm10568_vm8, %v10334_v52  ;;  %v3647_v31 = vadd.f32 %v10576_v29, %v3405_v24  ;;  %vm10578_vm10 = vcmp.eq.s32.totalorder %v6583_v21, %v10577_v20  ;;  %v10590_v24 = vld [vmem:[#allocation64_spill] sm:$0xff] }
 0x5fe   :  { %v5506_v38 = vadd.f32 %v5505_v16, %v5504_v40  ;;  %v5270_v39 = vpop.xlane.xlu2 %5269  ;;  %5655 = vmatmul.msk.f32.gmra.mxu2 %vm10569_vm11, %v10334_v52  ;;  %v10580_v40 = vld [vmem:[#allocation84_spill] sm:$0xff] }
 0x5ff   :  { %v5318_v48 = vadd.f32 %v5270_v39, %v8499_v51  ;;  %v10581_v16 = vld [vmem:[#allocation80_spill] sm:$0xff] }
 0x600   :  { %v3588_v57 = vpop.f32.mrf.mxu3  ;;  %v5508_v58 = vadd.f32 %v5507_v6, %v5506_v38  ;;  %v3409_v7 = vadd.f32 %v10581_v16, %v10580_v40  ;;  %v10582_v38 = vld [vmem:[#allocation37_spill] sm:$0xff]  ;;  %v10583_v6 = vld [vmem:[#allocation62_spill] sm:$0xff]  ;;  %v10594_v40 = vld [vmem:[#allocation16_spill] sm:$0xff] }
 0x601   :  { %v5366_v36 = vmax.f32 %v5318_v48, 0.0  ;;  %v3287_v34 = vpop.f32.mrf.mxu2  ;;  %v3921_v39 = vadd.f32 %v10582_v38, %v3647_v31  ;;  %v10591_v31 = vld [vmem:[#allocation38_spill] sm:$0xff]  ;;  %v10595_v16 = vld [vmem:[#allocation88_spill] sm:$0xff]  ;;  %v10596_v38 = vld [vmem:[#allocation85_spill] sm:$0xff] }
 0x602   :  { %v9416_v15 = vadd.f32 %v3584_v54, %v3287_v34  ;;  %vm10592_vm15 = vcmp.eq.s32.totalorder %v6583_v21, %v10591_v31 }
 0x603   :  { %v5509_v35 = vsel %vm5415_vm1, %v5366_v36, 0.0  ;;  %v3652_v36 = vadd.f32 %v10583_v6, %v3409_v7  ;;  %vm10586_vm1 = vmmov %vm10578_vm10  ;;  %v3417_v7 = vadd.f32 %v10595_v16, %v10594_v40  ;;  %v10608_v40 = vld [vmem:[#allocation94_spill] sm:$0xff]  ;;  %v10609_v16 = vld [vmem:[#allocation27_spill] sm:$0xff] }
 0x604   :  { %v5510_v50 = vadd.f32 %v5509_v35, %v5508_v58  ;;  %v10584_v58 = vld [vmem:[#allocation86_spill] sm:$0xff]  ;;  %v10587_v35 = vld [vmem:[#allocation67_spill] sm:$0xff]  ;;  %vm10600_vm8 = vmmov %vm10592_vm15 }
 0x605   :  { %5705 = vmatmul.msk.f32.gmra.mxu3 %vm10570_vm14, %v10334_v52  ;;  %vm10585_vm12 = vcmp.eq.s32.totalorder %v6583_v21, %v10584_v58 }
 0x606   :  { %5511 = vadd.xlane.f32.xlu0 %v5510_v50  ;;  %5656 = vmatmul.msk.f32.gmra.mxu2 %vm10571_vm4, %v10334_v52  ;;  %v10588_v50 = vld [vmem:[#allocation65_spill] sm:$0xff]  ;;  %vm10593_vm2 = vmmov %vm10585_vm12 }
 0x608   :  { %v3592_v51 = vpop.f32.mrf.mxu3 }
 0x609   :  { %v3295_v3 = vpop.f32.mrf.mxu2 }
 0x60a   :  { %v9427_v0 = vadd.f32 %v3588_v57, %v3295_v3  ;;  %v10589_v3 = vld [vmem:[#allocation81_spill] sm:$0xff] }
 0x60b   :  { %v3927_v14 = vadd.f32 %v10589_v3, %v3652_v36  ;;  %v10603_v3 = vld [vmem:[#allocation89_spill] sm:$0xff] }
 0x60d   :  { %5706 = vmatmul.msk.f32.gmra.mxu3 %vm10572_vm13, %v10334_v52 }
 0x60e   :  { %5657 = vmatmul.msk.f32.gmra.mxu2 %vm10573_vm6, %v10334_v52 }
 0x610   :  { %v4496_v54 = vpop.f32.mrf.mxu3 }
 0x611   :  { %v3303_v46 = vpop.f32.mrf.mxu2 }
 0x612   :  { %v9439_v17 = vadd.f32 %v3592_v51, %v3303_v46  ;;  %v3413_v51 = vadd.f32 %v10588_v50, %v10587_v35  ;;  %v10601_v35 = vld [vmem:[#allocation49_spill] sm:$0xff]  ;;  %v10602_v50 = vld [vmem:[#allocation14_spill] sm:$0xff] }
 0x614   :  { %v3657_v46 = vadd.f32 %v10590_v24, %v3413_v51  ;;  %v3421_v51 = vadd.f32 %v10602_v50, %v10601_v35  ;;  %v10615_v35 = vld [vmem:[#allocation95_spill] sm:$0xff]  ;;  %v10616_v50 = vld [vmem:[#allocation93_spill] sm:$0xff] }
 0x615   :  { %5707 = vmatmul.msk.f32.gmra.mxu3 %vm10578_vm10, %v10334_v52 }
 0x616   :  { %5658 = vmatmul.msk.f32.gmra.mxu2 %vm10579_vm3, %v10334_v52 }
 0x618   :  { %v4500_v9 = vpop.f32.mrf.mxu3 }
 0x619   :  { %v4271_v48 = vpop.f32.mrf.mxu2 }
 0x61a   :  { %v4272_v57 = vadd.f32 %v4271_v48, %v3921_v39  ;;  %v3933_v39 = vadd.f32 %v10596_v38, %v3657_v46  ;;  %v10610_v38 = vld [vmem:[#allocation90_spill] sm:$0xff] }
 0x61c   :  { %v4497_v34 = vadd.f32 %v4496_v54, %v4272_v57  ;;  %v10597_v57 = vld [vmem:[#allocation66_spill] sm:$0xff] }
 0x61d   :  { %5708 = vmatmul.msk.f32.gmra.mxu3 %vm10585_vm12, %v10334_v52  ;;  %v3662_v6 = vadd.f32 %v10597_v57, %v3417_v7  ;;  %v3425_v7 = vadd.f32 %v10609_v16, %v10608_v40  ;;  %v10622_v40 = vld [vmem:[#allocation92_spill] sm:$0xff] }
 0x61e   :  { %4687 = vst.msk [vmem:[#allocation2] sm:$0xff] %vm76_vm0, %v4497_v34  ;;  %5659 = vmatmul.msk.f32.gmra.mxu2 %vm10586_vm1, %v10334_v52  ;;  %v10598_v34 = vld [vmem:[#allocation40_spill] sm:$0xff] }
 0x61f   :  { %vm10599_vm5 = vcmp.eq.s32.totalorder %v6583_v21, %v10598_v34 }
 0x620   :  { %v4504_v61 = vpop.f32.mrf.mxu3  ;;  %vm10607_vm14 = vmmov %vm10599_vm5 }
 0x621   :  { %v4275_v22 = vpop.f32.mrf.mxu2 }
 0x622   :  { %v4276_v54 = vadd.f32 %v4275_v22, %v3927_v14  ;;  %v3939_v14 = vadd.f32 %v10603_v3, %v3662_v6  ;;  %v10617_v3 = vld [vmem:[#allocation24_spill] sm:$0xff] }
 0x624   :  { %v4501_v29 = vadd.f32 %v4500_v9, %v4276_v54  ;;  %v10604_v54 = vld [vmem:[#allocation68_spill] sm:$0xff] }
 0x625   :  { %5709 = vmatmul.msk.f32.gmra.mxu3 %vm10592_vm15, %v10334_v52  ;;  %v3667_v24 = vadd.f32 %v10604_v54, %v3421_v51  ;;  %v3429_v51 = vadd.f32 %v10616_v50, %v10615_v35  ;;  %vm10628_vm15 = vcmp.eq.s32.totalorder %v6583_v21, %v8545_v18 }
 0x626   :  { %4688 = vst.msk [vmem:[#allocation2 + $0x8] sm:$0xff] %vm76_vm0, %v4501_v29  ;;  %5660 = vmatmul.msk.f32.gmra.mxu2 %vm10593_vm2, %v10334_v52  ;;  %v10605_v29 = vld [vmem:[#allocation46_spill] sm:$0xff] }
 0x627   :  { %vm10606_vm11 = vcmp.eq.s32.totalorder %v6583_v21, %v10605_v29 }
 0x628   :  { %v4508_v20 = vpop.f32.mrf.mxu3  ;;  %vm10614_vm13 = vmmov %vm10606_vm11 }
 0x629   :  { %v4279_v48 = vpop.f32.mrf.mxu2 }
 0x62a   :  { %v4280_v9 = vadd.f32 %v4279_v48, %v3933_v39  ;;  %v3945_v39 = vadd.f32 %v10610_v38, %v3667_v24 }
 0x62c   :  { %v4505_v36 = vadd.f32 %v4504_v61, %v4280_v9  ;;  %v10611_v9 = vld [vmem:[#allocation20_spill] sm:$0xff] }
 0x62d   :  { %5710 = vmatmul.msk.f32.gmra.mxu3 %vm10599_vm5, %v10334_v52  ;;  %v3672_v57 = vadd.f32 %v10611_v9, %v3425_v7  ;;  %vm10631_vm5 = vmmov %vm10628_vm15 }
 0x62e   :  { %4689 = vst.msk [vmem:[#allocation2 + $0x10] sm:$0xff] %vm76_vm0, %v4505_v36  ;;  %5661 = vmatmul.msk.f32.gmra.mxu2 %vm10600_vm8, %v10334_v52  ;;  %v10612_v36 = vld [vmem:[#allocation26_spill] sm:$0xff] }
 0x62f   :  { %vm10613_vm4 = vcmp.eq.s32.totalorder %v6583_v21, %v10612_v36 }
 0x630   :  { %v4512_v58 = vpop.f32.mrf.mxu3  ;;  %vm10621_vm10 = vmmov %vm10613_vm4 }
 0x631   :  { %v4283_v22 = vpop.f32.mrf.mxu2 }
 0x632   :  { %v4284_v61 = vadd.f32 %v4283_v22, %v3939_v14  ;;  %v3951_v14 = vadd.f32 %v10617_v3, %v3672_v57 }
 0x634   :  { %v4509_v46 = vadd.f32 %v4508_v20, %v4284_v61  ;;  %v10618_v61 = vld [vmem:[#allocation28_spill] sm:$0xff] }
 0x635   :  { %5711 = vmatmul.msk.f32.gmra.mxu3 %vm10606_vm11, %v10334_v52  ;;  %v3677_v54 = vadd.f32 %v10618_v61, %v3429_v51 }
 0x636   :  { %4690 = vst.msk [vmem:[#allocation2 + $0x18] sm:$0xff] %vm76_vm0, %v4509_v46  ;;  %5662 = vmatmul.msk.f32.gmra.mxu2 %vm10607_vm14, %v10334_v52  ;;  %v10619_v46 = vld [vmem:[#allocation72_spill] sm:$0xff] }
 0x637   :  { %vm10620_vm6 = vcmp.eq.s32.totalorder %v6583_v21, %v10619_v46  ;;  %v3957_v16 = vadd.f32 %v10622_v40, %v3677_v54 }
 0x638   :  { %v4516_v31 = vpop.f32.mrf.mxu3  ;;  %vm10625_vm12 = vmmov %vm10620_vm6 }
 0x639   :  { %v4287_v48 = vpop.f32.mrf.mxu2 }
 0x63a   :  { %v4288_v20 = vadd.f32 %v4287_v48, %v3945_v39 }
 0x63c   :  { %v4513_v6 = vadd.f32 %v4512_v58, %v4288_v20 }
 0x63d   :  { %5712 = vmatmul.msk.f32.gmra.mxu3 %vm10613_vm4, %v10334_v52 }
 0x63e   :  { %4691 = vst.msk [vmem:[#allocation2 + $0x20] sm:$0xff] %vm76_vm0, %v4513_v6  ;;  %5663 = vmatmul.msk.f32.gmra.mxu2 %vm10614_vm13, %v10334_v52 }
 0x640   :  { %v4520_v34 = vpop.f32.mrf.mxu3 }
 0x641   :  { %v4291_v22 = vpop.f32.mrf.mxu2 }
 0x642   :  { %v4292_v58 = vadd.f32 %v4291_v22, %v3951_v14 }
 0x644   :  { %v4517_v24 = vadd.f32 %v4516_v31, %v4292_v58  ;;  %v10623_v31 = vld [vmem:[#allocation96_spill] sm:$0xff] }
 0x645   :  { %5713 = vmatmul.msk.f32.gmra.mxu3 %vm10620_vm6, %v10334_v52  ;;  %vm10624_vm3 = vcmp.eq.s32.totalorder %v6583_v21, %v10623_v31  ;;  %v10637_v31 = vld [vmem:[#allocation100_spill] sm:$0xff]  ;;  %vm10640_vm6 = vcmp.eq.s32.totalorder %v6583_v21, %v8631_v27 }
 0x646   :  { %4692 = vst.msk [vmem:[#allocation2 + $0x28] sm:$0xff] %vm76_vm0, %v4517_v24  ;;  %5664 = vmatmul.msk.f32.gmra.mxu2 %vm10621_vm10, %v10334_v52  ;;  %vm10627_vm1 = vmmov %vm10624_vm3  ;;  %vm10638_vm4 = vcmp.eq.s32.totalorder %v6583_v21, %v10637_v31 }
 0x647   :  { %vm10641_vm10 = vmmov %vm10638_vm4 }
 0x648   :  { %v4524_v29 = vpop.f32.mrf.mxu3 }
 0x649   :  { %v4295_v7 = vpop.f32.mrf.mxu2 }
 0x64a   :  { %v4296_v38 = vadd.f32 %v4295_v7, %v3957_v16 }
 0x64c   :  { %v4521_v39 = vadd.f32 %v4520_v34, %v4296_v38 }
 0x64d   :  { %5714 = vmatmul.msk.f32.gmra.mxu3 %vm10624_vm3, %v10334_v52  ;;  %vm10642_vm3 = vcmp.eq.s32.totalorder %v6583_v21, %v8646_v8 }
 0x64e   :  { %4693 = vst.msk [vmem:[#allocation2 + $0x30] sm:$0xff] %vm76_vm0, %v4521_v39  ;;  %5665 = vmatmul.msk.f32.gmra.mxu2 %vm10625_vm12, %v10334_v52  ;;  %vm10643_vm12 = vmmov %vm10640_vm6 }
 0x650   :  { %v4528_v48 = vpop.f32.mrf.mxu3 }
 0x651   :  { %v4299_v20 = vpop.f32.mrf.mxu2 }
 0x652   :  { %v4300_v9 = vadd.f32 %v4299_v20, %v8541_v37 }
 0x654   :  { %v4525_v57 = vadd.f32 %v4524_v29, %v4300_v9 }
 0x655   :  { %5715 = vmatmul.msk.f32.gmra.mxu3 %vm2754_vm9, %v10334_v52 }
 0x656   :  { %4694 = vst.msk [vmem:[#allocation2 + $0x38] sm:$0xff] %vm76_vm0, %v4525_v57  ;;  %5666 = vmatmul.msk.f32.gmra.mxu2 %vm10627_vm1, %v10334_v52 }
 0x658   :  { %v4532_v36 = vpop.f32.mrf.mxu3 }
 0x659   :  { %v4303_v34 = vpop.f32.mrf.mxu2 }
 0x65a   :  { %v4304_v35 = vadd.f32 %v4303_v34, %v8565_v13  ;;  %v10629_v13 = vld [vmem:[#allocation98_spill] sm:$0xff] }
 0x65b   :  { %vm10630_vm2 = vcmp.eq.s32.totalorder %v6583_v21, %v10629_v13 }
 0x65c   :  { %v4529_v50 = vadd.f32 %v4528_v48, %v4304_v35  ;;  %vm10633_vm8 = vmmov %vm10630_vm2 }
 0x65d   :  { %5716 = vmatmul.msk.f32.gmra.mxu3 %vm10628_vm15, %v10334_v52  ;;  %vm10646_vm15 = vmmov %vm10642_vm3 }
 0x65e   :  { %4695 = vst.msk [vmem:[#allocation2 + $0x40] sm:$0xff] %vm76_vm0, %v4529_v50  ;;  %5667 = vmatmul.msk.f32.gmra.mxu2 %vm2754_vm9, %v10334_v52  ;;  %vm10632_vm9 = vcmp.eq.s32.totalorder %v6583_v21, %v8586_v26 }
 0x65f   :  { %vm10636_vm14 = vmmov %vm10632_vm9 }
 0x660   :  { %v4536_v37 = vpop.f32.mrf.mxu3 }
 0x661   :  { %v4307_v51 = vpop.f32.mrf.mxu2 }
 0x662   :  { %v4308_v3 = vadd.f32 %v4307_v51, %v8584_v28 }
 0x664   :  { %v4533_v14 = vadd.f32 %v4532_v36, %v4308_v3 }
 0x665   :  { %5717 = vmatmul.msk.f32.gmra.mxu3 %vm10630_vm2, %v10334_v52  ;;  %vm10647_vm2 = vcmp.eq.s32.totalorder %v6583_v21, %v8676_v43 }
 0x666   :  { %4696 = vst.msk [vmem:[#allocation2 + $0x48] sm:$0xff] %vm76_vm0, %v4533_v14  ;;  %5668 = vmatmul.msk.f32.gmra.mxu2 %vm10631_vm5, %v10334_v52 }
 0x668   :  { %v4540_v22 = vpop.f32.mrf.mxu3 }
 0x669   :  { %v4311_v58 = vpop.f32.mrf.mxu2 }
 0x66a   :  { %v4312_v61 = vadd.f32 %v4311_v58, %v8599_v30  ;;  %v10634_v30 = vld [vmem:[#allocation99_spill] sm:$0xff] }
 0x66b   :  { %vm10635_vm11 = vcmp.eq.s32.totalorder %v6583_v21, %v10634_v30 }
 0x66c   :  { %v4537_v54 = vadd.f32 %v4536_v37, %v4312_v61  ;;  %vm10639_vm13 = vmmov %vm10635_vm11  ;;  %v5073_v61 = vrot.slane %v9159_v32, 4 }
 0x66d   :  { %5718 = vmatmul.msk.f32.gmra.mxu3 %vm10632_vm9, %v10334_v52  ;;  %vm10649_vm9 = vcmp.eq.s32.totalorder %v6583_v21, %v8691_v55 }
 0x66e   :  { %4697 = vst.msk [vmem:[#allocation2 + $0x50] sm:$0xff] %vm76_vm0, %v4537_v54  ;;  %5669 = vmatmul.msk.f32.gmra.mxu2 %vm10633_vm8, %v10334_v52  ;;  %vm10650_vm8 = vmmov %vm10647_vm2 }
 0x670   :  { %v4544_v28 = vpop.f32.mrf.mxu3 }
 0x671   :  { %v4315_v18 = vpop.f32.mrf.mxu2 }
 0x672   :  { %v4316_v24 = vadd.f32 %v4315_v18, %v8614_v10  ;;  %v9650_v18 = vpop.f32.mrf.mxu0 }
 0x674   :  { %v4541_v46 = vadd.f32 %v4540_v22, %v4316_v24 }
 0x675   :  { %5719 = vmatmul.msk.f32.gmra.mxu3 %vm10635_vm11, %v10334_v52  ;;  %vm10651_vm11 = vcmp.eq.s32.totalorder %v6583_v21, %v8706_v23 }
 0x676   :  { %4698 = vst.msk [vmem:[#allocation2 + $0x58] sm:$0xff] %vm76_vm0, %v4541_v46  ;;  %5670 = vmatmul.msk.f32.gmra.mxu2 %vm10636_vm14, %v10334_v52  ;;  %vm10652_vm14 = vmmov %vm10649_vm9 }
 0x678   :  { %v4548_v29 = vpop.f32.mrf.mxu3 }
 0x679   :  { %v5512_v40 = vpop.xlane.xlu0 %5511  ;;  %v4319_v16 = vpop.f32.mrf.mxu2 }
 0x67a   :  { %v5513_v7 = vrot.slane %v5512_v40, 4  ;;  %v4320_v38 = vadd.f32 %v4319_v16, %v8629_v2 }
 0x67c   :  { %v5514_v10 = vadd.f32 %v5513_v7, %v5512_v40  ;;  %v4545_v39 = vadd.f32 %v4544_v28, %v4320_v38  ;;  %v5074_v28 = vadd.f32 %v5073_v61, %v9159_v32  ;;  %v9655_v40 = vpop.f32.mrf.mxu1 }
 0x67d   :  { %5720 = vmatmul.msk.f32.gmra.mxu3 %vm10638_vm4, %v10334_v52  ;;  %vm10653_vm4 = vcmp.eq.s32.totalorder %v6583_v21, %v8726_v11 }
 0x67e   :  { %v5515_v48 = vrot.slane %v5514_v10, 2  ;;  %4699 = vst.msk [vmem:[#allocation2 + $0x60] sm:$0xff] %vm76_vm0, %v4545_v39  ;;  %5671 = vmatmul.msk.f32.gmra.mxu2 %vm10639_vm13, %v10334_v52  ;;  %v5075_v30 = vrot.slane %v5074_v28, 2  ;;  %vm5520_vm13 = vcmp.eq.s32.totalorder %v6583_v21, 127 }
 0x680   :  { %v4552_v26 = vpop.f32.mrf.mxu3  ;;  %v5516_v20 = vadd.f32 %v5515_v48, %v5514_v10  ;;  %v5076_v43 = vadd.f32 %v5075_v30, %v5074_v28 }
 0x681   :  { %v4323_v9 = vpop.f32.mrf.mxu2 }
 0x682   :  { %v5517_v57 = vrot.slane %v5516_v20, 1  ;;  %v4324_v2 = vadd.f32 %v4323_v9, %v8644_v47  ;;  %v5077_v10 = vrot.slane %v5076_v43, 1 }
 0x684   :  { %v5518_v6 = vadd.f32 %v5517_v57, %v5516_v20  ;;  %v4549_v36 = vadd.f32 %v4548_v29, %v4324_v2  ;;  %v9677_v55 = vpop.f32.mrf.mxu1 }
 0x685   :  { %5721 = vmatmul.msk.f32.gmra.mxu3 %vm10640_vm6, %v10334_v52  ;;  %vm10654_vm6 = vmmov %vm10651_vm11 }
 0x686   :  { %5738 = vpush %v5518_v6  ;;  %5672 = vmatmul.msk.f32.gmra.mxu2 %vm10641_vm10, %v10334_v52  ;;  %v10656_v6 = vld [vmem:[#allocation130_spill] sm:$0xff] }
 0x687   :  { %4700 = vst.msk [vmem:[#allocation2 + $0x68] sm:$0xff] %vm76_vm0, %v4549_v36 }
 0x688   :  { %v4556_v34 = vpop.f32.mrf.mxu3 }
 0x689   :  { %v4327_v35 = vpop.f32.mrf.mxu2 }
 0x68a   :  { %v4328_v50 = vadd.f32 %v4327_v35, %v8659_v62  ;;  %v10644_v62 = vld [vmem:[#allocation101_spill] sm:$0xff]  ;;  %v10660_v35 = vld [vmem:[#allocation108_spill] sm:$0xff] }
 0x68b   :  { %vm10645_vm1 = vcmp.eq.s32.totalorder %v6583_v21, %v10644_v62  ;;  %v10663_v62 = vld [vmem:[#allocation135_spill] sm:$0xff] }
 0x68c   :  { %v4553_v47 = vadd.f32 %v4552_v26, %v4328_v50  ;;  %vm10648_vm5 = vmmov %vm10645_vm1  ;;  %v10655_v26 = vld [vmem:[#allocation126_spill] sm:$0xff]  ;;  %v10661_v50 = vld [vmem:[#allocation107_spill] sm:$0xff] }
 0x68d   :  { %5722 = vmatmul.msk.f32.gmra.mxu3 %vm10642_vm3, %v10334_v52  ;;  %vm10659_vm3 = vmmov %vm10653_vm4 }
 0x68e   :  { %4701 = vst.msk [vmem:[#allocation2 + $0x70] sm:$0xff] %vm76_vm0, %v4553_v47  ;;  %5673 = vmatmul.msk.f32.gmra.mxu2 %vm10643_vm12, %v10334_v52  ;;  %v3493_v47 = vadd.f32 %v10661_v50, %v10660_v35 }
 0x690   :  { %v4560_v37 = vpop.f32.mrf.mxu3 }
 0x691   :  { %v4331_v51 = vpop.f32.mrf.mxu2 }
 0x692   :  { %v4332_v3 = vadd.f32 %v4331_v51, %v8674_v12 }
 0x694   :  { %v4557_v14 = vadd.f32 %v4556_v34, %v4332_v3  ;;  %v10657_v34 = vld [vmem:[#allocation102_spill] sm:$0xff] }
 0x695   :  { %5723 = vmatmul.msk.f32.gmra.mxu3 %vm10645_vm1, %v10334_v52  ;;  %vm10658_vm10 = vcmp.eq.s32.totalorder %v6583_v21, %v10657_v34  ;;  %v10684_v34 = vld [vmem:[#allocation116_spill] sm:$0xff] }
 0x696   :  { %4702 = vst.msk [vmem:[#allocation2 + $0x78] sm:$0xff] %vm76_vm0, %v4557_v14  ;;  %5674 = vmatmul.msk.f32.gmra.mxu2 %vm10646_vm15, %v10334_v52  ;;  %vm10666_vm1 = vmmov %vm10658_vm10 }
 0x698   :  { %v4564_v13 = vpop.f32.mrf.mxu3 }
 0x699   :  { %v4335_v27 = vpop.f32.mrf.mxu2 }
 0x69a   :  { %v4336_v22 = vadd.f32 %v4335_v27, %v8689_v49 }
 0x69c   :  { %v4561_v58 = vadd.f32 %v4560_v37, %v4336_v22  ;;  %v10662_v37 = vld [vmem:[#allocation131_spill] sm:$0xff] }
 0x69d   :  { %5724 = vmatmul.msk.f32.gmra.mxu3 %vm10647_vm2, %v10334_v52  ;;  %v10664_v22 = vld [vmem:[#allocation103_spill] sm:$0xff] }
 0x69e   :  { %4703 = vst.msk [vmem:[#allocation2 + $0x80] sm:$0xff] %vm76_vm0, %v4561_v58  ;;  %5675 = vmatmul.msk.f32.gmra.mxu2 %vm10648_vm5, %v10334_v52  ;;  %vm10665_vm12 = vcmp.eq.s32.totalorder %v6583_v21, %v10664_v22 }
 0x69f   :  { %vm10673_vm2 = vmmov %vm10665_vm12 }
 0x6a0   :  { %v4568_v12 = vpop.f32.mrf.mxu3 }
 0x6a1   :  { %v4339_v8 = vpop.f32.mrf.mxu2 }
 0x6a2   :  { %v4340_v54 = vadd.f32 %v4339_v8, %v8704_v5  ;;  %v3481_v5 = vadd.f32 %v8762_v42, %v8786_v60  ;;  %v10668_v8 = vld [vmem:[#allocation109_spill] sm:$0xff] }
 0x6a4   :  { %v4565_v49 = vadd.f32 %v4564_v13, %v4340_v54  ;;  %v3742_v32 = vadd.f32 %v9009_v41, %v3481_v5  ;;  %v9670_v41 = vpop.f32.mrf.mxu0  ;;  %v3757_v13 = vadd.f32 %v10663_v62, %v3493_v47  ;;  %v10669_v54 = vld [vmem:[#allocation136_spill] sm:$0xff] }
 0x6a5   :  { %5725 = vmatmul.msk.f32.gmra.mxu3 %vm10649_vm9, %v10334_v52 }
 0x6a6   :  { %4704 = vst.msk [vmem:[#allocation2 + $0x88] sm:$0xff] %vm76_vm0, %v4565_v49  ;;  %5676 = vmatmul.msk.f32.gmra.mxu2 %vm10650_vm8, %v10334_v52  ;;  %v4035_v60 = vadd.f32 %v9014_v53, %v3742_v32  ;;  %v5078_v53 = vadd.f32 %v5077_v10, %v5076_v43  ;;  %v4053_v49 = vadd.f32 %v10669_v54, %v3757_v13  ;;  %v10671_v32 = vld [vmem:[#allocation104_spill] sm:$0xff]  ;;  %v10691_v54 = vld [vmem:[#allocation125_spill] sm:$0xff] }
 0x6a7   :  { %vm10672_vm15 = vcmp.eq.s32.totalorder %v6583_v21, %v10671_v32 }
 0x6a8   :  { %v4572_v24 = vpop.f32.mrf.mxu3  ;;  %vm10678_vm9 = vmmov %vm10672_vm15 }
 0x6a9   :  { %v4343_v46 = vpop.f32.mrf.mxu2 }
 0x6aa   :  { %v4344_v29 = vadd.f32 %v4343_v46, %v8720_v19  ;;  %v3485_v19 = vadd.f32 %v8791_v33, %v8818_v59  ;;  %v10670_v46 = vld [vmem:[#allocation15_spill] sm:$0xff] }
 0x6ac   :  { %v4569_v16 = vadd.f32 %v4568_v12, %v4344_v29  ;;  %v3747_v39 = vadd.f32 %v9048_v25, %v3485_v19  ;;  %v3489_v25 = vadd.f32 %v8832_v44, %v8858_v4  ;;  %v3776_v2 = vpop.f32.mrf.mxu0  ;;  %v4076_v44 = vpop.f32.mrf.mxu1  ;;  %v10667_v12 = vld [vmem:[#allocation110_spill] sm:$0xff]  ;;  %v10675_v19 = vld [vmem:[#allocation111_spill] sm:$0xff] }
 0x6ad   :  { %5726 = vmatmul.msk.f32.gmra.mxu3 %vm10651_vm11, %v10334_v52  ;;  %v3497_v61 = vadd.f32 %v10668_v8, %v10667_v12 }
 0x6ae   :  { %4705 = vst.msk [vmem:[#allocation2 + $0x90] sm:$0xff] %vm76_vm0, %v4569_v16  ;;  %5677 = vmatmul.msk.f32.gmra.mxu2 %vm10652_vm14, %v10334_v52  ;;  %v4041_v20 = vadd.f32 %v10655_v26, %v3747_v39  ;;  %v3752_v23 = vadd.f32 %v10656_v6, %v3489_v25  ;;  %v10680_v25 = vld [vmem:[#allocation113_spill] sm:$0xff] }
 0x6af   :  { %v3762_v30 = vadd.f32 %v10670_v46, %v3497_v61 }
 0x6b0   :  { %v4576_v42 = vpop.f32.mrf.mxu3  ;;  %v4047_v51 = vadd.f32 %v10662_v37, %v3752_v23  ;;  %v10681_v23 = vld [vmem:[#allocation106_spill] sm:$0xff] }
 0x6b1   :  { %v4347_v7 = vpop.f32.mrf.mxu2  ;;  %vm10682_vm8 = vcmp.eq.s32.totalorder %v6583_v21, %v10681_v23 }
 0x6b2   :  { %v4348_v38 = vadd.f32 %v4347_v7, %v4035_v60  ;;  %v4059_v7 = vadd.f32 %v9168_v56, %v3762_v30  ;;  %v10679_v56 = vld [vmem:[#allocation114_spill] sm:$0xff] }
 0x6b4   :  { %v4573_v31 = vadd.f32 %v4572_v24, %v4348_v38  ;;  %v3781_v58 = vpop.f32.mrf.mxu0  ;;  %v4082_v28 = vpop.f32.mrf.mxu1 }
 0x6b5   :  { %5727 = vmatmul.msk.f32.gmra.mxu3 %vm10653_vm4, %v10334_v52  ;;  %vm10688_vm4 = vmmov %vm10682_vm8 }
 0x6b6   :  { %4706 = vst.msk [vmem:[#allocation2 + $0x98] sm:$0xff] %vm76_vm0, %v4573_v31  ;;  %5678 = vmatmul.msk.f32.gmra.mxu2 %vm10654_vm6, %v10334_v52 }
 0x6b7   :  { %s5739_s0 = spop %5738 }
 0x6b8   :  { %v4580_v33 = vpop.f32.mrf.mxu3  ;;  %v5521_v59 = vstv %s5739_s0 }
 0x6b9   :  { %v5522_v48 = vsel %vm5520_vm13, %v5521_v59, %v5078_v53  ;;  %v4351_v9 = vpop.f32.mrf.mxu2  ;;  %vm10692_vm13 = vcmp.eq.s32.totalorder %v6583_v21, %v10691_v54 }
 0x6ba   :  { %5523 = vst [vmem:[%s9868_s5] sm:$0x1] %v5522_v48  ;;  %v4352_v57 = vadd.f32 %v4351_v9, %v4041_v20  ;;  %v3505_v48 = vadd.f32 %v10680_v25, %v10679_v56  ;;  %v10701_v25 = vld [vmem:[#allocation133_spill] sm:$0xff]  ;;  %s5824_s5 = smov [#allocation2]  }
 0x6bb   :  { %s5528_s16 = sshll.u32 %s5824_s5, 4  ;;  %s5529_s16 = int_to_ptr.vmem [resolvable:$true] %s5528_s16 }
 0x6bc   :  { %v4577_v36 = vadd.f32 %v4576_v42, %v4352_v57  ;;  %v3786_v16 = vpop.f32.mrf.mxu0  ;;  %v10674_v42 = vld [vmem:[#allocation112_spill] sm:$0xff]  ;;  %v4088_v39 = vpop.f32.mrf.mxu1  ;;  %v3772_v57 = vadd.f32 %v9670_v41, %v3505_v48 }
 0x6bd   :  { %5728 = vmatmul.msk.f32.gmra.mxu3 %vm10658_vm10, %v10334_v52  ;;  %v3501_v60 = vadd.f32 %v10675_v19, %v10674_v42  ;;  %v10696_v19 = vld [vmem:[#allocation128_spill] sm:$0xff] }
 0x6be   :  { %4707 = vst.msk [vmem:[#allocation2 + $0xa0] sm:$0xff] %vm76_vm0, %v4577_v36  ;;  %5679 = vmatmul.msk.f32.gmra.mxu2 %vm10659_vm3, %v10334_v52  ;;  %v4071_v41 = vadd.f32 %v9677_v55, %v3772_v57  ;;  %v10689_v55 = vld [vmem:[#allocation118_spill] sm:$0xff]  ;;  %vm10697_vm10 = vcmp.eq.s32.totalorder %v6583_v21, %v10696_v19  ;;  %vm10698_vm3 = vmmov %vm10692_vm13  ;;  %v10714_v19 = vld [vmem:[#allocation69_spill] sm:$0xff] }
 0x6bf   :  { %v3767_v31 = vadd.f32 %v9650_v18, %v3501_v60 }
 0x6c0   :  { %v4584_v4 = vpop.f32.mrf.mxu3 }
 0x6c1   :  { %v4355_v3 = vpop.f32.mrf.mxu2  ;;  %v4065_v26 = vadd.f32 %v9655_v40, %v3767_v31 }
 0x6c2   :  { %v4356_v14 = vadd.f32 %v4355_v3, %v4047_v51 }
 0x6c4   :  { %v4581_v27 = vadd.f32 %v4580_v33, %v4356_v14  ;;  %v10676_v33 = vld [vmem:[#allocation105_spill] sm:$0xff]  ;;  %v3791_v18 = vpop.f32.mrf.mxu0  ;;  %v4094_v36 = vpop.f32.mrf.mxu1  ;;  %v10686_v14 = vld [vmem:[#allocation122_spill] sm:$0xff] }
 0x6c5   :  { %5729 = vmatmul.msk.f32.gmra.mxu3 %vm10665_vm12, %v10334_v52  ;;  %vm10677_vm5 = vcmp.eq.s32.totalorder %v6583_v21, %v10676_v33  ;;  %vm10687_vm14 = vcmp.eq.s32.totalorder %v6583_v21, %v10686_v14  ;;  %vm10702_vm12 = vcmp.eq.s32.totalorder %v6583_v21, %v10701_v25 }
 0x6c6   :  { %4708 = vst.msk [vmem:[#allocation2 + $0xa8] sm:$0xff] %vm76_vm0, %v4581_v27  ;;  %5680 = vmatmul.msk.f32.gmra.mxu2 %vm10666_vm1, %v10334_v52  ;;  %vm10683_vm11 = vmmov %vm10677_vm5  ;;  %v10690_v27 = vld [vmem:[#allocation117_spill] sm:$0xff] }
 0x6c7   :  { %v3513_v22 = vadd.f32 %v10690_v27, %v10689_v55  ;;  %vm10693_vm6 = vmmov %vm10687_vm14 }
 0x6c8   :  { %v4588_v11 = vpop.f32.mrf.mxu3  ;;  %vm10703_vm1 = vmmov %vm10697_vm10 }
 0x6c9   :  { %v4359_v24 = vpop.f32.mrf.mxu2  ;;  %v3782_v8 = vadd.f32 %v3781_v58, %v3513_v22  ;;  %v10710_v22 = vld [vmem:[#allocation9_spill] sm:$0xff] }
 0x6ca   :  { %v4360_v5 = vadd.f32 %v4359_v24, %v4053_v49 }
 0x6cb   :  { %v4083_v30 = vadd.f32 %v4082_v28, %v3782_v8  ;;  %v10699_v28 = vld [vmem:[#allocation123_spill] sm:$0xff] }
 0x6cc   :  { %v4585_v29 = vadd.f32 %v4584_v4, %v4360_v5  ;;  %v10685_v4 = vld [vmem:[#allocation115_spill] sm:$0xff]  ;;  %v3796_v37 = vpop.f32.mrf.mxu0  ;;  %v4100_v62 = vpop.f32.mrf.mxu1  ;;  %v10694_v5 = vld [vmem:[#allocation120_spill] sm:$0xff] }
 0x6cd   :  { %5730 = vmatmul.msk.f32.gmra.mxu3 %vm10672_vm15, %v10334_v52  ;;  %v3509_v35 = vadd.f32 %v10685_v4, %v10684_v34  ;;  %vm10707_vm15 = vmmov %vm10702_vm12 }
 0x6ce   :  { %4709 = vst.msk [vmem:[#allocation2 + $0xb0] sm:$0xff] %vm76_vm0, %v4585_v29  ;;  %5681 = vmatmul.msk.f32.gmra.mxu2 %vm10673_vm2, %v10334_v52 }
 0x6cf   :  { %v3777_v51 = vadd.f32 %v3776_v2, %v3509_v35 }
 0x6d0   :  { %v4592_v43 = vpop.f32.mrf.mxu3 }
 0x6d1   :  { %v4363_v38 = vpop.f32.mrf.mxu2 }
 0x6d2   :  { %v4364_v10 = vadd.f32 %v4363_v38, %v4059_v7  ;;  %v10700_v38 = vld [vmem:[#allocation121_spill] sm:$0xff] }
 0x6d4   :  { %v4589_v53 = vadd.f32 %v4588_v11, %v4364_v10  ;;  %v4077_v11 = vadd.f32 %v4076_v44, %v3777_v51  ;;  %v3801_v49 = vpop.f32.mrf.mxu0  ;;  %v10695_v44 = vld [vmem:[#allocation119_spill] sm:$0xff]  ;;  %v4106_v58 = vpop.f32.mrf.mxu1  ;;  %v3521_v10 = vadd.f32 %v10700_v38, %v10699_v28 }
 0x6d5   :  { %5731 = vmatmul.msk.f32.gmra.mxu3 %vm10677_vm5, %v10334_v52  ;;  %v3517_v46 = vadd.f32 %v10695_v44, %v10694_v5  ;;  %v10712_v5 = vld [vmem:[#allocation17_spill] sm:$0xff]  ;;  %v10713_v44 = vld [vmem:[#allocation6_spill] sm:$0xff] }
 0x6d6   :  { %4710 = vst.msk [vmem:[#allocation2 + $0xb8] sm:$0xff] %vm76_vm0, %v4589_v53  ;;  %5682 = vmatmul.msk.f32.gmra.mxu2 %vm10678_vm9, %v10334_v52 }
 0x6d8   :  { %v4596_v59 = vpop.f32.mrf.mxu3 }
 0x6d9   :  { %v4367_v20 = vpop.f32.mrf.mxu2 }
 0x6da   :  { %v4368_v9 = vadd.f32 %v4367_v20, %v4065_v26  ;;  %v10704_v26 = vld [vmem:[#allocation127_spill] sm:$0xff] }
 0x6dc   :  { %v4593_v6 = vadd.f32 %v4592_v43, %v4368_v9  ;;  %v3787_v43 = vadd.f32 %v3786_v16, %v3517_v46  ;;  %v3806_v60 = vpop.f32.mrf.mxu0  ;;  %v4112_v33 = vpop.f32.mrf.mxu1  ;;  %v3537_v46 = vadd.f32 %v10713_v44, %v10712_v5 }
 0x6dd   :  { %5732 = vmatmul.msk.f32.gmra.mxu3 %vm10682_vm8, %v10334_v52 }
 0x6de   :  { %4711 = vst.msk [vmem:[#allocation2 + $0xc0] sm:$0xff] %vm76_vm0, %v4593_v6  ;;  %5683 = vmatmul.msk.f32.gmra.mxu2 %vm10683_vm11, %v10334_v52  ;;  %v4089_v31 = vadd.f32 %v4088_v39, %v3787_v43  ;;  %v10705_v39 = vld [vmem:[#allocation124_spill] sm:$0xff] }
 0x6df   :  { %v3525_v20 = vadd.f32 %v10705_v39, %v10704_v26 }
 0x6e0   :  { %v4600_v40 = vpop.f32.mrf.mxu3 }
 0x6e1   :  { %v4371_v50 = vpop.f32.mrf.mxu2  ;;  %v3797_v23 = vadd.f32 %v3796_v37, %v3525_v20 }
 0x6e2   :  { %v4372_v47 = vadd.f32 %v4371_v50, %v4071_v41  ;;  %v10709_v41 = vld [vmem:[#allocation129_spill] sm:$0xff] }
 0x6e4   :  { %v4597_v3 = vadd.f32 %v4596_v59, %v4372_v47  ;;  %v3792_v59 = vadd.f32 %v3791_v18, %v3521_v10  ;;  %v3811_v57 = vpop.f32.mrf.mxu0  ;;  %v4118_v4 = vpop.f32.mrf.mxu1  ;;  %v4101_v47 = vadd.f32 %v4100_v62, %v3797_v23  ;;  %v10718_v23 = vld [vmem:[#allocation42_spill] sm:$0xff] }
 0x6e5   :  { %5733 = vmatmul.msk.f32.gmra.mxu3 %vm10687_vm14, %v10334_v52 }
 0x6e6   :  { %4712 = vst.msk [vmem:[#allocation2 + $0xc8] sm:$0xff] %vm76_vm0, %v4597_v3  ;;  %5684 = vmatmul.msk.f32.gmra.mxu2 %vm10688_vm4, %v10334_v52  ;;  %v4095_v9 = vadd.f32 %v4094_v36, %v3792_v59  ;;  %v10708_v36 = vld [vmem:[#allocation132_spill] sm:$0xff]  ;;  %v10716_v59 = vld [vmem:[#allocation71_spill] sm:$0xff] }
 0x6e7   :  { %v3529_v50 = vadd.f32 %v10709_v41, %v10708_v36 }
 0x6e8   :  { %v4604_v13 = vpop.f32.mrf.mxu3 }
 0x6e9   :  { %v4375_v2 = vpop.f32.mrf.mxu2  ;;  %v3802_v14 = vadd.f32 %v3801_v49, %v3529_v50 }
 0x6ea   :  { %v4376_v12 = vadd.f32 %v4375_v2, %v4077_v11  ;;  %v10711_v11 = vld [vmem:[#allocation134_spill] sm:$0xff] }
 0x6eb   :  { %v3533_v2 = vadd.f32 %v10711_v11, %v10710_v22 }
 0x6ec   :  { %v4601_v61 = vadd.f32 %v4600_v40, %v4376_v12  ;;  %v3816_v3 = vpop.f32.mrf.mxu0  ;;  %v4124_v55 = vpop.f32.mrf.mxu1  ;;  %v4107_v12 = vadd.f32 %v4106_v58, %v3802_v14  ;;  %v10721_v14 = vld [vmem:[#allocation29_spill] sm:$0xff] }
 0x6ed   :  { %5734 = vmatmul.msk.f32.gmra.mxu3 %vm10692_vm13, %v10334_v52 }
 0x6ee   :  { %4713 = vst.msk [vmem:[#allocation2 + $0xd0] sm:$0xff] %vm76_vm0, %v4601_v61  ;;  %5685 = vmatmul.msk.f32.gmra.mxu2 %vm10693_vm6, %v10334_v52  ;;  %v3807_v61 = vadd.f32 %v3806_v60, %v3533_v2  ;;  %v10715_v60 = vld [vmem:[#allocation21_spill] sm:$0xff] }
 0x6f0   :  { %v4608_v24 = vpop.f32.mrf.mxu3 }
 0x6f1   :  { %v4379_v29 = vpop.f32.mrf.mxu2 }
 0x6f2   :  { %v4380_v32 = vadd.f32 %v4379_v29, %v4083_v30  ;;  %v4113_v30 = vadd.f32 %v4112_v33, %v3807_v61 }
 0x6f4   :  { %v4605_v42 = vadd.f32 %v4604_v13, %v4380_v32  ;;  %v4130_v21 = vpop.f32.mrf.mxu1  ;;  %v3812_v32 = vadd.f32 %v3811_v57, %v3537_v46 }
 0x6f5   :  { %5735 = vmatmul.msk.f32.gmra.mxu3 %vm10697_vm10, %v10334_v52 }
 0x6f6   :  { %4714 = vst.msk [vmem:[#allocation2 + $0xd8] sm:$0xff] %vm76_vm0, %v4605_v42  ;;  %5686 = vmatmul.msk.f32.gmra.mxu2 %vm10698_vm3, %v10334_v52  ;;  %v4119_v28 = vadd.f32 %v4118_v4, %v3812_v32 }
 0x6f8   :  { %v4612_v7 = vpop.f32.mrf.mxu3 }
 0x6f9   :  { %v4383_v16 = vpop.f32.mrf.mxu2 }
 0x6fa   :  { %v4384_v53 = vadd.f32 %v4383_v16, %v4089_v31 }
 0x6fc   :  { %v4609_v56 = vadd.f32 %v4608_v24, %v4384_v53  ;;  %v3821_v24 = vpop.f32.mrf.mxu0  ;;  %v4136_v31 = vpop.f32.mrf.mxu1 }
 0x6fd   :  { %5736 = vmatmul.msk.f32.gmra.mxu3 %vm10702_vm12, %v10334_v52 }
 0x6fe   :  { %4715 = vst.msk [vmem:[#allocation2 + $0xe0] sm:$0xff] %vm76_vm0, %v4609_v56  ;;  %5687 = vmatmul.msk.f32.gmra.mxu2 %vm10703_vm1, %v10334_v52  ;;  %v10717_v56 = vld [vmem:[#allocation8_spill] sm:$0xff] }
 0x6ff   :  { %v3545_v25 = vadd.f32 %v10717_v56, %v10716_v59 }
 0x700   :  { %v4616_v48 = vpop.f32.mrf.mxu3 }
 0x701   :  { %v4387_v18 = vpop.f32.mrf.mxu2 }
 0x702   :  { %v4388_v6 = vadd.f32 %v4387_v18, %v4095_v9  ;;  %v3822_v9 = vadd.f32 %v3821_v24, %v3545_v25 }
 0x704   :  { %v4613_v40 = vadd.f32 %v4612_v7, %v4388_v6  ;;  %v3826_v58 = vpop.f32.mrf.mxu0  ;;  %v3541_v7 = vadd.f32 %v10715_v60, %v10714_v19  ;;  %v4142_v18 = vpop.f32.mrf.mxu1  ;;  %v4131_v4 = vadd.f32 %v4130_v21, %v3822_v9 }
 0x705   :  { %5737 = vmatmul.msk.f32.gmra.mxu3 %vm2776_vm7, %v10334_v52 }
 0x706   :  { %4716 = vst.msk [vmem:[#allocation2 + $0xe8] sm:$0xff] %vm76_vm0, %v4613_v40  ;;  %5688 = vmatmul.msk.f32.gmra.mxu2 %vm10707_vm15, %v10334_v52  ;;  %v3817_v16 = vadd.f32 %v3816_v3, %v3541_v7  ;;  %v10719_v40 = vld [vmem:[#allocation31_spill] sm:$0xff]  ;;  %v10720_v3 = vld [vmem:[#allocation33_spill] sm:$0xff] }
 0x707   :  { %v3549_v34 = vadd.f32 %v10719_v40, %v10718_v23 }
 0x708   :  { %v4620_v35 = vpop.f32.mrf.mxu3 }
 0x709   :  { %v4391_v37 = vpop.f32.mrf.mxu2  ;;  %v3827_v50 = vadd.f32 %v3826_v58, %v3549_v34 }
 0x70a   :  { %v4392_v51 = vadd.f32 %v4391_v37, %v4101_v47 }
 0x70c   :  { %v4617_v13 = vadd.f32 %v4616_v48, %v4392_v51  ;;  %v4125_v48 = vadd.f32 %v4124_v55, %v3817_v16  ;;  %v3831_v26 = vpop.f32.mrf.mxu0  ;;  %v4148_v37 = vpop.f32.mrf.mxu1  ;;  %v4137_v55 = vadd.f32 %v4136_v31, %v3827_v50 }
 0x70e   :  { %4717 = vst.msk [vmem:[#allocation2 + $0xf0] sm:$0xff] %vm76_vm0, %v4617_v13  ;;  %5689 = vmatmul.msk.f32.gmra.mxu2 %vm2776_vm7, %v10334_v52  ;;  %v3553_v13 = vadd.f32 %v10721_v14, %v10720_v3 }
 0x710   :  { %v4624_v27 = vpop.f32.mrf.mxu3  ;;  %v3832_v11 = vadd.f32 %v3831_v26, %v3553_v13  ;;  %v10727_v26 = vld [vmem:[#allocation83_spill] sm:$0xff] }
 0x711   :  { %v4395_v8 = vpop.f32.mrf.mxu2 }
 0x712   :  { %v4396_v62 = vadd.f32 %v4395_v8, %v4107_v12 }
 0x714   :  { %v4621_v54 = vadd.f32 %v4620_v35, %v4396_v62  ;;  %v3836_v41 = vpop.f32.mrf.mxu0  ;;  %v10722_v62 = vld [vmem:[#allocation76_spill] sm:$0xff]  ;;  %v4154_v24 = vpop.f32.mrf.mxu1 }
 0x715   :  { %v3557_v61 = vadd.f32 %v10722_v62, %v9282_v1 }
 0x716   :  { %4718 = vst.msk [vmem:[#allocation2 + $0xf8] sm:$0xff] %vm76_vm0, %v4621_v54  ;;  %v4143_v54 = vadd.f32 %v4142_v18, %v3832_v11 }
 0x717   :  { %v3837_v44 = vadd.f32 %v3836_v41, %v3557_v61 }
 0x718   :  { %v4628_v49 = vpop.f32.mrf.mxu3 }
 0x719   :  { %v4399_v52 = vpop.f32.mrf.mxu2 }
 0x71a   :  { %v4400_v29 = vadd.f32 %v4399_v52, %v4113_v30  ;;  %v10723_v52 = vld [vmem:[#allocation35_spill] sm:$0xff] }
 0x71c   :  { %v4625_v43 = vadd.f32 %v4624_v27, %v4400_v29  ;;  %v3841_v12 = vpop.f32.mrf.mxu0  ;;  %v10724_v29 = vld [vmem:[#allocation23_spill] sm:$0xff]  ;;  %v4160_v19 = vpop.f32.mrf.mxu1 }
 0x71d   :  { %v3561_v32 = vadd.f32 %v10724_v29, %v10723_v52 }
 0x71e   :  { %4719 = vst.msk [vmem:[#allocation2 + $0x100] sm:$0xff] %vm76_vm0, %v4625_v43  ;;  %v4149_v43 = vadd.f32 %v4148_v37, %v3837_v44 }
 0x71f   :  { %v3842_v60 = vadd.f32 %v3841_v12, %v3561_v32 }
 0x720   :  { %v4632_v42 = vpop.f32.mrf.mxu3 }
 0x721   :  { %v4403_v38 = vpop.f32.mrf.mxu2  ;;  %v4155_v31 = vadd.f32 %v4154_v24, %v3842_v60 }
 0x722   :  { %v4404_v10 = vadd.f32 %v4403_v38, %v4119_v28  ;;  %v10725_v28 = vld [vmem:[#allocation87_spill] sm:$0xff] }
 0x723   :  { %v10726_v38 = vld [vmem:[#allocation79_spill] sm:$0xff] }
 0x724   :  { %v4629_v53 = vadd.f32 %v4628_v49, %v4404_v10  ;;  %v3846_v30 = vpop.f32.mrf.mxu0  ;;  %v3565_v10 = vadd.f32 %v10726_v38, %v10725_v28  ;;  %v4166_v25 = vpop.f32.mrf.mxu1 }
 0x726   :  { %4720 = vst.msk [vmem:[#allocation2 + $0x108] sm:$0xff] %vm76_vm0, %v4629_v53  ;;  %v3847_v59 = vadd.f32 %v3846_v30, %v3565_v10 }
 0x728   :  { %v4636_v33 = vpop.f32.mrf.mxu3  ;;  %v4161_v9 = vadd.f32 %v4160_v19, %v3847_v59 }
 0x729   :  { %v4407_v39 = vpop.f32.mrf.mxu2 }
 0x72a   :  { %v4408_v20 = vadd.f32 %v4407_v39, %v4125_v48  ;;  %v10728_v39 = vld [vmem:[#allocation43_spill] sm:$0xff] }
 0x72c   :  { %v4633_v57 = vadd.f32 %v4632_v42, %v4408_v20  ;;  %v3851_v16 = vpop.f32.mrf.mxu0  ;;  %v3569_v20 = vadd.f32 %v10728_v39, %v10727_v26  ;;  %v4172_v34 = vpop.f32.mrf.mxu1 }
 0x72e   :  { %4721 = vst.msk [vmem:[#allocation2 + $0x110] sm:$0xff] %vm76_vm0, %v4633_v57  ;;  %v3852_v23 = vadd.f32 %v3851_v16, %v3569_v20 }
 0x730   :  { %v4640_v6 = vpop.f32.mrf.mxu3  ;;  %v4167_v41 = vadd.f32 %v4166_v25, %v3852_v23 }
 0x731   :  { %v4411_v35 = vpop.f32.mrf.mxu2 }
 0x732   :  { %v4412_v36 = vadd.f32 %v4411_v35, %v4131_v4  ;;  %v10729_v4 = vld [vmem:[#allocation70_spill] sm:$0xff]  ;;  %v10730_v35 = vld [vmem:[#allocation39_spill] sm:$0xff] }
 0x734   :  { %v4637_v47 = vadd.f32 %v4636_v33, %v4412_v36  ;;  %v3573_v36 = vadd.f32 %v10730_v35, %v10729_v4  ;;  %v4178_v13 = vpop.f32.mrf.mxu1 }
 0x736   :  { %4722 = vst.msk [vmem:[#allocation2 + $0x118] sm:$0xff] %vm76_vm0, %v4637_v47 }
 0x738   :  { %v4644_v51 = vpop.f32.mrf.mxu3 }
 0x739   :  { %v4415_v27 = vpop.f32.mrf.mxu2 }
 0x73a   :  { %v4416_v22 = vadd.f32 %v4415_v27, %v4137_v55 }
 0x73c   :  { %v4641_v2 = vadd.f32 %v4640_v6, %v4416_v22  ;;  %v3856_v6 = vpop.f32.mrf.mxu0  ;;  %v4184_v61 = vpop.f32.mrf.mxu1 }
 0x73d   :  { %v3857_v3 = vadd.f32 %v3856_v6, %v3573_v36 }
 0x73e   :  { %4723 = vst.msk [vmem:[#allocation2 + $0x120] sm:$0xff] %vm76_vm0, %v4641_v2 }
 0x73f   :  { %v4173_v55 = vadd.f32 %v4172_v34, %v3857_v3 }
 0x740   :  { %v4648_v8 = vpop.f32.mrf.mxu3 }
 0x741   :  { %v4419_v49 = vpop.f32.mrf.mxu2 }
 0x742   :  { %v4420_v5 = vadd.f32 %v4419_v49, %v4143_v54 }
 0x744   :  { %v4645_v46 = vadd.f32 %v4644_v51, %v4420_v5  ;;  %v3861_v51 = vpop.f32.mrf.mxu0  ;;  %v4190_v29 = vpop.f32.mrf.mxu1 }
 0x745   :  { %v3862_v2 = vadd.f32 %v3861_v51, %v9386_v63 }
 0x746   :  { %4724 = vst.msk [vmem:[#allocation2 + $0x128] sm:$0xff] %vm76_vm0, %v4645_v46 }
 0x747   :  { %v4179_v62 = vadd.f32 %v4178_v13, %v3862_v2 }
 0x748   :  { %v4652_v21 = vpop.f32.mrf.mxu3 }
 0x749   :  { %v4423_v58 = vpop.f32.mrf.mxu2 }
 0x74a   :  { %v4424_v42 = vadd.f32 %v4423_v58, %v4149_v43 }
 0x74c   :  { %v4649_v7 = vadd.f32 %v4648_v8, %v4424_v42  ;;  %v3866_v8 = vpop.f32.mrf.mxu0 }
 0x74d   :  { %v3867_v49 = vadd.f32 %v3866_v8, %v9402_v45 }
 0x74e   :  { %4725 = vst.msk [vmem:[#allocation2 + $0x130] sm:$0xff] %vm76_vm0, %v4649_v7 }
 0x74f   :  { %v4185_v30 = vadd.f32 %v4184_v61, %v3867_v49 }
 0x750   :  { %v4656_v1 = vpop.f32.mrf.mxu3 }
 0x751   :  { %v4427_v53 = vpop.f32.mrf.mxu2 }
 0x752   :  { %v4428_v33 = vadd.f32 %v4427_v53, %v4155_v31 }
 0x754   :  { %v4653_v56 = vadd.f32 %v4652_v21, %v4428_v33  ;;  %v3871_v46 = vpop.f32.mrf.mxu0 }
 0x755   :  { %v3872_v63 = vadd.f32 %v3871_v46, %v9416_v15 }
 0x756   :  { %4726 = vst.msk [vmem:[#allocation2 + $0x138] sm:$0xff] %vm76_vm0, %v4653_v56 }
 0x757   :  { %v4191_v58 = vadd.f32 %v4190_v29, %v3872_v63 }
 0x758   :  { %v4660_v48 = vpop.f32.mrf.mxu3 }
 0x759   :  { %v4431_v57 = vpop.f32.mrf.mxu2 }
 0x75a   :  { %v4432_v18 = vadd.f32 %v4431_v57, %v4161_v9 }
 0x75c   :  { %v4657_v40 = vadd.f32 %v4656_v1, %v4432_v18  ;;  %v3876_v42 = vpop.f32.mrf.mxu0  ;;  %v4196_v1 = vpop.f32.mrf.mxu1 }
 0x75d   :  { %v3877_v45 = vadd.f32 %v3876_v42, %v9427_v0 }
 0x75e   :  { %4727 = vst.msk [vmem:[#allocation2 + $0x140] sm:$0xff] %vm76_vm0, %v4657_v40 }
 0x75f   :  { %v4197_v28 = vadd.f32 %v4196_v1, %v3877_v45 }
 0x760   :  { %v4664_v50 = vpop.f32.mrf.mxu3 }
 0x761   :  { %v4435_v47 = vpop.f32.mrf.mxu2 }
 0x762   :  { %v4436_v37 = vadd.f32 %v4435_v47, %v4167_v41 }
 0x764   :  { %v4661_v14 = vadd.f32 %v4660_v48, %v4436_v37  ;;  %v3881_v16 = vpop.f32.mrf.mxu0  ;;  %v4202_v33 = vpop.f32.mrf.mxu1 }
 0x765   :  { %v3882_v15 = vadd.f32 %v3881_v16, %v9439_v17 }
 0x766   :  { %4728 = vst.msk [vmem:[#allocation2 + $0x148] sm:$0xff] %vm76_vm0, %v4661_v14 }
 0x767   :  { %v4203_v59 = vadd.f32 %v4202_v33, %v3882_v15 }
 0x768   :  { %v4668_v11 = vpop.f32.mrf.mxu3 }
 0x769   :  { %v4439_v27 = vpop.f32.mrf.mxu2 }
 0x76a   :  { %v4440_v22 = vadd.f32 %v4439_v27, %v4173_v55 }
 0x76c   :  { %v4665_v12 = vadd.f32 %v4664_v50, %v4440_v22 }
 0x76e   :  { %4729 = vst.msk [vmem:[#allocation2 + $0x150] sm:$0xff] %vm76_vm0, %v4665_v12 }
 0x770   :  { %v4672_v44 = vpop.f32.mrf.mxu3 }
 0x771   :  { %v4443_v54 = vpop.f32.mrf.mxu2 }
 0x772   :  { %v4444_v24 = vadd.f32 %v4443_v54, %v4179_v62 }
 0x774   :  { %v4669_v5 = vadd.f32 %v4668_v11, %v4444_v24 }
 0x776   :  { %4730 = vst.msk [vmem:[#allocation2 + $0x158] sm:$0xff] %vm76_vm0, %v4669_v5 }
 0x778   :  { %v4676_v43 = vpop.f32.mrf.mxu3 }
 0x779   :  { %v4447_v21 = vpop.f32.mrf.mxu2 }
 0x77a   :  { %v4448_v52 = vadd.f32 %v4447_v21, %v4185_v30 }
 0x77c   :  { %v4673_v32 = vadd.f32 %v4672_v44, %v4448_v52 }
 0x77e   :  { %4731 = vst.msk [vmem:[#allocation2 + $0x160] sm:$0xff] %vm76_vm0, %v4673_v32 }
 0x780   :  { %v4680_v38 = vpop.f32.mrf.mxu3 }
 0x781   :  { %v4451_v19 = vpop.f32.mrf.mxu2 }
 0x782   :  { %v4452_v60 = vadd.f32 %v4451_v19, %v4191_v58 }
 0x784   :  { %v4677_v7 = vadd.f32 %v4676_v43, %v4452_v60 }
 0x786   :  { %4732 = vst.msk [vmem:[#allocation2 + $0x168] sm:$0xff] %vm76_vm0, %v4677_v7 }
 0x788   :  { %v4684_v25 = vpop.f32.mrf.mxu3 }
 0x789   :  { %v4455_v10 = vpop.f32.mrf.mxu2 }
 0x78a   :  { %v4456_v31 = vadd.f32 %v4455_v10, %v4197_v28 }
 0x78c   :  { %v4681_v53 = vadd.f32 %v4680_v38, %v4456_v31 }
 0x78e   :  { %4733 = vst.msk [vmem:[#allocation2 + $0x170] sm:$0xff] %vm76_vm0, %v4681_v53 }
 0x791   :  { %v4459_v0 = vpop.f32.mrf.mxu2 }
 0x792   :  { %v4460_v56 = vadd.f32 %v4459_v0, %v4203_v59 }
 0x794   :  { %v4685_v48 = vadd.f32 %v4684_v25, %v4460_v56 }
 0x796   :  { %4734 = vst.msk [vmem:[#allocation2 + $0x178] sm:$0xff] %vm76_vm0, %v4685_v48 }
 0x797   :  { %5536 = dma.vmem_to_hbm [thread:$0]  %s5529_s16, 6144, %s5531_s19, [#allocation3], %s5825_s20, %s5825_s20, %s5826_s21  }
 0x798   :  { %5820 = dma.done.wait [#allocation3], 6144  }
 0x799   :  { %5821 = vsyncadd [#allocation3], 4294961152 }
 0x79a   :  { %5545 = vsyncpa [#allocation3], 1 }

</bundles_post_ra>
